<compile_context>
chip_gen: v6e
topology: v6e:2x2x1
jax: 0.10.0
libtpu: 0.0.40
codegen_flags: <defaults>
</compile_context>

<pallas_src>
import functools

import jax
import jax.numpy as jnp
from jax.experimental import pallas as pl
from jax.experimental.pallas import tpu as pltpu

ACT_NONE, ACT_RELU, ACT_LEAKY = 0, 1, 2

# (pre-activation, slot to save the layer output into, slot to add after conv)
_LAYER_CFG = (
    (ACT_NONE,  None, None),   # layer1   : conv
    (ACT_LEAKY, 0,    None),   # layer2   : lrelu+conv+bn       -> out2 (slot 0)
    (ACT_LEAKY, None, None),   # layer3
    (ACT_LEAKY, 1,    None),   # layer4   :                      -> out4 (slot 1)
    (ACT_LEAKY, None, None),   # layer5
    (ACT_LEAKY, None, None),   # layer6
    (ACT_LEAKY, None, None),   # dlayer6  : lrelu+tconv
    (ACT_RELU,  None, 1),      # dlayer5  : relu+tconv+bn, then + out4
    (ACT_RELU,  None, None),   # dlayer4
    (ACT_RELU,  None, 0),      # dlayer3  : relu+tconv+bn, then + out2
    (ACT_RELU,  None, None),   # dlayer2
    (ACT_RELU,  None, None),   # dlayer1  : relu+tconv (tanh applied afterwards)
)


def _g_fused_kernel(W, cfg, x_ref, mask_ref, w_ref, b_ref, o_ref,
                    skip0_ref, skip1_ref):
    """Whole-network forward for one batch element.

    x_ref    : (1, C, Ppad)   f32   padded (spatial ring + lane padding) input
    mask_ref : (1, Ppad)      f32   1.0 at interior pixels, 0.0 elsewhere
    w_ref    : (L, 9, C, C)   bf16  folded per-tap conv weights (BN scale in)
    b_ref    : (L, C, 1)      f32   folded per-channel bias (BN shift)
    o_ref    : (1, C, Ppad)   f32   tanh output (padded layout; wrapper crops)
    skip*_ref: (C, Ppad)      f32   VMEM scratch for the out2 / out4 skips
    """
    C = x_ref.shape[1]
    Ppad = x_ref.shape[2]
    Wp = W + 2

    # Hoisted once: JAX does not CSE broadcast_in_dim, so do the (1,Ppad) ->
    # (C,Ppad) broadcast a single time instead of once per layer.
    mask_b = jnp.broadcast_to(mask_ref[...], (C, Ppad))

    skips = (skip0_ref, skip1_ref)
    a = x_ref[0]                                       # (C, Ppad) f32, zero pads
    for l, (act, save_slot, add_slot) in enumerate(cfg):
        # Pre-activation, once per layer (act(0) = 0 keeps the pad ring zero).
        if act == ACT_RELU:
            a = jnp.maximum(a, 0.0)
        elif act == ACT_LEAKY:
            a = jnp.where(a >= 0.0, a, 0.2 * a)

        # 3x3 conv as 9 accumulating (C,C)x(C,Ppad) MXU matmuls.  Tap (dy,dx)
        # reads a[:, p + dy*Wp + dx], i.e. a static lane rotation of `a`
        # (XLU slot, no VMEM round trip, no patch matrix).  Lanes that wrap
        # around only affect pad-ring / lane-padding outputs, which the mask
        # multiply below zeroes again.
        y = None
        t = 0
        for dy in (-1, 0, 1):
            for dx in (-1, 0, 1):
                off = dy * Wp + dx
                src = a if off == 0 else pltpu.roll(a, shift=(-off) % Ppad, axis=1)
                part = jnp.dot(w_ref[l, t], src.astype(jnp.bfloat16),
                               preferred_element_type=jnp.float32)
                y = part if y is None else y + part
                t += 1

        y = (y + b_ref[l]) * mask_b          # folded-BN bias + re-zero pad ring

        if add_slot is not None:             # skip connections
            y = y + skips[add_slot][...]
        if save_slot is not None:
            skips[save_slot][...] = y
        a = y

    o_ref[0] = jnp.tanh(a)                   # dlayerfinal


def g_forward(params, x_nchw, *, output_nc):
    w, b = params["w"], params["b"]          # (L,9,C,C) bf16, (L,C,1) f32
    _, _, C, _ = w.shape
    N, cin, H, W = x_nchw.shape
    Hp, Wp = H + 2, W + 2
    P = Hp * Wp
    Ppad = ((P + 127) // 128) * 128          # lane-dense flattened spatial axis

    x = x_nchw.astype(jnp.float32)
    # Channel-pad to C, zero-pad spatially by 1, flatten, lane-pad to Ppad.
    xf = jnp.pad(x, ((0, 0), (0, C - cin), (1, 1), (1, 1))).reshape(N, C, P)
    xf = jnp.pad(xf, ((0, 0), (0, 0), (0, Ppad - P)))

    row = jnp.arange(Hp)[:, None]
    col = jnp.arange(Wp)[None, :]
    mask = (((row >= 1) & (row <= H) & (col >= 1) & (col <= W))
            .astype(jnp.float32).reshape(1, P))
    mask = jnp.pad(mask, ((0, 0), (0, Ppad - P)))

    # Explicit scoped-VMEM budget (defaults: 16 MiB v5e / 32 MiB v6e,v7x).
    act_bytes = C * Ppad * 4
    vmem_need = (w.size * 2 + b.size * 4         # resident params (bf16 / f32)
                 + 2 * 2 * act_bytes             # in/out blocks, double-buffered
                 + 2 * act_bytes                 # skip scratch
                 + 8 * act_bytes                 # live activations / headroom
                 + 2 * Ppad * 4)                 # mask
    vmem_limit = int(min(max(2 * vmem_need, 32 * 1024 * 1024),
                         56 * 1024 * 1024))      # stay below v7x 64 MiB physical

    kernel = functools.partial(_g_fused_kernel, W, _LAYER_CFG)
    out = pl.pallas_call(
        kernel,
        out_shape=jax.ShapeDtypeStruct((N, C, Ppad), jnp.float32),
        grid=(N,),
        in_specs=[
            pl.BlockSpec((1, C, Ppad), lambda n: (n, 0, 0)),
            pl.BlockSpec((1, Ppad), lambda n: (0, 0)),
            pl.BlockSpec(w.shape, lambda n: (0, 0, 0, 0)),
            pl.BlockSpec(b.shape, lambda n: (0, 0, 0)),
        ],
        out_specs=pl.BlockSpec((1, C, Ppad), lambda n: (n, 0, 0)),
        scratch_shapes=[pltpu.VMEM((C, Ppad), jnp.float32),   # out2 skip
                        pltpu.VMEM((C, Ppad), jnp.float32)],  # out4 skip
        compiler_params=pltpu.CompilerParams(
            dimension_semantics=("parallel",),
            vmem_limit_bytes=vmem_limit),
    )(xf, mask, w, b)

    # Drop lane padding, crop the pad ring and the channel padding (NCHW).
    out = out[:, :, :P].reshape(N, C, Hp, Wp)
    return out[:, :output_nc, 1:H + 1, 1:W + 1]


# ----------------------- pure-JAX reference (same folded params) -------------

def g_reference(params, x_nchw, *, output_nc):
    """lax.conv reference with the same folded params and the same
    bf16-operand / f32-accumulate precision; checks the kernel's data path."""
    w, b = params["w"], params["b"]
    _, _, C, _ = w.shape
    N, cin, H, W = x_nchw.shape
    a = jnp.pad(x_nchw.astype(jnp.float32), ((0, 0), (0, C - cin), (0, 0), (0, 0)))
    saved = [None, None]
    for l, (act, save_slot, add_slot) in enumerate(_LAYER_CFG):
        if act == ACT_RELU:
            a = jnp.maximum(a, 0.0)
        elif act == ACT_LEAKY:
            a = jnp.where(a >= 0.0, a, 0.2 * a)
        wl = jnp.transpose(w[l].reshape(3, 3, C, C), (2, 3, 0, 1))  # (co,ci,ky,kx)
        y = jax.lax.conv_general_dilated(
            a.astype(jnp.bfloat16), wl, (1, 1), "SAME",
            dimension_numbers=("NCHW", "OIHW", "NCHW"),
            preferred_element_type=jnp.float32)
        y = y + b[l].reshape(1, C, 1, 1)
        if add_slot is not None:
            y = y + saved[add_slot]
        if save_slot is not None:
            saved[save_slot] = y
        a = y
    return jnp.tanh(a)[:, :output_nc]


# ----------------------- deterministic parameter setup -----------------------

def init_params(key, input_nc, output_nc, nf):
    nf2 = nf // 2
    spec = [
        # cin,      cout,      transposed, bn
        (input_nc,  nf,        False,      False),   # layer1
        (nf,        nf,        False,      True),    # layer2
        (nf,        nf,        False,      True),    # layer3
        (nf,        nf,        False,      True),    # layer4
        (nf,        nf2,       False,      True),    # layer5
        (nf2,       1,         False,      True),    # layer6
        (1,         nf2,       True,       False),   # dlayer6
        (nf2,       nf,        True,       True),    # dlayer5
        (nf,        nf,        True,       True),    # dlayer4
        (nf,        nf,        True,       True),    # dlayer3
        (nf,        nf,        True,       True),    # dlayer2
        (nf,        output_nc, True,       False),   # dlayer1
    ]
    cmax = ((max(input_nc, output_nc, nf) + 7) // 8) * 8

    ws, bs = [], []
    keys = jax.random.split(key, 2 * len(spec))
    for i, (cin, cout, transposed, bn) in enumerate(spec):
        wkey, bkey = keys[2 * i], keys[2 * i + 1]
        if transposed:
            # ConvTranspose2d weight (Cin, Cout, 3, 3); stride 1 / pad 1 is a
            # same-padded correlation with the flipped, transposed kernel.
            wt = 0.2 * jax.random.normal(wkey, (cin, cout, 3, 3), jnp.float32)
            weq = jnp.transpose(jnp.flip(wt, (2, 3)), (1, 0, 2, 3))
        else:
            weq = 0.2 * jax.random.normal(wkey, (cout, cin, 3, 3), jnp.float32)

        if bn:  # eval-mode BatchNorm2d folded into a per-channel affine
            k1, k2, k3, k4 = jax.random.split(bkey, 4)
            gamma = 1.0 + 0.1 * jax.random.normal(k1, (cout,), jnp.float32)
            beta = 0.1 * jax.random.normal(k2, (cout,), jnp.float32)
            mean = 0.1 * jax.random.normal(k3, (cout,), jnp.float32)
            var = 1.0 + 0.1 * jax.random.uniform(k4, (cout,), jnp.float32)
            scale = gamma / jnp.sqrt(var + 1e-5)
            shift = beta - mean * scale
        else:
            scale = jnp.ones((cout,), jnp.float32)
            shift = jnp.zeros((cout,), jnp.float32)

        weq = weq * scale[:, None, None, None]          # fold BN scale
        # Per-tap layout (9, cmax, cmax): tap t = (dy+1)*3 + (dx+1),
        # w[t, co, ci] = weq[co, ci, dy+1, dx+1]; stored bf16 (MXU operand).
        w4 = jnp.zeros((3, 3, cmax, cmax), jnp.float32)
        w4 = w4.at[:, :, :cout, :cin].set(jnp.transpose(weq, (2, 3, 0, 1)))
        ws.append(w4.reshape(9, cmax, cmax).astype(jnp.bfloat16))
        bs.append(jnp.zeros((cmax, 1), jnp.float32).at[:cout, 0].set(shift))

    return {"w": jnp.stack(ws, 0), "b": jnp.stack(bs, 0)}


# --------------------------------- driver ------------------------------------

if __name__ == "__main__":
    input_nc, output_nc, nf = 3, 3, 8
    N, H, W = 2, 16, 16

    root = jax.random.PRNGKey(0)
    kx, kp = jax.random.split(root)
    x = jax.random.normal(kx, (N, input_nc, H, W), jnp.float32)
    params = init_params(kp, input_nc, output_nc, nf)

    fwd = jax.jit(functools.partial(g_forward, output_nc=output_nc))
    out = jax.block_until_ready(fwd(params, x))

    assert out.shape == (N, output_nc, H, W), out.shape
    assert bool(jnp.all(jnp.isfinite(out)))
    assert bool(jnp.all(jnp.abs(out) <= 1.0))   # tanh output range

    ref = jax.block_until_ready(
        jax.jit(functools.partial(g_reference, output_nc=output_nc))(params, x))
    err = float(jnp.max(jnp.abs(out - ref)))
    assert err < 2e-2, f"max abs err vs reference: {err}"

    print("KERNEL_OK")
</pallas_src>

<mosaic_0001>
module attributes {stable_mosaic.version = 11 : i64} {
  func.func @_g_fused_kernel(%arg0: i32, %arg1: memref<1x8x384xf32, #tpu.memory_space<vmem>>, %arg2: memref<1x384xf32, #tpu.memory_space<vmem>>, %arg3: memref<12x9x8x8xbf16, #tpu.memory_space<vmem>>, %arg4: memref<12x8x1xf32, #tpu.memory_space<vmem>>, %arg5: memref<1x8x384xf32, #tpu.memory_space<vmem>>, %arg6: memref<8x384xf32, #tpu.memory_space<vmem>>, %arg7: memref<8x384xf32, #tpu.memory_space<vmem>>) attributes {dimension_semantics = [#tpu.dimension_semantics<parallel>], iteration_bounds = array<i64: 2>, scalar_prefetch = 0 : i64, scratch_operands = 2 : i64, tpu.core_type = #tpu.core_type<tc>, window_params = [{transform_indices = @transform_0, window_bounds = array<i64: 1, 8, 384>}, {pipeline_mode = #tpu.pipeline_mode<synchronous>, transform_indices = @transform_1, window_bounds = array<i64: 1, 384>}, {pipeline_mode = #tpu.pipeline_mode<synchronous>, transform_indices = @transform_2, window_bounds = array<i64: 12, 9, 8, 8>}, {pipeline_mode = #tpu.pipeline_mode<synchronous>, transform_indices = @transform_3, window_bounds = array<i64: 12, 8, 1>}, {transform_indices = @transform_4, window_bounds = array<i64: 1, 8, 384>}]} {
    %c0 = arith.constant 0 : index
    %c0_0 = arith.constant 0 : index
    %0 = vector.load %arg2[%c0, %c0_0] : memref<1x384xf32, #tpu.memory_space<vmem>>, vector<1x384xf32>
    %1 = vector.shape_cast %0 : vector<1x384xf32> to vector<1x384xf32>
    %2 = vector.broadcast %1 : vector<1x384xf32> to vector<8x384xf32>
    %c0_1 = arith.constant 0 : index
    %c0_2 = arith.constant 0 : index
    %c0_3 = arith.constant 0 : index
    %3 = vector.load %arg1[%c0_1, %c0_2, %c0_3] : memref<1x8x384xf32, #tpu.memory_space<vmem>>, vector<1x8x384xf32>
    %4 = vector.shape_cast %3 : vector<1x8x384xf32> to vector<8x384xf32>
    %c19_i32 = arith.constant 19 : i32
    %5 = tpu.dynamic_rotate %4 by %c19_i32 dim 1 : vector<8x384xf32>, i32 -> vector<8x384xf32>
    %c0_4 = arith.constant 0 : index
    %c0_5 = arith.constant 0 : index
    %c0_6 = arith.constant 0 : index
    %c0_7 = arith.constant 0 : index
    %6 = vector.load %arg3[%c0_4, %c0_5, %c0_6, %c0_7] : memref<12x9x8x8xbf16, #tpu.memory_space<vmem>>, vector<1x1x8x8xbf16>
    %7 = vector.shape_cast %6 : vector<1x1x8x8xbf16> to vector<8x8xbf16>
    %8 = arith.truncf %5 : vector<8x384xf32> to vector<8x384xbf16>
    %cst = arith.constant dense<0.000000e+00> : vector<8x384xf32>
    %9 = tpu.matmul %7, %8, %cst {dimension_numbers = #tpu.dot_dimension_numbers<[1], [0], [0], [1], [0, 0, 1, 1], [], []>} : vector<8x8xbf16>, vector<8x384xbf16>, vector<8x384xf32> -> vector<8x384xf32>
    %c18_i32 = arith.constant 18 : i32
    %10 = tpu.dynamic_rotate %4 by %c18_i32 dim 1 : vector<8x384xf32>, i32 -> vector<8x384xf32>
    %c0_8 = arith.constant 0 : index
    %c1 = arith.constant 1 : index
    %c0_9 = arith.constant 0 : index
    %c0_10 = arith.constant 0 : index
    %11 = vector.load %arg3[%c0_8, %c1, %c0_9, %c0_10] : memref<12x9x8x8xbf16, #tpu.memory_space<vmem>>, vector<1x1x8x8xbf16>
    %12 = vector.shape_cast %11 : vector<1x1x8x8xbf16> to vector<8x8xbf16>
    %13 = arith.truncf %10 : vector<8x384xf32> to vector<8x384xbf16>
    %cst_11 = arith.constant dense<0.000000e+00> : vector<8x384xf32>
    %14 = tpu.matmul %12, %13, %cst_11 {dimension_numbers = #tpu.dot_dimension_numbers<[1], [0], [0], [1], [0, 0, 1, 1], [], []>} : vector<8x8xbf16>, vector<8x384xbf16>, vector<8x384xf32> -> vector<8x384xf32>
    %15 = arith.addf %9, %14 : vector<8x384xf32>
    %c17_i32 = arith.constant 17 : i32
    %16 = tpu.dynamic_rotate %4 by %c17_i32 dim 1 : vector<8x384xf32>, i32 -> vector<8x384xf32>
    %c0_12 = arith.constant 0 : index
    %c2 = arith.constant 2 : index
    %c0_13 = arith.constant 0 : index
    %c0_14 = arith.constant 0 : index
    %17 = vector.load %arg3[%c0_12, %c2, %c0_13, %c0_14] : memref<12x9x8x8xbf16, #tpu.memory_space<vmem>>, vector<1x1x8x8xbf16>
    %18 = vector.shape_cast %17 : vector<1x1x8x8xbf16> to vector<8x8xbf16>
    %19 = arith.truncf %16 : vector<8x384xf32> to vector<8x384xbf16>
    %cst_15 = arith.constant dense<0.000000e+00> : vector<8x384xf32>
    %20 = tpu.matmul %18, %19, %cst_15 {dimension_numbers = #tpu.dot_dimension_numbers<[1], [0], [0], [1], [0, 0, 1, 1], [], []>} : vector<8x8xbf16>, vector<8x384xbf16>, vector<8x384xf32> -> vector<8x384xf32>
    %21 = arith.addf %15, %20 : vector<8x384xf32>
    %c1_i32 = arith.constant 1 : i32
    %22 = tpu.dynamic_rotate %4 by %c1_i32 dim 1 : vector<8x384xf32>, i32 -> vector<8x384xf32>
    %c0_16 = arith.constant 0 : index
    %c3 = arith.constant 3 : index
    %c0_17 = arith.constant 0 : index
    %c0_18 = arith.constant 0 : index
    %23 = vector.load %arg3[%c0_16, %c3, %c0_17, %c0_18] : memref<12x9x8x8xbf16, #tpu.memory_space<vmem>>, vector<1x1x8x8xbf16>
    %24 = vector.shape_cast %23 : vector<1x1x8x8xbf16> to vector<8x8xbf16>
    %25 = arith.truncf %22 : vector<8x384xf32> to vector<8x384xbf16>
    %cst_19 = arith.constant dense<0.000000e+00> : vector<8x384xf32>
    %26 = tpu.matmul %24, %25, %cst_19 {dimension_numbers = #tpu.dot_dimension_numbers<[1], [0], [0], [1], [0, 0, 1, 1], [], []>} : vector<8x8xbf16>, vector<8x384xbf16>, vector<8x384xf32> -> vector<8x384xf32>
    %27 = arith.addf %21, %26 : vector<8x384xf32>
    %c0_20 = arith.constant 0 : index
    %c4 = arith.constant 4 : index
    %c0_21 = arith.constant 0 : index
    %c0_22 = arith.constant 0 : index
    %28 = vector.load %arg3[%c0_20, %c4, %c0_21, %c0_22] : memref<12x9x8x8xbf16, #tpu.memory_space<vmem>>, vector<1x1x8x8xbf16>
    %29 = vector.shape_cast %28 : vector<1x1x8x8xbf16> to vector<8x8xbf16>
    %30 = arith.truncf %4 : vector<8x384xf32> to vector<8x384xbf16>
    %cst_23 = arith.constant dense<0.000000e+00> : vector<8x384xf32>
    %31 = tpu.matmul %29, %30, %cst_23 {dimension_numbers = #tpu.dot_dimension_numbers<[1], [0], [0], [1], [0, 0, 1, 1], [], []>} : vector<8x8xbf16>, vector<8x384xbf16>, vector<8x384xf32> -> vector<8x384xf32>
    %32 = arith.addf %27, %31 : vector<8x384xf32>
    %c383_i32 = arith.constant 383 : i32
    %33 = tpu.dynamic_rotate %4 by %c383_i32 dim 1 : vector<8x384xf32>, i32 -> vector<8x384xf32>
    %c0_24 = arith.constant 0 : index
    %c5 = arith.constant 5 : index
    %c0_25 = arith.constant 0 : index
    %c0_26 = arith.constant 0 : index
    %34 = vector.load %arg3[%c0_24, %c5, %c0_25, %c0_26] : memref<12x9x8x8xbf16, #tpu.memory_space<vmem>>, vector<1x1x8x8xbf16>
    %35 = vector.shape_cast %34 : vector<1x1x8x8xbf16> to vector<8x8xbf16>
    %36 = arith.truncf %33 : vector<8x384xf32> to vector<8x384xbf16>
    %cst_27 = arith.constant dense<0.000000e+00> : vector<8x384xf32>
    %37 = tpu.matmul %35, %36, %cst_27 {dimension_numbers = #tpu.dot_dimension_numbers<[1], [0], [0], [1], [0, 0, 1, 1], [], []>} : vector<8x8xbf16>, vector<8x384xbf16>, vector<8x384xf32> -> vector<8x384xf32>
    %38 = arith.addf %32, %37 : vector<8x384xf32>
    %c367_i32 = arith.constant 367 : i32
    %39 = tpu.dynamic_rotate %4 by %c367_i32 dim 1 : vector<8x384xf32>, i32 -> vector<8x384xf32>
    %c0_28 = arith.constant 0 : index
    %c6 = arith.constant 6 : index
    %c0_29 = arith.constant 0 : index
    %c0_30 = arith.constant 0 : index
    %40 = vector.load %arg3[%c0_28, %c6, %c0_29, %c0_30] : memref<12x9x8x8xbf16, #tpu.memory_space<vmem>>, vector<1x1x8x8xbf16>
    %41 = vector.shape_cast %40 : vector<1x1x8x8xbf16> to vector<8x8xbf16>
    %42 = arith.truncf %39 : vector<8x384xf32> to vector<8x384xbf16>
    %cst_31 = arith.constant dense<0.000000e+00> : vector<8x384xf32>
    %43 = tpu.matmul %41, %42, %cst_31 {dimension_numbers = #tpu.dot_dimension_numbers<[1], [0], [0], [1], [0, 0, 1, 1], [], []>} : vector<8x8xbf16>, vector<8x384xbf16>, vector<8x384xf32> -> vector<8x384xf32>
    %44 = arith.addf %38, %43 : vector<8x384xf32>
    %c366_i32 = arith.constant 366 : i32
    %45 = tpu.dynamic_rotate %4 by %c366_i32 dim 1 : vector<8x384xf32>, i32 -> vector<8x384xf32>
    %c0_32 = arith.constant 0 : index
    %c7 = arith.constant 7 : index
    %c0_33 = arith.constant 0 : index
    %c0_34 = arith.constant 0 : index
    %46 = vector.load %arg3[%c0_32, %c7, %c0_33, %c0_34] : memref<12x9x8x8xbf16, #tpu.memory_space<vmem>>, vector<1x1x8x8xbf16>
    %47 = vector.shape_cast %46 : vector<1x1x8x8xbf16> to vector<8x8xbf16>
    %48 = arith.truncf %45 : vector<8x384xf32> to vector<8x384xbf16>
    %cst_35 = arith.constant dense<0.000000e+00> : vector<8x384xf32>
    %49 = tpu.matmul %47, %48, %cst_35 {dimension_numbers = #tpu.dot_dimension_numbers<[1], [0], [0], [1], [0, 0, 1, 1], [], []>} : vector<8x8xbf16>, vector<8x384xbf16>, vector<8x384xf32> -> vector<8x384xf32>
    %50 = arith.addf %44, %49 : vector<8x384xf32>
    %c365_i32 = arith.constant 365 : i32
    %51 = tpu.dynamic_rotate %4 by %c365_i32 dim 1 : vector<8x384xf32>, i32 -> vector<8x384xf32>
    %c0_36 = arith.constant 0 : index
    %c8 = arith.constant 8 : index
    %c0_37 = arith.constant 0 : index
    %c0_38 = arith.constant 0 : index
    %52 = vector.load %arg3[%c0_36, %c8, %c0_37, %c0_38] : memref<12x9x8x8xbf16, #tpu.memory_space<vmem>>, vector<1x1x8x8xbf16>
    %53 = vector.shape_cast %52 : vector<1x1x8x8xbf16> to vector<8x8xbf16>
    %54 = arith.truncf %51 : vector<8x384xf32> to vector<8x384xbf16>
    %cst_39 = arith.constant dense<0.000000e+00> : vector<8x384xf32>
    %55 = tpu.matmul %53, %54, %cst_39 {dimension_numbers = #tpu.dot_dimension_numbers<[1], [0], [0], [1], [0, 0, 1, 1], [], []>} : vector<8x8xbf16>, vector<8x384xbf16>, vector<8x384xf32> -> vector<8x384xf32>
    %56 = arith.addf %50, %55 : vector<8x384xf32>
    %c0_40 = arith.constant 0 : index
    %c0_41 = arith.constant 0 : index
    %c0_42 = arith.constant 0 : index
    %57 = vector.load %arg4[%c0_40, %c0_41, %c0_42] : memref<12x8x1xf32, #tpu.memory_space<vmem>>, vector<1x8x1xf32>
    %58 = vector.shape_cast %57 : vector<1x8x1xf32> to vector<8x1xf32>
    %59 = vector.broadcast %58 : vector<8x1xf32> to vector<8x384xf32>
    %60 = arith.addf %56, %59 : vector<8x384xf32>
    %61 = arith.mulf %60, %2 : vector<8x384xf32>
    %cst_43 = arith.constant 0.000000e+00 : f32
    %62 = vector.broadcast %cst_43 : f32 to vector<8x384xf32>
    %63 = arith.cmpf oge, %61, %62 : vector<8x384xf32>
    %cst_44 = arith.constant 2.000000e-01 : f32
    %64 = vector.broadcast %cst_44 : f32 to vector<8x384xf32>
    %65 = arith.mulf %64, %61 : vector<8x384xf32>
    %66 = arith.select %63, %61, %65 : vector<8x384xi1>, vector<8x384xf32>
    %c19_i32_45 = arith.constant 19 : i32
    %67 = tpu.dynamic_rotate %66 by %c19_i32_45 dim 1 : vector<8x384xf32>, i32 -> vector<8x384xf32>
    %c1_46 = arith.constant 1 : index
    %c0_47 = arith.constant 0 : index
    %c0_48 = arith.constant 0 : index
    %c0_49 = arith.constant 0 : index
    %68 = vector.load %arg3[%c1_46, %c0_47, %c0_48, %c0_49] : memref<12x9x8x8xbf16, #tpu.memory_space<vmem>>, vector<1x1x8x8xbf16>
    %69 = vector.shape_cast %68 : vector<1x1x8x8xbf16> to vector<8x8xbf16>
    %70 = arith.truncf %67 : vector<8x384xf32> to vector<8x384xbf16>
    %cst_50 = arith.constant dense<0.000000e+00> : vector<8x384xf32>
    %71 = tpu.matmul %69, %70, %cst_50 {dimension_numbers = #tpu.dot_dimension_numbers<[1], [0], [0], [1], [0, 0, 1, 1], [], []>} : vector<8x8xbf16>, vector<8x384xbf16>, vector<8x384xf32> -> vector<8x384xf32>
    %c18_i32_51 = arith.constant 18 : i32
    %72 = tpu.dynamic_rotate %66 by %c18_i32_51 dim 1 : vector<8x384xf32>, i32 -> vector<8x384xf32>
    %c1_52 = arith.constant 1 : index
    %c1_53 = arith.constant 1 : index
    %c0_54 = arith.constant 0 : index
    %c0_55 = arith.constant 0 : index
    %73 = vector.load %arg3[%c1_52, %c1_53, %c0_54, %c0_55] : memref<12x9x8x8xbf16, #tpu.memory_space<vmem>>, vector<1x1x8x8xbf16>
    %74 = vector.shape_cast %73 : vector<1x1x8x8xbf16> to vector<8x8xbf16>
    %75 = arith.truncf %72 : vector<8x384xf32> to vector<8x384xbf16>
    %cst_56 = arith.constant dense<0.000000e+00> : vector<8x384xf32>
    %76 = tpu.matmul %74, %75, %cst_56 {dimension_numbers = #tpu.dot_dimension_numbers<[1], [0], [0], [1], [0, 0, 1, 1], [], []>} : vector<8x8xbf16>, vector<8x384xbf16>, vector<8x384xf32> -> vector<8x384xf32>
    %77 = arith.addf %71, %76 : vector<8x384xf32>
    %c17_i32_57 = arith.constant 17 : i32
    %78 = tpu.dynamic_rotate %66 by %c17_i32_57 dim 1 : vector<8x384xf32>, i32 -> vector<8x384xf32>
    %c1_58 = arith.constant 1 : index
    %c2_59 = arith.constant 2 : index
    %c0_60 = arith.constant 0 : index
    %c0_61 = arith.constant 0 : index
    %79 = vector.load %arg3[%c1_58, %c2_59, %c0_60, %c0_61] : memref<12x9x8x8xbf16, #tpu.memory_space<vmem>>, vector<1x1x8x8xbf16>
    %80 = vector.shape_cast %79 : vector<1x1x8x8xbf16> to vector<8x8xbf16>
    %81 = arith.truncf %78 : vector<8x384xf32> to vector<8x384xbf16>
    %cst_62 = arith.constant dense<0.000000e+00> : vector<8x384xf32>
    %82 = tpu.matmul %80, %81, %cst_62 {dimension_numbers = #tpu.dot_dimension_numbers<[1], [0], [0], [1], [0, 0, 1, 1], [], []>} : vector<8x8xbf16>, vector<8x384xbf16>, vector<8x384xf32> -> vector<8x384xf32>
    %83 = arith.addf %77, %82 : vector<8x384xf32>
    %c1_i32_63 = arith.constant 1 : i32
    %84 = tpu.dynamic_rotate %66 by %c1_i32_63 dim 1 : vector<8x384xf32>, i32 -> vector<8x384xf32>
    %c1_64 = arith.constant 1 : index
    %c3_65 = arith.constant 3 : index
    %c0_66 = arith.constant 0 : index
    %c0_67 = arith.constant 0 : index
    %85 = vector.load %arg3[%c1_64, %c3_65, %c0_66, %c0_67] : memref<12x9x8x8xbf16, #tpu.memory_space<vmem>>, vector<1x1x8x8xbf16>
    %86 = vector.shape_cast %85 : vector<1x1x8x8xbf16> to vector<8x8xbf16>
    %87 = arith.truncf %84 : vector<8x384xf32> to vector<8x384xbf16>
    %cst_68 = arith.constant dense<0.000000e+00> : vector<8x384xf32>
    %88 = tpu.matmul %86, %87, %cst_68 {dimension_numbers = #tpu.dot_dimension_numbers<[1], [0], [0], [1], [0, 0, 1, 1], [], []>} : vector<8x8xbf16>, vector<8x384xbf16>, vector<8x384xf32> -> vector<8x384xf32>
    %89 = arith.addf %83, %88 : vector<8x384xf32>
    %c1_69 = arith.constant 1 : index
    %c4_70 = arith.constant 4 : index
    %c0_71 = arith.constant 0 : index
    %c0_72 = arith.constant 0 : index
    %90 = vector.load %arg3[%c1_69, %c4_70, %c0_71, %c0_72] : memref<12x9x8x8xbf16, #tpu.memory_space<vmem>>, vector<1x1x8x8xbf16>
    %91 = vector.shape_cast %90 : vector<1x1x8x8xbf16> to vector<8x8xbf16>
    %92 = arith.truncf %66 : vector<8x384xf32> to vector<8x384xbf16>
    %cst_73 = arith.constant dense<0.000000e+00> : vector<8x384xf32>
    %93 = tpu.matmul %91, %92, %cst_73 {dimension_numbers = #tpu.dot_dimension_numbers<[1], [0], [0], [1], [0, 0, 1, 1], [], []>} : vector<8x8xbf16>, vector<8x384xbf16>, vector<8x384xf32> -> vector<8x384xf32>
    %94 = arith.addf %89, %93 : vector<8x384xf32>
    %c383_i32_74 = arith.constant 383 : i32
    %95 = tpu.dynamic_rotate %66 by %c383_i32_74 dim 1 : vector<8x384xf32>, i32 -> vector<8x384xf32>
    %c1_75 = arith.constant 1 : index
    %c5_76 = arith.constant 5 : index
    %c0_77 = arith.constant 0 : index
    %c0_78 = arith.constant 0 : index
    %96 = vector.load %arg3[%c1_75, %c5_76, %c0_77, %c0_78] : memref<12x9x8x8xbf16, #tpu.memory_space<vmem>>, vector<1x1x8x8xbf16>
    %97 = vector.shape_cast %96 : vector<1x1x8x8xbf16> to vector<8x8xbf16>
    %98 = arith.truncf %95 : vector<8x384xf32> to vector<8x384xbf16>
    %cst_79 = arith.constant dense<0.000000e+00> : vector<8x384xf32>
    %99 = tpu.matmul %97, %98, %cst_79 {dimension_numbers = #tpu.dot_dimension_numbers<[1], [0], [0], [1], [0, 0, 1, 1], [], []>} : vector<8x8xbf16>, vector<8x384xbf16>, vector<8x384xf32> -> vector<8x384xf32>
    %100 = arith.addf %94, %99 : vector<8x384xf32>
    %c367_i32_80 = arith.constant 367 : i32
    %101 = tpu.dynamic_rotate %66 by %c367_i32_80 dim 1 : vector<8x384xf32>, i32 -> vector<8x384xf32>
    %c1_81 = arith.constant 1 : index
    %c6_82 = arith.constant 6 : index
    %c0_83 = arith.constant 0 : index
    %c0_84 = arith.constant 0 : index
    %102 = vector.load %arg3[%c1_81, %c6_82, %c0_83, %c0_84] : memref<12x9x8x8xbf16, #tpu.memory_space<vmem>>, vector<1x1x8x8xbf16>
    %103 = vector.shape_cast %102 : vector<1x1x8x8xbf16> to vector<8x8xbf16>
    %104 = arith.truncf %101 : vector<8x384xf32> to vector<8x384xbf16>
    %cst_85 = arith.constant dense<0.000000e+00> : vector<8x384xf32>
    %105 = tpu.matmul %103, %104, %cst_85 {dimension_numbers = #tpu.dot_dimension_numbers<[1], [0], [0], [1], [0, 0, 1, 1], [], []>} : vector<8x8xbf16>, vector<8x384xbf16>, vector<8x384xf32> -> vector<8x384xf32>
    %106 = arith.addf %100, %105 : vector<8x384xf32>
    %c366_i32_86 = arith.constant 366 : i32
    %107 = tpu.dynamic_rotate %66 by %c366_i32_86 dim 1 : vector<8x384xf32>, i32 -> vector<8x384xf32>
    %c1_87 = arith.constant 1 : index
    %c7_88 = arith.constant 7 : index
    %c0_89 = arith.constant 0 : index
    %c0_90 = arith.constant 0 : index
    %108 = vector.load %arg3[%c1_87, %c7_88, %c0_89, %c0_90] : memref<12x9x8x8xbf16, #tpu.memory_space<vmem>>, vector<1x1x8x8xbf16>
    %109 = vector.shape_cast %108 : vector<1x1x8x8xbf16> to vector<8x8xbf16>
    %110 = arith.truncf %107 : vector<8x384xf32> to vector<8x384xbf16>
    %cst_91 = arith.constant dense<0.000000e+00> : vector<8x384xf32>
    %111 = tpu.matmul %109, %110, %cst_91 {dimension_numbers = #tpu.dot_dimension_numbers<[1], [0], [0], [1], [0, 0, 1, 1], [], []>} : vector<8x8xbf16>, vector<8x384xbf16>, vector<8x384xf32> -> vector<8x384xf32>
    %112 = arith.addf %106, %111 : vector<8x384xf32>
    %c365_i32_92 = arith.constant 365 : i32
    %113 = tpu.dynamic_rotate %66 by %c365_i32_92 dim 1 : vector<8x384xf32>, i32 -> vector<8x384xf32>
    %c1_93 = arith.constant 1 : index
    %c8_94 = arith.constant 8 : index
    %c0_95 = arith.constant 0 : index
    %c0_96 = arith.constant 0 : index
    %114 = vector.load %arg3[%c1_93, %c8_94, %c0_95, %c0_96] : memref<12x9x8x8xbf16, #tpu.memory_space<vmem>>, vector<1x1x8x8xbf16>
    %115 = vector.shape_cast %114 : vector<1x1x8x8xbf16> to vector<8x8xbf16>
    %116 = arith.truncf %113 : vector<8x384xf32> to vector<8x384xbf16>
    %cst_97 = arith.constant dense<0.000000e+00> : vector<8x384xf32>
    %117 = tpu.matmul %115, %116, %cst_97 {dimension_numbers = #tpu.dot_dimension_numbers<[1], [0], [0], [1], [0, 0, 1, 1], [], []>} : vector<8x8xbf16>, vector<8x384xbf16>, vector<8x384xf32> -> vector<8x384xf32>
    %118 = arith.addf %112, %117 : vector<8x384xf32>
    %c1_98 = arith.constant 1 : index
    %c0_99 = arith.constant 0 : index
    %c0_100 = arith.constant 0 : index
    %119 = vector.load %arg4[%c1_98, %c0_99, %c0_100] : memref<12x8x1xf32, #tpu.memory_space<vmem>>, vector<1x8x1xf32>
    %120 = vector.shape_cast %119 : vector<1x8x1xf32> to vector<8x1xf32>
    %121 = vector.broadcast %120 : vector<8x1xf32> to vector<8x384xf32>
    %122 = arith.addf %118, %121 : vector<8x384xf32>
    %123 = arith.mulf %122, %2 : vector<8x384xf32>
    %c0_101 = arith.constant 0 : index
    %c0_102 = arith.constant 0 : index
    %124 = vector.load %arg6[%c0_101, %c0_102] : memref<8x384xf32, #tpu.memory_space<vmem>>, vector<8x384xf32>
    tpu.vector_store %arg6[%c0_101, %c0_102], %123 {strides = array<i32>} : memref<8x384xf32, #tpu.memory_space<vmem>>, vector<8x384xf32>,
    %cst_103 = arith.constant 0.000000e+00 : f32
    %125 = vector.broadcast %cst_103 : f32 to vector<8x384xf32>
    %126 = arith.cmpf oge, %123, %125 : vector<8x384xf32>
    %cst_104 = arith.constant 2.000000e-01 : f32
    %127 = vector.broadcast %cst_104 : f32 to vector<8x384xf32>
    %128 = arith.mulf %127, %123 : vector<8x384xf32>
    %129 = arith.select %126, %123, %128 : vector<8x384xi1>, vector<8x384xf32>
    %c19_i32_105 = arith.constant 19 : i32
    %130 = tpu.dynamic_rotate %129 by %c19_i32_105 dim 1 : vector<8x384xf32>, i32 -> vector<8x384xf32>
    %c2_106 = arith.constant 2 : index
    %c0_107 = arith.constant 0 : index
    %c0_108 = arith.constant 0 : index
    %c0_109 = arith.constant 0 : index
    %131 = vector.load %arg3[%c2_106, %c0_107, %c0_108, %c0_109] : memref<12x9x8x8xbf16, #tpu.memory_space<vmem>>, vector<1x1x8x8xbf16>
    %132 = vector.shape_cast %131 : vector<1x1x8x8xbf16> to vector<8x8xbf16>
    %133 = arith.truncf %130 : vector<8x384xf32> to vector<8x384xbf16>
    %cst_110 = arith.constant dense<0.000000e+00> : vector<8x384xf32>
    %134 = tpu.matmul %132, %133, %cst_110 {dimension_numbers = #tpu.dot_dimension_numbers<[1], [0], [0], [1], [0, 0, 1, 1], [], []>} : vector<8x8xbf16>, vector<8x384xbf16>, vector<8x384xf32> -> vector<8x384xf32>
    %c18_i32_111 = arith.constant 18 : i32
    %135 = tpu.dynamic_rotate %129 by %c18_i32_111 dim 1 : vector<8x384xf32>, i32 -> vector<8x384xf32>
    %c2_112 = arith.constant 2 : index
    %c1_113 = arith.constant 1 : index
    %c0_114 = arith.constant 0 : index
    %c0_115 = arith.constant 0 : index
    %136 = vector.load %arg3[%c2_112, %c1_113, %c0_114, %c0_115] : memref<12x9x8x8xbf16, #tpu.memory_space<vmem>>, vector<1x1x8x8xbf16>
    %137 = vector.shape_cast %136 : vector<1x1x8x8xbf16> to vector<8x8xbf16>
    %138 = arith.truncf %135 : vector<8x384xf32> to vector<8x384xbf16>
    %cst_116 = arith.constant dense<0.000000e+00> : vector<8x384xf32>
    %139 = tpu.matmul %137, %138, %cst_116 {dimension_numbers = #tpu.dot_dimension_numbers<[1], [0], [0], [1], [0, 0, 1, 1], [], []>} : vector<8x8xbf16>, vector<8x384xbf16>, vector<8x384xf32> -> vector<8x384xf32>
    %140 = arith.addf %134, %139 : vector<8x384xf32>
    %c17_i32_117 = arith.constant 17 : i32
    %141 = tpu.dynamic_rotate %129 by %c17_i32_117 dim 1 : vector<8x384xf32>, i32 -> vector<8x384xf32>
    %c2_118 = arith.constant 2 : index
    %c2_119 = arith.constant 2 : index
    %c0_120 = arith.constant 0 : index
    %c0_121 = arith.constant 0 : index
    %142 = vector.load %arg3[%c2_118, %c2_119, %c0_120, %c0_121] : memref<12x9x8x8xbf16, #tpu.memory_space<vmem>>, vector<1x1x8x8xbf16>
    %143 = vector.shape_cast %142 : vector<1x1x8x8xbf16> to vector<8x8xbf16>
    %144 = arith.truncf %141 : vector<8x384xf32> to vector<8x384xbf16>
    %cst_122 = arith.constant dense<0.000000e+00> : vector<8x384xf32>
    %145 = tpu.matmul %143, %144, %cst_122 {dimension_numbers = #tpu.dot_dimension_numbers<[1], [0], [0], [1], [0, 0, 1, 1], [], []>} : vector<8x8xbf16>, vector<8x384xbf16>, vector<8x384xf32> -> vector<8x384xf32>
    %146 = arith.addf %140, %145 : vector<8x384xf32>
    %c1_i32_123 = arith.constant 1 : i32
    %147 = tpu.dynamic_rotate %129 by %c1_i32_123 dim 1 : vector<8x384xf32>, i32 -> vector<8x384xf32>
    %c2_124 = arith.constant 2 : index
    %c3_125 = arith.constant 3 : index
    %c0_126 = arith.constant 0 : index
    %c0_127 = arith.constant 0 : index
    %148 = vector.load %arg3[%c2_124, %c3_125, %c0_126, %c0_127] : memref<12x9x8x8xbf16, #tpu.memory_space<vmem>>, vector<1x1x8x8xbf16>
    %149 = vector.shape_cast %148 : vector<1x1x8x8xbf16> to vector<8x8xbf16>
    %150 = arith.truncf %147 : vector<8x384xf32> to vector<8x384xbf16>
    %cst_128 = arith.constant dense<0.000000e+00> : vector<8x384xf32>
    %151 = tpu.matmul %149, %150, %cst_128 {dimension_numbers = #tpu.dot_dimension_numbers<[1], [0], [0], [1], [0, 0, 1, 1], [], []>} : vector<8x8xbf16>, vector<8x384xbf16>, vector<8x384xf32> -> vector<8x384xf32>
    %152 = arith.addf %146, %151 : vector<8x384xf32>
    %c2_129 = arith.constant 2 : index
    %c4_130 = arith.constant 4 : index
    %c0_131 = arith.constant 0 : index
    %c0_132 = arith.constant 0 : index
    %153 = vector.load %arg3[%c2_129, %c4_130, %c0_131, %c0_132] : memref<12x9x8x8xbf16, #tpu.memory_space<vmem>>, vector<1x1x8x8xbf16>
    %154 = vector.shape_cast %153 : vector<1x1x8x8xbf16> to vector<8x8xbf16>
    %155 = arith.truncf %129 : vector<8x384xf32> to vector<8x384xbf16>
    %cst_133 = arith.constant dense<0.000000e+00> : vector<8x384xf32>
    %156 = tpu.matmul %154, %155, %cst_133 {dimension_numbers = #tpu.dot_dimension_numbers<[1], [0], [0], [1], [0, 0, 1, 1], [], []>} : vector<8x8xbf16>, vector<8x384xbf16>, vector<8x384xf32> -> vector<8x384xf32>
    %157 = arith.addf %152, %156 : vector<8x384xf32>
    %c383_i32_134 = arith.constant 383 : i32
    %158 = tpu.dynamic_rotate %129 by %c383_i32_134 dim 1 : vector<8x384xf32>, i32 -> vector<8x384xf32>
    %c2_135 = arith.constant 2 : index
    %c5_136 = arith.constant 5 : index
    %c0_137 = arith.constant 0 : index
    %c0_138 = arith.constant 0 : index
    %159 = vector.load %arg3[%c2_135, %c5_136, %c0_137, %c0_138] : memref<12x9x8x8xbf16, #tpu.memory_space<vmem>>, vector<1x1x8x8xbf16>
    %160 = vector.shape_cast %159 : vector<1x1x8x8xbf16> to vector<8x8xbf16>
    %161 = arith.truncf %158 : vector<8x384xf32> to vector<8x384xbf16>
    %cst_139 = arith.constant dense<0.000000e+00> : vector<8x384xf32>
    %162 = tpu.matmul %160, %161, %cst_139 {dimension_numbers = #tpu.dot_dimension_numbers<[1], [0], [0], [1], [0, 0, 1, 1], [], []>} : vector<8x8xbf16>, vector<8x384xbf16>, vector<8x384xf32> -> vector<8x384xf32>
    %163 = arith.addf %157, %162 : vector<8x384xf32>
    %c367_i32_140 = arith.constant 367 : i32
    %164 = tpu.dynamic_rotate %129 by %c367_i32_140 dim 1 : vector<8x384xf32>, i32 -> vector<8x384xf32>
    %c2_141 = arith.constant 2 : index
    %c6_142 = arith.constant 6 : index
    %c0_143 = arith.constant 0 : index
    %c0_144 = arith.constant 0 : index
    %165 = vector.load %arg3[%c2_141, %c6_142, %c0_143, %c0_144] : memref<12x9x8x8xbf16, #tpu.memory_space<vmem>>, vector<1x1x8x8xbf16>
    %166 = vector.shape_cast %165 : vector<1x1x8x8xbf16> to vector<8x8xbf16>
    %167 = arith.truncf %164 : vector<8x384xf32> to vector<8x384xbf16>
    %cst_145 = arith.constant dense<0.000000e+00> : vector<8x384xf32>
    %168 = tpu.matmul %166, %167, %cst_145 {dimension_numbers = #tpu.dot_dimension_numbers<[1], [0], [0], [1], [0, 0, 1, 1], [], []>} : vector<8x8xbf16>, vector<8x384xbf16>, vector<8x384xf32> -> vector<8x384xf32>
    %169 = arith.addf %163, %168 : vector<8x384xf32>
    %c366_i32_146 = arith.constant 366 : i32
    %170 = tpu.dynamic_rotate %129 by %c366_i32_146 dim 1 : vector<8x384xf32>, i32 -> vector<8x384xf32>
    %c2_147 = arith.constant 2 : index
    %c7_148 = arith.constant 7 : index
    %c0_149 = arith.constant 0 : index
    %c0_150 = arith.constant 0 : index
    %171 = vector.load %arg3[%c2_147, %c7_148, %c0_149, %c0_150] : memref<12x9x8x8xbf16, #tpu.memory_space<vmem>>, vector<1x1x8x8xbf16>
    %172 = vector.shape_cast %171 : vector<1x1x8x8xbf16> to vector<8x8xbf16>
    %173 = arith.truncf %170 : vector<8x384xf32> to vector<8x384xbf16>
    %cst_151 = arith.constant dense<0.000000e+00> : vector<8x384xf32>
    %174 = tpu.matmul %172, %173, %cst_151 {dimension_numbers = #tpu.dot_dimension_numbers<[1], [0], [0], [1], [0, 0, 1, 1], [], []>} : vector<8x8xbf16>, vector<8x384xbf16>, vector<8x384xf32> -> vector<8x384xf32>
    %175 = arith.addf %169, %174 : vector<8x384xf32>
    %c365_i32_152 = arith.constant 365 : i32
    %176 = tpu.dynamic_rotate %129 by %c365_i32_152 dim 1 : vector<8x384xf32>, i32 -> vector<8x384xf32>
    %c2_153 = arith.constant 2 : index
    %c8_154 = arith.constant 8 : index
    %c0_155 = arith.constant 0 : index
    %c0_156 = arith.constant 0 : index
    %177 = vector.load %arg3[%c2_153, %c8_154, %c0_155, %c0_156] : memref<12x9x8x8xbf16, #tpu.memory_space<vmem>>, vector<1x1x8x8xbf16>
    %178 = vector.shape_cast %177 : vector<1x1x8x8xbf16> to vector<8x8xbf16>
    %179 = arith.truncf %176 : vector<8x384xf32> to vector<8x384xbf16>
    %cst_157 = arith.constant dense<0.000000e+00> : vector<8x384xf32>
    %180 = tpu.matmul %178, %179, %cst_157 {dimension_numbers = #tpu.dot_dimension_numbers<[1], [0], [0], [1], [0, 0, 1, 1], [], []>} : vector<8x8xbf16>, vector<8x384xbf16>, vector<8x384xf32> -> vector<8x384xf32>
    %181 = arith.addf %175, %180 : vector<8x384xf32>
    %c2_158 = arith.constant 2 : index
    %c0_159 = arith.constant 0 : index
    %c0_160 = arith.constant 0 : index
    %182 = vector.load %arg4[%c2_158, %c0_159, %c0_160] : memref<12x8x1xf32, #tpu.memory_space<vmem>>, vector<1x8x1xf32>
    %183 = vector.shape_cast %182 : vector<1x8x1xf32> to vector<8x1xf32>
    %184 = vector.broadcast %183 : vector<8x1xf32> to vector<8x384xf32>
    %185 = arith.addf %181, %184 : vector<8x384xf32>
    %186 = arith.mulf %185, %2 : vector<8x384xf32>
    %cst_161 = arith.constant 0.000000e+00 : f32
    %187 = vector.broadcast %cst_161 : f32 to vector<8x384xf32>
    %188 = arith.cmpf oge, %186, %187 : vector<8x384xf32>
    %cst_162 = arith.constant 2.000000e-01 : f32
    %189 = vector.broadcast %cst_162 : f32 to vector<8x384xf32>
    %190 = arith.mulf %189, %186 : vector<8x384xf32>
    %191 = arith.select %188, %186, %190 : vector<8x384xi1>, vector<8x384xf32>
    %c19_i32_163 = arith.constant 19 : i32
    %192 = tpu.dynamic_rotate %191 by %c19_i32_163 dim 1 : vector<8x384xf32>, i32 -> vector<8x384xf32>
    %c3_164 = arith.constant 3 : index
    %c0_165 = arith.constant 0 : index
    %c0_166 = arith.constant 0 : index
    %c0_167 = arith.constant 0 : index
    %193 = vector.load %arg3[%c3_164, %c0_165, %c0_166, %c0_167] : memref<12x9x8x8xbf16, #tpu.memory_space<vmem>>, vector<1x1x8x8xbf16>
    %194 = vector.shape_cast %193 : vector<1x1x8x8xbf16> to vector<8x8xbf16>
    %195 = arith.truncf %192 : vector<8x384xf32> to vector<8x384xbf16>
    %cst_168 = arith.constant dense<0.000000e+00> : vector<8x384xf32>
    %196 = tpu.matmul %194, %195, %cst_168 {dimension_numbers = #tpu.dot_dimension_numbers<[1], [0], [0], [1], [0, 0, 1, 1], [], []>} : vector<8x8xbf16>, vector<8x384xbf16>, vector<8x384xf32> -> vector<8x384xf32>
    %c18_i32_169 = arith.constant 18 : i32
    %197 = tpu.dynamic_rotate %191 by %c18_i32_169 dim 1 : vector<8x384xf32>, i32 -> vector<8x384xf32>
    %c3_170 = arith.constant 3 : index
    %c1_171 = arith.constant 1 : index
    %c0_172 = arith.constant 0 : index
    %c0_173 = arith.constant 0 : index
    %198 = vector.load %arg3[%c3_170, %c1_171, %c0_172, %c0_173] : memref<12x9x8x8xbf16, #tpu.memory_space<vmem>>, vector<1x1x8x8xbf16>
    %199 = vector.shape_cast %198 : vector<1x1x8x8xbf16> to vector<8x8xbf16>
    %200 = arith.truncf %197 : vector<8x384xf32> to vector<8x384xbf16>
    %cst_174 = arith.constant dense<0.000000e+00> : vector<8x384xf32>
    %201 = tpu.matmul %199, %200, %cst_174 {dimension_numbers = #tpu.dot_dimension_numbers<[1], [0], [0], [1], [0, 0, 1, 1], [], []>} : vector<8x8xbf16>, vector<8x384xbf16>, vector<8x384xf32> -> vector<8x384xf32>
    %202 = arith.addf %196, %201 : vector<8x384xf32>
    %c17_i32_175 = arith.constant 17 : i32
    %203 = tpu.dynamic_rotate %191 by %c17_i32_175 dim 1 : vector<8x384xf32>, i32 -> vector<8x384xf32>
    %c3_176 = arith.constant 3 : index
    %c2_177 = arith.constant 2 : index
    %c0_178 = arith.constant 0 : index
    %c0_179 = arith.constant 0 : index
    %204 = vector.load %arg3[%c3_176, %c2_177, %c0_178, %c0_179] : memref<12x9x8x8xbf16, #tpu.memory_space<vmem>>, vector<1x1x8x8xbf16>
    %205 = vector.shape_cast %204 : vector<1x1x8x8xbf16> to vector<8x8xbf16>
    %206 = arith.truncf %203 : vector<8x384xf32> to vector<8x384xbf16>
    %cst_180 = arith.constant dense<0.000000e+00> : vector<8x384xf32>
    %207 = tpu.matmul %205, %206, %cst_180 {dimension_numbers = #tpu.dot_dimension_numbers<[1], [0], [0], [1], [0, 0, 1, 1], [], []>} : vector<8x8xbf16>, vector<8x384xbf16>, vector<8x384xf32> -> vector<8x384xf32>
    %208 = arith.addf %202, %207 : vector<8x384xf32>
    %c1_i32_181 = arith.constant 1 : i32
    %209 = tpu.dynamic_rotate %191 by %c1_i32_181 dim 1 : vector<8x384xf32>, i32 -> vector<8x384xf32>
    %c3_182 = arith.constant 3 : index
    %c3_183 = arith.constant 3 : index
    %c0_184 = arith.constant 0 : index
    %c0_185 = arith.constant 0 : index
    %210 = vector.load %arg3[%c3_182, %c3_183, %c0_184, %c0_185] : memref<12x9x8x8xbf16, #tpu.memory_space<vmem>>, vector<1x1x8x8xbf16>
    %211 = vector.shape_cast %210 : vector<1x1x8x8xbf16> to vector<8x8xbf16>
    %212 = arith.truncf %209 : vector<8x384xf32> to vector<8x384xbf16>
    %cst_186 = arith.constant dense<0.000000e+00> : vector<8x384xf32>
    %213 = tpu.matmul %211, %212, %cst_186 {dimension_numbers = #tpu.dot_dimension_numbers<[1], [0], [0], [1], [0, 0, 1, 1], [], []>} : vector<8x8xbf16>, vector<8x384xbf16>, vector<8x384xf32> -> vector<8x384xf32>
    %214 = arith.addf %208, %213 : vector<8x384xf32>
    %c3_187 = arith.constant 3 : index
    %c4_188 = arith.constant 4 : index
    %c0_189 = arith.constant 0 : index
    %c0_190 = arith.constant 0 : index
    %215 = vector.load %arg3[%c3_187, %c4_188, %c0_189, %c0_190] : memref<12x9x8x8xbf16, #tpu.memory_space<vmem>>, vector<1x1x8x8xbf16>
    %216 = vector.shape_cast %215 : vector<1x1x8x8xbf16> to vector<8x8xbf16>
    %217 = arith.truncf %191 : vector<8x384xf32> to vector<8x384xbf16>
    %cst_191 = arith.constant dense<0.000000e+00> : vector<8x384xf32>
    %218 = tpu.matmul %216, %217, %cst_191 {dimension_numbers = #tpu.dot_dimension_numbers<[1], [0], [0], [1], [0, 0, 1, 1], [], []>} : vector<8x8xbf16>, vector<8x384xbf16>, vector<8x384xf32> -> vector<8x384xf32>
    %219 = arith.addf %214, %218 : vector<8x384xf32>
    %c383_i32_192 = arith.constant 383 : i32
    %220 = tpu.dynamic_rotate %191 by %c383_i32_192 dim 1 : vector<8x384xf32>, i32 -> vector<8x384xf32>
    %c3_193 = arith.constant 3 : index
    %c5_194 = arith.constant 5 : index
    %c0_195 = arith.constant 0 : index
    %c0_196 = arith.constant 0 : index
    %221 = vector.load %arg3[%c3_193, %c5_194, %c0_195, %c0_196] : memref<12x9x8x8xbf16, #tpu.memory_space<vmem>>, vector<1x1x8x8xbf16>
    %222 = vector.shape_cast %221 : vector<1x1x8x8xbf16> to vector<8x8xbf16>
    %223 = arith.truncf %220 : vector<8x384xf32> to vector<8x384xbf16>
    %cst_197 = arith.constant dense<0.000000e+00> : vector<8x384xf32>
    %224 = tpu.matmul %222, %223, %cst_197 {dimension_numbers = #tpu.dot_dimension_numbers<[1], [0], [0], [1], [0, 0, 1, 1], [], []>} : vector<8x8xbf16>, vector<8x384xbf16>, vector<8x384xf32> -> vector<8x384xf32>
    %225 = arith.addf %219, %224 : vector<8x384xf32>
    %c367_i32_198 = arith.constant 367 : i32
    %226 = tpu.dynamic_rotate %191 by %c367_i32_198 dim 1 : vector<8x384xf32>, i32 -> vector<8x384xf32>
    %c3_199 = arith.constant 3 : index
    %c6_200 = arith.constant 6 : index
    %c0_201 = arith.constant 0 : index
    %c0_202 = arith.constant 0 : index
    %227 = vector.load %arg3[%c3_199, %c6_200, %c0_201, %c0_202] : memref<12x9x8x8xbf16, #tpu.memory_space<vmem>>, vector<1x1x8x8xbf16>
    %228 = vector.shape_cast %227 : vector<1x1x8x8xbf16> to vector<8x8xbf16>
    %229 = arith.truncf %226 : vector<8x384xf32> to vector<8x384xbf16>
    %cst_203 = arith.constant dense<0.000000e+00> : vector<8x384xf32>
    %230 = tpu.matmul %228, %229, %cst_203 {dimension_numbers = #tpu.dot_dimension_numbers<[1], [0], [0], [1], [0, 0, 1, 1], [], []>} : vector<8x8xbf16>, vector<8x384xbf16>, vector<8x384xf32> -> vector<8x384xf32>
    %231 = arith.addf %225, %230 : vector<8x384xf32>
    %c366_i32_204 = arith.constant 366 : i32
    %232 = tpu.dynamic_rotate %191 by %c366_i32_204 dim 1 : vector<8x384xf32>, i32 -> vector<8x384xf32>
    %c3_205 = arith.constant 3 : index
    %c7_206 = arith.constant 7 : index
    %c0_207 = arith.constant 0 : index
    %c0_208 = arith.constant 0 : index
    %233 = vector.load %arg3[%c3_205, %c7_206, %c0_207, %c0_208] : memref<12x9x8x8xbf16, #tpu.memory_space<vmem>>, vector<1x1x8x8xbf16>
    %234 = vector.shape_cast %233 : vector<1x1x8x8xbf16> to vector<8x8xbf16>
    %235 = arith.truncf %232 : vector<8x384xf32> to vector<8x384xbf16>
    %cst_209 = arith.constant dense<0.000000e+00> : vector<8x384xf32>
    %236 = tpu.matmul %234, %235, %cst_209 {dimension_numbers = #tpu.dot_dimension_numbers<[1], [0], [0], [1], [0, 0, 1, 1], [], []>} : vector<8x8xbf16>, vector<8x384xbf16>, vector<8x384xf32> -> vector<8x384xf32>
    %237 = arith.addf %231, %236 : vector<8x384xf32>
    %c365_i32_210 = arith.constant 365 : i32
    %238 = tpu.dynamic_rotate %191 by %c365_i32_210 dim 1 : vector<8x384xf32>, i32 -> vector<8x384xf32>
    %c3_211 = arith.constant 3 : index
    %c8_212 = arith.constant 8 : index
    %c0_213 = arith.constant 0 : index
    %c0_214 = arith.constant 0 : index
    %239 = vector.load %arg3[%c3_211, %c8_212, %c0_213, %c0_214] : memref<12x9x8x8xbf16, #tpu.memory_space<vmem>>, vector<1x1x8x8xbf16>
    %240 = vector.shape_cast %239 : vector<1x1x8x8xbf16> to vector<8x8xbf16>
    %241 = arith.truncf %238 : vector<8x384xf32> to vector<8x384xbf16>
    %cst_215 = arith.constant dense<0.000000e+00> : vector<8x384xf32>
    %242 = tpu.matmul %240, %241, %cst_215 {dimension_numbers = #tpu.dot_dimension_numbers<[1], [0], [0], [1], [0, 0, 1, 1], [], []>} : vector<8x8xbf16>, vector<8x384xbf16>, vector<8x384xf32> -> vector<8x384xf32>
    %243 = arith.addf %237, %242 : vector<8x384xf32>
    %c3_216 = arith.constant 3 : index
    %c0_217 = arith.constant 0 : index
    %c0_218 = arith.constant 0 : index
    %244 = vector.load %arg4[%c3_216, %c0_217, %c0_218] : memref<12x8x1xf32, #tpu.memory_space<vmem>>, vector<1x8x1xf32>
    %245 = vector.shape_cast %244 : vector<1x8x1xf32> to vector<8x1xf32>
    %246 = vector.broadcast %245 : vector<8x1xf32> to vector<8x384xf32>
    %247 = arith.addf %243, %246 : vector<8x384xf32>
    %248 = arith.mulf %247, %2 : vector<8x384xf32>
    %c0_219 = arith.constant 0 : index
    %c0_220 = arith.constant 0 : index
    %249 = vector.load %arg7[%c0_219, %c0_220] : memref<8x384xf32, #tpu.memory_space<vmem>>, vector<8x384xf32>
    tpu.vector_store %arg7[%c0_219, %c0_220], %248 {strides = array<i32>} : memref<8x384xf32, #tpu.memory_space<vmem>>, vector<8x384xf32>,
    %cst_221 = arith.constant 0.000000e+00 : f32
    %250 = vector.broadcast %cst_221 : f32 to vector<8x384xf32>
    %251 = arith.cmpf oge, %248, %250 : vector<8x384xf32>
    %cst_222 = arith.constant 2.000000e-01 : f32
    %252 = vector.broadcast %cst_222 : f32 to vector<8x384xf32>
    %253 = arith.mulf %252, %248 : vector<8x384xf32>
    %254 = arith.select %251, %248, %253 : vector<8x384xi1>, vector<8x384xf32>
    %c19_i32_223 = arith.constant 19 : i32
    %255 = tpu.dynamic_rotate %254 by %c19_i32_223 dim 1 : vector<8x384xf32>, i32 -> vector<8x384xf32>
    %c4_224 = arith.constant 4 : index
    %c0_225 = arith.constant 0 : index
    %c0_226 = arith.constant 0 : index
    %c0_227 = arith.constant 0 : index
    %256 = vector.load %arg3[%c4_224, %c0_225, %c0_226, %c0_227] : memref<12x9x8x8xbf16, #tpu.memory_space<vmem>>, vector<1x1x8x8xbf16>
    %257 = vector.shape_cast %256 : vector<1x1x8x8xbf16> to vector<8x8xbf16>
    %258 = arith.truncf %255 : vector<8x384xf32> to vector<8x384xbf16>
    %cst_228 = arith.constant dense<0.000000e+00> : vector<8x384xf32>
    %259 = tpu.matmul %257, %258, %cst_228 {dimension_numbers = #tpu.dot_dimension_numbers<[1], [0], [0], [1], [0, 0, 1, 1], [], []>} : vector<8x8xbf16>, vector<8x384xbf16>, vector<8x384xf32> -> vector<8x384xf32>
    %c18_i32_229 = arith.constant 18 : i32
    %260 = tpu.dynamic_rotate %254 by %c18_i32_229 dim 1 : vector<8x384xf32>, i32 -> vector<8x384xf32>
    %c4_230 = arith.constant 4 : index
    %c1_231 = arith.constant 1 : index
    %c0_232 = arith.constant 0 : index
    %c0_233 = arith.constant 0 : index
    %261 = vector.load %arg3[%c4_230, %c1_231, %c0_232, %c0_233] : memref<12x9x8x8xbf16, #tpu.memory_space<vmem>>, vector<1x1x8x8xbf16>
    %262 = vector.shape_cast %261 : vector<1x1x8x8xbf16> to vector<8x8xbf16>
    %263 = arith.truncf %260 : vector<8x384xf32> to vector<8x384xbf16>
    %cst_234 = arith.constant dense<0.000000e+00> : vector<8x384xf32>
    %264 = tpu.matmul %262, %263, %cst_234 {dimension_numbers = #tpu.dot_dimension_numbers<[1], [0], [0], [1], [0, 0, 1, 1], [], []>} : vector<8x8xbf16>, vector<8x384xbf16>, vector<8x384xf32> -> vector<8x384xf32>
    %265 = arith.addf %259, %264 : vector<8x384xf32>
    %c17_i32_235 = arith.constant 17 : i32
    %266 = tpu.dynamic_rotate %254 by %c17_i32_235 dim 1 : vector<8x384xf32>, i32 -> vector<8x384xf32>
    %c4_236 = arith.constant 4 : index
    %c2_237 = arith.constant 2 : index
    %c0_238 = arith.constant 0 : index
    %c0_239 = arith.constant 0 : index
    %267 = vector.load %arg3[%c4_236, %c2_237, %c0_238, %c0_239] : memref<12x9x8x8xbf16, #tpu.memory_space<vmem>>, vector<1x1x8x8xbf16>
    %268 = vector.shape_cast %267 : vector<1x1x8x8xbf16> to vector<8x8xbf16>
    %269 = arith.truncf %266 : vector<8x384xf32> to vector<8x384xbf16>
    %cst_240 = arith.constant dense<0.000000e+00> : vector<8x384xf32>
    %270 = tpu.matmul %268, %269, %cst_240 {dimension_numbers = #tpu.dot_dimension_numbers<[1], [0], [0], [1], [0, 0, 1, 1], [], []>} : vector<8x8xbf16>, vector<8x384xbf16>, vector<8x384xf32> -> vector<8x384xf32>
    %271 = arith.addf %265, %270 : vector<8x384xf32>
    %c1_i32_241 = arith.constant 1 : i32
    %272 = tpu.dynamic_rotate %254 by %c1_i32_241 dim 1 : vector<8x384xf32>, i32 -> vector<8x384xf32>
    %c4_242 = arith.constant 4 : index
    %c3_243 = arith.constant 3 : index
    %c0_244 = arith.constant 0 : index
    %c0_245 = arith.constant 0 : index
    %273 = vector.load %arg3[%c4_242, %c3_243, %c0_244, %c0_245] : memref<12x9x8x8xbf16, #tpu.memory_space<vmem>>, vector<1x1x8x8xbf16>
    %274 = vector.shape_cast %273 : vector<1x1x8x8xbf16> to vector<8x8xbf16>
    %275 = arith.truncf %272 : vector<8x384xf32> to vector<8x384xbf16>
    %cst_246 = arith.constant dense<0.000000e+00> : vector<8x384xf32>
    %276 = tpu.matmul %274, %275, %cst_246 {dimension_numbers = #tpu.dot_dimension_numbers<[1], [0], [0], [1], [0, 0, 1, 1], [], []>} : vector<8x8xbf16>, vector<8x384xbf16>, vector<8x384xf32> -> vector<8x384xf32>
    %277 = arith.addf %271, %276 : vector<8x384xf32>
    %c4_247 = arith.constant 4 : index
    %c4_248 = arith.constant 4 : index
    %c0_249 = arith.constant 0 : index
    %c0_250 = arith.constant 0 : index
    %278 = vector.load %arg3[%c4_247, %c4_248, %c0_249, %c0_250] : memref<12x9x8x8xbf16, #tpu.memory_space<vmem>>, vector<1x1x8x8xbf16>
    %279 = vector.shape_cast %278 : vector<1x1x8x8xbf16> to vector<8x8xbf16>
    %280 = arith.truncf %254 : vector<8x384xf32> to vector<8x384xbf16>
    %cst_251 = arith.constant dense<0.000000e+00> : vector<8x384xf32>
    %281 = tpu.matmul %279, %280, %cst_251 {dimension_numbers = #tpu.dot_dimension_numbers<[1], [0], [0], [1], [0, 0, 1, 1], [], []>} : vector<8x8xbf16>, vector<8x384xbf16>, vector<8x384xf32> -> vector<8x384xf32>
    %282 = arith.addf %277, %281 : vector<8x384xf32>
    %c383_i32_252 = arith.constant 383 : i32
    %283 = tpu.dynamic_rotate %254 by %c383_i32_252 dim 1 : vector<8x384xf32>, i32 -> vector<8x384xf32>
    %c4_253 = arith.constant 4 : index
    %c5_254 = arith.constant 5 : index
    %c0_255 = arith.constant 0 : index
    %c0_256 = arith.constant 0 : index
    %284 = vector.load %arg3[%c4_253, %c5_254, %c0_255, %c0_256] : memref<12x9x8x8xbf16, #tpu.memory_space<vmem>>, vector<1x1x8x8xbf16>
    %285 = vector.shape_cast %284 : vector<1x1x8x8xbf16> to vector<8x8xbf16>
    %286 = arith.truncf %283 : vector<8x384xf32> to vector<8x384xbf16>
    %cst_257 = arith.constant dense<0.000000e+00> : vector<8x384xf32>
    %287 = tpu.matmul %285, %286, %cst_257 {dimension_numbers = #tpu.dot_dimension_numbers<[1], [0], [0], [1], [0, 0, 1, 1], [], []>} : vector<8x8xbf16>, vector<8x384xbf16>, vector<8x384xf32> -> vector<8x384xf32>
    %288 = arith.addf %282, %287 : vector<8x384xf32>
    %c367_i32_258 = arith.constant 367 : i32
    %289 = tpu.dynamic_rotate %254 by %c367_i32_258 dim 1 : vector<8x384xf32>, i32 -> vector<8x384xf32>
    %c4_259 = arith.constant 4 : index
    %c6_260 = arith.constant 6 : index
    %c0_261 = arith.constant 0 : index
    %c0_262 = arith.constant 0 : index
    %290 = vector.load %arg3[%c4_259, %c6_260, %c0_261, %c0_262] : memref<12x9x8x8xbf16, #tpu.memory_space<vmem>>, vector<1x1x8x8xbf16>
    %291 = vector.shape_cast %290 : vector<1x1x8x8xbf16> to vector<8x8xbf16>
    %292 = arith.truncf %289 : vector<8x384xf32> to vector<8x384xbf16>
    %cst_263 = arith.constant dense<0.000000e+00> : vector<8x384xf32>
    %293 = tpu.matmul %291, %292, %cst_263 {dimension_numbers = #tpu.dot_dimension_numbers<[1], [0], [0], [1], [0, 0, 1, 1], [], []>} : vector<8x8xbf16>, vector<8x384xbf16>, vector<8x384xf32> -> vector<8x384xf32>
    %294 = arith.addf %288, %293 : vector<8x384xf32>
    %c366_i32_264 = arith.constant 366 : i32
    %295 = tpu.dynamic_rotate %254 by %c366_i32_264 dim 1 : vector<8x384xf32>, i32 -> vector<8x384xf32>
    %c4_265 = arith.constant 4 : index
    %c7_266 = arith.constant 7 : index
    %c0_267 = arith.constant 0 : index
    %c0_268 = arith.constant 0 : index
    %296 = vector.load %arg3[%c4_265, %c7_266, %c0_267, %c0_268] : memref<12x9x8x8xbf16, #tpu.memory_space<vmem>>, vector<1x1x8x8xbf16>
    %297 = vector.shape_cast %296 : vector<1x1x8x8xbf16> to vector<8x8xbf16>
    %298 = arith.truncf %295 : vector<8x384xf32> to vector<8x384xbf16>
    %cst_269 = arith.constant dense<0.000000e+00> : vector<8x384xf32>
    %299 = tpu.matmul %297, %298, %cst_269 {dimension_numbers = #tpu.dot_dimension_numbers<[1], [0], [0], [1], [0, 0, 1, 1], [], []>} : vector<8x8xbf16>, vector<8x384xbf16>, vector<8x384xf32> -> vector<8x384xf32>
    %300 = arith.addf %294, %299 : vector<8x384xf32>
    %c365_i32_270 = arith.constant 365 : i32
    %301 = tpu.dynamic_rotate %254 by %c365_i32_270 dim 1 : vector<8x384xf32>, i32 -> vector<8x384xf32>
    %c4_271 = arith.constant 4 : index
    %c8_272 = arith.constant 8 : index
    %c0_273 = arith.constant 0 : index
    %c0_274 = arith.constant 0 : index
    %302 = vector.load %arg3[%c4_271, %c8_272, %c0_273, %c0_274] : memref<12x9x8x8xbf16, #tpu.memory_space<vmem>>, vector<1x1x8x8xbf16>
    %303 = vector.shape_cast %302 : vector<1x1x8x8xbf16> to vector<8x8xbf16>
    %304 = arith.truncf %301 : vector<8x384xf32> to vector<8x384xbf16>
    %cst_275 = arith.constant dense<0.000000e+00> : vector<8x384xf32>
    %305 = tpu.matmul %303, %304, %cst_275 {dimension_numbers = #tpu.dot_dimension_numbers<[1], [0], [0], [1], [0, 0, 1, 1], [], []>} : vector<8x8xbf16>, vector<8x384xbf16>, vector<8x384xf32> -> vector<8x384xf32>
    %306 = arith.addf %300, %305 : vector<8x384xf32>
    %c4_276 = arith.constant 4 : index
    %c0_277 = arith.constant 0 : index
    %c0_278 = arith.constant 0 : index
    %307 = vector.load %arg4[%c4_276, %c0_277, %c0_278] : memref<12x8x1xf32, #tpu.memory_space<vmem>>, vector<1x8x1xf32>
    %308 = vector.shape_cast %307 : vector<1x8x1xf32> to vector<8x1xf32>
    %309 = vector.broadcast %308 : vector<8x1xf32> to vector<8x384xf32>
    %310 = arith.addf %306, %309 : vector<8x384xf32>
    %311 = arith.mulf %310, %2 : vector<8x384xf32>
    %cst_279 = arith.constant 0.000000e+00 : f32
    %312 = vector.broadcast %cst_279 : f32 to vector<8x384xf32>
    %313 = arith.cmpf oge, %311, %312 : vector<8x384xf32>
    %cst_280 = arith.constant 2.000000e-01 : f32
    %314 = vector.broadcast %cst_280 : f32 to vector<8x384xf32>
    %315 = arith.mulf %314, %311 : vector<8x384xf32>
    %316 = arith.select %313, %311, %315 : vector<8x384xi1>, vector<8x384xf32>
    %c19_i32_281 = arith.constant 19 : i32
    %317 = tpu.dynamic_rotate %316 by %c19_i32_281 dim 1 : vector<8x384xf32>, i32 -> vector<8x384xf32>
    %c5_282 = arith.constant 5 : index
    %c0_283 = arith.constant 0 : index
    %c0_284 = arith.constant 0 : index
    %c0_285 = arith.constant 0 : index
    %318 = vector.load %arg3[%c5_282, %c0_283, %c0_284, %c0_285] : memref<12x9x8x8xbf16, #tpu.memory_space<vmem>>, vector<1x1x8x8xbf16>
    %319 = vector.shape_cast %318 : vector<1x1x8x8xbf16> to vector<8x8xbf16>
    %320 = arith.truncf %317 : vector<8x384xf32> to vector<8x384xbf16>
    %cst_286 = arith.constant dense<0.000000e+00> : vector<8x384xf32>
    %321 = tpu.matmul %319, %320, %cst_286 {dimension_numbers = #tpu.dot_dimension_numbers<[1], [0], [0], [1], [0, 0, 1, 1], [], []>} : vector<8x8xbf16>, vector<8x384xbf16>, vector<8x384xf32> -> vector<8x384xf32>
    %c18_i32_287 = arith.constant 18 : i32
    %322 = tpu.dynamic_rotate %316 by %c18_i32_287 dim 1 : vector<8x384xf32>, i32 -> vector<8x384xf32>
    %c5_288 = arith.constant 5 : index
    %c1_289 = arith.constant 1 : index
    %c0_290 = arith.constant 0 : index
    %c0_291 = arith.constant 0 : index
    %323 = vector.load %arg3[%c5_288, %c1_289, %c0_290, %c0_291] : memref<12x9x8x8xbf16, #tpu.memory_space<vmem>>, vector<1x1x8x8xbf16>
    %324 = vector.shape_cast %323 : vector<1x1x8x8xbf16> to vector<8x8xbf16>
    %325 = arith.truncf %322 : vector<8x384xf32> to vector<8x384xbf16>
    %cst_292 = arith.constant dense<0.000000e+00> : vector<8x384xf32>
    %326 = tpu.matmul %324, %325, %cst_292 {dimension_numbers = #tpu.dot_dimension_numbers<[1], [0], [0], [1], [0, 0, 1, 1], [], []>} : vector<8x8xbf16>, vector<8x384xbf16>, vector<8x384xf32> -> vector<8x384xf32>
    %327 = arith.addf %321, %326 : vector<8x384xf32>
    %c17_i32_293 = arith.constant 17 : i32
    %328 = tpu.dynamic_rotate %316 by %c17_i32_293 dim 1 : vector<8x384xf32>, i32 -> vector<8x384xf32>
    %c5_294 = arith.constant 5 : index
    %c2_295 = arith.constant 2 : index
    %c0_296 = arith.constant 0 : index
    %c0_297 = arith.constant 0 : index
    %329 = vector.load %arg3[%c5_294, %c2_295, %c0_296, %c0_297] : memref<12x9x8x8xbf16, #tpu.memory_space<vmem>>, vector<1x1x8x8xbf16>
    %330 = vector.shape_cast %329 : vector<1x1x8x8xbf16> to vector<8x8xbf16>
    %331 = arith.truncf %328 : vector<8x384xf32> to vector<8x384xbf16>
    %cst_298 = arith.constant dense<0.000000e+00> : vector<8x384xf32>
    %332 = tpu.matmul %330, %331, %cst_298 {dimension_numbers = #tpu.dot_dimension_numbers<[1], [0], [0], [1], [0, 0, 1, 1], [], []>} : vector<8x8xbf16>, vector<8x384xbf16>, vector<8x384xf32> -> vector<8x384xf32>
    %333 = arith.addf %327, %332 : vector<8x384xf32>
    %c1_i32_299 = arith.constant 1 : i32
    %334 = tpu.dynamic_rotate %316 by %c1_i32_299 dim 1 : vector<8x384xf32>, i32 -> vector<8x384xf32>
    %c5_300 = arith.constant 5 : index
    %c3_301 = arith.constant 3 : index
    %c0_302 = arith.constant 0 : index
    %c0_303 = arith.constant 0 : index
    %335 = vector.load %arg3[%c5_300, %c3_301, %c0_302, %c0_303] : memref<12x9x8x8xbf16, #tpu.memory_space<vmem>>, vector<1x1x8x8xbf16>
    %336 = vector.shape_cast %335 : vector<1x1x8x8xbf16> to vector<8x8xbf16>
    %337 = arith.truncf %334 : vector<8x384xf32> to vector<8x384xbf16>
    %cst_304 = arith.constant dense<0.000000e+00> : vector<8x384xf32>
    %338 = tpu.matmul %336, %337, %cst_304 {dimension_numbers = #tpu.dot_dimension_numbers<[1], [0], [0], [1], [0, 0, 1, 1], [], []>} : vector<8x8xbf16>, vector<8x384xbf16>, vector<8x384xf32> -> vector<8x384xf32>
    %339 = arith.addf %333, %338 : vector<8x384xf32>
    %c5_305 = arith.constant 5 : index
    %c4_306 = arith.constant 4 : index
    %c0_307 = arith.constant 0 : index
    %c0_308 = arith.constant 0 : index
    %340 = vector.load %arg3[%c5_305, %c4_306, %c0_307, %c0_308] : memref<12x9x8x8xbf16, #tpu.memory_space<vmem>>, vector<1x1x8x8xbf16>
    %341 = vector.shape_cast %340 : vector<1x1x8x8xbf16> to vector<8x8xbf16>
    %342 = arith.truncf %316 : vector<8x384xf32> to vector<8x384xbf16>
    %cst_309 = arith.constant dense<0.000000e+00> : vector<8x384xf32>
    %343 = tpu.matmul %341, %342, %cst_309 {dimension_numbers = #tpu.dot_dimension_numbers<[1], [0], [0], [1], [0, 0, 1, 1], [], []>} : vector<8x8xbf16>, vector<8x384xbf16>, vector<8x384xf32> -> vector<8x384xf32>
    %344 = arith.addf %339, %343 : vector<8x384xf32>
    %c383_i32_310 = arith.constant 383 : i32
    %345 = tpu.dynamic_rotate %316 by %c383_i32_310 dim 1 : vector<8x384xf32>, i32 -> vector<8x384xf32>
    %c5_311 = arith.constant 5 : index
    %c5_312 = arith.constant 5 : index
    %c0_313 = arith.constant 0 : index
    %c0_314 = arith.constant 0 : index
    %346 = vector.load %arg3[%c5_311, %c5_312, %c0_313, %c0_314] : memref<12x9x8x8xbf16, #tpu.memory_space<vmem>>, vector<1x1x8x8xbf16>
    %347 = vector.shape_cast %346 : vector<1x1x8x8xbf16> to vector<8x8xbf16>
    %348 = arith.truncf %345 : vector<8x384xf32> to vector<8x384xbf16>
    %cst_315 = arith.constant dense<0.000000e+00> : vector<8x384xf32>
    %349 = tpu.matmul %347, %348, %cst_315 {dimension_numbers = #tpu.dot_dimension_numbers<[1], [0], [0], [1], [0, 0, 1, 1], [], []>} : vector<8x8xbf16>, vector<8x384xbf16>, vector<8x384xf32> -> vector<8x384xf32>
    %350 = arith.addf %344, %349 : vector<8x384xf32>
    %c367_i32_316 = arith.constant 367 : i32
    %351 = tpu.dynamic_rotate %316 by %c367_i32_316 dim 1 : vector<8x384xf32>, i32 -> vector<8x384xf32>
    %c5_317 = arith.constant 5 : index
    %c6_318 = arith.constant 6 : index
    %c0_319 = arith.constant 0 : index
    %c0_320 = arith.constant 0 : index
    %352 = vector.load %arg3[%c5_317, %c6_318, %c0_319, %c0_320] : memref<12x9x8x8xbf16, #tpu.memory_space<vmem>>, vector<1x1x8x8xbf16>
    %353 = vector.shape_cast %352 : vector<1x1x8x8xbf16> to vector<8x8xbf16>
    %354 = arith.truncf %351 : vector<8x384xf32> to vector<8x384xbf16>
    %cst_321 = arith.constant dense<0.000000e+00> : vector<8x384xf32>
    %355 = tpu.matmul %353, %354, %cst_321 {dimension_numbers = #tpu.dot_dimension_numbers<[1], [0], [0], [1], [0, 0, 1, 1], [], []>} : vector<8x8xbf16>, vector<8x384xbf16>, vector<8x384xf32> -> vector<8x384xf32>
    %356 = arith.addf %350, %355 : vector<8x384xf32>
    %c366_i32_322 = arith.constant 366 : i32
    %357 = tpu.dynamic_rotate %316 by %c366_i32_322 dim 1 : vector<8x384xf32>, i32 -> vector<8x384xf32>
    %c5_323 = arith.constant 5 : index
    %c7_324 = arith.constant 7 : index
    %c0_325 = arith.constant 0 : index
    %c0_326 = arith.constant 0 : index
    %358 = vector.load %arg3[%c5_323, %c7_324, %c0_325, %c0_326] : memref<12x9x8x8xbf16, #tpu.memory_space<vmem>>, vector<1x1x8x8xbf16>
    %359 = vector.shape_cast %358 : vector<1x1x8x8xbf16> to vector<8x8xbf16>
    %360 = arith.truncf %357 : vector<8x384xf32> to vector<8x384xbf16>
    %cst_327 = arith.constant dense<0.000000e+00> : vector<8x384xf32>
    %361 = tpu.matmul %359, %360, %cst_327 {dimension_numbers = #tpu.dot_dimension_numbers<[1], [0], [0], [1], [0, 0, 1, 1], [], []>} : vector<8x8xbf16>, vector<8x384xbf16>, vector<8x384xf32> -> vector<8x384xf32>
    %362 = arith.addf %356, %361 : vector<8x384xf32>
    %c365_i32_328 = arith.constant 365 : i32
    %363 = tpu.dynamic_rotate %316 by %c365_i32_328 dim 1 : vector<8x384xf32>, i32 -> vector<8x384xf32>
    %c5_329 = arith.constant 5 : index
    %c8_330 = arith.constant 8 : index
    %c0_331 = arith.constant 0 : index
    %c0_332 = arith.constant 0 : index
    %364 = vector.load %arg3[%c5_329, %c8_330, %c0_331, %c0_332] : memref<12x9x8x8xbf16, #tpu.memory_space<vmem>>, vector<1x1x8x8xbf16>
    %365 = vector.shape_cast %364 : vector<1x1x8x8xbf16> to vector<8x8xbf16>
    %366 = arith.truncf %363 : vector<8x384xf32> to vector<8x384xbf16>
    %cst_333 = arith.constant dense<0.000000e+00> : vector<8x384xf32>
    %367 = tpu.matmul %365, %366, %cst_333 {dimension_numbers = #tpu.dot_dimension_numbers<[1], [0], [0], [1], [0, 0, 1, 1], [], []>} : vector<8x8xbf16>, vector<8x384xbf16>, vector<8x384xf32> -> vector<8x384xf32>
    %368 = arith.addf %362, %367 : vector<8x384xf32>
    %c5_334 = arith.constant 5 : index
    %c0_335 = arith.constant 0 : index
    %c0_336 = arith.constant 0 : index
    %369 = vector.load %arg4[%c5_334, %c0_335, %c0_336] : memref<12x8x1xf32, #tpu.memory_space<vmem>>, vector<1x8x1xf32>
    %370 = vector.shape_cast %369 : vector<1x8x1xf32> to vector<8x1xf32>
    %371 = vector.broadcast %370 : vector<8x1xf32> to vector<8x384xf32>
    %372 = arith.addf %368, %371 : vector<8x384xf32>
    %373 = arith.mulf %372, %2 : vector<8x384xf32>
    %cst_337 = arith.constant 0.000000e+00 : f32
    %374 = vector.broadcast %cst_337 : f32 to vector<8x384xf32>
    %375 = arith.cmpf oge, %373, %374 : vector<8x384xf32>
    %cst_338 = arith.constant 2.000000e-01 : f32
    %376 = vector.broadcast %cst_338 : f32 to vector<8x384xf32>
    %377 = arith.mulf %376, %373 : vector<8x384xf32>
    %378 = arith.select %375, %373, %377 : vector<8x384xi1>, vector<8x384xf32>
    %c19_i32_339 = arith.constant 19 : i32
    %379 = tpu.dynamic_rotate %378 by %c19_i32_339 dim 1 : vector<8x384xf32>, i32 -> vector<8x384xf32>
    %c6_340 = arith.constant 6 : index
    %c0_341 = arith.constant 0 : index
    %c0_342 = arith.constant 0 : index
    %c0_343 = arith.constant 0 : index
    %380 = vector.load %arg3[%c6_340, %c0_341, %c0_342, %c0_343] : memref<12x9x8x8xbf16, #tpu.memory_space<vmem>>, vector<1x1x8x8xbf16>
    %381 = vector.shape_cast %380 : vector<1x1x8x8xbf16> to vector<8x8xbf16>
    %382 = arith.truncf %379 : vector<8x384xf32> to vector<8x384xbf16>
    %cst_344 = arith.constant dense<0.000000e+00> : vector<8x384xf32>
    %383 = tpu.matmul %381, %382, %cst_344 {dimension_numbers = #tpu.dot_dimension_numbers<[1], [0], [0], [1], [0, 0, 1, 1], [], []>} : vector<8x8xbf16>, vector<8x384xbf16>, vector<8x384xf32> -> vector<8x384xf32>
    %c18_i32_345 = arith.constant 18 : i32
    %384 = tpu.dynamic_rotate %378 by %c18_i32_345 dim 1 : vector<8x384xf32>, i32 -> vector<8x384xf32>
    %c6_346 = arith.constant 6 : index
    %c1_347 = arith.constant 1 : index
    %c0_348 = arith.constant 0 : index
    %c0_349 = arith.constant 0 : index
    %385 = vector.load %arg3[%c6_346, %c1_347, %c0_348, %c0_349] : memref<12x9x8x8xbf16, #tpu.memory_space<vmem>>, vector<1x1x8x8xbf16>
    %386 = vector.shape_cast %385 : vector<1x1x8x8xbf16> to vector<8x8xbf16>
    %387 = arith.truncf %384 : vector<8x384xf32> to vector<8x384xbf16>
    %cst_350 = arith.constant dense<0.000000e+00> : vector<8x384xf32>
    %388 = tpu.matmul %386, %387, %cst_350 {dimension_numbers = #tpu.dot_dimension_numbers<[1], [0], [0], [1], [0, 0, 1, 1], [], []>} : vector<8x8xbf16>, vector<8x384xbf16>, vector<8x384xf32> -> vector<8x384xf32>
    %389 = arith.addf %383, %388 : vector<8x384xf32>
    %c17_i32_351 = arith.constant 17 : i32
    %390 = tpu.dynamic_rotate %378 by %c17_i32_351 dim 1 : vector<8x384xf32>, i32 -> vector<8x384xf32>
    %c6_352 = arith.constant 6 : index
    %c2_353 = arith.constant 2 : index
    %c0_354 = arith.constant 0 : index
    %c0_355 = arith.constant 0 : index
    %391 = vector.load %arg3[%c6_352, %c2_353, %c0_354, %c0_355] : memref<12x9x8x8xbf16, #tpu.memory_space<vmem>>, vector<1x1x8x8xbf16>
    %392 = vector.shape_cast %391 : vector<1x1x8x8xbf16> to vector<8x8xbf16>
    %393 = arith.truncf %390 : vector<8x384xf32> to vector<8x384xbf16>
    %cst_356 = arith.constant dense<0.000000e+00> : vector<8x384xf32>
    %394 = tpu.matmul %392, %393, %cst_356 {dimension_numbers = #tpu.dot_dimension_numbers<[1], [0], [0], [1], [0, 0, 1, 1], [], []>} : vector<8x8xbf16>, vector<8x384xbf16>, vector<8x384xf32> -> vector<8x384xf32>
    %395 = arith.addf %389, %394 : vector<8x384xf32>
    %c1_i32_357 = arith.constant 1 : i32
    %396 = tpu.dynamic_rotate %378 by %c1_i32_357 dim 1 : vector<8x384xf32>, i32 -> vector<8x384xf32>
    %c6_358 = arith.constant 6 : index
    %c3_359 = arith.constant 3 : index
    %c0_360 = arith.constant 0 : index
    %c0_361 = arith.constant 0 : index
    %397 = vector.load %arg3[%c6_358, %c3_359, %c0_360, %c0_361] : memref<12x9x8x8xbf16, #tpu.memory_space<vmem>>, vector<1x1x8x8xbf16>
    %398 = vector.shape_cast %397 : vector<1x1x8x8xbf16> to vector<8x8xbf16>
    %399 = arith.truncf %396 : vector<8x384xf32> to vector<8x384xbf16>
    %cst_362 = arith.constant dense<0.000000e+00> : vector<8x384xf32>
    %400 = tpu.matmul %398, %399, %cst_362 {dimension_numbers = #tpu.dot_dimension_numbers<[1], [0], [0], [1], [0, 0, 1, 1], [], []>} : vector<8x8xbf16>, vector<8x384xbf16>, vector<8x384xf32> -> vector<8x384xf32>
    %401 = arith.addf %395, %400 : vector<8x384xf32>
    %c6_363 = arith.constant 6 : index
    %c4_364 = arith.constant 4 : index
    %c0_365 = arith.constant 0 : index
    %c0_366 = arith.constant 0 : index
    %402 = vector.load %arg3[%c6_363, %c4_364, %c0_365, %c0_366] : memref<12x9x8x8xbf16, #tpu.memory_space<vmem>>, vector<1x1x8x8xbf16>
    %403 = vector.shape_cast %402 : vector<1x1x8x8xbf16> to vector<8x8xbf16>
    %404 = arith.truncf %378 : vector<8x384xf32> to vector<8x384xbf16>
    %cst_367 = arith.constant dense<0.000000e+00> : vector<8x384xf32>
    %405 = tpu.matmul %403, %404, %cst_367 {dimension_numbers = #tpu.dot_dimension_numbers<[1], [0], [0], [1], [0, 0, 1, 1], [], []>} : vector<8x8xbf16>, vector<8x384xbf16>, vector<8x384xf32> -> vector<8x384xf32>
    %406 = arith.addf %401, %405 : vector<8x384xf32>
    %c383_i32_368 = arith.constant 383 : i32
    %407 = tpu.dynamic_rotate %378 by %c383_i32_368 dim 1 : vector<8x384xf32>, i32 -> vector<8x384xf32>
    %c6_369 = arith.constant 6 : index
    %c5_370 = arith.constant 5 : index
    %c0_371 = arith.constant 0 : index
    %c0_372 = arith.constant 0 : index
    %408 = vector.load %arg3[%c6_369, %c5_370, %c0_371, %c0_372] : memref<12x9x8x8xbf16, #tpu.memory_space<vmem>>, vector<1x1x8x8xbf16>
    %409 = vector.shape_cast %408 : vector<1x1x8x8xbf16> to vector<8x8xbf16>
    %410 = arith.truncf %407 : vector<8x384xf32> to vector<8x384xbf16>
    %cst_373 = arith.constant dense<0.000000e+00> : vector<8x384xf32>
    %411 = tpu.matmul %409, %410, %cst_373 {dimension_numbers = #tpu.dot_dimension_numbers<[1], [0], [0], [1], [0, 0, 1, 1], [], []>} : vector<8x8xbf16>, vector<8x384xbf16>, vector<8x384xf32> -> vector<8x384xf32>
    %412 = arith.addf %406, %411 : vector<8x384xf32>
    %c367_i32_374 = arith.constant 367 : i32
    %413 = tpu.dynamic_rotate %378 by %c367_i32_374 dim 1 : vector<8x384xf32>, i32 -> vector<8x384xf32>
    %c6_375 = arith.constant 6 : index
    %c6_376 = arith.constant 6 : index
    %c0_377 = arith.constant 0 : index
    %c0_378 = arith.constant 0 : index
    %414 = vector.load %arg3[%c6_375, %c6_376, %c0_377, %c0_378] : memref<12x9x8x8xbf16, #tpu.memory_space<vmem>>, vector<1x1x8x8xbf16>
    %415 = vector.shape_cast %414 : vector<1x1x8x8xbf16> to vector<8x8xbf16>
    %416 = arith.truncf %413 : vector<8x384xf32> to vector<8x384xbf16>
    %cst_379 = arith.constant dense<0.000000e+00> : vector<8x384xf32>
    %417 = tpu.matmul %415, %416, %cst_379 {dimension_numbers = #tpu.dot_dimension_numbers<[1], [0], [0], [1], [0, 0, 1, 1], [], []>} : vector<8x8xbf16>, vector<8x384xbf16>, vector<8x384xf32> -> vector<8x384xf32>
    %418 = arith.addf %412, %417 : vector<8x384xf32>
    %c366_i32_380 = arith.constant 366 : i32
    %419 = tpu.dynamic_rotate %378 by %c366_i32_380 dim 1 : vector<8x384xf32>, i32 -> vector<8x384xf32>
    %c6_381 = arith.constant 6 : index
    %c7_382 = arith.constant 7 : index
    %c0_383 = arith.constant 0 : index
    %c0_384 = arith.constant 0 : index
    %420 = vector.load %arg3[%c6_381, %c7_382, %c0_383, %c0_384] : memref<12x9x8x8xbf16, #tpu.memory_space<vmem>>, vector<1x1x8x8xbf16>
    %421 = vector.shape_cast %420 : vector<1x1x8x8xbf16> to vector<8x8xbf16>
    %422 = arith.truncf %419 : vector<8x384xf32> to vector<8x384xbf16>
    %cst_385 = arith.constant dense<0.000000e+00> : vector<8x384xf32>
    %423 = tpu.matmul %421, %422, %cst_385 {dimension_numbers = #tpu.dot_dimension_numbers<[1], [0], [0], [1], [0, 0, 1, 1], [], []>} : vector<8x8xbf16>, vector<8x384xbf16>, vector<8x384xf32> -> vector<8x384xf32>
    %424 = arith.addf %418, %423 : vector<8x384xf32>
    %c365_i32_386 = arith.constant 365 : i32
    %425 = tpu.dynamic_rotate %378 by %c365_i32_386 dim 1 : vector<8x384xf32>, i32 -> vector<8x384xf32>
    %c6_387 = arith.constant 6 : index
    %c8_388 = arith.constant 8 : index
    %c0_389 = arith.constant 0 : index
    %c0_390 = arith.constant 0 : index
    %426 = vector.load %arg3[%c6_387, %c8_388, %c0_389, %c0_390] : memref<12x9x8x8xbf16, #tpu.memory_space<vmem>>, vector<1x1x8x8xbf16>
    %427 = vector.shape_cast %426 : vector<1x1x8x8xbf16> to vector<8x8xbf16>
    %428 = arith.truncf %425 : vector<8x384xf32> to vector<8x384xbf16>
    %cst_391 = arith.constant dense<0.000000e+00> : vector<8x384xf32>
    %429 = tpu.matmul %427, %428, %cst_391 {dimension_numbers = #tpu.dot_dimension_numbers<[1], [0], [0], [1], [0, 0, 1, 1], [], []>} : vector<8x8xbf16>, vector<8x384xbf16>, vector<8x384xf32> -> vector<8x384xf32>
    %430 = arith.addf %424, %429 : vector<8x384xf32>
    %c6_392 = arith.constant 6 : index
    %c0_393 = arith.constant 0 : index
    %c0_394 = arith.constant 0 : index
    %431 = vector.load %arg4[%c6_392, %c0_393, %c0_394] : memref<12x8x1xf32, #tpu.memory_space<vmem>>, vector<1x8x1xf32>
    %432 = vector.shape_cast %431 : vector<1x8x1xf32> to vector<8x1xf32>
    %433 = vector.broadcast %432 : vector<8x1xf32> to vector<8x384xf32>
    %434 = arith.addf %430, %433 : vector<8x384xf32>
    %435 = arith.mulf %434, %2 : vector<8x384xf32>
    %cst_395 = arith.constant 0.000000e+00 : f32
    %436 = vector.broadcast %cst_395 : f32 to vector<8x384xf32>
    %437 = arith.maximumf %435, %436 : vector<8x384xf32>
    %c19_i32_396 = arith.constant 19 : i32
    %438 = tpu.dynamic_rotate %437 by %c19_i32_396 dim 1 : vector<8x384xf32>, i32 -> vector<8x384xf32>
    %c7_397 = arith.constant 7 : index
    %c0_398 = arith.constant 0 : index
    %c0_399 = arith.constant 0 : index
    %c0_400 = arith.constant 0 : index
    %439 = vector.load %arg3[%c7_397, %c0_398, %c0_399, %c0_400] : memref<12x9x8x8xbf16, #tpu.memory_space<vmem>>, vector<1x1x8x8xbf16>
    %440 = vector.shape_cast %439 : vector<1x1x8x8xbf16> to vector<8x8xbf16>
    %441 = arith.truncf %438 : vector<8x384xf32> to vector<8x384xbf16>
    %cst_401 = arith.constant dense<0.000000e+00> : vector<8x384xf32>
    %442 = tpu.matmul %440, %441, %cst_401 {dimension_numbers = #tpu.dot_dimension_numbers<[1], [0], [0], [1], [0, 0, 1, 1], [], []>} : vector<8x8xbf16>, vector<8x384xbf16>, vector<8x384xf32> -> vector<8x384xf32>
    %c18_i32_402 = arith.constant 18 : i32
    %443 = tpu.dynamic_rotate %437 by %c18_i32_402 dim 1 : vector<8x384xf32>, i32 -> vector<8x384xf32>
    %c7_403 = arith.constant 7 : index
    %c1_404 = arith.constant 1 : index
    %c0_405 = arith.constant 0 : index
    %c0_406 = arith.constant 0 : index
    %444 = vector.load %arg3[%c7_403, %c1_404, %c0_405, %c0_406] : memref<12x9x8x8xbf16, #tpu.memory_space<vmem>>, vector<1x1x8x8xbf16>
    %445 = vector.shape_cast %444 : vector<1x1x8x8xbf16> to vector<8x8xbf16>
    %446 = arith.truncf %443 : vector<8x384xf32> to vector<8x384xbf16>
    %cst_407 = arith.constant dense<0.000000e+00> : vector<8x384xf32>
    %447 = tpu.matmul %445, %446, %cst_407 {dimension_numbers = #tpu.dot_dimension_numbers<[1], [0], [0], [1], [0, 0, 1, 1], [], []>} : vector<8x8xbf16>, vector<8x384xbf16>, vector<8x384xf32> -> vector<8x384xf32>
    %448 = arith.addf %442, %447 : vector<8x384xf32>
    %c17_i32_408 = arith.constant 17 : i32
    %449 = tpu.dynamic_rotate %437 by %c17_i32_408 dim 1 : vector<8x384xf32>, i32 -> vector<8x384xf32>
    %c7_409 = arith.constant 7 : index
    %c2_410 = arith.constant 2 : index
    %c0_411 = arith.constant 0 : index
    %c0_412 = arith.constant 0 : index
    %450 = vector.load %arg3[%c7_409, %c2_410, %c0_411, %c0_412] : memref<12x9x8x8xbf16, #tpu.memory_space<vmem>>, vector<1x1x8x8xbf16>
    %451 = vector.shape_cast %450 : vector<1x1x8x8xbf16> to vector<8x8xbf16>
    %452 = arith.truncf %449 : vector<8x384xf32> to vector<8x384xbf16>
    %cst_413 = arith.constant dense<0.000000e+00> : vector<8x384xf32>
    %453 = tpu.matmul %451, %452, %cst_413 {dimension_numbers = #tpu.dot_dimension_numbers<[1], [0], [0], [1], [0, 0, 1, 1], [], []>} : vector<8x8xbf16>, vector<8x384xbf16>, vector<8x384xf32> -> vector<8x384xf32>
    %454 = arith.addf %448, %453 : vector<8x384xf32>
    %c1_i32_414 = arith.constant 1 : i32
    %455 = tpu.dynamic_rotate %437 by %c1_i32_414 dim 1 : vector<8x384xf32>, i32 -> vector<8x384xf32>
    %c7_415 = arith.constant 7 : index
    %c3_416 = arith.constant 3 : index
    %c0_417 = arith.constant 0 : index
    %c0_418 = arith.constant 0 : index
    %456 = vector.load %arg3[%c7_415, %c3_416, %c0_417, %c0_418] : memref<12x9x8x8xbf16, #tpu.memory_space<vmem>>, vector<1x1x8x8xbf16>
    %457 = vector.shape_cast %456 : vector<1x1x8x8xbf16> to vector<8x8xbf16>
    %458 = arith.truncf %455 : vector<8x384xf32> to vector<8x384xbf16>
    %cst_419 = arith.constant dense<0.000000e+00> : vector<8x384xf32>
    %459 = tpu.matmul %457, %458, %cst_419 {dimension_numbers = #tpu.dot_dimension_numbers<[1], [0], [0], [1], [0, 0, 1, 1], [], []>} : vector<8x8xbf16>, vector<8x384xbf16>, vector<8x384xf32> -> vector<8x384xf32>
    %460 = arith.addf %454, %459 : vector<8x384xf32>
    %c7_420 = arith.constant 7 : index
    %c4_421 = arith.constant 4 : index
    %c0_422 = arith.constant 0 : index
    %c0_423 = arith.constant 0 : index
    %461 = vector.load %arg3[%c7_420, %c4_421, %c0_422, %c0_423] : memref<12x9x8x8xbf16, #tpu.memory_space<vmem>>, vector<1x1x8x8xbf16>
    %462 = vector.shape_cast %461 : vector<1x1x8x8xbf16> to vector<8x8xbf16>
    %463 = arith.truncf %437 : vector<8x384xf32> to vector<8x384xbf16>
    %cst_424 = arith.constant dense<0.000000e+00> : vector<8x384xf32>
    %464 = tpu.matmul %462, %463, %cst_424 {dimension_numbers = #tpu.dot_dimension_numbers<[1], [0], [0], [1], [0, 0, 1, 1], [], []>} : vector<8x8xbf16>, vector<8x384xbf16>, vector<8x384xf32> -> vector<8x384xf32>
    %465 = arith.addf %460, %464 : vector<8x384xf32>
    %c383_i32_425 = arith.constant 383 : i32
    %466 = tpu.dynamic_rotate %437 by %c383_i32_425 dim 1 : vector<8x384xf32>, i32 -> vector<8x384xf32>
    %c7_426 = arith.constant 7 : index
    %c5_427 = arith.constant 5 : index
    %c0_428 = arith.constant 0 : index
    %c0_429 = arith.constant 0 : index
    %467 = vector.load %arg3[%c7_426, %c5_427, %c0_428, %c0_429] : memref<12x9x8x8xbf16, #tpu.memory_space<vmem>>, vector<1x1x8x8xbf16>
    %468 = vector.shape_cast %467 : vector<1x1x8x8xbf16> to vector<8x8xbf16>
    %469 = arith.truncf %466 : vector<8x384xf32> to vector<8x384xbf16>
    %cst_430 = arith.constant dense<0.000000e+00> : vector<8x384xf32>
    %470 = tpu.matmul %468, %469, %cst_430 {dimension_numbers = #tpu.dot_dimension_numbers<[1], [0], [0], [1], [0, 0, 1, 1], [], []>} : vector<8x8xbf16>, vector<8x384xbf16>, vector<8x384xf32> -> vector<8x384xf32>
    %471 = arith.addf %465, %470 : vector<8x384xf32>
    %c367_i32_431 = arith.constant 367 : i32
    %472 = tpu.dynamic_rotate %437 by %c367_i32_431 dim 1 : vector<8x384xf32>, i32 -> vector<8x384xf32>
    %c7_432 = arith.constant 7 : index
    %c6_433 = arith.constant 6 : index
    %c0_434 = arith.constant 0 : index
    %c0_435 = arith.constant 0 : index
    %473 = vector.load %arg3[%c7_432, %c6_433, %c0_434, %c0_435] : memref<12x9x8x8xbf16, #tpu.memory_space<vmem>>, vector<1x1x8x8xbf16>
    %474 = vector.shape_cast %473 : vector<1x1x8x8xbf16> to vector<8x8xbf16>
    %475 = arith.truncf %472 : vector<8x384xf32> to vector<8x384xbf16>
    %cst_436 = arith.constant dense<0.000000e+00> : vector<8x384xf32>
    %476 = tpu.matmul %474, %475, %cst_436 {dimension_numbers = #tpu.dot_dimension_numbers<[1], [0], [0], [1], [0, 0, 1, 1], [], []>} : vector<8x8xbf16>, vector<8x384xbf16>, vector<8x384xf32> -> vector<8x384xf32>
    %477 = arith.addf %471, %476 : vector<8x384xf32>
    %c366_i32_437 = arith.constant 366 : i32
    %478 = tpu.dynamic_rotate %437 by %c366_i32_437 dim 1 : vector<8x384xf32>, i32 -> vector<8x384xf32>
    %c7_438 = arith.constant 7 : index
    %c7_439 = arith.constant 7 : index
    %c0_440 = arith.constant 0 : index
    %c0_441 = arith.constant 0 : index
    %479 = vector.load %arg3[%c7_438, %c7_439, %c0_440, %c0_441] : memref<12x9x8x8xbf16, #tpu.memory_space<vmem>>, vector<1x1x8x8xbf16>
    %480 = vector.shape_cast %479 : vector<1x1x8x8xbf16> to vector<8x8xbf16>
    %481 = arith.truncf %478 : vector<8x384xf32> to vector<8x384xbf16>
    %cst_442 = arith.constant dense<0.000000e+00> : vector<8x384xf32>
    %482 = tpu.matmul %480, %481, %cst_442 {dimension_numbers = #tpu.dot_dimension_numbers<[1], [0], [0], [1], [0, 0, 1, 1], [], []>} : vector<8x8xbf16>, vector<8x384xbf16>, vector<8x384xf32> -> vector<8x384xf32>
    %483 = arith.addf %477, %482 : vector<8x384xf32>
    %c365_i32_443 = arith.constant 365 : i32
    %484 = tpu.dynamic_rotate %437 by %c365_i32_443 dim 1 : vector<8x384xf32>, i32 -> vector<8x384xf32>
    %c7_444 = arith.constant 7 : index
    %c8_445 = arith.constant 8 : index
    %c0_446 = arith.constant 0 : index
    %c0_447 = arith.constant 0 : index
    %485 = vector.load %arg3[%c7_444, %c8_445, %c0_446, %c0_447] : memref<12x9x8x8xbf16, #tpu.memory_space<vmem>>, vector<1x1x8x8xbf16>
    %486 = vector.shape_cast %485 : vector<1x1x8x8xbf16> to vector<8x8xbf16>
    %487 = arith.truncf %484 : vector<8x384xf32> to vector<8x384xbf16>
    %cst_448 = arith.constant dense<0.000000e+00> : vector<8x384xf32>
    %488 = tpu.matmul %486, %487, %cst_448 {dimension_numbers = #tpu.dot_dimension_numbers<[1], [0], [0], [1], [0, 0, 1, 1], [], []>} : vector<8x8xbf16>, vector<8x384xbf16>, vector<8x384xf32> -> vector<8x384xf32>
    %489 = arith.addf %483, %488 : vector<8x384xf32>
    %c7_449 = arith.constant 7 : index
    %c0_450 = arith.constant 0 : index
    %c0_451 = arith.constant 0 : index
    %490 = vector.load %arg4[%c7_449, %c0_450, %c0_451] : memref<12x8x1xf32, #tpu.memory_space<vmem>>, vector<1x8x1xf32>
    %491 = vector.shape_cast %490 : vector<1x8x1xf32> to vector<8x1xf32>
    %492 = vector.broadcast %491 : vector<8x1xf32> to vector<8x384xf32>
    %493 = arith.addf %489, %492 : vector<8x384xf32>
    %494 = arith.mulf %493, %2 : vector<8x384xf32>
    %c0_452 = arith.constant 0 : index
    %c0_453 = arith.constant 0 : index
    %495 = vector.load %arg7[%c0_452, %c0_453] : memref<8x384xf32, #tpu.memory_space<vmem>>, vector<8x384xf32>
    %496 = arith.addf %494, %495 : vector<8x384xf32>
    %cst_454 = arith.constant 0.000000e+00 : f32
    %497 = vector.broadcast %cst_454 : f32 to vector<8x384xf32>
    %498 = arith.maximumf %496, %497 : vector<8x384xf32>
    %c19_i32_455 = arith.constant 19 : i32
    %499 = tpu.dynamic_rotate %498 by %c19_i32_455 dim 1 : vector<8x384xf32>, i32 -> vector<8x384xf32>
    %c8_456 = arith.constant 8 : index
    %c0_457 = arith.constant 0 : index
    %c0_458 = arith.constant 0 : index
    %c0_459 = arith.constant 0 : index
    %500 = vector.load %arg3[%c8_456, %c0_457, %c0_458, %c0_459] : memref<12x9x8x8xbf16, #tpu.memory_space<vmem>>, vector<1x1x8x8xbf16>
    %501 = vector.shape_cast %500 : vector<1x1x8x8xbf16> to vector<8x8xbf16>
    %502 = arith.truncf %499 : vector<8x384xf32> to vector<8x384xbf16>
    %cst_460 = arith.constant dense<0.000000e+00> : vector<8x384xf32>
    %503 = tpu.matmul %501, %502, %cst_460 {dimension_numbers = #tpu.dot_dimension_numbers<[1], [0], [0], [1], [0, 0, 1, 1], [], []>} : vector<8x8xbf16>, vector<8x384xbf16>, vector<8x384xf32> -> vector<8x384xf32>
    %c18_i32_461 = arith.constant 18 : i32
    %504 = tpu.dynamic_rotate %498 by %c18_i32_461 dim 1 : vector<8x384xf32>, i32 -> vector<8x384xf32>
    %c8_462 = arith.constant 8 : index
    %c1_463 = arith.constant 1 : index
    %c0_464 = arith.constant 0 : index
    %c0_465 = arith.constant 0 : index
    %505 = vector.load %arg3[%c8_462, %c1_463, %c0_464, %c0_465] : memref<12x9x8x8xbf16, #tpu.memory_space<vmem>>, vector<1x1x8x8xbf16>
    %506 = vector.shape_cast %505 : vector<1x1x8x8xbf16> to vector<8x8xbf16>
    %507 = arith.truncf %504 : vector<8x384xf32> to vector<8x384xbf16>
    %cst_466 = arith.constant dense<0.000000e+00> : vector<8x384xf32>
    %508 = tpu.matmul %506, %507, %cst_466 {dimension_numbers = #tpu.dot_dimension_numbers<[1], [0], [0], [1], [0, 0, 1, 1], [], []>} : vector<8x8xbf16>, vector<8x384xbf16>, vector<8x384xf32> -> vector<8x384xf32>
    %509 = arith.addf %503, %508 : vector<8x384xf32>
    %c17_i32_467 = arith.constant 17 : i32
    %510 = tpu.dynamic_rotate %498 by %c17_i32_467 dim 1 : vector<8x384xf32>, i32 -> vector<8x384xf32>
    %c8_468 = arith.constant 8 : index
    %c2_469 = arith.constant 2 : index
    %c0_470 = arith.constant 0 : index
    %c0_471 = arith.constant 0 : index
    %511 = vector.load %arg3[%c8_468, %c2_469, %c0_470, %c0_471] : memref<12x9x8x8xbf16, #tpu.memory_space<vmem>>, vector<1x1x8x8xbf16>
    %512 = vector.shape_cast %511 : vector<1x1x8x8xbf16> to vector<8x8xbf16>
    %513 = arith.truncf %510 : vector<8x384xf32> to vector<8x384xbf16>
    %cst_472 = arith.constant dense<0.000000e+00> : vector<8x384xf32>
    %514 = tpu.matmul %512, %513, %cst_472 {dimension_numbers = #tpu.dot_dimension_numbers<[1], [0], [0], [1], [0, 0, 1, 1], [], []>} : vector<8x8xbf16>, vector<8x384xbf16>, vector<8x384xf32> -> vector<8x384xf32>
    %515 = arith.addf %509, %514 : vector<8x384xf32>
    %c1_i32_473 = arith.constant 1 : i32
    %516 = tpu.dynamic_rotate %498 by %c1_i32_473 dim 1 : vector<8x384xf32>, i32 -> vector<8x384xf32>
    %c8_474 = arith.constant 8 : index
    %c3_475 = arith.constant 3 : index
    %c0_476 = arith.constant 0 : index
    %c0_477 = arith.constant 0 : index
    %517 = vector.load %arg3[%c8_474, %c3_475, %c0_476, %c0_477] : memref<12x9x8x8xbf16, #tpu.memory_space<vmem>>, vector<1x1x8x8xbf16>
    %518 = vector.shape_cast %517 : vector<1x1x8x8xbf16> to vector<8x8xbf16>
    %519 = arith.truncf %516 : vector<8x384xf32> to vector<8x384xbf16>
    %cst_478 = arith.constant dense<0.000000e+00> : vector<8x384xf32>
    %520 = tpu.matmul %518, %519, %cst_478 {dimension_numbers = #tpu.dot_dimension_numbers<[1], [0], [0], [1], [0, 0, 1, 1], [], []>} : vector<8x8xbf16>, vector<8x384xbf16>, vector<8x384xf32> -> vector<8x384xf32>
    %521 = arith.addf %515, %520 : vector<8x384xf32>
    %c8_479 = arith.constant 8 : index
    %c4_480 = arith.constant 4 : index
    %c0_481 = arith.constant 0 : index
    %c0_482 = arith.constant 0 : index
    %522 = vector.load %arg3[%c8_479, %c4_480, %c0_481, %c0_482] : memref<12x9x8x8xbf16, #tpu.memory_space<vmem>>, vector<1x1x8x8xbf16>
    %523 = vector.shape_cast %522 : vector<1x1x8x8xbf16> to vector<8x8xbf16>
    %524 = arith.truncf %498 : vector<8x384xf32> to vector<8x384xbf16>
    %cst_483 = arith.constant dense<0.000000e+00> : vector<8x384xf32>
    %525 = tpu.matmul %523, %524, %cst_483 {dimension_numbers = #tpu.dot_dimension_numbers<[1], [0], [0], [1], [0, 0, 1, 1], [], []>} : vector<8x8xbf16>, vector<8x384xbf16>, vector<8x384xf32> -> vector<8x384xf32>
    %526 = arith.addf %521, %525 : vector<8x384xf32>
    %c383_i32_484 = arith.constant 383 : i32
    %527 = tpu.dynamic_rotate %498 by %c383_i32_484 dim 1 : vector<8x384xf32>, i32 -> vector<8x384xf32>
    %c8_485 = arith.constant 8 : index
    %c5_486 = arith.constant 5 : index
    %c0_487 = arith.constant 0 : index
    %c0_488 = arith.constant 0 : index
    %528 = vector.load %arg3[%c8_485, %c5_486, %c0_487, %c0_488] : memref<12x9x8x8xbf16, #tpu.memory_space<vmem>>, vector<1x1x8x8xbf16>
    %529 = vector.shape_cast %528 : vector<1x1x8x8xbf16> to vector<8x8xbf16>
    %530 = arith.truncf %527 : vector<8x384xf32> to vector<8x384xbf16>
    %cst_489 = arith.constant dense<0.000000e+00> : vector<8x384xf32>
    %531 = tpu.matmul %529, %530, %cst_489 {dimension_numbers = #tpu.dot_dimension_numbers<[1], [0], [0], [1], [0, 0, 1, 1], [], []>} : vector<8x8xbf16>, vector<8x384xbf16>, vector<8x384xf32> -> vector<8x384xf32>
    %532 = arith.addf %526, %531 : vector<8x384xf32>
    %c367_i32_490 = arith.constant 367 : i32
    %533 = tpu.dynamic_rotate %498 by %c367_i32_490 dim 1 : vector<8x384xf32>, i32 -> vector<8x384xf32>
    %c8_491 = arith.constant 8 : index
    %c6_492 = arith.constant 6 : index
    %c0_493 = arith.constant 0 : index
    %c0_494 = arith.constant 0 : index
    %534 = vector.load %arg3[%c8_491, %c6_492, %c0_493, %c0_494] : memref<12x9x8x8xbf16, #tpu.memory_space<vmem>>, vector<1x1x8x8xbf16>
    %535 = vector.shape_cast %534 : vector<1x1x8x8xbf16> to vector<8x8xbf16>
    %536 = arith.truncf %533 : vector<8x384xf32> to vector<8x384xbf16>
    %cst_495 = arith.constant dense<0.000000e+00> : vector<8x384xf32>
    %537 = tpu.matmul %535, %536, %cst_495 {dimension_numbers = #tpu.dot_dimension_numbers<[1], [0], [0], [1], [0, 0, 1, 1], [], []>} : vector<8x8xbf16>, vector<8x384xbf16>, vector<8x384xf32> -> vector<8x384xf32>
    %538 = arith.addf %532, %537 : vector<8x384xf32>
    %c366_i32_496 = arith.constant 366 : i32
    %539 = tpu.dynamic_rotate %498 by %c366_i32_496 dim 1 : vector<8x384xf32>, i32 -> vector<8x384xf32>
    %c8_497 = arith.constant 8 : index
    %c7_498 = arith.constant 7 : index
    %c0_499 = arith.constant 0 : index
    %c0_500 = arith.constant 0 : index
    %540 = vector.load %arg3[%c8_497, %c7_498, %c0_499, %c0_500] : memref<12x9x8x8xbf16, #tpu.memory_space<vmem>>, vector<1x1x8x8xbf16>
    %541 = vector.shape_cast %540 : vector<1x1x8x8xbf16> to vector<8x8xbf16>
    %542 = arith.truncf %539 : vector<8x384xf32> to vector<8x384xbf16>
    %cst_501 = arith.constant dense<0.000000e+00> : vector<8x384xf32>
    %543 = tpu.matmul %541, %542, %cst_501 {dimension_numbers = #tpu.dot_dimension_numbers<[1], [0], [0], [1], [0, 0, 1, 1], [], []>} : vector<8x8xbf16>, vector<8x384xbf16>, vector<8x384xf32> -> vector<8x384xf32>
    %544 = arith.addf %538, %543 : vector<8x384xf32>
    %c365_i32_502 = arith.constant 365 : i32
    %545 = tpu.dynamic_rotate %498 by %c365_i32_502 dim 1 : vector<8x384xf32>, i32 -> vector<8x384xf32>
    %c8_503 = arith.constant 8 : index
    %c8_504 = arith.constant 8 : index
    %c0_505 = arith.constant 0 : index
    %c0_506 = arith.constant 0 : index
    %546 = vector.load %arg3[%c8_503, %c8_504, %c0_505, %c0_506] : memref<12x9x8x8xbf16, #tpu.memory_space<vmem>>, vector<1x1x8x8xbf16>
    %547 = vector.shape_cast %546 : vector<1x1x8x8xbf16> to vector<8x8xbf16>
    %548 = arith.truncf %545 : vector<8x384xf32> to vector<8x384xbf16>
    %cst_507 = arith.constant dense<0.000000e+00> : vector<8x384xf32>
    %549 = tpu.matmul %547, %548, %cst_507 {dimension_numbers = #tpu.dot_dimension_numbers<[1], [0], [0], [1], [0, 0, 1, 1], [], []>} : vector<8x8xbf16>, vector<8x384xbf16>, vector<8x384xf32> -> vector<8x384xf32>
    %550 = arith.addf %544, %549 : vector<8x384xf32>
    %c8_508 = arith.constant 8 : index
    %c0_509 = arith.constant 0 : index
    %c0_510 = arith.constant 0 : index
    %551 = vector.load %arg4[%c8_508, %c0_509, %c0_510] : memref<12x8x1xf32, #tpu.memory_space<vmem>>, vector<1x8x1xf32>
    %552 = vector.shape_cast %551 : vector<1x8x1xf32> to vector<8x1xf32>
    %553 = vector.broadcast %552 : vector<8x1xf32> to vector<8x384xf32>
    %554 = arith.addf %550, %553 : vector<8x384xf32>
    %555 = arith.mulf %554, %2 : vector<8x384xf32>
    %cst_511 = arith.constant 0.000000e+00 : f32
    %556 = vector.broadcast %cst_511 : f32 to vector<8x384xf32>
    %557 = arith.maximumf %555, %556 : vector<8x384xf32>
    %c19_i32_512 = arith.constant 19 : i32
    %558 = tpu.dynamic_rotate %557 by %c19_i32_512 dim 1 : vector<8x384xf32>, i32 -> vector<8x384xf32>
    %c9 = arith.constant 9 : index
    %c0_513 = arith.constant 0 : index
    %c0_514 = arith.constant 0 : index
    %c0_515 = arith.constant 0 : index
    %559 = vector.load %arg3[%c9, %c0_513, %c0_514, %c0_515] : memref<12x9x8x8xbf16, #tpu.memory_space<vmem>>, vector<1x1x8x8xbf16>
    %560 = vector.shape_cast %559 : vector<1x1x8x8xbf16> to vector<8x8xbf16>
    %561 = arith.truncf %558 : vector<8x384xf32> to vector<8x384xbf16>
    %cst_516 = arith.constant dense<0.000000e+00> : vector<8x384xf32>
    %562 = tpu.matmul %560, %561, %cst_516 {dimension_numbers = #tpu.dot_dimension_numbers<[1], [0], [0], [1], [0, 0, 1, 1], [], []>} : vector<8x8xbf16>, vector<8x384xbf16>, vector<8x384xf32> -> vector<8x384xf32>
    %c18_i32_517 = arith.constant 18 : i32
    %563 = tpu.dynamic_rotate %557 by %c18_i32_517 dim 1 : vector<8x384xf32>, i32 -> vector<8x384xf32>
    %c9_518 = arith.constant 9 : index
    %c1_519 = arith.constant 1 : index
    %c0_520 = arith.constant 0 : index
    %c0_521 = arith.constant 0 : index
    %564 = vector.load %arg3[%c9_518, %c1_519, %c0_520, %c0_521] : memref<12x9x8x8xbf16, #tpu.memory_space<vmem>>, vector<1x1x8x8xbf16>
    %565 = vector.shape_cast %564 : vector<1x1x8x8xbf16> to vector<8x8xbf16>
    %566 = arith.truncf %563 : vector<8x384xf32> to vector<8x384xbf16>
    %cst_522 = arith.constant dense<0.000000e+00> : vector<8x384xf32>
    %567 = tpu.matmul %565, %566, %cst_522 {dimension_numbers = #tpu.dot_dimension_numbers<[1], [0], [0], [1], [0, 0, 1, 1], [], []>} : vector<8x8xbf16>, vector<8x384xbf16>, vector<8x384xf32> -> vector<8x384xf32>
    %568 = arith.addf %562, %567 : vector<8x384xf32>
    %c17_i32_523 = arith.constant 17 : i32
    %569 = tpu.dynamic_rotate %557 by %c17_i32_523 dim 1 : vector<8x384xf32>, i32 -> vector<8x384xf32>
    %c9_524 = arith.constant 9 : index
    %c2_525 = arith.constant 2 : index
    %c0_526 = arith.constant 0 : index
    %c0_527 = arith.constant 0 : index
    %570 = vector.load %arg3[%c9_524, %c2_525, %c0_526, %c0_527] : memref<12x9x8x8xbf16, #tpu.memory_space<vmem>>, vector<1x1x8x8xbf16>
    %571 = vector.shape_cast %570 : vector<1x1x8x8xbf16> to vector<8x8xbf16>
    %572 = arith.truncf %569 : vector<8x384xf32> to vector<8x384xbf16>
    %cst_528 = arith.constant dense<0.000000e+00> : vector<8x384xf32>
    %573 = tpu.matmul %571, %572, %cst_528 {dimension_numbers = #tpu.dot_dimension_numbers<[1], [0], [0], [1], [0, 0, 1, 1], [], []>} : vector<8x8xbf16>, vector<8x384xbf16>, vector<8x384xf32> -> vector<8x384xf32>
    %574 = arith.addf %568, %573 : vector<8x384xf32>
    %c1_i32_529 = arith.constant 1 : i32
    %575 = tpu.dynamic_rotate %557 by %c1_i32_529 dim 1 : vector<8x384xf32>, i32 -> vector<8x384xf32>
    %c9_530 = arith.constant 9 : index
    %c3_531 = arith.constant 3 : index
    %c0_532 = arith.constant 0 : index
    %c0_533 = arith.constant 0 : index
    %576 = vector.load %arg3[%c9_530, %c3_531, %c0_532, %c0_533] : memref<12x9x8x8xbf16, #tpu.memory_space<vmem>>, vector<1x1x8x8xbf16>
    %577 = vector.shape_cast %576 : vector<1x1x8x8xbf16> to vector<8x8xbf16>
    %578 = arith.truncf %575 : vector<8x384xf32> to vector<8x384xbf16>
    %cst_534 = arith.constant dense<0.000000e+00> : vector<8x384xf32>
    %579 = tpu.matmul %577, %578, %cst_534 {dimension_numbers = #tpu.dot_dimension_numbers<[1], [0], [0], [1], [0, 0, 1, 1], [], []>} : vector<8x8xbf16>, vector<8x384xbf16>, vector<8x384xf32> -> vector<8x384xf32>
    %580 = arith.addf %574, %579 : vector<8x384xf32>
    %c9_535 = arith.constant 9 : index
    %c4_536 = arith.constant 4 : index
    %c0_537 = arith.constant 0 : index
    %c0_538 = arith.constant 0 : index
    %581 = vector.load %arg3[%c9_535, %c4_536, %c0_537, %c0_538] : memref<12x9x8x8xbf16, #tpu.memory_space<vmem>>, vector<1x1x8x8xbf16>
    %582 = vector.shape_cast %581 : vector<1x1x8x8xbf16> to vector<8x8xbf16>
    %583 = arith.truncf %557 : vector<8x384xf32> to vector<8x384xbf16>
    %cst_539 = arith.constant dense<0.000000e+00> : vector<8x384xf32>
    %584 = tpu.matmul %582, %583, %cst_539 {dimension_numbers = #tpu.dot_dimension_numbers<[1], [0], [0], [1], [0, 0, 1, 1], [], []>} : vector<8x8xbf16>, vector<8x384xbf16>, vector<8x384xf32> -> vector<8x384xf32>
    %585 = arith.addf %580, %584 : vector<8x384xf32>
    %c383_i32_540 = arith.constant 383 : i32
    %586 = tpu.dynamic_rotate %557 by %c383_i32_540 dim 1 : vector<8x384xf32>, i32 -> vector<8x384xf32>
    %c9_541 = arith.constant 9 : index
    %c5_542 = arith.constant 5 : index
    %c0_543 = arith.constant 0 : index
    %c0_544 = arith.constant 0 : index
    %587 = vector.load %arg3[%c9_541, %c5_542, %c0_543, %c0_544] : memref<12x9x8x8xbf16, #tpu.memory_space<vmem>>, vector<1x1x8x8xbf16>
    %588 = vector.shape_cast %587 : vector<1x1x8x8xbf16> to vector<8x8xbf16>
    %589 = arith.truncf %586 : vector<8x384xf32> to vector<8x384xbf16>
    %cst_545 = arith.constant dense<0.000000e+00> : vector<8x384xf32>
    %590 = tpu.matmul %588, %589, %cst_545 {dimension_numbers = #tpu.dot_dimension_numbers<[1], [0], [0], [1], [0, 0, 1, 1], [], []>} : vector<8x8xbf16>, vector<8x384xbf16>, vector<8x384xf32> -> vector<8x384xf32>
    %591 = arith.addf %585, %590 : vector<8x384xf32>
    %c367_i32_546 = arith.constant 367 : i32
    %592 = tpu.dynamic_rotate %557 by %c367_i32_546 dim 1 : vector<8x384xf32>, i32 -> vector<8x384xf32>
    %c9_547 = arith.constant 9 : index
    %c6_548 = arith.constant 6 : index
    %c0_549 = arith.constant 0 : index
    %c0_550 = arith.constant 0 : index
    %593 = vector.load %arg3[%c9_547, %c6_548, %c0_549, %c0_550] : memref<12x9x8x8xbf16, #tpu.memory_space<vmem>>, vector<1x1x8x8xbf16>
    %594 = vector.shape_cast %593 : vector<1x1x8x8xbf16> to vector<8x8xbf16>
    %595 = arith.truncf %592 : vector<8x384xf32> to vector<8x384xbf16>
    %cst_551 = arith.constant dense<0.000000e+00> : vector<8x384xf32>
    %596 = tpu.matmul %594, %595, %cst_551 {dimension_numbers = #tpu.dot_dimension_numbers<[1], [0], [0], [1], [0, 0, 1, 1], [], []>} : vector<8x8xbf16>, vector<8x384xbf16>, vector<8x384xf32> -> vector<8x384xf32>
    %597 = arith.addf %591, %596 : vector<8x384xf32>
    %c366_i32_552 = arith.constant 366 : i32
    %598 = tpu.dynamic_rotate %557 by %c366_i32_552 dim 1 : vector<8x384xf32>, i32 -> vector<8x384xf32>
    %c9_553 = arith.constant 9 : index
    %c7_554 = arith.constant 7 : index
    %c0_555 = arith.constant 0 : index
    %c0_556 = arith.constant 0 : index
    %599 = vector.load %arg3[%c9_553, %c7_554, %c0_555, %c0_556] : memref<12x9x8x8xbf16, #tpu.memory_space<vmem>>, vector<1x1x8x8xbf16>
    %600 = vector.shape_cast %599 : vector<1x1x8x8xbf16> to vector<8x8xbf16>
    %601 = arith.truncf %598 : vector<8x384xf32> to vector<8x384xbf16>
    %cst_557 = arith.constant dense<0.000000e+00> : vector<8x384xf32>
    %602 = tpu.matmul %600, %601, %cst_557 {dimension_numbers = #tpu.dot_dimension_numbers<[1], [0], [0], [1], [0, 0, 1, 1], [], []>} : vector<8x8xbf16>, vector<8x384xbf16>, vector<8x384xf32> -> vector<8x384xf32>
    %603 = arith.addf %597, %602 : vector<8x384xf32>
    %c365_i32_558 = arith.constant 365 : i32
    %604 = tpu.dynamic_rotate %557 by %c365_i32_558 dim 1 : vector<8x384xf32>, i32 -> vector<8x384xf32>
    %c9_559 = arith.constant 9 : index
    %c8_560 = arith.constant 8 : index
    %c0_561 = arith.constant 0 : index
    %c0_562 = arith.constant 0 : index
    %605 = vector.load %arg3[%c9_559, %c8_560, %c0_561, %c0_562] : memref<12x9x8x8xbf16, #tpu.memory_space<vmem>>, vector<1x1x8x8xbf16>
    %606 = vector.shape_cast %605 : vector<1x1x8x8xbf16> to vector<8x8xbf16>
    %607 = arith.truncf %604 : vector<8x384xf32> to vector<8x384xbf16>
    %cst_563 = arith.constant dense<0.000000e+00> : vector<8x384xf32>
    %608 = tpu.matmul %606, %607, %cst_563 {dimension_numbers = #tpu.dot_dimension_numbers<[1], [0], [0], [1], [0, 0, 1, 1], [], []>} : vector<8x8xbf16>, vector<8x384xbf16>, vector<8x384xf32> -> vector<8x384xf32>
    %609 = arith.addf %603, %608 : vector<8x384xf32>
    %c9_564 = arith.constant 9 : index
    %c0_565 = arith.constant 0 : index
    %c0_566 = arith.constant 0 : index
    %610 = vector.load %arg4[%c9_564, %c0_565, %c0_566] : memref<12x8x1xf32, #tpu.memory_space<vmem>>, vector<1x8x1xf32>
    %611 = vector.shape_cast %610 : vector<1x8x1xf32> to vector<8x1xf32>
    %612 = vector.broadcast %611 : vector<8x1xf32> to vector<8x384xf32>
    %613 = arith.addf %609, %612 : vector<8x384xf32>
    %614 = arith.mulf %613, %2 : vector<8x384xf32>
    %c0_567 = arith.constant 0 : index
    %c0_568 = arith.constant 0 : index
    %615 = vector.load %arg6[%c0_567, %c0_568] : memref<8x384xf32, #tpu.memory_space<vmem>>, vector<8x384xf32>
    %616 = arith.addf %614, %615 : vector<8x384xf32>
    %cst_569 = arith.constant 0.000000e+00 : f32
    %617 = vector.broadcast %cst_569 : f32 to vector<8x384xf32>
    %618 = arith.maximumf %616, %617 : vector<8x384xf32>
    %c19_i32_570 = arith.constant 19 : i32
    %619 = tpu.dynamic_rotate %618 by %c19_i32_570 dim 1 : vector<8x384xf32>, i32 -> vector<8x384xf32>
    %c10 = arith.constant 10 : index
    %c0_571 = arith.constant 0 : index
    %c0_572 = arith.constant 0 : index
    %c0_573 = arith.constant 0 : index
    %620 = vector.load %arg3[%c10, %c0_571, %c0_572, %c0_573] : memref<12x9x8x8xbf16, #tpu.memory_space<vmem>>, vector<1x1x8x8xbf16>
    %621 = vector.shape_cast %620 : vector<1x1x8x8xbf16> to vector<8x8xbf16>
    %622 = arith.truncf %619 : vector<8x384xf32> to vector<8x384xbf16>
    %cst_574 = arith.constant dense<0.000000e+00> : vector<8x384xf32>
    %623 = tpu.matmul %621, %622, %cst_574 {dimension_numbers = #tpu.dot_dimension_numbers<[1], [0], [0], [1], [0, 0, 1, 1], [], []>} : vector<8x8xbf16>, vector<8x384xbf16>, vector<8x384xf32> -> vector<8x384xf32>
    %c18_i32_575 = arith.constant 18 : i32
    %624 = tpu.dynamic_rotate %618 by %c18_i32_575 dim 1 : vector<8x384xf32>, i32 -> vector<8x384xf32>
    %c10_576 = arith.constant 10 : index
    %c1_577 = arith.constant 1 : index
    %c0_578 = arith.constant 0 : index
    %c0_579 = arith.constant 0 : index
    %625 = vector.load %arg3[%c10_576, %c1_577, %c0_578, %c0_579] : memref<12x9x8x8xbf16, #tpu.memory_space<vmem>>, vector<1x1x8x8xbf16>
    %626 = vector.shape_cast %625 : vector<1x1x8x8xbf16> to vector<8x8xbf16>
    %627 = arith.truncf %624 : vector<8x384xf32> to vector<8x384xbf16>
    %cst_580 = arith.constant dense<0.000000e+00> : vector<8x384xf32>
    %628 = tpu.matmul %626, %627, %cst_580 {dimension_numbers = #tpu.dot_dimension_numbers<[1], [0], [0], [1], [0, 0, 1, 1], [], []>} : vector<8x8xbf16>, vector<8x384xbf16>, vector<8x384xf32> -> vector<8x384xf32>
    %629 = arith.addf %623, %628 : vector<8x384xf32>
    %c17_i32_581 = arith.constant 17 : i32
    %630 = tpu.dynamic_rotate %618 by %c17_i32_581 dim 1 : vector<8x384xf32>, i32 -> vector<8x384xf32>
    %c10_582 = arith.constant 10 : index
    %c2_583 = arith.constant 2 : index
    %c0_584 = arith.constant 0 : index
    %c0_585 = arith.constant 0 : index
    %631 = vector.load %arg3[%c10_582, %c2_583, %c0_584, %c0_585] : memref<12x9x8x8xbf16, #tpu.memory_space<vmem>>, vector<1x1x8x8xbf16>
    %632 = vector.shape_cast %631 : vector<1x1x8x8xbf16> to vector<8x8xbf16>
    %633 = arith.truncf %630 : vector<8x384xf32> to vector<8x384xbf16>
    %cst_586 = arith.constant dense<0.000000e+00> : vector<8x384xf32>
    %634 = tpu.matmul %632, %633, %cst_586 {dimension_numbers = #tpu.dot_dimension_numbers<[1], [0], [0], [1], [0, 0, 1, 1], [], []>} : vector<8x8xbf16>, vector<8x384xbf16>, vector<8x384xf32> -> vector<8x384xf32>
    %635 = arith.addf %629, %634 : vector<8x384xf32>
    %c1_i32_587 = arith.constant 1 : i32
    %636 = tpu.dynamic_rotate %618 by %c1_i32_587 dim 1 : vector<8x384xf32>, i32 -> vector<8x384xf32>
    %c10_588 = arith.constant 10 : index
    %c3_589 = arith.constant 3 : index
    %c0_590 = arith.constant 0 : index
    %c0_591 = arith.constant 0 : index
    %637 = vector.load %arg3[%c10_588, %c3_589, %c0_590, %c0_591] : memref<12x9x8x8xbf16, #tpu.memory_space<vmem>>, vector<1x1x8x8xbf16>
    %638 = vector.shape_cast %637 : vector<1x1x8x8xbf16> to vector<8x8xbf16>
    %639 = arith.truncf %636 : vector<8x384xf32> to vector<8x384xbf16>
    %cst_592 = arith.constant dense<0.000000e+00> : vector<8x384xf32>
    %640 = tpu.matmul %638, %639, %cst_592 {dimension_numbers = #tpu.dot_dimension_numbers<[1], [0], [0], [1], [0, 0, 1, 1], [], []>} : vector<8x8xbf16>, vector<8x384xbf16>, vector<8x384xf32> -> vector<8x384xf32>
    %641 = arith.addf %635, %640 : vector<8x384xf32>
    %c10_593 = arith.constant 10 : index
    %c4_594 = arith.constant 4 : index
    %c0_595 = arith.constant 0 : index
    %c0_596 = arith.constant 0 : index
    %642 = vector.load %arg3[%c10_593, %c4_594, %c0_595, %c0_596] : memref<12x9x8x8xbf16, #tpu.memory_space<vmem>>, vector<1x1x8x8xbf16>
    %643 = vector.shape_cast %642 : vector<1x1x8x8xbf16> to vector<8x8xbf16>
    %644 = arith.truncf %618 : vector<8x384xf32> to vector<8x384xbf16>
    %cst_597 = arith.constant dense<0.000000e+00> : vector<8x384xf32>
    %645 = tpu.matmul %643, %644, %cst_597 {dimension_numbers = #tpu.dot_dimension_numbers<[1], [0], [0], [1], [0, 0, 1, 1], [], []>} : vector<8x8xbf16>, vector<8x384xbf16>, vector<8x384xf32> -> vector<8x384xf32>
    %646 = arith.addf %641, %645 : vector<8x384xf32>
    %c383_i32_598 = arith.constant 383 : i32
    %647 = tpu.dynamic_rotate %618 by %c383_i32_598 dim 1 : vector<8x384xf32>, i32 -> vector<8x384xf32>
    %c10_599 = arith.constant 10 : index
    %c5_600 = arith.constant 5 : index
    %c0_601 = arith.constant 0 : index
    %c0_602 = arith.constant 0 : index
    %648 = vector.load %arg3[%c10_599, %c5_600, %c0_601, %c0_602] : memref<12x9x8x8xbf16, #tpu.memory_space<vmem>>, vector<1x1x8x8xbf16>
    %649 = vector.shape_cast %648 : vector<1x1x8x8xbf16> to vector<8x8xbf16>
    %650 = arith.truncf %647 : vector<8x384xf32> to vector<8x384xbf16>
    %cst_603 = arith.constant dense<0.000000e+00> : vector<8x384xf32>
    %651 = tpu.matmul %649, %650, %cst_603 {dimension_numbers = #tpu.dot_dimension_numbers<[1], [0], [0], [1], [0, 0, 1, 1], [], []>} : vector<8x8xbf16>, vector<8x384xbf16>, vector<8x384xf32> -> vector<8x384xf32>
    %652 = arith.addf %646, %651 : vector<8x384xf32>
    %c367_i32_604 = arith.constant 367 : i32
    %653 = tpu.dynamic_rotate %618 by %c367_i32_604 dim 1 : vector<8x384xf32>, i32 -> vector<8x384xf32>
    %c10_605 = arith.constant 10 : index
    %c6_606 = arith.constant 6 : index
    %c0_607 = arith.constant 0 : index
    %c0_608 = arith.constant 0 : index
    %654 = vector.load %arg3[%c10_605, %c6_606, %c0_607, %c0_608] : memref<12x9x8x8xbf16, #tpu.memory_space<vmem>>, vector<1x1x8x8xbf16>
    %655 = vector.shape_cast %654 : vector<1x1x8x8xbf16> to vector<8x8xbf16>
    %656 = arith.truncf %653 : vector<8x384xf32> to vector<8x384xbf16>
    %cst_609 = arith.constant dense<0.000000e+00> : vector<8x384xf32>
    %657 = tpu.matmul %655, %656, %cst_609 {dimension_numbers = #tpu.dot_dimension_numbers<[1], [0], [0], [1], [0, 0, 1, 1], [], []>} : vector<8x8xbf16>, vector<8x384xbf16>, vector<8x384xf32> -> vector<8x384xf32>
    %658 = arith.addf %652, %657 : vector<8x384xf32>
    %c366_i32_610 = arith.constant 366 : i32
    %659 = tpu.dynamic_rotate %618 by %c366_i32_610 dim 1 : vector<8x384xf32>, i32 -> vector<8x384xf32>
    %c10_611 = arith.constant 10 : index
    %c7_612 = arith.constant 7 : index
    %c0_613 = arith.constant 0 : index
    %c0_614 = arith.constant 0 : index
    %660 = vector.load %arg3[%c10_611, %c7_612, %c0_613, %c0_614] : memref<12x9x8x8xbf16, #tpu.memory_space<vmem>>, vector<1x1x8x8xbf16>
    %661 = vector.shape_cast %660 : vector<1x1x8x8xbf16> to vector<8x8xbf16>
    %662 = arith.truncf %659 : vector<8x384xf32> to vector<8x384xbf16>
    %cst_615 = arith.constant dense<0.000000e+00> : vector<8x384xf32>
    %663 = tpu.matmul %661, %662, %cst_615 {dimension_numbers = #tpu.dot_dimension_numbers<[1], [0], [0], [1], [0, 0, 1, 1], [], []>} : vector<8x8xbf16>, vector<8x384xbf16>, vector<8x384xf32> -> vector<8x384xf32>
    %664 = arith.addf %658, %663 : vector<8x384xf32>
    %c365_i32_616 = arith.constant 365 : i32
    %665 = tpu.dynamic_rotate %618 by %c365_i32_616 dim 1 : vector<8x384xf32>, i32 -> vector<8x384xf32>
    %c10_617 = arith.constant 10 : index
    %c8_618 = arith.constant 8 : index
    %c0_619 = arith.constant 0 : index
    %c0_620 = arith.constant 0 : index
    %666 = vector.load %arg3[%c10_617, %c8_618, %c0_619, %c0_620] : memref<12x9x8x8xbf16, #tpu.memory_space<vmem>>, vector<1x1x8x8xbf16>
    %667 = vector.shape_cast %666 : vector<1x1x8x8xbf16> to vector<8x8xbf16>
    %668 = arith.truncf %665 : vector<8x384xf32> to vector<8x384xbf16>
    %cst_621 = arith.constant dense<0.000000e+00> : vector<8x384xf32>
    %669 = tpu.matmul %667, %668, %cst_621 {dimension_numbers = #tpu.dot_dimension_numbers<[1], [0], [0], [1], [0, 0, 1, 1], [], []>} : vector<8x8xbf16>, vector<8x384xbf16>, vector<8x384xf32> -> vector<8x384xf32>
    %670 = arith.addf %664, %669 : vector<8x384xf32>
    %c10_622 = arith.constant 10 : index
    %c0_623 = arith.constant 0 : index
    %c0_624 = arith.constant 0 : index
    %671 = vector.load %arg4[%c10_622, %c0_623, %c0_624] : memref<12x8x1xf32, #tpu.memory_space<vmem>>, vector<1x8x1xf32>
    %672 = vector.shape_cast %671 : vector<1x8x1xf32> to vector<8x1xf32>
    %673 = vector.broadcast %672 : vector<8x1xf32> to vector<8x384xf32>
    %674 = arith.addf %670, %673 : vector<8x384xf32>
    %675 = arith.mulf %674, %2 : vector<8x384xf32>
    %cst_625 = arith.constant 0.000000e+00 : f32
    %676 = vector.broadcast %cst_625 : f32 to vector<8x384xf32>
    %677 = arith.maximumf %675, %676 : vector<8x384xf32>
    %c19_i32_626 = arith.constant 19 : i32
    %678 = tpu.dynamic_rotate %677 by %c19_i32_626 dim 1 : vector<8x384xf32>, i32 -> vector<8x384xf32>
    %c11 = arith.constant 11 : index
    %c0_627 = arith.constant 0 : index
    %c0_628 = arith.constant 0 : index
    %c0_629 = arith.constant 0 : index
    %679 = vector.load %arg3[%c11, %c0_627, %c0_628, %c0_629] : memref<12x9x8x8xbf16, #tpu.memory_space<vmem>>, vector<1x1x8x8xbf16>
    %680 = vector.shape_cast %679 : vector<1x1x8x8xbf16> to vector<8x8xbf16>
    %681 = arith.truncf %678 : vector<8x384xf32> to vector<8x384xbf16>
    %cst_630 = arith.constant dense<0.000000e+00> : vector<8x384xf32>
    %682 = tpu.matmul %680, %681, %cst_630 {dimension_numbers = #tpu.dot_dimension_numbers<[1], [0], [0], [1], [0, 0, 1, 1], [], []>} : vector<8x8xbf16>, vector<8x384xbf16>, vector<8x384xf32> -> vector<8x384xf32>
    %c18_i32_631 = arith.constant 18 : i32
    %683 = tpu.dynamic_rotate %677 by %c18_i32_631 dim 1 : vector<8x384xf32>, i32 -> vector<8x384xf32>
    %c11_632 = arith.constant 11 : index
    %c1_633 = arith.constant 1 : index
    %c0_634 = arith.constant 0 : index
    %c0_635 = arith.constant 0 : index
    %684 = vector.load %arg3[%c11_632, %c1_633, %c0_634, %c0_635] : memref<12x9x8x8xbf16, #tpu.memory_space<vmem>>, vector<1x1x8x8xbf16>
    %685 = vector.shape_cast %684 : vector<1x1x8x8xbf16> to vector<8x8xbf16>
    %686 = arith.truncf %683 : vector<8x384xf32> to vector<8x384xbf16>
    %cst_636 = arith.constant dense<0.000000e+00> : vector<8x384xf32>
    %687 = tpu.matmul %685, %686, %cst_636 {dimension_numbers = #tpu.dot_dimension_numbers<[1], [0], [0], [1], [0, 0, 1, 1], [], []>} : vector<8x8xbf16>, vector<8x384xbf16>, vector<8x384xf32> -> vector<8x384xf32>
    %688 = arith.addf %682, %687 : vector<8x384xf32>
    %c17_i32_637 = arith.constant 17 : i32
    %689 = tpu.dynamic_rotate %677 by %c17_i32_637 dim 1 : vector<8x384xf32>, i32 -> vector<8x384xf32>
    %c11_638 = arith.constant 11 : index
    %c2_639 = arith.constant 2 : index
    %c0_640 = arith.constant 0 : index
    %c0_641 = arith.constant 0 : index
    %690 = vector.load %arg3[%c11_638, %c2_639, %c0_640, %c0_641] : memref<12x9x8x8xbf16, #tpu.memory_space<vmem>>, vector<1x1x8x8xbf16>
    %691 = vector.shape_cast %690 : vector<1x1x8x8xbf16> to vector<8x8xbf16>
    %692 = arith.truncf %689 : vector<8x384xf32> to vector<8x384xbf16>
    %cst_642 = arith.constant dense<0.000000e+00> : vector<8x384xf32>
    %693 = tpu.matmul %691, %692, %cst_642 {dimension_numbers = #tpu.dot_dimension_numbers<[1], [0], [0], [1], [0, 0, 1, 1], [], []>} : vector<8x8xbf16>, vector<8x384xbf16>, vector<8x384xf32> -> vector<8x384xf32>
    %694 = arith.addf %688, %693 : vector<8x384xf32>
    %c1_i32_643 = arith.constant 1 : i32
    %695 = tpu.dynamic_rotate %677 by %c1_i32_643 dim 1 : vector<8x384xf32>, i32 -> vector<8x384xf32>
    %c11_644 = arith.constant 11 : index
    %c3_645 = arith.constant 3 : index
    %c0_646 = arith.constant 0 : index
    %c0_647 = arith.constant 0 : index
    %696 = vector.load %arg3[%c11_644, %c3_645, %c0_646, %c0_647] : memref<12x9x8x8xbf16, #tpu.memory_space<vmem>>, vector<1x1x8x8xbf16>
    %697 = vector.shape_cast %696 : vector<1x1x8x8xbf16> to vector<8x8xbf16>
    %698 = arith.truncf %695 : vector<8x384xf32> to vector<8x384xbf16>
    %cst_648 = arith.constant dense<0.000000e+00> : vector<8x384xf32>
    %699 = tpu.matmul %697, %698, %cst_648 {dimension_numbers = #tpu.dot_dimension_numbers<[1], [0], [0], [1], [0, 0, 1, 1], [], []>} : vector<8x8xbf16>, vector<8x384xbf16>, vector<8x384xf32> -> vector<8x384xf32>
    %700 = arith.addf %694, %699 : vector<8x384xf32>
    %c11_649 = arith.constant 11 : index
    %c4_650 = arith.constant 4 : index
    %c0_651 = arith.constant 0 : index
    %c0_652 = arith.constant 0 : index
    %701 = vector.load %arg3[%c11_649, %c4_650, %c0_651, %c0_652] : memref<12x9x8x8xbf16, #tpu.memory_space<vmem>>, vector<1x1x8x8xbf16>
    %702 = vector.shape_cast %701 : vector<1x1x8x8xbf16> to vector<8x8xbf16>
    %703 = arith.truncf %677 : vector<8x384xf32> to vector<8x384xbf16>
    %cst_653 = arith.constant dense<0.000000e+00> : vector<8x384xf32>
    %704 = tpu.matmul %702, %703, %cst_653 {dimension_numbers = #tpu.dot_dimension_numbers<[1], [0], [0], [1], [0, 0, 1, 1], [], []>} : vector<8x8xbf16>, vector<8x384xbf16>, vector<8x384xf32> -> vector<8x384xf32>
    %705 = arith.addf %700, %704 : vector<8x384xf32>
    %c383_i32_654 = arith.constant 383 : i32
    %706 = tpu.dynamic_rotate %677 by %c383_i32_654 dim 1 : vector<8x384xf32>, i32 -> vector<8x384xf32>
    %c11_655 = arith.constant 11 : index
    %c5_656 = arith.constant 5 : index
    %c0_657 = arith.constant 0 : index
    %c0_658 = arith.constant 0 : index
    %707 = vector.load %arg3[%c11_655, %c5_656, %c0_657, %c0_658] : memref<12x9x8x8xbf16, #tpu.memory_space<vmem>>, vector<1x1x8x8xbf16>
    %708 = vector.shape_cast %707 : vector<1x1x8x8xbf16> to vector<8x8xbf16>
    %709 = arith.truncf %706 : vector<8x384xf32> to vector<8x384xbf16>
    %cst_659 = arith.constant dense<0.000000e+00> : vector<8x384xf32>
    %710 = tpu.matmul %708, %709, %cst_659 {dimension_numbers = #tpu.dot_dimension_numbers<[1], [0], [0], [1], [0, 0, 1, 1], [], []>} : vector<8x8xbf16>, vector<8x384xbf16>, vector<8x384xf32> -> vector<8x384xf32>
    %711 = arith.addf %705, %710 : vector<8x384xf32>
    %c367_i32_660 = arith.constant 367 : i32
    %712 = tpu.dynamic_rotate %677 by %c367_i32_660 dim 1 : vector<8x384xf32>, i32 -> vector<8x384xf32>
    %c11_661 = arith.constant 11 : index
    %c6_662 = arith.constant 6 : index
    %c0_663 = arith.constant 0 : index
    %c0_664 = arith.constant 0 : index
    %713 = vector.load %arg3[%c11_661, %c6_662, %c0_663, %c0_664] : memref<12x9x8x8xbf16, #tpu.memory_space<vmem>>, vector<1x1x8x8xbf16>
    %714 = vector.shape_cast %713 : vector<1x1x8x8xbf16> to vector<8x8xbf16>
    %715 = arith.truncf %712 : vector<8x384xf32> to vector<8x384xbf16>
    %cst_665 = arith.constant dense<0.000000e+00> : vector<8x384xf32>
    %716 = tpu.matmul %714, %715, %cst_665 {dimension_numbers = #tpu.dot_dimension_numbers<[1], [0], [0], [1], [0, 0, 1, 1], [], []>} : vector<8x8xbf16>, vector<8x384xbf16>, vector<8x384xf32> -> vector<8x384xf32>
    %717 = arith.addf %711, %716 : vector<8x384xf32>
    %c366_i32_666 = arith.constant 366 : i32
    %718 = tpu.dynamic_rotate %677 by %c366_i32_666 dim 1 : vector<8x384xf32>, i32 -> vector<8x384xf32>
    %c11_667 = arith.constant 11 : index
    %c7_668 = arith.constant 7 : index
    %c0_669 = arith.constant 0 : index
    %c0_670 = arith.constant 0 : index
    %719 = vector.load %arg3[%c11_667, %c7_668, %c0_669, %c0_670] : memref<12x9x8x8xbf16, #tpu.memory_space<vmem>>, vector<1x1x8x8xbf16>
    %720 = vector.shape_cast %719 : vector<1x1x8x8xbf16> to vector<8x8xbf16>
    %721 = arith.truncf %718 : vector<8x384xf32> to vector<8x384xbf16>
    %cst_671 = arith.constant dense<0.000000e+00> : vector<8x384xf32>
    %722 = tpu.matmul %720, %721, %cst_671 {dimension_numbers = #tpu.dot_dimension_numbers<[1], [0], [0], [1], [0, 0, 1, 1], [], []>} : vector<8x8xbf16>, vector<8x384xbf16>, vector<8x384xf32> -> vector<8x384xf32>
    %723 = arith.addf %717, %722 : vector<8x384xf32>
    %c365_i32_672 = arith.constant 365 : i32
    %724 = tpu.dynamic_rotate %677 by %c365_i32_672 dim 1 : vector<8x384xf32>, i32 -> vector<8x384xf32>
    %c11_673 = arith.constant 11 : index
    %c8_674 = arith.constant 8 : index
    %c0_675 = arith.constant 0 : index
    %c0_676 = arith.constant 0 : index
    %725 = vector.load %arg3[%c11_673, %c8_674, %c0_675, %c0_676] : memref<12x9x8x8xbf16, #tpu.memory_space<vmem>>, vector<1x1x8x8xbf16>
    %726 = vector.shape_cast %725 : vector<1x1x8x8xbf16> to vector<8x8xbf16>
    %727 = arith.truncf %724 : vector<8x384xf32> to vector<8x384xbf16>
    %cst_677 = arith.constant dense<0.000000e+00> : vector<8x384xf32>
    %728 = tpu.matmul %726, %727, %cst_677 {dimension_numbers = #tpu.dot_dimension_numbers<[1], [0], [0], [1], [0, 0, 1, 1], [], []>} : vector<8x8xbf16>, vector<8x384xbf16>, vector<8x384xf32> -> vector<8x384xf32>
    %729 = arith.addf %723, %728 : vector<8x384xf32>
    %c11_678 = arith.constant 11 : index
    %c0_679 = arith.constant 0 : index
    %c0_680 = arith.constant 0 : index
    %730 = vector.load %arg4[%c11_678, %c0_679, %c0_680] : memref<12x8x1xf32, #tpu.memory_space<vmem>>, vector<1x8x1xf32>
    %731 = vector.shape_cast %730 : vector<1x8x1xf32> to vector<8x1xf32>
    %732 = vector.broadcast %731 : vector<8x1xf32> to vector<8x384xf32>
    %733 = arith.addf %729, %732 : vector<8x384xf32>
    %734 = arith.mulf %733, %2 : vector<8x384xf32>
    %735 = math.tanh %734 : vector<8x384xf32>
    %c0_681 = arith.constant 0 : index
    %c0_682 = arith.constant 0 : index
    %c0_683 = arith.constant 0 : index
    %736 = vector.load %arg5[%c0_681, %c0_682, %c0_683] : memref<1x8x384xf32, #tpu.memory_space<vmem>>, vector<1x8x384xf32>
    %737 = vector.shape_cast %736 : vector<1x8x384xf32> to vector<8x384xf32>
    %738 = vector.shape_cast %735 : vector<8x384xf32> to vector<1x8x384xf32>
    tpu.vector_store %arg5[%c0_681, %c0_682, %c0_683], %738 {strides = array<i32>} : memref<1x8x384xf32, #tpu.memory_space<vmem>>, vector<1x8x384xf32>,
    return
  }
  func.func @transform_0(%arg0: i32) -> (i32, i32, i32) {
    %c0_i32 = arith.constant 0 : i32
    %c0_i32_0 = arith.constant 0 : i32
    %c0_i32_1 = arith.constant 0 : i32
    return %arg0, %c0_i32, %c0_i32_0 : i32, i32, i32
  }
  func.func @transform_1(%arg0: i32) -> (i32, i32) {
    %c0_i32 = arith.constant 0 : i32
    %c0_i32_0 = arith.constant 0 : i32
    %c0_i32_1 = arith.constant 0 : i32
    return %c0_i32, %c0_i32_0 : i32, i32
  }
  func.func @transform_2(%arg0: i32) -> (i32, i32, i32, i32) {
    %c0_i32 = arith.constant 0 : i32
    %c0_i32_0 = arith.constant 0 : i32
    %c0_i32_1 = arith.constant 0 : i32
    %c0_i32_2 = arith.constant 0 : i32
    %c0_i32_3 = arith.constant 0 : i32
    return %c0_i32, %c0_i32_0, %c0_i32_1, %c0_i32_2 : i32, i32, i32, i32
  }
  func.func @transform_3(%arg0: i32) -> (i32, i32, i32) {
    %c0_i32 = arith.constant 0 : i32
    %c0_i32_0 = arith.constant 0 : i32
    %c0_i32_1 = arith.constant 0 : i32
    %c0_i32_2 = arith.constant 0 : i32
    return %c0_i32, %c0_i32_0, %c0_i32_1 : i32, i32, i32
  }
  func.func @transform_4(%arg0: i32) -> (i32, i32, i32) {
    %c0_i32 = arith.constant 0 : i32
    %c0_i32_0 = arith.constant 0 : i32
    %c0_i32_1 = arith.constant 0 : i32
    return %arg0, %c0_i32, %c0_i32_0 : i32, i32, i32
  }
}

</mosaic_0001>

<bundles_post_ra>
// kernel: g_forward.1
= control target key start
LH: loop header
LB: loop body
LE: loop exit
PB: predicated region body
PF: predicated region fallthrough
CT: control target
= control target key end

     0   :  { %s14100_s15 = smov 0   ;;  %s16583_s0 = inlined_call_operand.vmem [shape: f32[2,8,384], index: 0, kind: input, shape index: {}]   ;;  %s16584_s1 = inlined_call_operand.vmem [shape: f32[1,384], index: 1, kind: input, shape index: {}]   ;;  %s16585_s2 = inlined_call_operand.vmem [shape: bf16[12,9,8,8], index: 2, kind: input, shape index: {}]   ;;  %s16586_s3 = inlined_call_operand.vmem [shape: f32[12,8,1], index: 3, kind: input, shape index: {}]   ;;  %s16587_s4 = inlined_call_operand.vmem [shape: f32[2,8,384], index: 4, kind: output, shape index: {}]  }
   0x1 LB: > { %s12233_s16 = sadd.s32 4294967295, %s14062_s15   ;;  %p12237_p0 = scmp.ge.s32.totalorder %s14062_s15, 1  ;;  %s14062_s15 = sphi %s14100_s15, %s14_s15  }
   0x2   : > { %p162_p1 = scmp.lt.s32.totalorder %s14062_s15, 3 }
   0x4   : > { %p163_p2 = pnand %p12237_p0, %p162_p1 }
   0x5   : > { %p188_p3 = scmp.lt.s32.totalorder (!%p163_p2), %s12233_s16, 1  ;;  %s14067_s21 = smov (!%p163_p2), 18  }
   0x6   : > { %166 = sbr.rel (%p163_p2) target bundleno = 4759 (0x1297), region = 36  ;;  %s14068_s22 = smov (!%p163_p2), 19  }
   0x7   : > { %s14069_s23 = smov (!%p163_p2), 17   ;;  %s14070_s24 = smov (!%p163_p2), 1  }
   0x8   : > { %s14071_s25 = smov (!%p163_p2), 127   ;;  %s14072_s26 = smov (!%p163_p2), 111  }
   0x9   : > { %s14073_s27 = smov (!%p163_p2), 110   ;;  %s14074_s28 = smov (!%p163_p2), 109  }
   0xb   : > { %s16589_s16 = smov (!%p188_p3, %s12233_s16), 1  ;;  %v14064_v0 = vmov 0.0   ;;  %v14065_v1 = vmov 0   ;;  %vm14066_vm0 = vmmov 0   ;;  %v1205_v6 = vld [vmem:[%s16586_s3] sm:$0xff]  ;;  %v201_v7 = vlaneseq }
   0xc   : > { %12900 = vmatprep.subr.bf16.mxu1 %v14064_v0  ;;  %s13548_s17 = smul.u32 24, %s16589_s16  ;;  %296 = vmatprep.mubr.bf16.mxu0 %v14065_v1  ;;  %vm254_vm3 = vcmask 1043456   ;;  %v12240_v33 = vld [vmem:[%s16585_s2 + $0x4] sm:$0xf]  ;;  %vm250_vm5 = vcmask 64512  }
   0xd   : > { %12902 = vmatprep.mubr.msk.bf16.mxu1 %vm14066_vm0, %v14064_v0  ;;  %13608 = vset.pattern.permute.xlu0 %v14065_v1  ;;  %v14158_v8 = vand.u32 127, %v201_v7  ;;  %v231_v49 = vld [vmem:[%s16585_s2] sm:$0xf]  ;;  %v12247_v57 = vld [vmem:[%s16585_s2 + $0x8] sm:$0xf] }
   0xe   : > { %s192_s20 = scalar_lea.vmem %s16583_s0, %s13548_s17  ;;  %13689 = vset.pattern.permute.xlu1 %v14065_v1  ;;  %s197_s14 = scalar_lea.vmem %s16587_s4, %s13548_s17 }
   0xf   : > { %v14120_v2 = vld [vmem:[%s192_s20] sm:$0xff]  ;;  %v14122_v3 = vld [vmem:[%s192_s20 + $0x8] sm:$0xff]  ;;  %v14130_v5 = vld [vmem:[%s192_s20 + $0x10] sm:$0xff]  ;;  %vm241_vm1 = vcmp.lt.s32.totalorder %v14158_v8, 18  ;;  %vm227_vm2 = vcmp.lt.s32.totalorder %v14158_v8, 19  ;;  %vm444_vm4 = vcmp.lt.s32.totalorder %v14158_v8, 17 }
  0x10   : > { %v13568_v4 = vpack.i.bf16 %v14122_v3, %v14120_v2  ;;  %vm555_vm6 = vcmp.lt.s32.totalorder %v14158_v8, 1  ;;  %v663_v61 = vpack.c.bf16 %v14122_v3, %v14122_v3  ;;  %vm767_vm7 = vcmp.lt.s32.totalorder %v14158_v8, 127 }
  0x11   : > { %v664_v3 = vpack.c.bf16 %v14130_v5, %v14130_v5  ;;  %vm878_vm8 = vcmp.lt.s32.totalorder %v14158_v8, 111  ;;  %vm989_vm9 = vcmp.lt.s32.totalorder %v14158_v8, 110  ;;  %vm1100_vm10 = vcmp.lt.s32.totalorder %v14158_v8, 109 }
  0x12   : > { %13569 = vrot.lane.b32.xlu0 %v13568_v4, %s14067_s21  ;;  %13574 = vrot.lane.b32.xlu1 %v13568_v4, %s14068_s22 }
  0x16   : > { %239 = vrot.lane.b32.xlu0 %v14130_v5, %s14067_s21  ;;  %223 = vrot.lane.b32.xlu1 %v14130_v5, %s14068_s22 }
  0x1a   : > { %13579 = vrot.lane.b32.xlu0 %v13568_v4, %s14069_s23  ;;  %442 = vrot.lane.b32.xlu1 %v14130_v5, %s14069_s23 }
  0x1e   : > { %13584 = vrot.lane.b32.xlu0 %v13568_v4, %s14070_s24  ;;  %553 = vrot.lane.b32.xlu1 %v14130_v5, %s14070_s24 }
  0x22   : > { %13589 = vrot.lane.b32.xlu0 %v13568_v4, %s14071_s25  ;;  %765 = vrot.lane.b32.xlu1 %v14130_v5, %s14071_s25 }
  0x26   : > { %13594 = vrot.lane.b32.xlu0 %v13568_v4, %s14072_s26  ;;  %876 = vrot.lane.b32.xlu1 %v14130_v5, %s14072_s26 }
  0x2a   : > { %13599 = vrot.lane.b32.xlu0 %v13568_v4, %s14073_s27  ;;  %987 = vrot.lane.b32.xlu1 %v14130_v5, %s14073_s27 }
  0x2e   : > { %13604 = vrot.lane.b32.xlu0 %v13568_v4, %s14074_s28  ;;  %1098 = vrot.lane.b32.xlu1 %v14130_v5, %s14074_s28  ;;  %v662_v4 = vpack.c.bf16 %v14120_v2, %v14120_v2  ;;  %v675_v2 = vsel %vm254_vm3, %v664_v3, 0 }
  0x32   : > { %1208 = vperm.xlu0 %13608, %v1205_v6  }
  0x84   : > { %v13570_v9 = vpop.permute.xlu0 %13569  ;;  %v13575_v10 = vpop.permute.xlu1 %13574 }
  0x85   : > { %v13572_v11 = vunpack.i.h.bf16 %v13570_v9  ;;  %v13571_v12 = vunpack.i.l.bf16 %v13570_v9  ;;  %v13577_v13 = vunpack.i.h.bf16 %v13575_v10  ;;  %v13576_v14 = vunpack.i.l.bf16 %v13575_v10  ;;  %v12251_v10 = vld [vmem:[%s16585_s2 + $0xc] sm:$0xf] }
  0x87   : > { %v243_v15 = vsel %vm241_vm1, %v13571_v12, %v13572_v11  ;;  %v229_v16 = vsel %vm227_vm2, %v13576_v14, %v13577_v13 }
  0x88   : > { %v240_v17 = vpop.permute.xlu0 %239  ;;  %v248_v18 = vpack.c.bf16 %v243_v15, %v243_v15  ;;  %v224_v19 = vpop.permute.xlu1 %223  ;;  %v233_v20 = vpack.c.bf16 %v229_v16, %v229_v16 }
  0x89   : > { %v244_v21 = vsel %vm241_vm1, %v240_v17, %v13571_v12  ;;  %v242_v22 = vsel %vm241_vm1, %v13572_v11, %v240_v17  ;;  %v228_v23 = vsel %vm227_vm2, %v13577_v13, %v224_v19  ;;  %v230_v24 = vsel %vm227_vm2, %v224_v19, %v13576_v14 }
  0x8a   : > { %12241 = vmatprep.subr.msk.bf16.mxu0 %vm254_vm3, %v248_v18  ;;  %v247_v25 = vpack.c.bf16 %v244_v21, %v244_v21  ;;  %v249_v26 = vpack.c.bf16 %v242_v22, %v242_v22  ;;  %v232_v27 = vpack.c.bf16 %v230_v24, %v230_v24  ;;  %v234_v28 = vpack.c.bf16 %v228_v23, %v228_v23  ;;  %v12255_v21 = vld [vmem:[%s16585_s2 + $0x10] sm:$0xf] }
  0x8b   : > { %v669_v12 = vsel %vm254_vm3, %v662_v4, 0 }
  0x8c   : > { %v256_v29 = vsel %vm254_vm3, %v247_v25, 0  ;;  %v262_v30 = vsel %vm254_vm3, %v249_v26, 0  ;;  %v13580_v31 = vpop.permute.xlu0 %13579  ;;  %v443_v32 = vpop.permute.xlu1 %442  ;;  %v349_v36 = vsel %vm254_vm3, %v232_v27, 0  ;;  %v355_v37 = vsel %vm254_vm3, %v234_v28, 0 }
  0x8d   : > { %279 = vmatpush1.bf16.msra.mxu0 %v256_v29  ;;  %12901 = vmatpush3.bf16.msra.mxu1 %v262_v30  ;;  %v13582_v34 = vunpack.i.h.bf16 %v13580_v31  ;;  %v13581_v35 = vunpack.i.l.bf16 %v13580_v31 }
  0x8e   : > { %12244 = vmatprep.subr.msk.bf16.mxu0 %vm254_vm3, %v233_v20  ;;  %12906 = vmatprep.subr.bf16.mxu1 %v14064_v0 }
  0x8f   : > { %v445_v38 = vsel %vm444_vm4, %v13582_v34, %v443_v32  ;;  %v447_v39 = vsel %vm444_vm4, %v443_v32, %v13581_v35  ;;  %v446_v40 = vsel %vm444_vm4, %v13581_v35, %v13582_v34  ;;  %v12259_v34 = vld [vmem:[%s16585_s2 + $0x14] sm:$0xf] }
  0x90   : > { %12242 = vmatmul.mubr.msk.bf16.vlgmr.msra.gmra.mxu0 %vm250_vm5, %v12240_v33  ;;  %12903 = vmatmul.mubr.msk.bf16.vlgmr.msra.gmra.mxu1 %vm250_vm5, %v12240_v33  ;;  %v451_v41 = vpack.c.bf16 %v446_v40, %v446_v40  ;;  %v13585_v42 = vpop.permute.xlu0 %13584  ;;  %v450_v45 = vpack.c.bf16 %v447_v39, %v447_v39  ;;  %v452_v46 = vpack.c.bf16 %v445_v38, %v445_v38  ;;  %v554_v47 = vpop.permute.xlu1 %553 }
  0x91   : > { %372 = vmatpush1.bf16.msra.mxu0 %v349_v36  ;;  %12907 = vmatpush3.bf16.msra.mxu1 %v355_v37  ;;  %v13587_v43 = vunpack.i.h.bf16 %v13585_v42  ;;  %v13586_v44 = vunpack.i.l.bf16 %v13585_v42 }
  0x92   : > { %389 = vmatprep.mubr.bf16.mxu0 %v14065_v1  ;;  %12908 = vmatprep.mubr.msk.bf16.mxu1 %vm14066_vm0, %v14064_v0  ;;  %v457_v50 = vsel %vm254_vm3, %v450_v45, 0  ;;  %v463_v51 = vsel %vm254_vm3, %v452_v46, 0 }
  0x93   : > { %12248 = vmatprep.subr.msk.bf16.mxu0 %vm254_vm3, %v451_v41  ;;  %12912 = vmatprep.subr.bf16.mxu1 %v14064_v0  ;;  %v557_v48 = vsel %vm555_vm6, %v13586_v44, %v13587_v43  ;;  %v556_v52 = vsel %vm555_vm6, %v13587_v43, %v554_v47  ;;  %v558_v53 = vsel %vm555_vm6, %v554_v47, %v13586_v44  ;;  %v12263_v47 = vld [vmem:[%s16585_s2 + $0x18] sm:$0xf] }
  0x94   : > { %v562_v54 = vpack.c.bf16 %v557_v48, %v557_v48  ;;  %v561_v55 = vpack.c.bf16 %v558_v53, %v558_v53  ;;  %v563_v56 = vpack.c.bf16 %v556_v52, %v556_v52  ;;  %v13590_v58 = vpop.permute.xlu0 %13589  ;;  %v766_v63 = vpop.permute.xlu1 %765 }
  0x95   : > { %v13592_v62 = vunpack.i.h.bf16 %v13590_v58  ;;  %v13591_v6 = vunpack.i.l.bf16 %v13590_v58  ;;  %v12271_v58 = vld [vmem:[%s16585_s2 + $0x20] sm:$0xf] }
  0x96   : > { %v568_v59 = vsel %vm254_vm3, %v561_v55, 0  ;;  %v574_v60 = vsel %vm254_vm3, %v563_v56, 0  ;;  %v12267_v55 = vld [vmem:[%s16585_s2 + $0x1c] sm:$0xf] }
  0x97   : > { %v768_v9 = vsel %vm767_vm7, %v13592_v62, %v766_v63  ;;  %v770_v5 = vsel %vm767_vm7, %v766_v63, %v13591_v6  ;;  %v769_v14 = vsel %vm767_vm7, %v13591_v6, %v13592_v62 }
  0x98   : > { %12245 = vmatmul.mubr.msk.bf16.vlgmr.msra.gmra.mxu0 %vm250_vm5, %v231_v49  ;;  %12909 = vmatmul.mubr.msk.bf16.vlgmr.msra.gmra.mxu1 %vm250_vm5, %v231_v49  ;;  %v13595_v11 = vpop.permute.xlu0 %13594  ;;  %v774_v13 = vpack.c.bf16 %v768_v9, %v768_v9  ;;  %v877_v16 = vpop.permute.xlu1 %876  ;;  %v775_v17 = vpack.c.bf16 %v770_v5, %v770_v5  ;;  %v773_v18 = vpack.c.bf16 %v769_v14, %v769_v14 }
  0x99   : > { %480 = vmatpush1.bf16.msra.mxu0 %v457_v50  ;;  %12913 = vmatpush3.bf16.msra.mxu1 %v463_v51  ;;  %v13597_v15 = vunpack.i.h.bf16 %v13595_v11  ;;  %v13596_v19 = vunpack.i.l.bf16 %v13595_v11 }
  0x9a   : > { %497 = vmatprep.mubr.bf16.mxu0 %v14065_v1  ;;  %12914 = vmatprep.mubr.msk.bf16.mxu1 %vm14066_vm0, %v14064_v0  ;;  %v780_v23 = vsel %vm254_vm3, %v773_v18, 0  ;;  %v786_v24 = vsel %vm254_vm3, %v775_v17, 0 }
  0x9b   : > { %12252 = vmatprep.subr.msk.bf16.mxu0 %vm254_vm3, %v562_v54  ;;  %12918 = vmatprep.subr.bf16.mxu1 %v14064_v0  ;;  %v879_v20 = vsel %vm878_vm8, %v13597_v15, %v877_v16  ;;  %v881_v25 = vsel %vm878_vm8, %v877_v16, %v13596_v19  ;;  %v880_v27 = vsel %vm878_vm8, %v13596_v19, %v13597_v15 }
  0x9c   : > { %v13600_v22 = vpop.permute.xlu0 %13599  ;;  %v885_v26 = vpack.c.bf16 %v879_v20, %v879_v20  ;;  %v988_v29 = vpop.permute.xlu1 %987  ;;  %v886_v30 = vpack.c.bf16 %v881_v25, %v881_v25  ;;  %v884_v31 = vpack.c.bf16 %v880_v27, %v880_v27 }
  0x9d   : > { %v13602_v28 = vunpack.i.h.bf16 %v13600_v22  ;;  %v13601_v32 = vunpack.i.l.bf16 %v13600_v22 }
  0x9e   : > { %v891_v36 = vsel %vm254_vm3, %v884_v31, 0  ;;  %v897_v37 = vsel %vm254_vm3, %v886_v30, 0 }
  0x9f   : > { %v990_v33 = vsel %vm989_vm9, %v13602_v28, %v988_v29  ;;  %v992_v38 = vsel %vm989_vm9, %v988_v29, %v13601_v32  ;;  %v991_v40 = vsel %vm989_vm9, %v13601_v32, %v13602_v28 }
  0xa0   : > { %12249 = vmatmul.mubr.msk.bf16.vlgmr.msra.gmra.mxu0 %vm250_vm5, %v12247_v57  ;;  %12915 = vmatmul.mubr.msk.bf16.vlgmr.msra.gmra.mxu1 %vm250_vm5, %v12247_v57  ;;  %v13605_v35 = vpop.permute.xlu0 %13604  ;;  %v996_v39 = vpack.c.bf16 %v990_v33, %v990_v33  ;;  %v1099_v42 = vpop.permute.xlu1 %1098  ;;  %v997_v43 = vpack.c.bf16 %v992_v38, %v992_v38  ;;  %v995_v44 = vpack.c.bf16 %v991_v40, %v991_v40 }
  0xa1   : > { %591 = vmatpush1.bf16.msra.mxu0 %v568_v59  ;;  %12919 = vmatpush3.bf16.msra.mxu1 %v574_v60  ;;  %v13607_v41 = vunpack.i.h.bf16 %v13605_v35  ;;  %v13606_v45 = vunpack.i.l.bf16 %v13605_v35 }
  0xa2   : > { %608 = vmatprep.mubr.bf16.mxu0 %v14065_v1  ;;  %12920 = vmatprep.mubr.msk.bf16.mxu1 %vm14066_vm0, %v14064_v0  ;;  %v1002_v48 = vsel %vm254_vm3, %v995_v44, 0  ;;  %v1008_v49 = vsel %vm254_vm3, %v997_v43, 0 }
  0xa3   : > { %12256 = vmatprep.subr.msk.bf16.mxu0 %vm254_vm3, %v663_v61  ;;  %12924 = vmatprep.subr.bf16.mxu1 %v14064_v0  ;;  %v1101_v46 = vsel %vm1100_vm10, %v13607_v41, %v1099_v42  ;;  %v1103_v50 = vsel %vm1100_vm10, %v1099_v42, %v13606_v45  ;;  %v1102_v52 = vsel %vm1100_vm10, %v13606_v45, %v13607_v41 }
  0xa4   : > { %v1107_v51 = vpack.c.bf16 %v1101_v46, %v1101_v46  ;;  %v1108_v53 = vpack.c.bf16 %v1103_v50, %v1103_v50  ;;  %v1106_v54 = vpack.c.bf16 %v1102_v52, %v1102_v52 }
  0xa6   : > { %v1113_v56 = vsel %vm254_vm3, %v1106_v54, 0  ;;  %v1119_v57 = vsel %vm254_vm3, %v1108_v53, 0 }
  0xa8   : > { %12253 = vmatmul.mubr.msk.bf16.vlgmr.msra.gmra.mxu0 %vm250_vm5, %v12251_v10  ;;  %12921 = vmatmul.mubr.msk.bf16.vlgmr.msra.gmra.mxu1 %vm250_vm5, %v12251_v10 }
  0xa9   : > { %692 = vmatpush1.bf16.msra.mxu0 %v669_v12  ;;  %12925 = vmatpush3.bf16.msra.mxu1 %v675_v2 }
  0xaa   : > { %709 = vmatprep.mubr.bf16.mxu0 %v14065_v1  ;;  %12926 = vmatprep.mubr.msk.bf16.mxu1 %vm14066_vm0, %v14064_v0 }
  0xab   : > { %12260 = vmatprep.subr.msk.bf16.mxu0 %vm254_vm3, %v774_v13  ;;  %12930 = vmatprep.subr.bf16.mxu1 %v14064_v0 }
  0xb0   : > { %12257 = vmatmul.mubr.msk.bf16.vlgmr.msra.gmra.mxu0 %vm250_vm5, %v12255_v21  ;;  %12927 = vmatmul.mubr.msk.bf16.vlgmr.msra.gmra.mxu1 %vm250_vm5, %v12255_v21 }
  0xb1   : > { %803 = vmatpush1.bf16.msra.mxu0 %v780_v23  ;;  %12931 = vmatpush3.bf16.msra.mxu1 %v786_v24 }
  0xb2   : > { %820 = vmatprep.mubr.bf16.mxu0 %v14065_v1  ;;  %12932 = vmatprep.mubr.msk.bf16.mxu1 %vm14066_vm0, %v14064_v0 }
  0xb3   : > { %12264 = vmatprep.subr.msk.bf16.mxu0 %vm254_vm3, %v885_v26  ;;  %12936 = vmatprep.subr.bf16.mxu1 %v14064_v0 }
  0xb8   : > { %12261 = vmatmul.mubr.msk.bf16.vlgmr.msra.gmra.mxu0 %vm250_vm5, %v12259_v34  ;;  %12933 = vmatmul.mubr.msk.bf16.vlgmr.msra.gmra.mxu1 %vm250_vm5, %v12259_v34 }
  0xb9   : > { %914 = vmatpush1.bf16.msra.mxu0 %v891_v36  ;;  %12937 = vmatpush3.bf16.msra.mxu1 %v897_v37 }
  0xba   : > { %931 = vmatprep.mubr.bf16.mxu0 %v14065_v1  ;;  %12938 = vmatprep.mubr.msk.bf16.mxu1 %vm14066_vm0, %v14064_v0 }
  0xbb   : > { %12268 = vmatprep.subr.msk.bf16.mxu0 %vm254_vm3, %v996_v39  ;;  %12942 = vmatprep.subr.bf16.mxu1 %v14064_v0 }
  0xc0   : > { %12265 = vmatmul.mubr.msk.bf16.vlgmr.msra.gmra.mxu0 %vm250_vm5, %v12263_v47  ;;  %12939 = vmatmul.mubr.msk.bf16.vlgmr.msra.gmra.mxu1 %vm250_vm5, %v12263_v47 }
  0xc1   : > { %1025 = vmatpush1.bf16.msra.mxu0 %v1002_v48  ;;  %12943 = vmatpush3.bf16.msra.mxu1 %v1008_v49 }
  0xc2   : > { %1042 = vmatprep.mubr.bf16.mxu0 %v14065_v1  ;;  %12944 = vmatprep.mubr.msk.bf16.mxu1 %vm14066_vm0, %v14064_v0 }
  0xc3   : > { %12272 = vmatprep.subr.msk.bf16.mxu0 %vm254_vm3, %v1107_v51  ;;  %12948 = vmatprep.subr.bf16.mxu1 %v14064_v0 }
  0xc8   : > { %12269 = vmatmul.mubr.msk.bf16.vlgmr.msra.gmra.mxu0 %vm250_vm5, %v12267_v55  ;;  %12945 = vmatmul.mubr.msk.bf16.vlgmr.msra.gmra.mxu1 %vm250_vm5, %v12267_v55 }
  0xc9   : > { %1136 = vmatpush1.bf16.msra.mxu0 %v1113_v56  ;;  %12949 = vmatpush3.bf16.msra.mxu1 %v1119_v57 }
  0xca   : > { %1153 = vmatprep.mubr.bf16.mxu0 %v14065_v1  ;;  %12950 = vmatprep.mubr.msk.bf16.mxu1 %vm14066_vm0, %v14064_v0 }
  0xcb   : > { %12954 = vmatprep.subr.bf16.mxu1 %v14064_v0 }
  0xd0   : > { %12273 = vmatmul.mubr.msk.bf16.vlgmr.msra.gmra.mxu0 %vm250_vm5, %v12271_v58  ;;  %12951 = vmatmul.mubr.msk.bf16.vlgmr.msra.gmra.mxu1 %vm250_vm5, %v12271_v58 }
  0xd1   : > { %1298 = vmatprep.mubr.bf16.mxu0 %v14065_v1  ;;  %12956 = vmatprep.mubr.msk.bf16.mxu1 %vm14066_vm0, %v14064_v0 }
 0x150   : > { %v298_v59 = vpop.f32.mrf.mxu0  ;;  %v339_v60 = vpop.f32.mrf.mxu1 }
 0x152   : > { %v300_v61 = vpop.f32.mrf.mxu0  ;;  %v12904_v62 = vpop.f32.mrf.mxu1 }
 0x154   : > { %v302_v63 = vpop.f32.mrf.mxu0  ;;  %v342_v4 = vpop.f32.mrf.mxu1 }
 0x156   : > { %v303_v3 = vpop.f32.mrf.mxu0  ;;  %v12905_v6 = vpop.f32.mrf.mxu1 }
 0x158   : > { %v391_v9 = vpop.f32.mrf.mxu0  ;;  %v432_v10 = vpop.f32.mrf.mxu1 }
 0x159   : > { %v392_v51 = vadd.f32 %v391_v9, %v298_v59  ;;  %v433_v52 = vadd.f32 %v432_v10, %v339_v60 }
 0x15a   : > { %v393_v11 = vpop.f32.mrf.mxu0  ;;  %v12910_v12 = vpop.f32.mrf.mxu1 }
 0x15b   : > { %v394_v55 = vadd.f32 %v393_v11, %v300_v61 }
 0x15c   : > { %v395_v2 = vpop.f32.mrf.mxu0  ;;  %v435_v5 = vpop.f32.mrf.mxu1 }
 0x15e   : > { %v396_v13 = vpop.f32.mrf.mxu0  ;;  %v12911_v14 = vpop.f32.mrf.mxu1 }
 0x15f   : > { %v202_v13 = vshrl.u32 %v201_v7, 7 }
 0x160   : > { %v499_v15 = vpop.f32.mrf.mxu0  ;;  %v540_v16 = vpop.f32.mrf.mxu1 }
 0x161   : > { %v546_v56 = vadd.f32 %v499_v15, %v392_v51  ;;  %v548_v57 = vadd.f32 %v540_v16, %v433_v52 }
 0x162   : > { %v501_v17 = vpop.f32.mrf.mxu0  ;;  %v12916_v18 = vpop.f32.mrf.mxu1 }
 0x163   : > { %v547_v63 = vadd.f32 %v501_v17, %v394_v55 }
 0x164   : > { %v503_v19 = vpop.f32.mrf.mxu0  ;;  %v543_v20 = vpop.f32.mrf.mxu1 }
 0x165   : > { %v203_v19 = vsub.s32 0, %v202_v13 }
 0x166   : > { %v504_v21 = vpop.f32.mrf.mxu0  ;;  %v12917_v22 = vpop.f32.mrf.mxu1 }
 0x167   : > { %v199_v22 = vld [vmem:[%s16584_s1] sm:$0x7] }
 0x168   : > { %v610_v23 = vpop.f32.mrf.mxu0  ;;  %v651_v24 = vpop.f32.mrf.mxu1 }
 0x169   : > { %v657_v4 = vadd.f32 %v610_v23, %v546_v56  ;;  %v659_v3 = vadd.f32 %v651_v24, %v548_v57  ;;  %v1209_v24 = vpop.permute.xlu0 %1208  ;;  %v12311_v56 = vld [vmem:[%s16586_s3 + $0x8] sm:$0xff] }
 0x16a   : > { %v612_v25 = vpop.f32.mrf.mxu0  ;;  %v12922_v26 = vpop.f32.mrf.mxu1 }
 0x16b   : > { %v658_v2 = vadd.f32 %v612_v25, %v547_v63 }
 0x16c   : > { %v614_v27 = vpop.f32.mrf.mxu0  ;;  %v654_v28 = vpop.f32.mrf.mxu1 }
 0x16d   : > { %v207_v28 = vsub.s32 1, %v202_v13 }
 0x16e   : > { %v615_v29 = vpop.f32.mrf.mxu0  ;;  %v12923_v30 = vpop.f32.mrf.mxu1 }
 0x170   : > { %v711_v31 = vpop.f32.mrf.mxu0  ;;  %v752_v32 = vpop.f32.mrf.mxu1 }
 0x171   : > { %v758_v5 = vadd.f32 %v711_v31, %v657_v4  ;;  %v760_v14 = vadd.f32 %v752_v32, %v659_v3  ;;  %v14334_v31 = vrot.slane %v199_v22, %v203_v19 }
 0x172   : > { %v713_v33 = vpop.f32.mrf.mxu0  ;;  %v12928_v34 = vpop.f32.mrf.mxu1 }
 0x173   : > { %v759_v60 = vadd.f32 %v713_v33, %v658_v2  ;;  %v211_v33 = vsub.s32 2, %v202_v13 }
 0x174   : > { %v715_v35 = vpop.f32.mrf.mxu0  ;;  %v755_v36 = vpop.f32.mrf.mxu1 }
 0x176   : > { %v716_v37 = vpop.f32.mrf.mxu0  ;;  %v12929_v38 = vpop.f32.mrf.mxu1 }
 0x177   : > { %v14336_v38 = vrot.slane %v199_v22, %v207_v28 }
 0x178   : > { %v822_v39 = vpop.f32.mrf.mxu0  ;;  %v863_v40 = vpop.f32.mrf.mxu1 }
 0x179   : > { %v869_v9 = vadd.f32 %v822_v39, %v758_v5  ;;  %v871_v10 = vadd.f32 %v863_v40, %v760_v14 }
 0x17a   : > { %v824_v41 = vpop.f32.mrf.mxu0  ;;  %v12934_v42 = vpop.f32.mrf.mxu1 }
 0x17b   : > { %v870_v15 = vadd.f32 %v824_v41, %v759_v60 }
 0x17c   : > { %v826_v43 = vpop.f32.mrf.mxu0  ;;  %v866_v44 = vpop.f32.mrf.mxu1 }
 0x17d   : > { %v14339_v43 = vrot.slane %v199_v22, %v211_v33 }
 0x17e   : > { %v827_v45 = vpop.f32.mrf.mxu0  ;;  %v12935_v46 = vpop.f32.mrf.mxu1 }
 0x180   : > { %v933_v47 = vpop.f32.mrf.mxu0  ;;  %v974_v48 = vpop.f32.mrf.mxu1 }
 0x181   : > { %v980_v16 = vadd.f32 %v933_v47, %v869_v9  ;;  %v982_v17 = vadd.f32 %v974_v48, %v871_v10 }
 0x182   : > { %v935_v49 = vpop.f32.mrf.mxu0  ;;  %v12940_v50 = vpop.f32.mrf.mxu1 }
 0x183   : > { %v981_v23 = vadd.f32 %v935_v49, %v870_v15 }
 0x184   : > { %v937_v53 = vpop.f32.mrf.mxu0  ;;  %v977_v54 = vpop.f32.mrf.mxu1 }
 0x186   : > { %v938_v58 = vpop.f32.mrf.mxu0  ;;  %v12941_v62 = vpop.f32.mrf.mxu1 }
 0x188   : > { %v1044_v6 = vpop.f32.mrf.mxu0  ;;  %v1085_v12 = vpop.f32.mrf.mxu1 }
 0x189   : > { %v1091_v7 = vadd.f32 %v1044_v6, %v980_v16  ;;  %v1093_v25 = vadd.f32 %v1085_v12, %v982_v17 }
 0x18a   : > { %v1046_v18 = vpop.f32.mrf.mxu0  ;;  %v12946_v59 = vpop.f32.mrf.mxu1 }
 0x18b   : > { %v1092_v29 = vadd.f32 %v1046_v18, %v981_v23 }
 0x18c   : > { %v1048_v61 = vpop.f32.mrf.mxu0  ;;  %v1088_v11 = vpop.f32.mrf.mxu1 }
 0x18e   : > { %v1049_v20 = vpop.f32.mrf.mxu0  ;;  %v12947_v21 = vpop.f32.mrf.mxu1 }
 0x18f   : > { %v12276_v20 = vld [vmem:[%s16585_s2 + $0x28] sm:$0xf] }
 0x190   : > { %v1155_v26 = vpop.f32.mrf.mxu0  ;;  %v1196_v27 = vpop.f32.mrf.mxu1 }
 0x191   : > { %v1202_v30 = vadd.f32 %v1155_v26, %v1091_v7  ;;  %v1204_v32 = vadd.f32 %v1196_v27, %v1093_v25 }
 0x192   : > { %v1157_v34 = vpop.f32.mrf.mxu0  ;;  %v12952_v35 = vpop.f32.mrf.mxu1 }
 0x193   : > { %v1211_v36 = vadd.f32 %v1209_v24, %v1202_v30  ;;  %v1203_v37 = vadd.f32 %v1157_v34, %v1092_v29  ;;  %v1213_v44 = vadd.f32 %v1209_v24, %v1204_v32  ;;  %v12275_v35 = vld [vmem:[%s16585_s2 + $0x24] sm:$0xf] }
 0x194   : > { %v1159_v39 = vpop.f32.mrf.mxu0  ;;  %v1199_v40 = vpop.f32.mrf.mxu1 }
 0x195   : > { %v1214_v41 = vmul.f32 %v1211_v36, %v14334_v31  ;;  %v1212_v42 = vadd.f32 %v1209_v24, %v1203_v37  ;;  %v1216_v49 = vmul.f32 %v1213_v44, %v14339_v43 }
 0x196   : > { %v1160_v45 = vpop.f32.mrf.mxu0  ;;  %v12953_v46 = vpop.f32.mrf.mxu1 }
 0x197   : > { %v1220_v47 = vmul.f32 0.2, %v1214_v41  ;;  %v1215_v48 = vmul.f32 %v1212_v42, %v14336_v38  ;;  %vm1217_vm11 = vcmp.ge.f32.partialorder %v1214_v41, 0.0  ;;  %v1222_v54 = vmul.f32 0.2, %v1216_v49 }
 0x198   : > { %vm1219_vm13 = vcmp.ge.f32.partialorder %v1216_v49, 0.0 }
 0x199   : > { %vm1218_vm12 = vcmp.ge.f32.partialorder %v1215_v48, 0.0  ;;  %v1221_v50 = vmul.f32 0.2, %v1215_v48  ;;  %v14343_v51 = vsel %vm1217_vm11, %v1214_v41, %v1220_v47  ;;  %v14351_v55 = vsel %vm1219_vm13, %v1216_v49, %v1222_v54  ;;  %v12283_v47 = vld [vmem:[%s16585_s2 + $0x2c] sm:$0xf] }
 0x19b   : > { %v14345_v52 = vsel %vm1218_vm12, %v1215_v48, %v1221_v50 }
 0x19c   : > { %v13614_v53 = vpack.i.bf16 %v14345_v52, %v14343_v51 }
 0x19e   : > { %13615 = vrot.lane.b32.xlu0 %v13614_v53, %s14068_s22  ;;  %13610 = vrot.lane.b32.xlu1 %v13614_v53, %s14067_s21 }
 0x1a2   : > { %13620 = vrot.lane.b32.xlu0 %v13614_v53, %s14069_s23  ;;  %1244 = vrot.lane.b32.xlu1 %v14351_v55, %s14067_s21 }
 0x1a6   : > { %13625 = vrot.lane.b32.xlu0 %v13614_v53, %s14070_s24  ;;  %1230 = vrot.lane.b32.xlu1 %v14351_v55, %s14068_s22 }
 0x1aa   : > { %13630 = vrot.lane.b32.xlu0 %v13614_v53, %s14071_s25  ;;  %1444 = vrot.lane.b32.xlu1 %v14351_v55, %s14069_s23 }
 0x1ae   : > { %13635 = vrot.lane.b32.xlu0 %v13614_v53, %s14072_s26  ;;  %1554 = vrot.lane.b32.xlu1 %v14351_v55, %s14070_s24 }
 0x1b2   : > { %13640 = vrot.lane.b32.xlu0 %v13614_v53, %s14073_s27  ;;  %1765 = vrot.lane.b32.xlu1 %v14351_v55, %s14071_s25 }
 0x1b6   : > { %13645 = vrot.lane.b32.xlu0 %v13614_v53, %s14074_s28  ;;  %1875 = vrot.lane.b32.xlu1 %v14351_v55, %s14072_s26  ;;  %v1663_v53 = vpack.c.bf16 %v14345_v52, %v14345_v52 }
 0x1ba   : > { %2205 = vperm.xlu0 %13608, %v12311_v56   ;;  %1985 = vrot.lane.b32.xlu1 %v14351_v55, %s14073_s27 }
 0x1be   : > { %2095 = vrot.lane.b32.xlu1 %v14351_v55, %s14074_s28 }
 0x210   : > { %v13616_v57 = vpop.permute.xlu0 %13615  ;;  %v13611_v58 = vpop.permute.xlu1 %13610 }
 0x211   : > { %v13618_v62 = vunpack.i.h.bf16 %v13616_v57  ;;  %v13617_v63 = vunpack.i.l.bf16 %v13616_v57  ;;  %v13613_v4 = vunpack.i.h.bf16 %v13611_v58  ;;  %v13612_v3 = vunpack.i.l.bf16 %v13611_v58 }
 0x212   : > { %v1662_v57 = vpack.c.bf16 %v14343_v51, %v14343_v51  ;;  %v1664_v58 = vpack.c.bf16 %v14351_v55, %v14351_v55 }
 0x213   : > { %v1247_v6 = vsel %vm241_vm1, %v13612_v3, %v13613_v4  ;;  %v1233_v13 = vsel %vm227_vm2, %v13617_v63, %v13618_v62 }
 0x214   : > { %v13621_v12 = vpop.permute.xlu0 %13620  ;;  %v1245_v2 = vpop.permute.xlu1 %1244  ;;  %v1252_v5 = vpack.c.bf16 %v1247_v6, %v1247_v6  ;;  %v1238_v16 = vpack.c.bf16 %v1233_v13, %v1233_v13  ;;  %v1669_v6 = vsel %vm254_vm3, %v1662_v57, 0  ;;  %v1675_v51 = vsel %vm254_vm3, %v1664_v58, 0 }
 0x215   : > { %v13623_v14 = vunpack.i.h.bf16 %v13621_v12  ;;  %v13622_v18 = vunpack.i.l.bf16 %v13621_v12  ;;  %v1246_v59 = vsel %vm241_vm1, %v13613_v4, %v1245_v2  ;;  %v1248_v60 = vsel %vm241_vm1, %v1245_v2, %v13612_v3 }
 0x216   : > { %v1251_v9 = vpack.c.bf16 %v1248_v60, %v1248_v60  ;;  %v1253_v10 = vpack.c.bf16 %v1246_v59, %v1246_v59  ;;  %12277 = vmatprep.subr.msk.bf16.mxu0 %vm254_vm3, %v1252_v5  ;;  %v12291_v60 = vld [vmem:[%s16585_s2 + $0x34] sm:$0xf] }
 0x217   : > { %v1447_v21 = vsel %vm444_vm4, %v13622_v18, %v13623_v14 }
 0x218   : > { %v1231_v61 = vpop.permute.xlu1 %1230  ;;  %v1258_v11 = vsel %vm254_vm3, %v1251_v9, 0  ;;  %v1264_v15 = vsel %vm254_vm3, %v1253_v10, 0  ;;  %v13626_v22 = vpop.permute.xlu0 %13625  ;;  %v1452_v27 = vpack.c.bf16 %v1447_v21, %v1447_v21 }
 0x219   : > { %v1232_v19 = vsel %vm227_vm2, %v13618_v62, %v1231_v61  ;;  %v1234_v17 = vsel %vm227_vm2, %v1231_v61, %v13617_v63  ;;  %1281 = vmatpush1.bf16.msra.mxu0 %v1258_v11  ;;  %12955 = vmatpush3.bf16.msra.mxu1 %v1264_v15  ;;  %v13628_v28 = vunpack.i.h.bf16 %v13626_v22  ;;  %v13627_v29 = vunpack.i.l.bf16 %v13626_v22  ;;  %v12287_v63 = vld [vmem:[%s16585_s2 + $0x30] sm:$0xf] }
 0x21a   : > { %v1237_v23 = vpack.c.bf16 %v1234_v17, %v1234_v17  ;;  %v1239_v7 = vpack.c.bf16 %v1232_v19, %v1232_v19  ;;  %12280 = vmatprep.subr.msk.bf16.mxu0 %vm254_vm3, %v1238_v16  ;;  %12960 = vmatprep.subr.bf16.mxu1 %v14064_v0 }
 0x21b   : > { %v1557_v36 = vsel %vm555_vm6, %v13627_v29, %v13628_v28 }
 0x21c   : > { %v1445_v24 = vpop.permute.xlu1 %1444  ;;  %12278 = vmatmul.mubr.msk.bf16.vlgmr.msra.gmra.mxu0 %vm250_vm5, %v12276_v20  ;;  %12957 = vmatmul.mubr.msk.bf16.vlgmr.msra.gmra.mxu1 %vm250_vm5, %v12276_v20  ;;  %v1351_v25 = vsel %vm254_vm3, %v1237_v23, 0  ;;  %v1357_v26 = vsel %vm254_vm3, %v1239_v7, 0  ;;  %v1562_v41 = vpack.c.bf16 %v1557_v36, %v1557_v36  ;;  %v13631_v48 = vpop.permute.xlu0 %13630  ;;  %v12295_v7 = vld [vmem:[%s16585_s2 + $0x38] sm:$0xf] }
 0x21d   : > { %v1446_v30 = vsel %vm444_vm4, %v13623_v14, %v1445_v24  ;;  %v1448_v32 = vsel %vm444_vm4, %v1445_v24, %v13622_v18  ;;  %1374 = vmatpush1.bf16.msra.mxu0 %v1351_v25  ;;  %12961 = vmatpush3.bf16.msra.mxu1 %v1357_v26  ;;  %v13633_v56 = vunpack.i.h.bf16 %v13631_v48  ;;  %v13632_v52 = vunpack.i.l.bf16 %v13631_v48 }
 0x21e   : > { %12284 = vmatprep.subr.msk.bf16.mxu0 %vm254_vm3, %v1452_v27  ;;  %1391 = vmatprep.mubr.bf16.mxu0 %v14065_v1  ;;  %v1451_v33 = vpack.c.bf16 %v1448_v32, %v1448_v32  ;;  %v1453_v34 = vpack.c.bf16 %v1446_v30, %v1446_v30 }
 0x21f   : > { %12962 = vmatprep.mubr.msk.bf16.mxu1 %vm14066_vm0, %v14064_v0  ;;  %12966 = vmatprep.subr.bf16.mxu1 %v14064_v0  ;;  %v1768_v12 = vsel %vm767_vm7, %v13632_v52, %v13633_v56 }
 0x220   : > { %v1555_v37 = vpop.permute.xlu1 %1554  ;;  %v1458_v39 = vsel %vm254_vm3, %v1451_v33, 0  ;;  %v1464_v40 = vsel %vm254_vm3, %v1453_v34, 0  ;;  %v13636_v4 = vpop.permute.xlu0 %13635  ;;  %v1772_v14 = vpack.c.bf16 %v1768_v12, %v1768_v12 }
 0x221   : > { %v1556_v42 = vsel %vm555_vm6, %v13628_v28, %v1555_v37  ;;  %v1558_v44 = vsel %vm555_vm6, %v1555_v37, %v13627_v29  ;;  %v13638_v5 = vunpack.i.h.bf16 %v13636_v4  ;;  %v13637_v18 = vunpack.i.l.bf16 %v13636_v4  ;;  %v12299_v37 = vld [vmem:[%s16585_s2 + $0x3c] sm:$0xf] }
 0x222   : > { %v1561_v45 = vpack.c.bf16 %v1558_v44, %v1558_v44  ;;  %v1563_v46 = vpack.c.bf16 %v1556_v42, %v1556_v42  ;;  %v1779_v61 = vsel %vm254_vm3, %v1772_v14, 0 }
 0x223   : > { %v1878_v16 = vsel %vm878_vm8, %v13637_v18, %v13638_v5 }
 0x224   : > { %12281 = vmatmul.mubr.msk.bf16.vlgmr.msra.gmra.mxu0 %vm250_vm5, %v12275_v35  ;;  %12963 = vmatmul.mubr.msk.bf16.vlgmr.msra.gmra.mxu1 %vm250_vm5, %v12275_v35  ;;  %v1568_v49 = vsel %vm254_vm3, %v1561_v45, 0  ;;  %v1574_v50 = vsel %vm254_vm3, %v1563_v46, 0  ;;  %v1766_v54 = vpop.permute.xlu1 %1765  ;;  %v13641_v9 = vpop.permute.xlu0 %13640  ;;  %v1882_v21 = vpack.c.bf16 %v1878_v16, %v1878_v16 }
 0x225   : > { %1481 = vmatpush1.bf16.msra.mxu0 %v1458_v39  ;;  %12967 = vmatpush3.bf16.msra.mxu1 %v1464_v40  ;;  %v1767_v62 = vsel %vm767_vm7, %v13633_v56, %v1766_v54  ;;  %v1769_v55 = vsel %vm767_vm7, %v1766_v54, %v13632_v52  ;;  %v13643_v17 = vunpack.i.h.bf16 %v13641_v9  ;;  %v13642_v22 = vunpack.i.l.bf16 %v13641_v9 }
 0x226   : > { %12288 = vmatprep.subr.msk.bf16.mxu0 %vm254_vm3, %v1562_v41  ;;  %1498 = vmatprep.mubr.bf16.mxu0 %v14065_v1  ;;  %v1773_v3 = vpack.c.bf16 %v1767_v62, %v1767_v62  ;;  %v1774_v13 = vpack.c.bf16 %v1769_v55, %v1769_v55  ;;  %v1889_v26 = vsel %vm254_vm3, %v1882_v21, 0 }
 0x227   : > { %12968 = vmatprep.mubr.msk.bf16.mxu1 %vm14066_vm0, %v14064_v0  ;;  %12972 = vmatprep.subr.bf16.mxu1 %v14064_v0  ;;  %v1988_v29 = vsel %vm989_vm9, %v13642_v22, %v13643_v17 }
 0x228   : > { %v1876_v2 = vpop.permute.xlu1 %1875  ;;  %v1785_v11 = vsel %vm254_vm3, %v1774_v13, 0  ;;  %v13646_v24 = vpop.permute.xlu0 %13645  ;;  %v1992_v34 = vpack.c.bf16 %v1988_v29, %v1988_v29 }
 0x229   : > { %v1877_v59 = vsel %vm878_vm8, %v13638_v5, %v1876_v2  ;;  %v1879_v15 = vsel %vm878_vm8, %v1876_v2, %v13637_v18  ;;  %v13648_v32 = vunpack.i.h.bf16 %v13646_v24  ;;  %v13647_v35 = vunpack.i.l.bf16 %v13646_v24 }
 0x22a   : > { %v1883_v10 = vpack.c.bf16 %v1877_v59, %v1877_v59  ;;  %v1884_v20 = vpack.c.bf16 %v1879_v15, %v1879_v15  ;;  %v1999_v40 = vsel %vm254_vm3, %v1992_v34, 0 }
 0x22b   : > { %v2098_v44 = vsel %vm1100_vm10, %v13647_v35, %v13648_v32 }
 0x22c   : > { %12285 = vmatmul.mubr.msk.bf16.vlgmr.msra.gmra.mxu0 %vm250_vm5, %v12283_v47  ;;  %12969 = vmatmul.mubr.msk.bf16.vlgmr.msra.gmra.mxu1 %vm250_vm5, %v12283_v47  ;;  %v1986_v19 = vpop.permute.xlu1 %1985  ;;  %v1895_v27 = vsel %vm254_vm3, %v1884_v20, 0  ;;  %v2102_v46 = vpack.c.bf16 %v2098_v44, %v2098_v44  ;;  %v12303_v47 = vld [vmem:[%s16585_s2 + $0x40] sm:$0xf] }
 0x22d   : > { %1591 = vmatpush1.bf16.msra.mxu0 %v1568_v49  ;;  %12973 = vmatpush3.bf16.msra.mxu1 %v1574_v50  ;;  %v1987_v23 = vsel %vm989_vm9, %v13643_v17, %v1986_v19  ;;  %v1989_v28 = vsel %vm989_vm9, %v1986_v19, %v13642_v22  ;;  %v12307_v50 = vld [vmem:[%s16585_s2 + $0x44] sm:$0xf] }
 0x22e   : > { %12292 = vmatprep.subr.msk.bf16.mxu0 %vm254_vm3, %v1663_v53  ;;  %1608 = vmatprep.mubr.bf16.mxu0 %v14065_v1  ;;  %v1993_v25 = vpack.c.bf16 %v1987_v23, %v1987_v23  ;;  %v1994_v33 = vpack.c.bf16 %v1989_v28, %v1989_v28  ;;  %v2109_v48 = vsel %vm254_vm3, %v2102_v46, 0 }
 0x22f   : > { %12974 = vmatprep.mubr.msk.bf16.mxu1 %vm14066_vm0, %v14064_v0  ;;  %12978 = vmatprep.subr.bf16.mxu1 %v14064_v0 }
 0x230   : > { %v2096_v30 = vpop.permute.xlu1 %2095  ;;  %v2005_v41 = vsel %vm254_vm3, %v1994_v33, 0 }
 0x231   : > { %v2097_v36 = vsel %vm1100_vm10, %v13648_v32, %v2096_v30  ;;  %v2099_v42 = vsel %vm1100_vm10, %v2096_v30, %v13647_v35 }
 0x232   : > { %v2103_v39 = vpack.c.bf16 %v2097_v36, %v2097_v36  ;;  %v2104_v45 = vpack.c.bf16 %v2099_v42, %v2099_v42 }
 0x234   : > { %12289 = vmatmul.mubr.msk.bf16.vlgmr.msra.gmra.mxu0 %vm250_vm5, %v12287_v63  ;;  %12975 = vmatmul.mubr.msk.bf16.vlgmr.msra.gmra.mxu1 %vm250_vm5, %v12287_v63  ;;  %v2115_v49 = vsel %vm254_vm3, %v2104_v45, 0 }
 0x235   : > { %1692 = vmatpush1.bf16.msra.mxu0 %v1669_v6  ;;  %12979 = vmatpush3.bf16.msra.mxu1 %v1675_v51 }
 0x236   : > { %12296 = vmatprep.subr.msk.bf16.mxu0 %vm254_vm3, %v1773_v3  ;;  %1709 = vmatprep.mubr.bf16.mxu0 %v14065_v1 }
 0x237   : > { %12980 = vmatprep.mubr.msk.bf16.mxu1 %vm14066_vm0, %v14064_v0  ;;  %12984 = vmatprep.subr.bf16.mxu1 %v14064_v0 }
 0x23c   : > { %12293 = vmatmul.mubr.msk.bf16.vlgmr.msra.gmra.mxu0 %vm250_vm5, %v12291_v60  ;;  %12981 = vmatmul.mubr.msk.bf16.vlgmr.msra.gmra.mxu1 %vm250_vm5, %v12291_v60 }
 0x23d   : > { %1802 = vmatpush1.bf16.msra.mxu0 %v1779_v61  ;;  %12985 = vmatpush3.bf16.msra.mxu1 %v1785_v11 }
 0x23e   : > { %12300 = vmatprep.subr.msk.bf16.mxu0 %vm254_vm3, %v1883_v10  ;;  %1819 = vmatprep.mubr.bf16.mxu0 %v14065_v1 }
 0x23f   : > { %12986 = vmatprep.mubr.msk.bf16.mxu1 %vm14066_vm0, %v14064_v0  ;;  %12990 = vmatprep.subr.bf16.mxu1 %v14064_v0 }
 0x244   : > { %12297 = vmatmul.mubr.msk.bf16.vlgmr.msra.gmra.mxu0 %vm250_vm5, %v12295_v7  ;;  %12987 = vmatmul.mubr.msk.bf16.vlgmr.msra.gmra.mxu1 %vm250_vm5, %v12295_v7 }
 0x245   : > { %1912 = vmatpush1.bf16.msra.mxu0 %v1889_v26  ;;  %12991 = vmatpush3.bf16.msra.mxu1 %v1895_v27 }
 0x246   : > { %12304 = vmatprep.subr.msk.bf16.mxu0 %vm254_vm3, %v1993_v25  ;;  %1929 = vmatprep.mubr.bf16.mxu0 %v14065_v1 }
 0x247   : > { %12992 = vmatprep.mubr.msk.bf16.mxu1 %vm14066_vm0, %v14064_v0  ;;  %12996 = vmatprep.subr.bf16.mxu1 %v14064_v0 }
 0x24c   : > { %12301 = vmatmul.mubr.msk.bf16.vlgmr.msra.gmra.mxu0 %vm250_vm5, %v12299_v37  ;;  %12993 = vmatmul.mubr.msk.bf16.vlgmr.msra.gmra.mxu1 %vm250_vm5, %v12299_v37 }
 0x24d   : > { %2022 = vmatpush1.bf16.msra.mxu0 %v1999_v40  ;;  %12997 = vmatpush3.bf16.msra.mxu1 %v2005_v41 }
 0x24e   : > { %12308 = vmatprep.subr.msk.bf16.mxu0 %vm254_vm3, %v2103_v39  ;;  %2039 = vmatprep.mubr.bf16.mxu0 %v14065_v1 }
 0x24f   : > { %12998 = vmatprep.mubr.msk.bf16.mxu1 %vm14066_vm0, %v14064_v0  ;;  %13002 = vmatprep.subr.bf16.mxu1 %v14064_v0 }
 0x254   : > { %12305 = vmatmul.mubr.msk.bf16.vlgmr.msra.gmra.mxu0 %vm250_vm5, %v12303_v47  ;;  %12999 = vmatmul.mubr.msk.bf16.vlgmr.msra.gmra.mxu1 %vm250_vm5, %v12303_v47 }
 0x255   : > { %2132 = vmatpush1.bf16.msra.mxu0 %v2109_v48  ;;  %13003 = vmatpush3.bf16.msra.mxu1 %v2115_v49 }
 0x256   : > { %2149 = vmatprep.mubr.bf16.mxu0 %v14065_v1  ;;  %13004 = vmatprep.mubr.msk.bf16.mxu1 %vm14066_vm0, %v14064_v0 }
 0x257   : > { %13008 = vmatprep.subr.bf16.mxu1 %v14064_v0 }
 0x25c   : > { %12309 = vmatmul.mubr.msk.bf16.vlgmr.msra.gmra.mxu0 %vm250_vm5, %v12307_v50  ;;  %13005 = vmatmul.mubr.msk.bf16.vlgmr.msra.gmra.mxu1 %vm250_vm5, %v12307_v50 }
 0x25d   : > { %2298 = vmatprep.mubr.bf16.mxu0 %v14065_v1  ;;  %13010 = vmatprep.mubr.msk.bf16.mxu1 %vm14066_vm0, %v14064_v0 }
 0x2dc   : > { %v1300_v53 = vpop.f32.mrf.mxu0  ;;  %v1341_v54 = vpop.f32.mrf.mxu1 }
 0x2de   : > { %v1302_v56 = vpop.f32.mrf.mxu0  ;;  %v12958_v57 = vpop.f32.mrf.mxu1 }
 0x2e0   : > { %v1304_v58 = vpop.f32.mrf.mxu0  ;;  %v1344_v52 = vpop.f32.mrf.mxu1 }
 0x2e2   : > { %v1305_v62 = vpop.f32.mrf.mxu0  ;;  %v12959_v63 = vpop.f32.mrf.mxu1 }
 0x2e4   : > { %v1393_v4 = vpop.f32.mrf.mxu0  ;;  %v1434_v3 = vpop.f32.mrf.mxu1 }
 0x2e5   : > { %v1394_v45 = vadd.f32 %v1393_v4, %v1300_v53  ;;  %v1435_v46 = vadd.f32 %v1434_v3, %v1341_v54 }
 0x2e6   : > { %v1395_v6 = vpop.f32.mrf.mxu0  ;;  %v12964_v51 = vpop.f32.mrf.mxu1 }
 0x2e7   : > { %v1396_v49 = vadd.f32 %v1395_v6, %v1302_v56 }
 0x2e8   : > { %v1397_v55 = vpop.f32.mrf.mxu0  ;;  %v1437_v12 = vpop.f32.mrf.mxu1 }
 0x2ea   : > { %v1398_v2 = vpop.f32.mrf.mxu0  ;;  %v12965_v5 = vpop.f32.mrf.mxu1 }
 0x2ec   : > { %v1500_v13 = vpop.f32.mrf.mxu0  ;;  %v1541_v14 = vpop.f32.mrf.mxu1 }
 0x2ed   : > { %v1547_v50 = vadd.f32 %v1500_v13, %v1394_v45  ;;  %v1549_v57 = vadd.f32 %v1541_v14, %v1435_v46  ;;  %v12348_v45 = vld [vmem:[%s16586_s3 + $0x10] sm:$0xff] }
 0x2ee   : > { %v1502_v18 = vpop.f32.mrf.mxu0  ;;  %v12970_v59 = vpop.f32.mrf.mxu1 }
 0x2ef   : > { %v1548_v62 = vadd.f32 %v1502_v18, %v1396_v49 }
 0x2f0   : > { %v1504_v60 = vpop.f32.mrf.mxu0  ;;  %v1544_v9 = vpop.f32.mrf.mxu1 }
 0x2f2   : > { %v1505_v10 = vpop.f32.mrf.mxu0  ;;  %v12971_v61 = vpop.f32.mrf.mxu1 }
 0x2f4   : > { %v1610_v11 = vpop.f32.mrf.mxu0  ;;  %v1651_v15 = vpop.f32.mrf.mxu1 }
 0x2f5   : > { %v1657_v63 = vadd.f32 %v1610_v11, %v1547_v50  ;;  %v1659_v51 = vadd.f32 %v1651_v15, %v1549_v57 }
 0x2f6   : > { %v1612_v16 = vpop.f32.mrf.mxu0  ;;  %v12976_v19 = vpop.f32.mrf.mxu1 }
 0x2f7   : > { %v1658_v2 = vadd.f32 %v1612_v16, %v1548_v62  ;;  %v2206_v16 = vpop.permute.xlu0 %2205 }
 0x2f8   : > { %v1614_v17 = vpop.f32.mrf.mxu0  ;;  %v1654_v20 = vpop.f32.mrf.mxu1 }
 0x2fa   : > { %v1615_v21 = vpop.f32.mrf.mxu0  ;;  %v12977_v22 = vpop.f32.mrf.mxu1 }
 0x2fc   : > { %v1711_v23 = vpop.f32.mrf.mxu0  ;;  %v1752_v7 = vpop.f32.mrf.mxu1 }
 0x2fd   : > { %v1758_v5 = vadd.f32 %v1711_v23, %v1657_v63  ;;  %v1760_v59 = vadd.f32 %v1752_v7, %v1659_v51 }
 0x2fe   : > { %v1713_v24 = vpop.f32.mrf.mxu0  ;;  %v12982_v25 = vpop.f32.mrf.mxu1 }
 0x2ff   : > { %v1759_v10 = vadd.f32 %v1713_v24, %v1658_v2 }
 0x300   : > { %v1715_v26 = vpop.f32.mrf.mxu0  ;;  %v1755_v27 = vpop.f32.mrf.mxu1 }
 0x302   : > { %v1716_v28 = vpop.f32.mrf.mxu0  ;;  %v12983_v29 = vpop.f32.mrf.mxu1 }
 0x304   : > { %v1821_v30 = vpop.f32.mrf.mxu0  ;;  %v1862_v32 = vpop.f32.mrf.mxu1 }
 0x305   : > { %v1868_v53 = vadd.f32 %v1821_v30, %v1758_v5  ;;  %v1870_v54 = vadd.f32 %v1862_v32, %v1760_v59 }
 0x306   : > { %v1823_v33 = vpop.f32.mrf.mxu0  ;;  %v12988_v34 = vpop.f32.mrf.mxu1 }
 0x307   : > { %v1869_v56 = vadd.f32 %v1823_v33, %v1759_v10 }
 0x308   : > { %v1825_v35 = vpop.f32.mrf.mxu0  ;;  %v1865_v36 = vpop.f32.mrf.mxu1 }
 0x30a   : > { %v1826_v37 = vpop.f32.mrf.mxu0  ;;  %v12989_v39 = vpop.f32.mrf.mxu1 }
 0x30c   : > { %v1931_v40 = vpop.f32.mrf.mxu0  ;;  %v1972_v41 = vpop.f32.mrf.mxu1 }
 0x30d   : > { %v1978_v6 = vadd.f32 %v1931_v40, %v1868_v53  ;;  %v1980_v13 = vadd.f32 %v1972_v41, %v1870_v54 }
 0x30e   : > { %v1933_v42 = vpop.f32.mrf.mxu0  ;;  %v12994_v44 = vpop.f32.mrf.mxu1 }
 0x30f   : > { %v1979_v18 = vadd.f32 %v1933_v42, %v1869_v56 }
 0x310   : > { %v1935_v47 = vpop.f32.mrf.mxu0  ;;  %v1975_v48 = vpop.f32.mrf.mxu1 }
 0x312   : > { %v1936_v58 = vpop.f32.mrf.mxu0  ;;  %v12995_v52 = vpop.f32.mrf.mxu1 }
 0x314   : > { %v2041_v55 = vpop.f32.mrf.mxu0  ;;  %v2082_v12 = vpop.f32.mrf.mxu1 }
 0x315   : > { %v2088_v11 = vadd.f32 %v2041_v55, %v1978_v6  ;;  %v2090_v15 = vadd.f32 %v2082_v12, %v1980_v13 }
 0x316   : > { %v2043_v60 = vpop.f32.mrf.mxu0  ;;  %v13000_v9 = vpop.f32.mrf.mxu1 }
 0x317   : > { %v2089_v20 = vadd.f32 %v2043_v60, %v1979_v18  ;;  %v12313_v60 = vld [vmem:[%s16585_s2 + $0x4c] sm:$0xf] }
 0x318   : > { %v2045_v4 = vpop.f32.mrf.mxu0  ;;  %v2085_v3 = vpop.f32.mrf.mxu1 }
 0x31a   : > { %v2046_v14 = vpop.f32.mrf.mxu0  ;;  %v13001_v61 = vpop.f32.mrf.mxu1 }
 0x31c   : > { %v2151_v19 = vpop.f32.mrf.mxu0  ;;  %v2192_v17 = vpop.f32.mrf.mxu1 }
 0x31d   : > { %v2198_v21 = vadd.f32 %v2151_v19, %v2088_v11  ;;  %v2200_v22 = vadd.f32 %v2192_v17, %v2090_v15 }
 0x31e   : > { %v2153_v23 = vpop.f32.mrf.mxu0  ;;  %v13006_v7 = vpop.f32.mrf.mxu1 }
 0x31f   : > { %v2208_v24 = vadd.f32 %v2206_v16, %v2198_v21  ;;  %v2210_v25 = vadd.f32 %v2206_v16, %v2200_v22  ;;  %v2199_v26 = vadd.f32 %v2153_v23, %v2089_v20  ;;  %v12312_v7 = vld [vmem:[%s16585_s2 + $0x48] sm:$0xf] }
 0x320   : > { %v2155_v27 = vpop.f32.mrf.mxu0  ;;  %v2195_v28 = vpop.f32.mrf.mxu1 }
 0x321   : > { %v14541_v29 = vmul.f32 %v2208_v24, %v14334_v31  ;;  %v14544_v30 = vmul.f32 %v2210_v25, %v14339_v43  ;;  %v2209_v32 = vadd.f32 %v2206_v16, %v2199_v26 }
 0x322   : > { %v2156_v33 = vpop.f32.mrf.mxu0  ;;  %v13007_v34 = vpop.f32.mrf.mxu1 }
 0x323   : > { %vm2219_vm14 = vcmp.ge.f32.partialorder %v14544_v30, 0.0  ;;  %v2222_v35 = vmul.f32 0.2, %v14544_v30  ;;  %v2220_v36 = vmul.f32 0.2, %v14541_v29  ;;  %v14550_v37 = vmul.f32 %v2209_v32, %v14336_v38 }
 0x324   : > { %vm2217_vm15 = vcmp.ge.f32.partialorder %v14541_v29, 0.0 }
 0x325   : > { %v14554_v39 = vsel %vm2219_vm14, %v14544_v30, %v2222_v35  ;;  %vm2218_vm11 = vcmp.ge.f32.partialorder %v14550_v37, 0.0  ;;  %v2221_v40 = vmul.f32 0.2, %v14550_v37  ;;  %v14561_v41 = vsel %vm2217_vm15, %v14541_v29, %v2220_v36  ;;  %v12320_v36 = vld [vmem:[%s16585_s2 + $0x50] sm:$0xf] }
 0x326   : > { %2244 = vrot.lane.b32.xlu0 %v14554_v39, %s14067_s21 }
 0x327   : > { %v14564_v42 = vsel %vm2218_vm11, %v14550_v37, %v2221_v40 }
 0x328   : > { %v13649_v44 = vpack.i.bf16 %v14564_v42, %v14561_v41 }
 0x32a   : > { %2230 = vrot.lane.b32.xlu0 %v14554_v39, %s14068_s22  ;;  %13650 = vrot.lane.b32.xlu1 %v13649_v44, %s14067_s21 }
 0x32e   : > { %2444 = vrot.lane.b32.xlu0 %v14554_v39, %s14069_s23  ;;  %13655 = vrot.lane.b32.xlu1 %v13649_v44, %s14068_s22 }
 0x332   : > { %2554 = vrot.lane.b32.xlu0 %v14554_v39, %s14070_s24  ;;  %13660 = vrot.lane.b32.xlu1 %v13649_v44, %s14069_s23 }
 0x336   : > { %2765 = vrot.lane.b32.xlu0 %v14554_v39, %s14071_s25  ;;  %13665 = vrot.lane.b32.xlu1 %v13649_v44, %s14070_s24 }
 0x33a   : > { %2875 = vrot.lane.b32.xlu0 %v14554_v39, %s14072_s26  ;;  %13670 = vrot.lane.b32.xlu1 %v13649_v44, %s14071_s25 }
 0x33e   : > { %2985 = vrot.lane.b32.xlu0 %v14554_v39, %s14073_s27  ;;  %13675 = vrot.lane.b32.xlu1 %v13649_v44, %s14072_s26 }
 0x342   : > { %3095 = vrot.lane.b32.xlu0 %v14554_v39, %s14074_s28  ;;  %13680 = vrot.lane.b32.xlu1 %v13649_v44, %s14073_s27 }
 0x346   : > { %13685 = vrot.lane.b32.xlu1 %v13649_v44, %s14074_s28 }
 0x34a   : > { %3205 = vperm.xlu1 %13689, %v12348_v45  }
 0x398   : > { %v2245_v46 = vpop.permute.xlu0 %2244 }
 0x39c   : > { %v13651_v47 = vpop.permute.xlu1 %13650  ;;  %v2231_v52 = vpop.permute.xlu0 %2230 }
 0x39d   : > { %v13653_v48 = vunpack.i.h.bf16 %v13651_v47  ;;  %v13652_v49 = vunpack.i.l.bf16 %v13651_v47 }
 0x39f   : > { %v2247_v50 = vsel %vm241_vm1, %v13652_v49, %v13653_v48  ;;  %v2248_v57 = vsel %vm241_vm1, %v2245_v46, %v13652_v49  ;;  %v2246_v58 = vsel %vm241_vm1, %v13653_v48, %v2245_v46  ;;  %v2663_v46 = vpack.c.bf16 %v14564_v42, %v14564_v42 }
 0x3a0   : > { %v13656_v62 = vpop.permute.xlu1 %13655  ;;  %v2252_v63 = vpack.c.bf16 %v2247_v50, %v2247_v50  ;;  %v2251_v51 = vpack.c.bf16 %v2248_v57, %v2248_v57  ;;  %v2253_v55 = vpack.c.bf16 %v2246_v58, %v2246_v58  ;;  %v2445_v14 = vpop.permute.xlu0 %2444  ;;  %v2662_v49 = vpack.c.bf16 %v14561_v41, %v14561_v41  ;;  %v12324_v57 = vld [vmem:[%s16585_s2 + $0x54] sm:$0xf] }
 0x3a1   : > { %v13658_v12 = vunpack.i.h.bf16 %v13656_v62  ;;  %v13657_v2 = vunpack.i.l.bf16 %v13656_v62  ;;  %v2664_v50 = vpack.c.bf16 %v14554_v39, %v14554_v39 }
 0x3a2   : > { %12314 = vmatprep.subr.msk.bf16.mxu0 %vm254_vm3, %v2252_v63  ;;  %v2258_v5 = vsel %vm254_vm3, %v2251_v51, 0  ;;  %v2264_v59 = vsel %vm254_vm3, %v2253_v55, 0  ;;  %v2669_v62 = vsel %vm254_vm3, %v2662_v49, 0 }
 0x3a3   : > { %2281 = vmatpush1.bf16.msra.mxu0 %v2258_v5  ;;  %13009 = vmatpush3.bf16.msra.mxu1 %v2264_v59  ;;  %v2233_v9 = vsel %vm227_vm2, %v13657_v2, %v13658_v12  ;;  %v2234_v10 = vsel %vm227_vm2, %v2231_v52, %v13657_v2  ;;  %v2232_v53 = vsel %vm227_vm2, %v13658_v12, %v2231_v52  ;;  %v2675_v41 = vsel %vm254_vm3, %v2664_v50, 0 }
 0x3a4   : > { %v13661_v54 = vpop.permute.xlu1 %13660  ;;  %v2238_v4 = vpack.c.bf16 %v2233_v9, %v2233_v9  ;;  %13014 = vmatprep.subr.bf16.mxu1 %v14064_v0  ;;  %v2237_v3 = vpack.c.bf16 %v2234_v10, %v2234_v10  ;;  %v2239_v56 = vpack.c.bf16 %v2232_v53, %v2232_v53  ;;  %v2555_v26 = vpop.permute.xlu0 %2554 }
 0x3a5   : > { %v13663_v6 = vunpack.i.h.bf16 %v13661_v54  ;;  %v13662_v13 = vunpack.i.l.bf16 %v13661_v54 }
 0x3a6   : > { %12315 = vmatmul.mubr.msk.bf16.vlgmr.msra.gmra.mxu0 %vm250_vm5, %v12313_v60  ;;  %13011 = vmatmul.mubr.msk.bf16.vlgmr.msra.gmra.mxu1 %vm250_vm5, %v12313_v60  ;;  %v2351_v61 = vsel %vm254_vm3, %v2237_v3, 0  ;;  %v2357_v18 = vsel %vm254_vm3, %v2239_v56, 0  ;;  %v12328_v60 = vld [vmem:[%s16585_s2 + $0x58] sm:$0xf] }
 0x3a7   : > { %12317 = vmatprep.subr.msk.bf16.mxu0 %vm254_vm3, %v2238_v4  ;;  %13015 = vmatpush3.bf16.msra.mxu1 %v2357_v18  ;;  %v2447_v11 = vsel %vm444_vm4, %v13662_v13, %v13663_v6  ;;  %v2448_v15 = vsel %vm444_vm4, %v2445_v14, %v13662_v13  ;;  %v2446_v19 = vsel %vm444_vm4, %v13663_v6, %v2445_v14 }
 0x3a8   : > { %2374 = vmatpush1.bf16.msra.mxu0 %v2351_v61  ;;  %v13666_v17 = vpop.permute.xlu1 %13665  ;;  %v2452_v16 = vpack.c.bf16 %v2447_v11, %v2447_v11  ;;  %2391 = vmatprep.mubr.bf16.mxu0 %v14065_v1  ;;  %v2451_v22 = vpack.c.bf16 %v2448_v15, %v2448_v15  ;;  %v2453_v23 = vpack.c.bf16 %v2446_v19, %v2446_v19  ;;  %v2766_v48 = vpop.permute.xlu0 %2765  ;;  %v12332_v11 = vld [vmem:[%s16585_s2 + $0x5c] sm:$0xf] }
 0x3a9   : > { %v13668_v20 = vunpack.i.h.bf16 %v13666_v17  ;;  %v13667_v21 = vunpack.i.l.bf16 %v13666_v17  ;;  %13016 = vmatprep.mubr.msk.bf16.mxu1 %vm14066_vm0, %v14064_v0  ;;  %13020 = vmatprep.subr.bf16.mxu1 %v14064_v0 }
 0x3aa   : > { %12321 = vmatprep.subr.msk.bf16.mxu0 %vm254_vm3, %v2452_v16  ;;  %v2458_v27 = vsel %vm254_vm3, %v2451_v22, 0  ;;  %v2464_v28 = vsel %vm254_vm3, %v2453_v23, 0 }
 0x3ab   : > { %v2557_v24 = vsel %vm555_vm6, %v13667_v21, %v13668_v20  ;;  %v2558_v32 = vsel %vm555_vm6, %v2555_v26, %v13667_v21  ;;  %v2556_v33 = vsel %vm555_vm6, %v13668_v20, %v2555_v26 }
 0x3ac   : > { %v2562_v25 = vpack.c.bf16 %v2557_v24, %v2557_v24  ;;  %v2561_v34 = vpack.c.bf16 %v2558_v32, %v2558_v32  ;;  %v2563_v35 = vpack.c.bf16 %v2556_v33, %v2556_v33  ;;  %v13671_v40 = vpop.permute.xlu1 %13670  ;;  %v2876_v12 = vpop.permute.xlu0 %2875 }
 0x3ad   : > { %v13673_v47 = vunpack.i.h.bf16 %v13671_v40  ;;  %v13672_v42 = vunpack.i.l.bf16 %v13671_v40 }
 0x3ae   : > { %12318 = vmatmul.mubr.msk.bf16.vlgmr.msra.gmra.mxu0 %vm250_vm5, %v12312_v7  ;;  %13017 = vmatmul.mubr.msk.bf16.vlgmr.msra.gmra.mxu1 %vm250_vm5, %v12312_v7  ;;  %v2568_v44 = vsel %vm254_vm3, %v2561_v34, 0  ;;  %v2574_v45 = vsel %vm254_vm3, %v2563_v35, 0 }
 0x3af   : > { %2481 = vmatpush1.bf16.msra.mxu0 %v2458_v27  ;;  %13021 = vmatpush3.bf16.msra.mxu1 %v2464_v28  ;;  %v2767_v58 = vsel %vm767_vm7, %v13673_v47, %v2766_v48  ;;  %v2768_v39 = vsel %vm767_vm7, %v13672_v42, %v13673_v47  ;;  %v2769_v55 = vsel %vm767_vm7, %v2766_v48, %v13672_v42  ;;  %v12336_v27 = vld [vmem:[%s16585_s2 + $0x60] sm:$0xf]  ;;  %v12344_v48 = vld [vmem:[%s16585_s2 + $0x68] sm:$0xf] }
 0x3b0   : > { %12325 = vmatprep.subr.msk.bf16.mxu0 %vm254_vm3, %v2562_v25  ;;  %2498 = vmatprep.mubr.bf16.mxu0 %v14065_v1  ;;  %v13676_v52 = vpop.permute.xlu1 %13675  ;;  %v2773_v63 = vpack.c.bf16 %v2767_v58, %v2767_v58  ;;  %v2772_v2 = vpack.c.bf16 %v2768_v39, %v2768_v39  ;;  %v2774_v5 = vpack.c.bf16 %v2769_v55, %v2769_v55  ;;  %v2986_v13 = vpop.permute.xlu0 %2985 }
 0x3b1   : > { %13022 = vmatprep.mubr.msk.bf16.mxu1 %vm14066_vm0, %v14064_v0  ;;  %13026 = vmatprep.subr.bf16.mxu1 %v14064_v0  ;;  %v13678_v51 = vunpack.i.h.bf16 %v13676_v52  ;;  %v13677_v59 = vunpack.i.l.bf16 %v13676_v52 }
 0x3b2   : > { %v2779_v53 = vsel %vm254_vm3, %v2772_v2, 0  ;;  %v2785_v54 = vsel %vm254_vm3, %v2774_v5, 0 }
 0x3b3   : > { %v2877_v9 = vsel %vm878_vm8, %v13678_v51, %v2876_v12  ;;  %v2878_v56 = vsel %vm878_vm8, %v13677_v59, %v13678_v51  ;;  %v2879_v6 = vsel %vm878_vm8, %v2876_v12, %v13677_v59 }
 0x3b4   : > { %v13681_v10 = vpop.permute.xlu1 %13680  ;;  %v2883_v4 = vpack.c.bf16 %v2877_v9, %v2877_v9  ;;  %v2882_v14 = vpack.c.bf16 %v2878_v56, %v2878_v56  ;;  %v2884_v61 = vpack.c.bf16 %v2879_v6, %v2879_v6  ;;  %v3096_v7 = vpop.permute.xlu0 %3095 }
 0x3b5   : > { %v13683_v3 = vunpack.i.h.bf16 %v13681_v10  ;;  %v13682_v18 = vunpack.i.l.bf16 %v13681_v10 }
 0x3b6   : > { %12322 = vmatmul.mubr.msk.bf16.vlgmr.msra.gmra.mxu0 %vm250_vm5, %v12320_v36  ;;  %13023 = vmatmul.mubr.msk.bf16.vlgmr.msra.gmra.mxu1 %vm250_vm5, %v12320_v36  ;;  %v2889_v17 = vsel %vm254_vm3, %v2882_v14, 0  ;;  %v2895_v16 = vsel %vm254_vm3, %v2884_v61, 0 }
 0x3b7   : > { %2591 = vmatpush1.bf16.msra.mxu0 %v2568_v44  ;;  %13027 = vmatpush3.bf16.msra.mxu1 %v2574_v45  ;;  %v2987_v15 = vsel %vm989_vm9, %v13683_v3, %v2986_v13  ;;  %v2988_v22 = vsel %vm989_vm9, %v13682_v18, %v13683_v3  ;;  %v2989_v23 = vsel %vm989_vm9, %v2986_v13, %v13682_v18  ;;  %v12340_v45 = vld [vmem:[%s16585_s2 + $0x64] sm:$0xf] }
 0x3b8   : > { %12329 = vmatprep.subr.msk.bf16.mxu0 %vm254_vm3, %v2663_v46  ;;  %2608 = vmatprep.mubr.bf16.mxu0 %v14065_v1  ;;  %v13686_v19 = vpop.permute.xlu1 %13685  ;;  %v2993_v20 = vpack.c.bf16 %v2987_v15, %v2987_v15  ;;  %v2992_v24 = vpack.c.bf16 %v2988_v22, %v2988_v22  ;;  %v2994_v25 = vpack.c.bf16 %v2989_v23, %v2989_v23 }
 0x3b9   : > { %13028 = vmatprep.mubr.msk.bf16.mxu1 %vm14066_vm0, %v14064_v0  ;;  %13032 = vmatprep.subr.bf16.mxu1 %v14064_v0  ;;  %v13688_v21 = vunpack.i.h.bf16 %v13686_v19  ;;  %v13687_v26 = vunpack.i.l.bf16 %v13686_v19 }
 0x3ba   : > { %v2999_v32 = vsel %vm254_vm3, %v2992_v24, 0  ;;  %v3005_v33 = vsel %vm254_vm3, %v2994_v25, 0 }
 0x3bb   : > { %v3097_v28 = vsel %vm1100_vm10, %v13688_v21, %v3096_v7  ;;  %v3098_v35 = vsel %vm1100_vm10, %v13687_v26, %v13688_v21  ;;  %v3099_v36 = vsel %vm1100_vm10, %v3096_v7, %v13687_v26 }
 0x3bc   : > { %v3103_v34 = vpack.c.bf16 %v3097_v28, %v3097_v28  ;;  %v3102_v40 = vpack.c.bf16 %v3098_v35, %v3098_v35  ;;  %v3104_v44 = vpack.c.bf16 %v3099_v36, %v3099_v36 }
 0x3be   : > { %12326 = vmatmul.mubr.msk.bf16.vlgmr.msra.gmra.mxu0 %vm250_vm5, %v12324_v57  ;;  %13029 = vmatmul.mubr.msk.bf16.vlgmr.msra.gmra.mxu1 %vm250_vm5, %v12324_v57  ;;  %v3109_v46 = vsel %vm254_vm3, %v3102_v40, 0  ;;  %v3115_v47 = vsel %vm254_vm3, %v3104_v44, 0 }
 0x3bf   : > { %2692 = vmatpush1.bf16.msra.mxu0 %v2669_v62  ;;  %13033 = vmatpush3.bf16.msra.mxu1 %v2675_v41 }
 0x3c0   : > { %12333 = vmatprep.subr.msk.bf16.mxu0 %vm254_vm3, %v2773_v63  ;;  %2709 = vmatprep.mubr.bf16.mxu0 %v14065_v1 }
 0x3c1   : > { %13034 = vmatprep.mubr.msk.bf16.mxu1 %vm14066_vm0, %v14064_v0  ;;  %13038 = vmatprep.subr.bf16.mxu1 %v14064_v0 }
 0x3c6   : > { %12330 = vmatmul.mubr.msk.bf16.vlgmr.msra.gmra.mxu0 %vm250_vm5, %v12328_v60  ;;  %13035 = vmatmul.mubr.msk.bf16.vlgmr.msra.gmra.mxu1 %vm250_vm5, %v12328_v60 }
 0x3c7   : > { %2802 = vmatpush1.bf16.msra.mxu0 %v2779_v53  ;;  %13039 = vmatpush3.bf16.msra.mxu1 %v2785_v54 }
 0x3c8   : > { %12337 = vmatprep.subr.msk.bf16.mxu0 %vm254_vm3, %v2883_v4  ;;  %2819 = vmatprep.mubr.bf16.mxu0 %v14065_v1 }
 0x3c9   : > { %13040 = vmatprep.mubr.msk.bf16.mxu1 %vm14066_vm0, %v14064_v0  ;;  %13044 = vmatprep.subr.bf16.mxu1 %v14064_v0 }
 0x3ce   : > { %12334 = vmatmul.mubr.msk.bf16.vlgmr.msra.gmra.mxu0 %vm250_vm5, %v12332_v11  ;;  %13041 = vmatmul.mubr.msk.bf16.vlgmr.msra.gmra.mxu1 %vm250_vm5, %v12332_v11 }
 0x3cf   : > { %2912 = vmatpush1.bf16.msra.mxu0 %v2889_v17  ;;  %13045 = vmatpush3.bf16.msra.mxu1 %v2895_v16 }
 0x3d0   : > { %12341 = vmatprep.subr.msk.bf16.mxu0 %vm254_vm3, %v2993_v20  ;;  %2929 = vmatprep.mubr.bf16.mxu0 %v14065_v1 }
 0x3d1   : > { %13046 = vmatprep.mubr.msk.bf16.mxu1 %vm14066_vm0, %v14064_v0  ;;  %13050 = vmatprep.subr.bf16.mxu1 %v14064_v0 }
 0x3d6   : > { %12338 = vmatmul.mubr.msk.bf16.vlgmr.msra.gmra.mxu0 %vm250_vm5, %v12336_v27  ;;  %13047 = vmatmul.mubr.msk.bf16.vlgmr.msra.gmra.mxu1 %vm250_vm5, %v12336_v27 }
 0x3d7   : > { %3022 = vmatpush1.bf16.msra.mxu0 %v2999_v32  ;;  %13051 = vmatpush3.bf16.msra.mxu1 %v3005_v33 }
 0x3d8   : > { %12345 = vmatprep.subr.msk.bf16.mxu0 %vm254_vm3, %v3103_v34  ;;  %3039 = vmatprep.mubr.bf16.mxu0 %v14065_v1 }
 0x3d9   : > { %13052 = vmatprep.mubr.msk.bf16.mxu1 %vm14066_vm0, %v14064_v0  ;;  %13056 = vmatprep.subr.bf16.mxu1 %v14064_v0 }
 0x3de   : > { %12342 = vmatmul.mubr.msk.bf16.vlgmr.msra.gmra.mxu0 %vm250_vm5, %v12340_v45  ;;  %13053 = vmatmul.mubr.msk.bf16.vlgmr.msra.gmra.mxu1 %vm250_vm5, %v12340_v45 }
 0x3df   : > { %3132 = vmatpush1.bf16.msra.mxu0 %v3109_v46  ;;  %13057 = vmatpush3.bf16.msra.mxu1 %v3115_v47 }
 0x3e0   : > { %3149 = vmatprep.mubr.bf16.mxu0 %v14065_v1  ;;  %13058 = vmatprep.mubr.msk.bf16.mxu1 %vm14066_vm0, %v14064_v0 }
 0x3e1   : > { %13062 = vmatprep.subr.bf16.mxu1 %v14064_v0 }
 0x3e6   : > { %12346 = vmatmul.mubr.msk.bf16.vlgmr.msra.gmra.mxu0 %vm250_vm5, %v12344_v48  ;;  %13059 = vmatmul.mubr.msk.bf16.vlgmr.msra.gmra.mxu1 %vm250_vm5, %v12344_v48 }
 0x3e7   : > { %3295 = vmatprep.mubr.bf16.mxu0 %v14065_v1  ;;  %13064 = vmatprep.mubr.msk.bf16.mxu1 %vm14066_vm0, %v14064_v0 }
 0x466   : > { %v2300_v49 = vpop.f32.mrf.mxu0  ;;  %v2341_v50 = vpop.f32.mrf.mxu1 }
 0x468   : > { %v2302_v42 = vpop.f32.mrf.mxu0  ;;  %v13012_v57 = vpop.f32.mrf.mxu1 }
 0x46a   : > { %v2304_v58 = vpop.f32.mrf.mxu0  ;;  %v2344_v52 = vpop.f32.mrf.mxu1 }
 0x46c   : > { %v2305_v62 = vpop.f32.mrf.mxu0  ;;  %v13013_v41 = vpop.f32.mrf.mxu1 }
 0x46e   : > { %v2393_v63 = vpop.f32.mrf.mxu0  ;;  %v2434_v51 = vpop.f32.mrf.mxu1 }
 0x46f   : > { %v2394_v46 = vadd.f32 %v2393_v63, %v2300_v49  ;;  %v2435_v47 = vadd.f32 %v2434_v51, %v2341_v50 }
 0x470   : > { %v2395_v39 = vpop.f32.mrf.mxu0  ;;  %v13018_v55 = vpop.f32.mrf.mxu1 }
 0x471   : > { %v2396_v58 = vadd.f32 %v2395_v39, %v2302_v42 }
 0x472   : > { %v2397_v12 = vpop.f32.mrf.mxu0  ;;  %v2437_v2 = vpop.f32.mrf.mxu1 }
 0x474   : > { %v2398_v5 = vpop.f32.mrf.mxu0  ;;  %v13019_v59 = vpop.f32.mrf.mxu1 }
 0x476   : > { %v2500_v60 = vpop.f32.mrf.mxu0  ;;  %v2541_v9 = vpop.f32.mrf.mxu1 }
 0x477   : > { %v2547_v52 = vadd.f32 %v2500_v60, %v2394_v46  ;;  %v2549_v62 = vadd.f32 %v2541_v9, %v2435_v47 }
 0x478   : > { %v2502_v10 = vpop.f32.mrf.mxu0  ;;  %v13024_v53 = vpop.f32.mrf.mxu1 }
 0x479   : > { %v2548_v12 = vadd.f32 %v2502_v10, %v2396_v58 }
 0x47a   : > { %v2504_v54 = vpop.f32.mrf.mxu0  ;;  %v2544_v4 = vpop.f32.mrf.mxu1 }
 0x47c   : > { %v2505_v3 = vpop.f32.mrf.mxu0  ;;  %v13025_v56 = vpop.f32.mrf.mxu1 }
 0x47e   : > { %v2610_v6 = vpop.f32.mrf.mxu0  ;;  %v2651_v13 = vpop.f32.mrf.mxu1 }
 0x47f   : > { %v2657_v2 = vadd.f32 %v2610_v6, %v2547_v52  ;;  %v2659_v5 = vadd.f32 %v2651_v13, %v2549_v62 }
 0x480   : > { %v2612_v14 = vpop.f32.mrf.mxu0  ;;  %v13030_v61 = vpop.f32.mrf.mxu1 }
 0x481   : > { %v2658_v54 = vadd.f32 %v2612_v14, %v2548_v12 }
 0x482   : > { %v2614_v18 = vpop.f32.mrf.mxu0  ;;  %v2654_v11 = vpop.f32.mrf.mxu1 }
 0x484   : > { %v2615_v15 = vpop.f32.mrf.mxu0  ;;  %v13031_v19 = vpop.f32.mrf.mxu1 }
 0x485   : > { %v3206_v15 = vpop.permute.xlu1 %3205 }
 0x486   : > { %v2711_v17 = vpop.f32.mrf.mxu0  ;;  %v2752_v16 = vpop.f32.mrf.mxu1 }
 0x487   : > { %v2758_v4 = vadd.f32 %v2711_v17, %v2657_v2  ;;  %v2760_v3 = vadd.f32 %v2752_v16, %v2659_v5 }
 0x488   : > { %v2713_v20 = vpop.f32.mrf.mxu0  ;;  %v13036_v21 = vpop.f32.mrf.mxu1 }
 0x489   : > { %v2759_v18 = vadd.f32 %v2713_v20, %v2658_v54 }
 0x48a   : > { %v2715_v22 = vpop.f32.mrf.mxu0  ;;  %v2755_v23 = vpop.f32.mrf.mxu1 }
 0x48c   : > { %v2716_v7 = vpop.f32.mrf.mxu0  ;;  %v13037_v24 = vpop.f32.mrf.mxu1 }
 0x48e   : > { %v2821_v25 = vpop.f32.mrf.mxu0  ;;  %v2862_v26 = vpop.f32.mrf.mxu1 }
 0x48f   : > { %v2868_v49 = vadd.f32 %v2821_v25, %v2758_v4  ;;  %v2870_v50 = vadd.f32 %v2862_v26, %v2760_v3 }
 0x490   : > { %v2823_v27 = vpop.f32.mrf.mxu0  ;;  %v13042_v28 = vpop.f32.mrf.mxu1 }
 0x491   : > { %v2869_v42 = vadd.f32 %v2823_v27, %v2759_v18 }
 0x492   : > { %v2825_v32 = vpop.f32.mrf.mxu0  ;;  %v2865_v33 = vpop.f32.mrf.mxu1 }
 0x494   : > { %v2826_v34 = vpop.f32.mrf.mxu0  ;;  %v13043_v35 = vpop.f32.mrf.mxu1 }
 0x496   : > { %v2931_v36 = vpop.f32.mrf.mxu0  ;;  %v2972_v40 = vpop.f32.mrf.mxu1 }
 0x497   : > { %v2978_v39 = vadd.f32 %v2931_v36, %v2868_v49  ;;  %v2980_v60 = vadd.f32 %v2972_v40, %v2870_v50  ;;  %v12350_v49 = vld [vmem:[%s16585_s2 + $0x70] sm:$0xf] }
 0x498   : > { %v2933_v44 = vpop.f32.mrf.mxu0  ;;  %v13048_v45 = vpop.f32.mrf.mxu1 }
 0x499   : > { %v2979_v10 = vadd.f32 %v2933_v44, %v2869_v42 }
 0x49a   : > { %v2935_v48 = vpop.f32.mrf.mxu0  ;;  %v2975_v57 = vpop.f32.mrf.mxu1 }
 0x49b   : > { %v12385_v57 = vld [vmem:[%s16586_s3 + $0x18] sm:$0xff] }
 0x49c   : > { %v2936_v41 = vpop.f32.mrf.mxu0  ;;  %v13049_v55 = vpop.f32.mrf.mxu1 }
 0x49e   : > { %v3041_v59 = vpop.f32.mrf.mxu0  ;;  %v3082_v53 = vpop.f32.mrf.mxu1 }
 0x49f   : > { %v3088_v6 = vadd.f32 %v3041_v59, %v2978_v39  ;;  %v3090_v13 = vadd.f32 %v3082_v53, %v2980_v60 }
 0x4a0   : > { %v3043_v56 = vpop.f32.mrf.mxu0  ;;  %v13054_v61 = vpop.f32.mrf.mxu1 }
 0x4a1   : > { %v3089_v17 = vadd.f32 %v3043_v56, %v2979_v10 }
 0x4a2   : > { %v3045_v63 = vpop.f32.mrf.mxu0  ;;  %v3085_v51 = vpop.f32.mrf.mxu1 }
 0x4a4   : > { %v3046_v9 = vpop.f32.mrf.mxu0  ;;  %v13055_v11 = vpop.f32.mrf.mxu1 }
 0x4a6   : > { %v3151_v19 = vpop.f32.mrf.mxu0  ;;  %v3192_v14 = vpop.f32.mrf.mxu1 }
 0x4a7   : > { %v3198_v16 = vadd.f32 %v3151_v19, %v3088_v6  ;;  %v3200_v21 = vadd.f32 %v3192_v14, %v3090_v13 }
 0x4a8   : > { %v3153_v22 = vpop.f32.mrf.mxu0  ;;  %v13060_v20 = vpop.f32.mrf.mxu1 }
 0x4a9   : > { %v3208_v23 = vadd.f32 %v3206_v15, %v3198_v16  ;;  %v3210_v7 = vadd.f32 %v3206_v15, %v3200_v21  ;;  %v3199_v24 = vadd.f32 %v3153_v22, %v3089_v17 }
 0x4aa   : > { %v3155_v25 = vpop.f32.mrf.mxu0  ;;  %v3195_v26 = vpop.f32.mrf.mxu1 }
 0x4ab   : > { %v3211_v27 = vmul.f32 %v3208_v23, %v14334_v31  ;;  %v3213_v28 = vmul.f32 %v3210_v7, %v14339_v43  ;;  %v3209_v32 = vadd.f32 %v3206_v15, %v3199_v24  ;;  %v12349_v24 = vld [vmem:[%s16585_s2 + $0x6c] sm:$0xf] }
 0x4ac   : > { %v3156_v33 = vpop.f32.mrf.mxu0  ;;  %v13061_v34 = vpop.f32.mrf.mxu1 }
 0x4ad   : > { %vm3216_vm12 = vcmp.ge.f32.partialorder %v3213_v28, 0.0  ;;  %v3219_v35 = vmul.f32 0.2, %v3213_v28  ;;  %v3217_v36 = vmul.f32 0.2, %v3211_v27  ;;  %v3212_v40 = vmul.f32 %v3209_v32, %v14336_v38 }
 0x4ae   : > { %vm3214_vm13 = vcmp.ge.f32.partialorder %v3211_v27, 0.0 }
 0x4af   : > { %v14758_v44 = vsel %vm3216_vm12, %v3213_v28, %v3219_v35  ;;  %vm3215_vm14 = vcmp.ge.f32.partialorder %v3212_v40, 0.0  ;;  %v3218_v45 = vmul.f32 0.2, %v3212_v40  ;;  %v14762_v46 = vsel %vm3214_vm13, %v3211_v27, %v3217_v36 }
 0x4b0   : > { %3241 = vrot.lane.b32.xlu1 %v14758_v44, %s14067_s21 }
 0x4b1   : > { %v14764_v47 = vsel %vm3215_vm14, %v3212_v40, %v3218_v45  ;;  %v12357_v40 = vld [vmem:[%s16585_s2 + $0x74] sm:$0xf] }
 0x4b2   : > { %v13690_v48 = vpack.i.bf16 %v14764_v47, %v14762_v46 }
 0x4b4   : > { %3227 = vrot.lane.b32.xlu1 %v14758_v44, %s14068_s22  ;;  %13691 = vrot.lane.b32.xlu0 %v13690_v48, %s14067_s21 }
 0x4b8   : > { %3441 = vrot.lane.b32.xlu1 %v14758_v44, %s14069_s23  ;;  %13696 = vrot.lane.b32.xlu0 %v13690_v48, %s14068_s22 }
 0x4bc   : > { %3551 = vrot.lane.b32.xlu1 %v14758_v44, %s14070_s24  ;;  %13701 = vrot.lane.b32.xlu0 %v13690_v48, %s14069_s23 }
 0x4c0   : > { %3762 = vrot.lane.b32.xlu1 %v14758_v44, %s14071_s25  ;;  %13706 = vrot.lane.b32.xlu0 %v13690_v48, %s14070_s24 }
 0x4c4   : > { %3872 = vrot.lane.b32.xlu1 %v14758_v44, %s14072_s26  ;;  %13711 = vrot.lane.b32.xlu0 %v13690_v48, %s14071_s25 }
 0x4c8   : > { %3982 = vrot.lane.b32.xlu1 %v14758_v44, %s14073_s27  ;;  %13716 = vrot.lane.b32.xlu0 %v13690_v48, %s14072_s26 }
 0x4cc   : > { %4092 = vrot.lane.b32.xlu1 %v14758_v44, %s14074_s28  ;;  %13721 = vrot.lane.b32.xlu0 %v13690_v48, %s14073_s27 }
 0x4d0   : > { %13726 = vrot.lane.b32.xlu0 %v13690_v48, %s14074_s28 }
 0x4d4   : > { %4202 = vperm.xlu0 %13608, %v12385_v57  }
 0x522   : > { %v3242_v58 = vpop.permute.xlu1 %3241 }
 0x526   : > { %v13692_v52 = vpop.permute.xlu0 %13691  ;;  %v3228_v5 = vpop.permute.xlu1 %3227 }
 0x527   : > { %v13694_v62 = vunpack.i.h.bf16 %v13692_v52  ;;  %v13693_v41 = vunpack.i.l.bf16 %v13692_v52 }
 0x529   : > { %v3244_v55 = vsel %vm241_vm1, %v13693_v41, %v13694_v62  ;;  %v3245_v12 = vsel %vm241_vm1, %v3242_v58, %v13693_v41  ;;  %v3243_v2 = vsel %vm241_vm1, %v13694_v62, %v3242_v58  ;;  %v3660_v58 = vpack.c.bf16 %v14764_v47, %v14764_v47 }
 0x52a   : > { %v13697_v59 = vpop.permute.xlu0 %13696  ;;  %v3249_v53 = vpack.c.bf16 %v3244_v55, %v3244_v55  ;;  %v3248_v54 = vpack.c.bf16 %v3245_v12, %v3245_v12  ;;  %v3250_v4 = vpack.c.bf16 %v3243_v2, %v3243_v2  ;;  %v3442_v6 = vpop.permute.xlu1 %3441  ;;  %v3659_v41 = vpack.c.bf16 %v14762_v46, %v14762_v46  ;;  %v12361_v12 = vld [vmem:[%s16585_s2 + $0x78] sm:$0xf] }
 0x52b   : > { %v13699_v3 = vunpack.i.h.bf16 %v13697_v59  ;;  %v13698_v56 = vunpack.i.l.bf16 %v13697_v59  ;;  %v3661_v55 = vpack.c.bf16 %v14758_v44, %v14758_v44 }
 0x52c   : > { %12351 = vmatprep.subr.msk.bf16.mxu0 %vm254_vm3, %v3249_v53  ;;  %v3255_v61 = vsel %vm254_vm3, %v3248_v54, 0  ;;  %v3261_v18 = vsel %vm254_vm3, %v3250_v4, 0  ;;  %v3666_v59 = vsel %vm254_vm3, %v3659_v41, 0 }
 0x52d   : > { %3278 = vmatpush1.bf16.msra.mxu0 %v3255_v61  ;;  %13063 = vmatpush3.bf16.msra.mxu1 %v3261_v18  ;;  %v3230_v50 = vsel %vm227_vm2, %v13698_v56, %v13699_v3  ;;  %v3231_v63 = vsel %vm227_vm2, %v3228_v5, %v13698_v56  ;;  %v3229_v51 = vsel %vm227_vm2, %v13699_v3, %v3228_v5  ;;  %v3672_v46 = vsel %vm254_vm3, %v3661_v55, 0 }
 0x52e   : > { %v13702_v42 = vpop.permute.xlu0 %13701  ;;  %v3235_v39 = vpack.c.bf16 %v3230_v50, %v3230_v50  ;;  %13068 = vmatprep.subr.bf16.mxu1 %v14064_v0  ;;  %v3234_v60 = vpack.c.bf16 %v3231_v63, %v3231_v63  ;;  %v3236_v9 = vpack.c.bf16 %v3229_v51, %v3229_v51  ;;  %v3552_v27 = vpop.permute.xlu1 %3551 }
 0x52f   : > { %v13704_v11 = vunpack.i.h.bf16 %v13702_v42  ;;  %v13703_v10 = vunpack.i.l.bf16 %v13702_v42 }
 0x530   : > { %12352 = vmatmul.mubr.msk.bf16.vlgmr.msra.gmra.mxu0 %vm250_vm5, %v12350_v49  ;;  %13065 = vmatmul.mubr.msk.bf16.vlgmr.msra.gmra.mxu1 %vm250_vm5, %v12350_v49  ;;  %v3348_v13 = vsel %vm254_vm3, %v3234_v60, 0  ;;  %v3354_v15 = vsel %vm254_vm3, %v3236_v9, 0  ;;  %v12365_v49 = vld [vmem:[%s16585_s2 + $0x7c] sm:$0xf] }
 0x531   : > { %12354 = vmatprep.subr.msk.bf16.mxu0 %vm254_vm3, %v3235_v39  ;;  %13069 = vmatpush3.bf16.msra.mxu1 %v3354_v15  ;;  %v3444_v19 = vsel %vm444_vm4, %v13703_v10, %v13704_v11  ;;  %v3445_v14 = vsel %vm444_vm4, %v3442_v6, %v13703_v10  ;;  %v3443_v17 = vsel %vm444_vm4, %v13704_v11, %v3442_v6 }
 0x532   : > { %3371 = vmatpush1.bf16.msra.mxu0 %v3348_v13  ;;  %v13707_v16 = vpop.permute.xlu0 %13706  ;;  %v3449_v21 = vpack.c.bf16 %v3444_v19, %v3444_v19  ;;  %3388 = vmatprep.mubr.bf16.mxu0 %v14065_v1  ;;  %v3448_v23 = vpack.c.bf16 %v3445_v14, %v3445_v14  ;;  %v3450_v7 = vpack.c.bf16 %v3443_v17, %v3443_v17  ;;  %v3763_v62 = vpop.permute.xlu1 %3762  ;;  %v12369_v19 = vld [vmem:[%s16585_s2 + $0x80] sm:$0xf] }
 0x533   : > { %v13709_v22 = vunpack.i.h.bf16 %v13707_v16  ;;  %v13708_v20 = vunpack.i.l.bf16 %v13707_v16  ;;  %13070 = vmatprep.mubr.msk.bf16.mxu1 %vm14066_vm0, %v14064_v0  ;;  %13074 = vmatprep.subr.bf16.mxu1 %v14064_v0 }
 0x534   : > { %12358 = vmatprep.subr.msk.bf16.mxu0 %vm254_vm3, %v3449_v21  ;;  %v3455_v28 = vsel %vm254_vm3, %v3448_v23, 0  ;;  %v3461_v32 = vsel %vm254_vm3, %v3450_v7, 0 }
 0x535   : > { %v3554_v25 = vsel %vm555_vm6, %v13708_v20, %v13709_v22  ;;  %v3555_v33 = vsel %vm555_vm6, %v3552_v27, %v13708_v20  ;;  %v3553_v34 = vsel %vm555_vm6, %v13709_v22, %v3552_v27 }
 0x536   : > { %v3559_v26 = vpack.c.bf16 %v3554_v25, %v3554_v25  ;;  %v3558_v35 = vpack.c.bf16 %v3555_v33, %v3555_v33  ;;  %v3560_v36 = vpack.c.bf16 %v3553_v34, %v3553_v34  ;;  %v13712_v45 = vpop.permute.xlu0 %13711  ;;  %v3873_v3 = vpop.permute.xlu1 %3872 }
 0x537   : > { %v13714_v52 = vunpack.i.h.bf16 %v13712_v45  ;;  %v13713_v47 = vunpack.i.l.bf16 %v13712_v45 }
 0x538   : > { %12355 = vmatmul.mubr.msk.bf16.vlgmr.msra.gmra.mxu0 %vm250_vm5, %v12349_v24  ;;  %13071 = vmatmul.mubr.msk.bf16.vlgmr.msra.gmra.mxu1 %vm250_vm5, %v12349_v24  ;;  %v3565_v48 = vsel %vm254_vm3, %v3558_v35, 0  ;;  %v3571_v57 = vsel %vm254_vm3, %v3560_v36, 0 }
 0x539   : > { %3478 = vmatpush1.bf16.msra.mxu0 %v3455_v28  ;;  %13075 = vmatpush3.bf16.msra.mxu1 %v3461_v32  ;;  %v3764_v2 = vsel %vm767_vm7, %v13714_v52, %v3763_v62  ;;  %v3765_v44 = vsel %vm767_vm7, %v13713_v47, %v13714_v52  ;;  %v3766_v4 = vsel %vm767_vm7, %v3763_v62, %v13713_v47  ;;  %v12373_v28 = vld [vmem:[%s16585_s2 + $0x84] sm:$0xf]  ;;  %v12381_v62 = vld [vmem:[%s16585_s2 + $0x8c] sm:$0xf] }
 0x53a   : > { %12362 = vmatprep.subr.msk.bf16.mxu0 %vm254_vm3, %v3559_v26  ;;  %3495 = vmatprep.mubr.bf16.mxu0 %v14065_v1  ;;  %v13717_v5 = vpop.permute.xlu0 %13716  ;;  %v3770_v53 = vpack.c.bf16 %v3764_v2, %v3764_v2  ;;  %v3769_v56 = vpack.c.bf16 %v3765_v44, %v3765_v44  ;;  %v3771_v61 = vpack.c.bf16 %v3766_v4, %v3766_v4  ;;  %v3983_v10 = vpop.permute.xlu1 %3982 }
 0x53b   : > { %13076 = vmatprep.mubr.msk.bf16.mxu1 %vm14066_vm0, %v14064_v0  ;;  %13080 = vmatprep.subr.bf16.mxu1 %v14064_v0  ;;  %v13719_v54 = vunpack.i.h.bf16 %v13717_v5  ;;  %v13718_v18 = vunpack.i.l.bf16 %v13717_v5 }
 0x53c   : > { %v3776_v51 = vsel %vm254_vm3, %v3769_v56, 0  ;;  %v3782_v42 = vsel %vm254_vm3, %v3771_v61, 0 }
 0x53d   : > { %v3874_v50 = vsel %vm878_vm8, %v13719_v54, %v3873_v3  ;;  %v3875_v9 = vsel %vm878_vm8, %v13718_v18, %v13719_v54  ;;  %v3876_v11 = vsel %vm878_vm8, %v3873_v3, %v13718_v18 }
 0x53e   : > { %v13722_v63 = vpop.permute.xlu0 %13721  ;;  %v3880_v39 = vpack.c.bf16 %v3874_v50, %v3874_v50  ;;  %v3879_v6 = vpack.c.bf16 %v3875_v9, %v3875_v9  ;;  %v3881_v13 = vpack.c.bf16 %v3876_v11, %v3876_v11  ;;  %v4093_v24 = vpop.permute.xlu1 %4092 }
 0x53f   : > { %v13724_v60 = vunpack.i.h.bf16 %v13722_v63  ;;  %v13723_v15 = vunpack.i.l.bf16 %v13722_v63 }
 0x540   : > { %12359 = vmatmul.mubr.msk.bf16.vlgmr.msra.gmra.mxu0 %vm250_vm5, %v12357_v40  ;;  %13077 = vmatmul.mubr.msk.bf16.vlgmr.msra.gmra.mxu1 %vm250_vm5, %v12357_v40  ;;  %v3886_v16 = vsel %vm254_vm3, %v3879_v6, 0  ;;  %v3892_v21 = vsel %vm254_vm3, %v3881_v13, 0 }
 0x541   : > { %3588 = vmatpush1.bf16.msra.mxu0 %v3565_v48  ;;  %13081 = vmatpush3.bf16.msra.mxu1 %v3571_v57  ;;  %v3984_v14 = vsel %vm989_vm9, %v13724_v60, %v3983_v10  ;;  %v3985_v23 = vsel %vm989_vm9, %v13723_v15, %v13724_v60  ;;  %v3986_v7 = vsel %vm989_vm9, %v3983_v10, %v13723_v15  ;;  %v12377_v57 = vld [vmem:[%s16585_s2 + $0x88] sm:$0xf] }
 0x542   : > { %12366 = vmatprep.subr.msk.bf16.mxu0 %vm254_vm3, %v3660_v58  ;;  %3605 = vmatprep.mubr.bf16.mxu0 %v14065_v1  ;;  %v13727_v17 = vpop.permute.xlu0 %13726  ;;  %v3990_v22 = vpack.c.bf16 %v3984_v14, %v3984_v14  ;;  %v3989_v25 = vpack.c.bf16 %v3985_v23, %v3985_v23  ;;  %v3991_v26 = vpack.c.bf16 %v3986_v7, %v3986_v7 }
 0x543   : > { %13082 = vmatprep.mubr.msk.bf16.mxu1 %vm14066_vm0, %v14064_v0  ;;  %13086 = vmatprep.subr.bf16.mxu1 %v14064_v0  ;;  %v13729_v20 = vunpack.i.h.bf16 %v13727_v17  ;;  %v13728_v27 = vunpack.i.l.bf16 %v13727_v17 }
 0x544   : > { %v3996_v33 = vsel %vm254_vm3, %v3989_v25, 0  ;;  %v4002_v34 = vsel %vm254_vm3, %v3991_v26, 0 }
 0x545   : > { %v4094_v32 = vsel %vm1100_vm10, %v13729_v20, %v4093_v24  ;;  %v4095_v36 = vsel %vm1100_vm10, %v13728_v27, %v13729_v20  ;;  %v4096_v40 = vsel %vm1100_vm10, %v4093_v24, %v13728_v27 }
 0x546   : > { %v4100_v35 = vpack.c.bf16 %v4094_v32, %v4094_v32  ;;  %v4099_v45 = vpack.c.bf16 %v4095_v36, %v4095_v36  ;;  %v4101_v48 = vpack.c.bf16 %v4096_v40, %v4096_v40 }
 0x548   : > { %12363 = vmatmul.mubr.msk.bf16.vlgmr.msra.gmra.mxu0 %vm250_vm5, %v12361_v12  ;;  %13083 = vmatmul.mubr.msk.bf16.vlgmr.msra.gmra.mxu1 %vm250_vm5, %v12361_v12  ;;  %v4106_v58 = vsel %vm254_vm3, %v4099_v45, 0  ;;  %v4112_v52 = vsel %vm254_vm3, %v4101_v48, 0 }
 0x549   : > { %3689 = vmatpush1.bf16.msra.mxu0 %v3666_v59  ;;  %13087 = vmatpush3.bf16.msra.mxu1 %v3672_v46 }
 0x54a   : > { %12370 = vmatprep.subr.msk.bf16.mxu0 %vm254_vm3, %v3770_v53  ;;  %3706 = vmatprep.mubr.bf16.mxu0 %v14065_v1 }
 0x54b   : > { %13088 = vmatprep.mubr.msk.bf16.mxu1 %vm14066_vm0, %v14064_v0  ;;  %13092 = vmatprep.subr.bf16.mxu1 %v14064_v0 }
 0x550   : > { %12367 = vmatmul.mubr.msk.bf16.vlgmr.msra.gmra.mxu0 %vm250_vm5, %v12365_v49  ;;  %13089 = vmatmul.mubr.msk.bf16.vlgmr.msra.gmra.mxu1 %vm250_vm5, %v12365_v49 }
 0x551   : > { %3799 = vmatpush1.bf16.msra.mxu0 %v3776_v51  ;;  %13093 = vmatpush3.bf16.msra.mxu1 %v3782_v42 }
 0x552   : > { %12374 = vmatprep.subr.msk.bf16.mxu0 %vm254_vm3, %v3880_v39  ;;  %3816 = vmatprep.mubr.bf16.mxu0 %v14065_v1 }
 0x553   : > { %13094 = vmatprep.mubr.msk.bf16.mxu1 %vm14066_vm0, %v14064_v0  ;;  %13098 = vmatprep.subr.bf16.mxu1 %v14064_v0 }
 0x558   : > { %12371 = vmatmul.mubr.msk.bf16.vlgmr.msra.gmra.mxu0 %vm250_vm5, %v12369_v19  ;;  %13095 = vmatmul.mubr.msk.bf16.vlgmr.msra.gmra.mxu1 %vm250_vm5, %v12369_v19 }
 0x559   : > { %3909 = vmatpush1.bf16.msra.mxu0 %v3886_v16  ;;  %13099 = vmatpush3.bf16.msra.mxu1 %v3892_v21 }
 0x55a   : > { %12378 = vmatprep.subr.msk.bf16.mxu0 %vm254_vm3, %v3990_v22  ;;  %3926 = vmatprep.mubr.bf16.mxu0 %v14065_v1 }
 0x55b   : > { %13100 = vmatprep.mubr.msk.bf16.mxu1 %vm14066_vm0, %v14064_v0  ;;  %13104 = vmatprep.subr.bf16.mxu1 %v14064_v0 }
 0x560   : > { %12375 = vmatmul.mubr.msk.bf16.vlgmr.msra.gmra.mxu0 %vm250_vm5, %v12373_v28  ;;  %13101 = vmatmul.mubr.msk.bf16.vlgmr.msra.gmra.mxu1 %vm250_vm5, %v12373_v28 }
 0x561   : > { %4019 = vmatpush1.bf16.msra.mxu0 %v3996_v33  ;;  %13105 = vmatpush3.bf16.msra.mxu1 %v4002_v34 }
 0x562   : > { %12382 = vmatprep.subr.msk.bf16.mxu0 %vm254_vm3, %v4100_v35  ;;  %4036 = vmatprep.mubr.bf16.mxu0 %v14065_v1 }
 0x563   : > { %13106 = vmatprep.mubr.msk.bf16.mxu1 %vm14066_vm0, %v14064_v0  ;;  %13110 = vmatprep.subr.bf16.mxu1 %v14064_v0 }
 0x568   : > { %12379 = vmatmul.mubr.msk.bf16.vlgmr.msra.gmra.mxu0 %vm250_vm5, %v12377_v57  ;;  %13107 = vmatmul.mubr.msk.bf16.vlgmr.msra.gmra.mxu1 %vm250_vm5, %v12377_v57 }
 0x569   : > { %4129 = vmatpush1.bf16.msra.mxu0 %v4106_v58  ;;  %13111 = vmatpush3.bf16.msra.mxu1 %v4112_v52 }
 0x56a   : > { %4146 = vmatprep.mubr.bf16.mxu0 %v14065_v1  ;;  %13112 = vmatprep.mubr.msk.bf16.mxu1 %vm14066_vm0, %v14064_v0 }
 0x56b   : > { %13116 = vmatprep.subr.bf16.mxu1 %v14064_v0 }
 0x570   : > { %12383 = vmatmul.mubr.msk.bf16.vlgmr.msra.gmra.mxu0 %vm250_vm5, %v12381_v62  ;;  %13113 = vmatmul.mubr.msk.bf16.vlgmr.msra.gmra.mxu1 %vm250_vm5, %v12381_v62 }
 0x571   : > { %4295 = vmatprep.mubr.bf16.mxu0 %v14065_v1  ;;  %13118 = vmatprep.mubr.msk.bf16.mxu1 %vm14066_vm0, %v14064_v0 }
 0x5f0   : > { %v3297_v41 = vpop.f32.mrf.mxu0  ;;  %v3338_v55 = vpop.f32.mrf.mxu1 }
 0x5f2   : > { %v3299_v47 = vpop.f32.mrf.mxu0  ;;  %v13066_v12 = vpop.f32.mrf.mxu1 }
 0x5f4   : > { %v3301_v2 = vpop.f32.mrf.mxu0  ;;  %v3341_v5 = vpop.f32.mrf.mxu1 }
 0x5f6   : > { %v3302_v59 = vpop.f32.mrf.mxu0  ;;  %v13067_v46 = vpop.f32.mrf.mxu1 }
 0x5f8   : > { %v3390_v53 = vpop.f32.mrf.mxu0  ;;  %v3431_v54 = vpop.f32.mrf.mxu1 }
 0x5f9   : > { %v3391_v58 = vadd.f32 %v3390_v53, %v3297_v41  ;;  %v3432_v52 = vadd.f32 %v3431_v54, %v3338_v55 }
 0x5fa   : > { %v3392_v44 = vpop.f32.mrf.mxu0  ;;  %v13072_v4 = vpop.f32.mrf.mxu1 }
 0x5fb   : > { %v3393_v2 = vadd.f32 %v3392_v44, %v3299_v47 }
 0x5fc   : > { %v3394_v3 = vpop.f32.mrf.mxu0  ;;  %v3434_v56 = vpop.f32.mrf.mxu1 }
 0x5fe   : > { %v3395_v61 = vpop.f32.mrf.mxu0  ;;  %v13073_v18 = vpop.f32.mrf.mxu1 }
 0x600   : > { %v3497_v49 = vpop.f32.mrf.mxu0  ;;  %v3538_v50 = vpop.f32.mrf.mxu1 }
 0x601   : > { %v3544_v5 = vadd.f32 %v3497_v49, %v3391_v58  ;;  %v3546_v59 = vadd.f32 %v3538_v50, %v3432_v52 }
 0x602   : > { %v3499_v63 = vpop.f32.mrf.mxu0  ;;  %v13078_v51 = vpop.f32.mrf.mxu1 }
 0x603   : > { %v3545_v3 = vadd.f32 %v3499_v63, %v3393_v2 }
 0x604   : > { %v3501_v42 = vpop.f32.mrf.mxu0  ;;  %v3541_v39 = vpop.f32.mrf.mxu1 }
 0x606   : > { %v3502_v60 = vpop.f32.mrf.mxu0  ;;  %v13079_v9 = vpop.f32.mrf.mxu1 }
 0x608   : > { %v3607_v11 = vpop.f32.mrf.mxu0  ;;  %v3648_v10 = vpop.f32.mrf.mxu1 }
 0x609   : > { %v3654_v56 = vadd.f32 %v3607_v11, %v3544_v5  ;;  %v3656_v61 = vadd.f32 %v3648_v10, %v3546_v59 }
 0x60a   : > { %v3609_v6 = vpop.f32.mrf.mxu0  ;;  %v13084_v13 = vpop.f32.mrf.mxu1 }
 0x60b   : > { %v3655_v42 = vadd.f32 %v3609_v6, %v3545_v3  ;;  %v4203_v6 = vpop.permute.xlu0 %4202 }
 0x60c   : > { %v3611_v15 = vpop.f32.mrf.mxu0  ;;  %v3651_v19 = vpop.f32.mrf.mxu1 }
 0x60e   : > { %v3612_v14 = vpop.f32.mrf.mxu0  ;;  %v13085_v17 = vpop.f32.mrf.mxu1 }
 0x610   : > { %v3708_v16 = vpop.f32.mrf.mxu0  ;;  %v3749_v21 = vpop.f32.mrf.mxu1 }
 0x611   : > { %v3755_v39 = vadd.f32 %v3708_v16, %v3654_v56  ;;  %v3757_v60 = vadd.f32 %v3749_v21, %v3656_v61 }
 0x612   : > { %v3710_v22 = vpop.f32.mrf.mxu0  ;;  %v13090_v20 = vpop.f32.mrf.mxu1 }
 0x613   : > { %v3756_v15 = vadd.f32 %v3710_v22, %v3655_v42 }
 0x614   : > { %v3712_v23 = vpop.f32.mrf.mxu0  ;;  %v3752_v7 = vpop.f32.mrf.mxu1 }
 0x616   : > { %v3713_v24 = vpop.f32.mrf.mxu0  ;;  %v13091_v25 = vpop.f32.mrf.mxu1 }
 0x618   : > { %v3818_v26 = vpop.f32.mrf.mxu0  ;;  %v3859_v27 = vpop.f32.mrf.mxu1 }
 0x619   : > { %v3865_v41 = vadd.f32 %v3818_v26, %v3755_v39  ;;  %v3867_v55 = vadd.f32 %v3859_v27, %v3757_v60 }
 0x61a   : > { %v3820_v28 = vpop.f32.mrf.mxu0  ;;  %v13096_v32 = vpop.f32.mrf.mxu1 }
 0x61b   : > { %v3866_v47 = vadd.f32 %v3820_v28, %v3756_v15 }
 0x61c   : > { %v3822_v33 = vpop.f32.mrf.mxu0  ;;  %v3862_v34 = vpop.f32.mrf.mxu1 }
 0x61e   : > { %v3823_v35 = vpop.f32.mrf.mxu0  ;;  %v13097_v36 = vpop.f32.mrf.mxu1 }
 0x620   : > { %v3928_v40 = vpop.f32.mrf.mxu0  ;;  %v3969_v45 = vpop.f32.mrf.mxu1 }
 0x621   : > { %v3975_v44 = vadd.f32 %v3928_v40, %v3865_v41  ;;  %v3977_v49 = vadd.f32 %v3969_v45, %v3867_v55  ;;  %v12387_v41 = vld [vmem:[%s16585_s2 + $0x94] sm:$0xf] }
 0x622   : > { %v3930_v48 = vpop.f32.mrf.mxu0  ;;  %v13102_v57 = vpop.f32.mrf.mxu1 }
 0x623   : > { %v3976_v63 = vadd.f32 %v3930_v48, %v3866_v47 }
 0x624   : > { %v3932_v62 = vpop.f32.mrf.mxu0  ;;  %v3972_v12 = vpop.f32.mrf.mxu1 }
 0x625   : > { %v12422_v12 = vld [vmem:[%s16586_s3 + $0x20] sm:$0xff] }
 0x626   : > { %v3933_v46 = vpop.f32.mrf.mxu0  ;;  %v13103_v4 = vpop.f32.mrf.mxu1 }
 0x628   : > { %v4038_v18 = vpop.f32.mrf.mxu0  ;;  %v4079_v51 = vpop.f32.mrf.mxu1 }
 0x629   : > { %v4085_v11 = vadd.f32 %v4038_v18, %v3975_v44  ;;  %v4087_v10 = vadd.f32 %v4079_v51, %v3977_v49 }
 0x62a   : > { %v4040_v9 = vpop.f32.mrf.mxu0  ;;  %v13108_v13 = vpop.f32.mrf.mxu1 }
 0x62b   : > { %v4086_v16 = vadd.f32 %v4040_v9, %v3976_v63 }
 0x62c   : > { %v4042_v53 = vpop.f32.mrf.mxu0  ;;  %v4082_v54 = vpop.f32.mrf.mxu1 }
 0x62e   : > { %v4043_v50 = vpop.f32.mrf.mxu0  ;;  %v13109_v19 = vpop.f32.mrf.mxu1 }
 0x630   : > { %v4148_v14 = vpop.f32.mrf.mxu0  ;;  %v4189_v17 = vpop.f32.mrf.mxu1 }
 0x631   : > { %v4195_v21 = vadd.f32 %v4148_v14, %v4085_v11  ;;  %v4197_v20 = vadd.f32 %v4189_v17, %v4087_v10 }
 0x632   : > { %v4150_v23 = vpop.f32.mrf.mxu0  ;;  %v13114_v22 = vpop.f32.mrf.mxu1 }
 0x633   : > { %v4205_v7 = vadd.f32 %v4203_v6, %v4195_v21  ;;  %v4207_v24 = vadd.f32 %v4203_v6, %v4197_v20  ;;  %v4196_v25 = vadd.f32 %v4150_v23, %v4086_v16 }
 0x634   : > { %v4152_v26 = vpop.f32.mrf.mxu0  ;;  %v4192_v27 = vpop.f32.mrf.mxu1 }
 0x635   : > { %v14956_v28 = vmul.f32 %v4205_v7, %v14334_v31  ;;  %v14959_v32 = vmul.f32 %v4207_v24, %v14339_v43  ;;  %v4206_v33 = vadd.f32 %v4203_v6, %v4196_v25  ;;  %v12386_v25 = vld [vmem:[%s16585_s2 + $0x90] sm:$0xf] }
 0x636   : > { %v4153_v34 = vpop.f32.mrf.mxu0  ;;  %v13115_v35 = vpop.f32.mrf.mxu1 }
 0x637   : > { %vm4216_vm15 = vcmp.ge.f32.partialorder %v14959_v32, 0.0  ;;  %v4219_v36 = vmul.f32 0.2, %v14959_v32  ;;  %v4217_v40 = vmul.f32 0.2, %v14956_v28  ;;  %v14965_v45 = vmul.f32 %v4206_v33, %v14336_v38 }
 0x638   : > { %vm4214_vm11 = vcmp.ge.f32.partialorder %v14956_v28, 0.0 }
 0x639   : > { %v14969_v48 = vsel %vm4216_vm15, %v14959_v32, %v4219_v36  ;;  %vm4215_vm12 = vcmp.ge.f32.partialorder %v14965_v45, 0.0  ;;  %v4218_v57 = vmul.f32 0.2, %v14965_v45  ;;  %v14976_v58 = vsel %vm4214_vm11, %v14956_v28, %v4217_v40 }
 0x63a   : > { %4241 = vrot.lane.b32.xlu0 %v14969_v48, %s14067_s21 }
 0x63b   : > { %v14979_v52 = vsel %vm4215_vm12, %v14965_v45, %v4218_v57 }
 0x63c   : > { %v13730_v62 = vpack.i.bf16 %v14979_v52, %v14976_v58 }
 0x63e   : > { %4227 = vrot.lane.b32.xlu0 %v14969_v48, %s14068_s22  ;;  %13731 = vrot.lane.b32.xlu1 %v13730_v62, %s14067_s21 }
 0x642   : > { %4441 = vrot.lane.b32.xlu0 %v14969_v48, %s14069_s23  ;;  %13736 = vrot.lane.b32.xlu1 %v13730_v62, %s14068_s22 }
 0x646   : > { %4551 = vrot.lane.b32.xlu0 %v14969_v48, %s14070_s24  ;;  %13741 = vrot.lane.b32.xlu1 %v13730_v62, %s14069_s23 }
 0x64a   : > { %4762 = vrot.lane.b32.xlu0 %v14969_v48, %s14071_s25  ;;  %13746 = vrot.lane.b32.xlu1 %v13730_v62, %s14070_s24 }
 0x64e   : > { %4872 = vrot.lane.b32.xlu0 %v14969_v48, %s14072_s26  ;;  %13751 = vrot.lane.b32.xlu1 %v13730_v62, %s14071_s25 }
 0x652   : > { %4982 = vrot.lane.b32.xlu0 %v14969_v48, %s14073_s27  ;;  %13756 = vrot.lane.b32.xlu1 %v13730_v62, %s14072_s26 }
 0x656   : > { %5092 = vrot.lane.b32.xlu0 %v14969_v48, %s14074_s28  ;;  %13761 = vrot.lane.b32.xlu1 %v13730_v62, %s14073_s27 }
 0x65a   : > { %13766 = vrot.lane.b32.xlu1 %v13730_v62, %s14074_s28 }
 0x65e   : > { %5202 = vperm.xlu1 %13689, %v12422_v12   ;;  %v12394_v12 = vld [vmem:[%s16585_s2 + $0x98] sm:$0xf] }
 0x6ac   : > { %v4242_v2 = vpop.permute.xlu0 %4241 }
 0x6b0   : > { %v13732_v5 = vpop.permute.xlu1 %13731  ;;  %v4228_v61 = vpop.permute.xlu0 %4227 }
 0x6b1   : > { %v13734_v59 = vunpack.i.h.bf16 %v13732_v5  ;;  %v13733_v46 = vunpack.i.l.bf16 %v13732_v5 }
 0x6b3   : > { %v4244_v4 = vsel %vm241_vm1, %v13733_v46, %v13734_v59  ;;  %v4245_v3 = vsel %vm241_vm1, %v4242_v2, %v13733_v46  ;;  %v4243_v56 = vsel %vm241_vm1, %v13734_v59, %v4242_v2  ;;  %v4660_v46 = vpack.c.bf16 %v14979_v52, %v14979_v52 }
 0x6b4   : > { %v13737_v18 = vpop.permute.xlu1 %13736  ;;  %v4249_v51 = vpack.c.bf16 %v4244_v4, %v4244_v4  ;;  %v4248_v42 = vpack.c.bf16 %v4245_v3, %v4245_v3  ;;  %v4250_v39 = vpack.c.bf16 %v4243_v56, %v4243_v56  ;;  %v4442_v11 = vpop.permute.xlu0 %4441  ;;  %v4659_v56 = vpack.c.bf16 %v14976_v58, %v14976_v58 }
 0x6b5   : > { %v13739_v60 = vunpack.i.h.bf16 %v13737_v18  ;;  %v13738_v9 = vunpack.i.l.bf16 %v13737_v18  ;;  %v12398_v18 = vld [vmem:[%s16585_s2 + $0x9c] sm:$0xf] }
 0x6b6   : > { %12388 = vmatprep.subr.msk.bf16.mxu0 %vm254_vm3, %v4249_v51  ;;  %v4255_v13 = vsel %vm254_vm3, %v4248_v42, 0  ;;  %v4261_v15 = vsel %vm254_vm3, %v4250_v39, 0  ;;  %v4666_v39 = vsel %vm254_vm3, %v4659_v56, 0 }
 0x6b7   : > { %4278 = vmatpush1.bf16.msra.mxu0 %v4255_v13  ;;  %13117 = vmatpush3.bf16.msra.mxu1 %v4261_v15  ;;  %v4230_v55 = vsel %vm227_vm2, %v13738_v9, %v13739_v60  ;;  %v4231_v53 = vsel %vm227_vm2, %v4228_v61, %v13738_v9  ;;  %v4229_v54 = vsel %vm227_vm2, %v13739_v60, %v4228_v61 }
 0x6b8   : > { %v13742_v47 = vpop.permute.xlu1 %13741  ;;  %v4235_v44 = vpack.c.bf16 %v4230_v55, %v4230_v55  ;;  %13122 = vmatprep.subr.bf16.mxu1 %v14064_v0  ;;  %v4234_v49 = vpack.c.bf16 %v4231_v53, %v4231_v53  ;;  %v4236_v50 = vpack.c.bf16 %v4229_v54, %v4229_v54  ;;  %v4552_v33 = vpop.permute.xlu0 %4551  ;;  %v4661_v61 = vpack.c.bf16 %v14969_v48, %v14969_v48  ;;  %v12402_v54 = vld [vmem:[%s16585_s2 + $0xa0] sm:$0xf] }
 0x6b9   : > { %v13744_v19 = vunpack.i.h.bf16 %v13742_v47  ;;  %v13743_v63 = vunpack.i.l.bf16 %v13742_v47 }
 0x6ba   : > { %12389 = vmatmul.mubr.msk.bf16.vlgmr.msra.gmra.mxu0 %vm250_vm5, %v12387_v41  ;;  %13119 = vmatmul.mubr.msk.bf16.vlgmr.msra.gmra.mxu1 %vm250_vm5, %v12387_v41  ;;  %v4348_v10 = vsel %vm254_vm3, %v4234_v49, 0  ;;  %v4354_v14 = vsel %vm254_vm3, %v4236_v50, 0  ;;  %v4672_v58 = vsel %vm254_vm3, %v4661_v61, 0 }
 0x6bb   : > { %12391 = vmatprep.subr.msk.bf16.mxu0 %vm254_vm3, %v4235_v44  ;;  %13123 = vmatpush3.bf16.msra.mxu1 %v4354_v14  ;;  %v4444_v17 = vsel %vm444_vm4, %v13743_v63, %v13744_v19  ;;  %v4445_v6 = vsel %vm444_vm4, %v4442_v11, %v13743_v63  ;;  %v4443_v16 = vsel %vm444_vm4, %v13744_v19, %v4442_v11 }
 0x6bc   : > { %4371 = vmatpush1.bf16.msra.mxu0 %v4348_v10  ;;  %v13747_v21 = vpop.permute.xlu1 %13746  ;;  %v4449_v20 = vpack.c.bf16 %v4444_v17, %v4444_v17  ;;  %4388 = vmatprep.mubr.bf16.mxu0 %v14065_v1  ;;  %v4448_v7 = vpack.c.bf16 %v4445_v6, %v4445_v6  ;;  %v4450_v24 = vpack.c.bf16 %v4443_v16, %v4443_v16  ;;  %v4763_v3 = vpop.permute.xlu0 %4762 }
 0x6bd   : > { %v13749_v23 = vunpack.i.h.bf16 %v13747_v21  ;;  %v13748_v22 = vunpack.i.l.bf16 %v13747_v21  ;;  %13124 = vmatprep.mubr.msk.bf16.mxu1 %vm14066_vm0, %v14064_v0  ;;  %13128 = vmatprep.subr.bf16.mxu1 %v14064_v0  ;;  %v12406_v21 = vld [vmem:[%s16585_s2 + $0xa4] sm:$0xf] }
 0x6be   : > { %12395 = vmatprep.subr.msk.bf16.mxu0 %vm254_vm3, %v4449_v20  ;;  %v4455_v34 = vsel %vm254_vm3, %v4448_v7, 0  ;;  %v4461_v35 = vsel %vm254_vm3, %v4450_v24, 0 }
 0x6bf   : > { %v4554_v26 = vsel %vm555_vm6, %v13748_v22, %v13749_v23  ;;  %v4555_v36 = vsel %vm555_vm6, %v4552_v33, %v13748_v22  ;;  %v4553_v40 = vsel %vm555_vm6, %v13749_v23, %v4552_v33 }
 0x6c0   : > { %v4559_v27 = vpack.c.bf16 %v4554_v26, %v4554_v26  ;;  %v4558_v57 = vpack.c.bf16 %v4555_v36, %v4555_v36  ;;  %v4560_v62 = vpack.c.bf16 %v4553_v40, %v4553_v40  ;;  %v13752_v2 = vpop.permute.xlu1 %13751  ;;  %v4873_v15 = vpop.permute.xlu0 %4872  ;;  %v12410_v40 = vld [vmem:[%s16585_s2 + $0xa8] sm:$0xf] }
 0x6c1   : > { %v13754_v4 = vunpack.i.h.bf16 %v13752_v2  ;;  %v13753_v52 = vunpack.i.l.bf16 %v13752_v2 }
 0x6c2   : > { %12392 = vmatmul.mubr.msk.bf16.vlgmr.msra.gmra.mxu0 %vm250_vm5, %v12386_v25  ;;  %13125 = vmatmul.mubr.msk.bf16.vlgmr.msra.gmra.mxu1 %vm250_vm5, %v12386_v25  ;;  %v4565_v5 = vsel %vm254_vm3, %v4558_v57, 0  ;;  %v4571_v59 = vsel %vm254_vm3, %v4560_v62, 0 }
 0x6c3   : > { %4478 = vmatpush1.bf16.msra.mxu0 %v4455_v34  ;;  %13129 = vmatpush3.bf16.msra.mxu1 %v4461_v35  ;;  %v4764_v51 = vsel %vm767_vm7, %v13754_v4, %v4763_v3  ;;  %v4765_v48 = vsel %vm767_vm7, %v13753_v52, %v13754_v4  ;;  %v4766_v13 = vsel %vm767_vm7, %v4763_v3, %v13753_v52  ;;  %v12414_v3 = vld [vmem:[%s16585_s2 + $0xac] sm:$0xf]  ;;  %v12418_v52 = vld [vmem:[%s16585_s2 + $0xb0] sm:$0xf] }
 0x6c4   : > { %12399 = vmatprep.subr.msk.bf16.mxu0 %vm254_vm3, %v4559_v27  ;;  %4495 = vmatprep.mubr.bf16.mxu0 %v14065_v1  ;;  %v13757_v42 = vpop.permute.xlu1 %13756  ;;  %v4770_v60 = vpack.c.bf16 %v4764_v51, %v4764_v51  ;;  %v4769_v41 = vpack.c.bf16 %v4765_v48, %v4765_v48  ;;  %v4771_v55 = vpack.c.bf16 %v4766_v13, %v4766_v13  ;;  %v4983_v14 = vpop.permute.xlu0 %4982 }
 0x6c5   : > { %13130 = vmatprep.mubr.msk.bf16.mxu1 %vm14066_vm0, %v14064_v0  ;;  %13134 = vmatprep.subr.bf16.mxu1 %v14064_v0  ;;  %v13759_v9 = vunpack.i.h.bf16 %v13757_v42  ;;  %v13758_v53 = vunpack.i.l.bf16 %v13757_v42 }
 0x6c6   : > { %v4776_v49 = vsel %vm254_vm3, %v4769_v41, 0  ;;  %v4782_v50 = vsel %vm254_vm3, %v4771_v55, 0 }
 0x6c7   : > { %v4874_v47 = vsel %vm878_vm8, %v13759_v9, %v4873_v15  ;;  %v4875_v11 = vsel %vm878_vm8, %v13758_v53, %v13759_v9  ;;  %v4876_v10 = vsel %vm878_vm8, %v4873_v15, %v13758_v53 }
 0x6c8   : > { %v13762_v44 = vpop.permute.xlu1 %13761  ;;  %v4880_v19 = vpack.c.bf16 %v4874_v47, %v4874_v47  ;;  %v4879_v17 = vpack.c.bf16 %v4875_v11, %v4875_v11  ;;  %v4881_v6 = vpack.c.bf16 %v4876_v10, %v4876_v10  ;;  %v5093_v33 = vpop.permute.xlu0 %5092 }
 0x6c9   : > { %v13764_v63 = vunpack.i.h.bf16 %v13762_v44  ;;  %v13763_v16 = vunpack.i.l.bf16 %v13762_v44 }
 0x6ca   : > { %12396 = vmatmul.mubr.msk.bf16.vlgmr.msra.gmra.mxu0 %vm250_vm5, %v12394_v12  ;;  %13131 = vmatmul.mubr.msk.bf16.vlgmr.msra.gmra.mxu1 %vm250_vm5, %v12394_v12  ;;  %v4886_v22 = vsel %vm254_vm3, %v4879_v17, 0  ;;  %v4892_v7 = vsel %vm254_vm3, %v4881_v6, 0 }
 0x6cb   : > { %4588 = vmatpush1.bf16.msra.mxu0 %v4565_v5  ;;  %13135 = vmatpush3.bf16.msra.mxu1 %v4571_v59  ;;  %v4984_v20 = vsel %vm989_vm9, %v13764_v63, %v4983_v14  ;;  %v4985_v26 = vsel %vm989_vm9, %v13763_v16, %v13764_v63  ;;  %v4986_v27 = vsel %vm989_vm9, %v4983_v14, %v13763_v16 }
 0x6cc   : > { %12403 = vmatprep.subr.msk.bf16.mxu0 %vm254_vm3, %v4660_v46  ;;  %4605 = vmatprep.mubr.bf16.mxu0 %v14065_v1  ;;  %v13767_v23 = vpop.permute.xlu1 %13766  ;;  %v4990_v24 = vpack.c.bf16 %v4984_v20, %v4984_v20  ;;  %v4989_v34 = vpack.c.bf16 %v4985_v26, %v4985_v26  ;;  %v4991_v35 = vpack.c.bf16 %v4986_v27, %v4986_v27 }
 0x6cd   : > { %13136 = vmatprep.mubr.msk.bf16.mxu1 %vm14066_vm0, %v14064_v0  ;;  %13140 = vmatprep.subr.bf16.mxu1 %v14064_v0  ;;  %v13769_v25 = vunpack.i.h.bf16 %v13767_v23  ;;  %v13768_v36 = vunpack.i.l.bf16 %v13767_v23 }
 0x6ce   : > { %v4996_v62 = vsel %vm254_vm3, %v4989_v34, 0  ;;  %v5002_v12 = vsel %vm254_vm3, %v4991_v35, 0 }
 0x6cf   : > { %v5094_v57 = vsel %vm1100_vm10, %v13769_v25, %v5093_v33  ;;  %v5095_v5 = vsel %vm1100_vm10, %v13768_v36, %v13769_v25  ;;  %v5096_v59 = vsel %vm1100_vm10, %v5093_v33, %v13768_v36 }
 0x6d0   : > { %v5100_v2 = vpack.c.bf16 %v5094_v57, %v5094_v57  ;;  %v5099_v46 = vpack.c.bf16 %v5095_v5, %v5095_v5  ;;  %v5101_v4 = vpack.c.bf16 %v5096_v59, %v5096_v59 }
 0x6d2   : > { %12400 = vmatmul.mubr.msk.bf16.vlgmr.msra.gmra.mxu0 %vm250_vm5, %v12398_v18  ;;  %13137 = vmatmul.mubr.msk.bf16.vlgmr.msra.gmra.mxu1 %vm250_vm5, %v12398_v18  ;;  %v5106_v56 = vsel %vm254_vm3, %v5099_v46, 0  ;;  %v5112_v61 = vsel %vm254_vm3, %v5101_v4, 0 }
 0x6d3   : > { %4689 = vmatpush1.bf16.msra.mxu0 %v4666_v39  ;;  %13141 = vmatpush3.bf16.msra.mxu1 %v4672_v58 }
 0x6d4   : > { %12407 = vmatprep.subr.msk.bf16.mxu0 %vm254_vm3, %v4770_v60  ;;  %4706 = vmatprep.mubr.bf16.mxu0 %v14065_v1 }
 0x6d5   : > { %13142 = vmatprep.mubr.msk.bf16.mxu1 %vm14066_vm0, %v14064_v0  ;;  %13146 = vmatprep.subr.bf16.mxu1 %v14064_v0 }
 0x6da   : > { %12404 = vmatmul.mubr.msk.bf16.vlgmr.msra.gmra.mxu0 %vm250_vm5, %v12402_v54  ;;  %13143 = vmatmul.mubr.msk.bf16.vlgmr.msra.gmra.mxu1 %vm250_vm5, %v12402_v54 }
 0x6db   : > { %4799 = vmatpush1.bf16.msra.mxu0 %v4776_v49  ;;  %13147 = vmatpush3.bf16.msra.mxu1 %v4782_v50 }
 0x6dc   : > { %12411 = vmatprep.subr.msk.bf16.mxu0 %vm254_vm3, %v4880_v19  ;;  %4816 = vmatprep.mubr.bf16.mxu0 %v14065_v1 }
 0x6dd   : > { %13148 = vmatprep.mubr.msk.bf16.mxu1 %vm14066_vm0, %v14064_v0  ;;  %13152 = vmatprep.subr.bf16.mxu1 %v14064_v0 }
 0x6e2   : > { %12408 = vmatmul.mubr.msk.bf16.vlgmr.msra.gmra.mxu0 %vm250_vm5, %v12406_v21  ;;  %13149 = vmatmul.mubr.msk.bf16.vlgmr.msra.gmra.mxu1 %vm250_vm5, %v12406_v21 }
 0x6e3   : > { %4909 = vmatpush1.bf16.msra.mxu0 %v4886_v22  ;;  %13153 = vmatpush3.bf16.msra.mxu1 %v4892_v7 }
 0x6e4   : > { %12415 = vmatprep.subr.msk.bf16.mxu0 %vm254_vm3, %v4990_v24  ;;  %4926 = vmatprep.mubr.bf16.mxu0 %v14065_v1 }
 0x6e5   : > { %13154 = vmatprep.mubr.msk.bf16.mxu1 %vm14066_vm0, %v14064_v0  ;;  %13158 = vmatprep.subr.bf16.mxu1 %v14064_v0 }
 0x6ea   : > { %12412 = vmatmul.mubr.msk.bf16.vlgmr.msra.gmra.mxu0 %vm250_vm5, %v12410_v40  ;;  %13155 = vmatmul.mubr.msk.bf16.vlgmr.msra.gmra.mxu1 %vm250_vm5, %v12410_v40 }
 0x6eb   : > { %5019 = vmatpush1.bf16.msra.mxu0 %v4996_v62  ;;  %13159 = vmatpush3.bf16.msra.mxu1 %v5002_v12 }
 0x6ec   : > { %12419 = vmatprep.subr.msk.bf16.mxu0 %vm254_vm3, %v5100_v2  ;;  %5036 = vmatprep.mubr.bf16.mxu0 %v14065_v1 }
 0x6ed   : > { %13160 = vmatprep.mubr.msk.bf16.mxu1 %vm14066_vm0, %v14064_v0  ;;  %13164 = vmatprep.subr.bf16.mxu1 %v14064_v0 }
 0x6f2   : > { %12416 = vmatmul.mubr.msk.bf16.vlgmr.msra.gmra.mxu0 %vm250_vm5, %v12414_v3  ;;  %13161 = vmatmul.mubr.msk.bf16.vlgmr.msra.gmra.mxu1 %vm250_vm5, %v12414_v3 }
 0x6f3   : > { %5129 = vmatpush1.bf16.msra.mxu0 %v5106_v56  ;;  %13165 = vmatpush3.bf16.msra.mxu1 %v5112_v61 }
 0x6f4   : > { %5146 = vmatprep.mubr.bf16.mxu0 %v14065_v1  ;;  %13166 = vmatprep.mubr.msk.bf16.mxu1 %vm14066_vm0, %v14064_v0 }
 0x6f5   : > { %13170 = vmatprep.subr.bf16.mxu1 %v14064_v0 }
 0x6fa   : > { %12420 = vmatmul.mubr.msk.bf16.vlgmr.msra.gmra.mxu0 %vm250_vm5, %v12418_v52  ;;  %13167 = vmatmul.mubr.msk.bf16.vlgmr.msra.gmra.mxu1 %vm250_vm5, %v12418_v52 }
 0x6fb   : > { %5292 = vmatprep.mubr.bf16.mxu0 %v14065_v1  ;;  %13172 = vmatprep.mubr.msk.bf16.mxu1 %vm14066_vm0, %v14064_v0 }
 0x77a   : > { %v4297_v18 = vpop.f32.mrf.mxu0  ;;  %v4338_v51 = vpop.f32.mrf.mxu1 }
 0x77c   : > { %v4299_v42 = vpop.f32.mrf.mxu0  ;;  %v13120_v39 = vpop.f32.mrf.mxu1 }
 0x77e   : > { %v4301_v58 = vpop.f32.mrf.mxu0  ;;  %v4341_v60 = vpop.f32.mrf.mxu1 }
 0x780   : > { %v4302_v9 = vpop.f32.mrf.mxu0  ;;  %v13121_v48 = vpop.f32.mrf.mxu1 }
 0x782   : > { %v4390_v13 = vpop.f32.mrf.mxu0  ;;  %v4431_v15 = vpop.f32.mrf.mxu1 }
 0x783   : > { %v4391_v39 = vadd.f32 %v4390_v13, %v4297_v18  ;;  %v4432_v58 = vadd.f32 %v4431_v15, %v4338_v51 }
 0x784   : > { %v4392_v41 = vpop.f32.mrf.mxu0  ;;  %v13126_v55 = vpop.f32.mrf.mxu1 }
 0x785   : > { %v4393_v48 = vadd.f32 %v4392_v41, %v4299_v42 }
 0x786   : > { %v4394_v53 = vpop.f32.mrf.mxu0  ;;  %v4434_v54 = vpop.f32.mrf.mxu1 }
 0x788   : > { %v4395_v47 = vpop.f32.mrf.mxu0  ;;  %v13127_v44 = vpop.f32.mrf.mxu1 }
 0x78a   : > { %v4497_v49 = vpop.f32.mrf.mxu0  ;;  %v4538_v50 = vpop.f32.mrf.mxu1 }
 0x78b   : > { %v4544_v55 = vadd.f32 %v4497_v49, %v4391_v39  ;;  %v4546_v53 = vadd.f32 %v4538_v50, %v4432_v58 }
 0x78c   : > { %v4499_v19 = vpop.f32.mrf.mxu0  ;;  %v13132_v63 = vpop.f32.mrf.mxu1 }
 0x78d   : > { %v4545_v44 = vadd.f32 %v4499_v19, %v4393_v48 }
 0x78e   : > { %v4501_v11 = vpop.f32.mrf.mxu0  ;;  %v4541_v10 = vpop.f32.mrf.mxu1 }
 0x790   : > { %v4502_v14 = vpop.f32.mrf.mxu0  ;;  %v13133_v17 = vpop.f32.mrf.mxu1 }
 0x792   : > { %v4607_v6 = vpop.f32.mrf.mxu0  ;;  %v4648_v16 = vpop.f32.mrf.mxu1 }
 0x793   : > { %v4654_v63 = vadd.f32 %v4607_v6, %v4544_v55  ;;  %v4656_v11 = vadd.f32 %v4648_v16, %v4546_v53  ;;  %v12459_v53 = vld [vmem:[%s16586_s3 + $0x28] sm:$0xff] }
 0x794   : > { %v4609_v21 = vpop.f32.mrf.mxu0  ;;  %v13138_v20 = vpop.f32.mrf.mxu1 }
 0x795   : > { %v4655_v17 = vadd.f32 %v4609_v21, %v4545_v44  ;;  %v5203_v21 = vpop.permute.xlu1 %5202 }
 0x796   : > { %v4611_v23 = vpop.f32.mrf.mxu0  ;;  %v4651_v22 = vpop.f32.mrf.mxu1 }
 0x798   : > { %v4612_v7 = vpop.f32.mrf.mxu0  ;;  %v13139_v24 = vpop.f32.mrf.mxu1 }
 0x79a   : > { %v4708_v25 = vpop.f32.mrf.mxu0  ;;  %v4749_v26 = vpop.f32.mrf.mxu1 }
 0x79b   : > { %v4755_v20 = vadd.f32 %v4708_v25, %v4654_v63  ;;  %v4757_v23 = vadd.f32 %v4749_v26, %v4656_v11 }
 0x79c   : > { %v4710_v27 = vpop.f32.mrf.mxu0  ;;  %v13144_v33 = vpop.f32.mrf.mxu1 }
 0x79d   : > { %v4756_v24 = vadd.f32 %v4710_v27, %v4655_v17 }
 0x79e   : > { %v4712_v34 = vpop.f32.mrf.mxu0  ;;  %v4752_v35 = vpop.f32.mrf.mxu1 }
 0x7a0   : > { %v4713_v36 = vpop.f32.mrf.mxu0  ;;  %v13145_v40 = vpop.f32.mrf.mxu1 }
 0x7a2   : > { %v4818_v57 = vpop.f32.mrf.mxu0  ;;  %v4859_v62 = vpop.f32.mrf.mxu1 }
 0x7a3   : > { %v4865_v18 = vadd.f32 %v4818_v57, %v4755_v20  ;;  %v4867_v51 = vadd.f32 %v4859_v62, %v4757_v23 }
 0x7a4   : > { %v4820_v12 = vpop.f32.mrf.mxu0  ;;  %v13150_v2 = vpop.f32.mrf.mxu1 }
 0x7a5   : > { %v4866_v42 = vadd.f32 %v4820_v12, %v4756_v24 }
 0x7a6   : > { %v4822_v5 = vpop.f32.mrf.mxu0  ;;  %v4862_v59 = vpop.f32.mrf.mxu1 }
 0x7a8   : > { %v4823_v46 = vpop.f32.mrf.mxu0  ;;  %v13151_v4 = vpop.f32.mrf.mxu1 }
 0x7aa   : > { %v4928_v3 = vpop.f32.mrf.mxu0  ;;  %v4969_v56 = vpop.f32.mrf.mxu1 }
 0x7ab   : > { %v4975_v41 = vadd.f32 %v4928_v3, %v4865_v18  ;;  %v4977_v49 = vadd.f32 %v4969_v56, %v4867_v51 }
 0x7ac   : > { %v4930_v61 = vpop.f32.mrf.mxu0  ;;  %v13156_v52 = vpop.f32.mrf.mxu1 }
 0x7ad   : > { %v4976_v19 = vadd.f32 %v4930_v61, %v4866_v42 }
 0x7ae   : > { %v4932_v60 = vpop.f32.mrf.mxu0  ;;  %v4972_v9 = vpop.f32.mrf.mxu1 }
 0x7b0   : > { %v4933_v54 = vpop.f32.mrf.mxu0  ;;  %v13157_v47 = vpop.f32.mrf.mxu1 }
 0x7b2   : > { %v5038_v10 = vpop.f32.mrf.mxu0  ;;  %v5079_v14 = vpop.f32.mrf.mxu1 }
 0x7b3   : > { %v5085_v6 = vadd.f32 %v5038_v10, %v4975_v41  ;;  %v5087_v16 = vadd.f32 %v5079_v14, %v4977_v49 }
 0x7b4   : > { %v5040_v22 = vpop.f32.mrf.mxu0  ;;  %v13162_v7 = vpop.f32.mrf.mxu1 }
 0x7b5   : > { %v5086_v25 = vadd.f32 %v5040_v22, %v4976_v19 }
 0x7b6   : > { %v5042_v13 = vpop.f32.mrf.mxu0  ;;  %v5082_v15 = vpop.f32.mrf.mxu1 }
 0x7b7   : > { %v12424_v15 = vld [vmem:[%s16585_s2 + $0xb8] sm:$0xf] }
 0x7b8   : > { %v5043_v50 = vpop.f32.mrf.mxu0  ;;  %v13163_v33 = vpop.f32.mrf.mxu1 }
 0x7ba   : > { %v5148_v34 = vpop.f32.mrf.mxu0  ;;  %v5189_v35 = vpop.f32.mrf.mxu1 }
 0x7bb   : > { %v5195_v26 = vadd.f32 %v5148_v34, %v5085_v6  ;;  %v5197_v36 = vadd.f32 %v5189_v35, %v5087_v16 }
 0x7bc   : > { %v5150_v40 = vpop.f32.mrf.mxu0  ;;  %v13168_v27 = vpop.f32.mrf.mxu1 }
 0x7bd   : > { %v5205_v57 = vadd.f32 %v5203_v21, %v5195_v26  ;;  %v5207_v62 = vadd.f32 %v5203_v21, %v5197_v36  ;;  %v5196_v2 = vadd.f32 %v5150_v40, %v5086_v25 }
 0x7be   : > { %v5152_v5 = vpop.f32.mrf.mxu0  ;;  %v5192_v12 = vpop.f32.mrf.mxu1 }
 0x7bf   : > { %v5208_v59 = vmul.f32 %v5205_v57, %v14334_v31  ;;  %v5210_v46 = vmul.f32 %v5207_v62, %v14339_v43  ;;  %v5206_v4 = vadd.f32 %v5203_v21, %v5196_v2 }
 0x7c0   : > { %v5153_v3 = vpop.f32.mrf.mxu0  ;;  %v13169_v56 = vpop.f32.mrf.mxu1 }
 0x7c1   : > { %vm5213_vm13 = vcmp.ge.f32.partialorder %v5210_v46, 0.0  ;;  %v5216_v61 = vmul.f32 0.2, %v5210_v46  ;;  %v5214_v52 = vmul.f32 0.2, %v5208_v59  ;;  %v5209_v39 = vmul.f32 %v5206_v4, %v14336_v38 }
 0x7c2   : > { %vm5211_vm14 = vcmp.ge.f32.partialorder %v5208_v59, 0.0 }
 0x7c3   : > { %v15173_v58 = vsel %vm5213_vm13, %v5210_v46, %v5216_v61  ;;  %vm5212_vm15 = vcmp.ge.f32.partialorder %v5209_v39, 0.0  ;;  %v5215_v60 = vmul.f32 0.2, %v5209_v39  ;;  %v15177_v9 = vsel %vm5211_vm14, %v5208_v59, %v5214_v52  ;;  %v12423_v59 = vld [vmem:[%s16585_s2 + $0xb4] sm:$0xf] }
 0x7c4   : > { %5238 = vrot.lane.b32.xlu1 %v15173_v58, %s14067_s21 }
 0x7c5   : > { %v15179_v48 = vsel %vm5212_vm15, %v5209_v39, %v5215_v60 }
 0x7c6   : > { %v13770_v55 = vpack.i.bf16 %v15179_v48, %v15177_v9 }
 0x7c8   : > { %5224 = vrot.lane.b32.xlu1 %v15173_v58, %s14068_s22  ;;  %13771 = vrot.lane.b32.xlu0 %v13770_v55, %s14067_s21 }
 0x7cc   : > { %5438 = vrot.lane.b32.xlu1 %v15173_v58, %s14069_s23  ;;  %13776 = vrot.lane.b32.xlu0 %v13770_v55, %s14068_s22 }
 0x7d0   : > { %5548 = vrot.lane.b32.xlu1 %v15173_v58, %s14070_s24  ;;  %13781 = vrot.lane.b32.xlu0 %v13770_v55, %s14069_s23 }
 0x7d4   : > { %5759 = vrot.lane.b32.xlu1 %v15173_v58, %s14071_s25  ;;  %13786 = vrot.lane.b32.xlu0 %v13770_v55, %s14070_s24 }
 0x7d8   : > { %5869 = vrot.lane.b32.xlu1 %v15173_v58, %s14072_s26  ;;  %13791 = vrot.lane.b32.xlu0 %v13770_v55, %s14071_s25 }
 0x7dc   : > { %5979 = vrot.lane.b32.xlu1 %v15173_v58, %s14073_s27  ;;  %13796 = vrot.lane.b32.xlu0 %v13770_v55, %s14072_s26 }
 0x7e0   : > { %6089 = vrot.lane.b32.xlu1 %v15173_v58, %s14074_s28  ;;  %13801 = vrot.lane.b32.xlu0 %v13770_v55, %s14073_s27 }
 0x7e4   : > { %13806 = vrot.lane.b32.xlu0 %v13770_v55, %s14074_s28 }
 0x7e8   : > { %6199 = vperm.xlu0 %13608, %v12459_v53   ;;  %v12431_v53 = vld [vmem:[%s16585_s2 + $0xbc] sm:$0xf] }
 0x836   : > { %v5239_v54 = vpop.permute.xlu1 %5238 }
 0x83a   : > { %v13772_v47 = vpop.permute.xlu0 %13771  ;;  %v5225_v17 = vpop.permute.xlu1 %5224 }
 0x83b   : > { %v13774_v44 = vunpack.i.h.bf16 %v13772_v47  ;;  %v13773_v63 = vunpack.i.l.bf16 %v13772_v47 }
 0x83d   : > { %v5241_v11 = vsel %vm241_vm1, %v13773_v63, %v13774_v44  ;;  %v5242_v10 = vsel %vm241_vm1, %v5239_v54, %v13773_v63  ;;  %v5240_v14 = vsel %vm241_vm1, %v13774_v44, %v5239_v54  ;;  %v5657_v63 = vpack.c.bf16 %v15179_v48, %v15179_v48 }
 0x83e   : > { %v13777_v20 = vpop.permute.xlu0 %13776  ;;  %v5246_v23 = vpack.c.bf16 %v5241_v11, %v5241_v11  ;;  %v5245_v22 = vpack.c.bf16 %v5242_v10, %v5242_v10  ;;  %v5247_v7 = vpack.c.bf16 %v5240_v14, %v5240_v14  ;;  %v5439_v35 = vpop.permute.xlu1 %5438  ;;  %v5656_v14 = vpack.c.bf16 %v15177_v9, %v15177_v9 }
 0x83f   : > { %v13779_v24 = vunpack.i.h.bf16 %v13777_v20  ;;  %v13778_v18 = vunpack.i.l.bf16 %v13777_v20  ;;  %v12435_v20 = vld [vmem:[%s16585_s2 + $0xc0] sm:$0xf] }
 0x840   : > { %12425 = vmatprep.subr.msk.bf16.mxu0 %vm254_vm3, %v5246_v23  ;;  %v5252_v51 = vsel %vm254_vm3, %v5245_v22, 0  ;;  %v5258_v13 = vsel %vm254_vm3, %v5247_v7, 0  ;;  %v5663_v7 = vsel %vm254_vm3, %v5656_v14, 0 }
 0x841   : > { %5275 = vmatpush1.bf16.msra.mxu0 %v5252_v51  ;;  %13171 = vmatpush3.bf16.msra.mxu1 %v5258_v13  ;;  %v5227_v42 = vsel %vm227_vm2, %v13778_v18, %v13779_v24  ;;  %v5228_v41 = vsel %vm227_vm2, %v5225_v17, %v13778_v18  ;;  %v5226_v49 = vsel %vm227_vm2, %v13779_v24, %v5225_v17 }
 0x842   : > { %v13782_v50 = vpop.permute.xlu0 %13781  ;;  %v5232_v33 = vpack.c.bf16 %v5227_v42, %v5227_v42  ;;  %13176 = vmatprep.subr.bf16.mxu1 %v14064_v0  ;;  %v5231_v19 = vpack.c.bf16 %v5228_v41, %v5228_v41  ;;  %v5233_v6 = vpack.c.bf16 %v5226_v49, %v5226_v49  ;;  %v5549_v3 = vpop.permute.xlu1 %5548  ;;  %v5658_v17 = vpack.c.bf16 %v15173_v58, %v15173_v58  ;;  %v12439_v49 = vld [vmem:[%s16585_s2 + $0xc4] sm:$0xf] }
 0x843   : > { %v13784_v16 = vunpack.i.h.bf16 %v13782_v50  ;;  %v13783_v34 = vunpack.i.l.bf16 %v13782_v50 }
 0x844   : > { %12426 = vmatmul.mubr.msk.bf16.vlgmr.msra.gmra.mxu0 %vm250_vm5, %v12424_v15  ;;  %13173 = vmatmul.mubr.msk.bf16.vlgmr.msra.gmra.mxu1 %vm250_vm5, %v12424_v15  ;;  %v5345_v21 = vsel %vm254_vm3, %v5231_v19, 0  ;;  %v5351_v25 = vsel %vm254_vm3, %v5233_v6, 0  ;;  %v5669_v9 = vsel %vm254_vm3, %v5658_v17, 0 }
 0x845   : > { %12428 = vmatprep.subr.msk.bf16.mxu0 %vm254_vm3, %v5232_v33  ;;  %13177 = vmatpush3.bf16.msra.mxu1 %v5351_v25  ;;  %v5441_v26 = vsel %vm444_vm4, %v13783_v34, %v13784_v16  ;;  %v5442_v36 = vsel %vm444_vm4, %v5439_v35, %v13783_v34  ;;  %v5440_v40 = vsel %vm444_vm4, %v13784_v16, %v5439_v35 }
 0x846   : > { %5368 = vmatpush1.bf16.msra.mxu0 %v5345_v21  ;;  %v13787_v27 = vpop.permute.xlu0 %13786  ;;  %v5446_v57 = vpack.c.bf16 %v5441_v26, %v5441_v26  ;;  %5385 = vmatprep.mubr.bf16.mxu0 %v14065_v1  ;;  %v5445_v5 = vpack.c.bf16 %v5442_v36, %v5442_v36  ;;  %v5447_v12 = vpack.c.bf16 %v5440_v40, %v5440_v40  ;;  %v5760_v10 = vpop.permute.xlu1 %5759 }
 0x847   : > { %v13789_v62 = vunpack.i.h.bf16 %v13787_v27  ;;  %v13788_v2 = vunpack.i.l.bf16 %v13787_v27  ;;  %13178 = vmatprep.mubr.msk.bf16.mxu1 %vm14066_vm0, %v14064_v0  ;;  %13182 = vmatprep.subr.bf16.mxu1 %v14064_v0  ;;  %v12443_v27 = vld [vmem:[%s16585_s2 + $0xc8] sm:$0xf] }
 0x848   : > { %12432 = vmatprep.subr.msk.bf16.mxu0 %vm254_vm3, %v5446_v57  ;;  %v5452_v56 = vsel %vm254_vm3, %v5445_v5, 0  ;;  %v5458_v61 = vsel %vm254_vm3, %v5447_v12, 0 }
 0x849   : > { %v5551_v46 = vsel %vm555_vm6, %v13788_v2, %v13789_v62  ;;  %v5552_v52 = vsel %vm555_vm6, %v5549_v3, %v13788_v2  ;;  %v5550_v39 = vsel %vm555_vm6, %v13789_v62, %v5549_v3 }
 0x84a   : > { %v5556_v4 = vpack.c.bf16 %v5551_v46, %v5551_v46  ;;  %v5555_v60 = vpack.c.bf16 %v5552_v52, %v5552_v52  ;;  %v5557_v55 = vpack.c.bf16 %v5550_v39, %v5550_v39  ;;  %v13792_v54 = vpop.permute.xlu0 %13791  ;;  %v5870_v13 = vpop.permute.xlu1 %5869  ;;  %v12447_v39 = vld [vmem:[%s16585_s2 + $0xcc] sm:$0xf] }
 0x84b   : > { %v13794_v11 = vunpack.i.h.bf16 %v13792_v54  ;;  %v13793_v48 = vunpack.i.l.bf16 %v13792_v54 }
 0x84c   : > { %12429 = vmatmul.mubr.msk.bf16.vlgmr.msra.gmra.mxu0 %vm250_vm5, %v12423_v59  ;;  %13179 = vmatmul.mubr.msk.bf16.vlgmr.msra.gmra.mxu1 %vm250_vm5, %v12423_v59  ;;  %v5562_v47 = vsel %vm254_vm3, %v5555_v60, 0  ;;  %v5568_v44 = vsel %vm254_vm3, %v5557_v55, 0 }
 0x84d   : > { %5475 = vmatpush1.bf16.msra.mxu0 %v5452_v56  ;;  %13183 = vmatpush3.bf16.msra.mxu1 %v5458_v61  ;;  %v5761_v23 = vsel %vm767_vm7, %v13794_v11, %v5760_v10  ;;  %v5762_v58 = vsel %vm767_vm7, %v13793_v48, %v13794_v11  ;;  %v5763_v51 = vsel %vm767_vm7, %v5760_v10, %v13793_v48  ;;  %v12451_v10 = vld [vmem:[%s16585_s2 + $0xd0] sm:$0xf]  ;;  %v12455_v48 = vld [vmem:[%s16585_s2 + $0xd4] sm:$0xf] }
 0x84e   : > { %12436 = vmatprep.subr.msk.bf16.mxu0 %vm254_vm3, %v5556_v4  ;;  %5492 = vmatprep.mubr.bf16.mxu0 %v14065_v1  ;;  %v13797_v22 = vpop.permute.xlu0 %13796  ;;  %v5767_v24 = vpack.c.bf16 %v5761_v23, %v5761_v23  ;;  %v5766_v15 = vpack.c.bf16 %v5762_v58, %v5762_v58  ;;  %v5768_v42 = vpack.c.bf16 %v5763_v51, %v5763_v51  ;;  %v5980_v25 = vpop.permute.xlu1 %5979 }
 0x84f   : > { %13184 = vmatprep.mubr.msk.bf16.mxu1 %vm14066_vm0, %v14064_v0  ;;  %13188 = vmatprep.subr.bf16.mxu1 %v14064_v0  ;;  %v13799_v18 = vunpack.i.h.bf16 %v13797_v22  ;;  %v13798_v41 = vunpack.i.l.bf16 %v13797_v22 }
 0x850   : > { %v5773_v19 = vsel %vm254_vm3, %v5766_v15, 0  ;;  %v5779_v6 = vsel %vm254_vm3, %v5768_v42, 0 }
 0x851   : > { %v5871_v50 = vsel %vm878_vm8, %v13799_v18, %v5870_v13  ;;  %v5872_v35 = vsel %vm878_vm8, %v13798_v41, %v13799_v18  ;;  %v5873_v21 = vsel %vm878_vm8, %v5870_v13, %v13798_v41 }
 0x852   : > { %v13802_v33 = vpop.permute.xlu0 %13801  ;;  %v5877_v16 = vpack.c.bf16 %v5871_v50, %v5871_v50  ;;  %v5876_v26 = vpack.c.bf16 %v5872_v35, %v5872_v35  ;;  %v5878_v36 = vpack.c.bf16 %v5873_v21, %v5873_v21  ;;  %v6090_v3 = vpop.permute.xlu1 %6089 }
 0x853   : > { %v13804_v34 = vunpack.i.h.bf16 %v13802_v33  ;;  %v13803_v40 = vunpack.i.l.bf16 %v13802_v33 }
 0x854   : > { %12433 = vmatmul.mubr.msk.bf16.vlgmr.msra.gmra.mxu0 %vm250_vm5, %v12431_v53  ;;  %13185 = vmatmul.mubr.msk.bf16.vlgmr.msra.gmra.mxu1 %vm250_vm5, %v12431_v53  ;;  %v5883_v2 = vsel %vm254_vm3, %v5876_v26, 0  ;;  %v5889_v5 = vsel %vm254_vm3, %v5878_v36, 0 }
 0x855   : > { %5585 = vmatpush1.bf16.msra.mxu0 %v5562_v47  ;;  %13189 = vmatpush3.bf16.msra.mxu1 %v5568_v44  ;;  %v5981_v57 = vsel %vm989_vm9, %v13804_v34, %v5980_v25  ;;  %v5982_v46 = vsel %vm989_vm9, %v13803_v40, %v13804_v34  ;;  %v5983_v4 = vsel %vm989_vm9, %v5980_v25, %v13803_v40 }
 0x856   : > { %12440 = vmatprep.subr.msk.bf16.mxu0 %vm254_vm3, %v5657_v63  ;;  %5602 = vmatprep.mubr.bf16.mxu0 %v14065_v1  ;;  %v13807_v62 = vpop.permute.xlu0 %13806  ;;  %v5987_v12 = vpack.c.bf16 %v5981_v57, %v5981_v57  ;;  %v5986_v56 = vpack.c.bf16 %v5982_v46, %v5982_v46  ;;  %v5988_v61 = vpack.c.bf16 %v5983_v4, %v5983_v4 }
 0x857   : > { %13190 = vmatprep.mubr.msk.bf16.mxu1 %vm14066_vm0, %v14064_v0  ;;  %13194 = vmatprep.subr.bf16.mxu1 %v14064_v0  ;;  %v13809_v59 = vunpack.i.h.bf16 %v13807_v62  ;;  %v13808_v52 = vunpack.i.l.bf16 %v13807_v62 }
 0x858   : > { %v5993_v55 = vsel %vm254_vm3, %v5986_v56, 0  ;;  %v5999_v53 = vsel %vm254_vm3, %v5988_v61, 0 }
 0x859   : > { %v6091_v60 = vsel %vm1100_vm10, %v13809_v59, %v6090_v3  ;;  %v6092_v47 = vsel %vm1100_vm10, %v13808_v52, %v13809_v59  ;;  %v6093_v44 = vsel %vm1100_vm10, %v6090_v3, %v13808_v52 }
 0x85a   : > { %v6097_v54 = vpack.c.bf16 %v6091_v60, %v6091_v60  ;;  %v6096_v63 = vpack.c.bf16 %v6092_v47, %v6092_v47  ;;  %v6098_v11 = vpack.c.bf16 %v6093_v44, %v6093_v44 }
 0x85c   : > { %12437 = vmatmul.mubr.msk.bf16.vlgmr.msra.gmra.mxu0 %vm250_vm5, %v12435_v20  ;;  %13191 = vmatmul.mubr.msk.bf16.vlgmr.msra.gmra.mxu1 %vm250_vm5, %v12435_v20  ;;  %v6103_v14 = vsel %vm254_vm3, %v6096_v63, 0  ;;  %v6109_v17 = vsel %vm254_vm3, %v6098_v11, 0 }
 0x85d   : > { %5686 = vmatpush1.bf16.msra.mxu0 %v5663_v7  ;;  %13195 = vmatpush3.bf16.msra.mxu1 %v5669_v9 }
 0x85e   : > { %12444 = vmatprep.subr.msk.bf16.mxu0 %vm254_vm3, %v5767_v24  ;;  %5703 = vmatprep.mubr.bf16.mxu0 %v14065_v1 }
 0x85f   : > { %13196 = vmatprep.mubr.msk.bf16.mxu1 %vm14066_vm0, %v14064_v0  ;;  %13200 = vmatprep.subr.bf16.mxu1 %v14064_v0 }
 0x864   : > { %12441 = vmatmul.mubr.msk.bf16.vlgmr.msra.gmra.mxu0 %vm250_vm5, %v12439_v49  ;;  %13197 = vmatmul.mubr.msk.bf16.vlgmr.msra.gmra.mxu1 %vm250_vm5, %v12439_v49 }
 0x865   : > { %5796 = vmatpush1.bf16.msra.mxu0 %v5773_v19  ;;  %13201 = vmatpush3.bf16.msra.mxu1 %v5779_v6 }
 0x866   : > { %12448 = vmatprep.subr.msk.bf16.mxu0 %vm254_vm3, %v5877_v16  ;;  %5813 = vmatprep.mubr.bf16.mxu0 %v14065_v1 }
 0x867   : > { %13202 = vmatprep.mubr.msk.bf16.mxu1 %vm14066_vm0, %v14064_v0  ;;  %13206 = vmatprep.subr.bf16.mxu1 %v14064_v0 }
 0x86c   : > { %12445 = vmatmul.mubr.msk.bf16.vlgmr.msra.gmra.mxu0 %vm250_vm5, %v12443_v27  ;;  %13203 = vmatmul.mubr.msk.bf16.vlgmr.msra.gmra.mxu1 %vm250_vm5, %v12443_v27 }
 0x86d   : > { %5906 = vmatpush1.bf16.msra.mxu0 %v5883_v2  ;;  %13207 = vmatpush3.bf16.msra.mxu1 %v5889_v5 }
 0x86e   : > { %12452 = vmatprep.subr.msk.bf16.mxu0 %vm254_vm3, %v5987_v12  ;;  %5923 = vmatprep.mubr.bf16.mxu0 %v14065_v1 }
 0x86f   : > { %13208 = vmatprep.mubr.msk.bf16.mxu1 %vm14066_vm0, %v14064_v0  ;;  %13212 = vmatprep.subr.bf16.mxu1 %v14064_v0 }
 0x874   : > { %12449 = vmatmul.mubr.msk.bf16.vlgmr.msra.gmra.mxu0 %vm250_vm5, %v12447_v39  ;;  %13209 = vmatmul.mubr.msk.bf16.vlgmr.msra.gmra.mxu1 %vm250_vm5, %v12447_v39 }
 0x875   : > { %6016 = vmatpush1.bf16.msra.mxu0 %v5993_v55  ;;  %13213 = vmatpush3.bf16.msra.mxu1 %v5999_v53 }
 0x876   : > { %12456 = vmatprep.subr.msk.bf16.mxu0 %vm254_vm3, %v6097_v54  ;;  %6033 = vmatprep.mubr.bf16.mxu0 %v14065_v1 }
 0x877   : > { %13214 = vmatprep.mubr.msk.bf16.mxu1 %vm14066_vm0, %v14064_v0  ;;  %13218 = vmatprep.subr.bf16.mxu1 %v14064_v0 }
 0x87c   : > { %12453 = vmatmul.mubr.msk.bf16.vlgmr.msra.gmra.mxu0 %vm250_vm5, %v12451_v10  ;;  %13215 = vmatmul.mubr.msk.bf16.vlgmr.msra.gmra.mxu1 %vm250_vm5, %v12451_v10 }
 0x87d   : > { %6126 = vmatpush1.bf16.msra.mxu0 %v6103_v14  ;;  %13219 = vmatpush3.bf16.msra.mxu1 %v6109_v17 }
 0x87e   : > { %6143 = vmatprep.mubr.bf16.mxu0 %v14065_v1  ;;  %13220 = vmatprep.mubr.msk.bf16.mxu1 %vm14066_vm0, %v14064_v0 }
 0x87f   : > { %13224 = vmatprep.subr.bf16.mxu1 %v14064_v0 }
 0x884   : > { %12457 = vmatmul.mubr.msk.bf16.vlgmr.msra.gmra.mxu0 %vm250_vm5, %v12455_v48  ;;  %13221 = vmatmul.mubr.msk.bf16.vlgmr.msra.gmra.mxu1 %vm250_vm5, %v12455_v48 }
 0x885   : > { %6289 = vmatprep.mubr.bf16.mxu0 %v14065_v1  ;;  %13226 = vmatprep.mubr.msk.bf16.mxu1 %vm14066_vm0, %v14064_v0 }
 0x904   : > { %v5294_v20 = vpop.f32.mrf.mxu0  ;;  %v5335_v23 = vpop.f32.mrf.mxu1 }
 0x906   : > { %v5296_v22 = vpop.f32.mrf.mxu0  ;;  %v13174_v7 = vpop.f32.mrf.mxu1 }
 0x908   : > { %v5298_v9 = vpop.f32.mrf.mxu0  ;;  %v5338_v24 = vpop.f32.mrf.mxu1 }
 0x90a   : > { %v5299_v18 = vpop.f32.mrf.mxu0  ;;  %v13175_v58 = vpop.f32.mrf.mxu1 }
 0x90c   : > { %v5387_v51 = vpop.f32.mrf.mxu0  ;;  %v5428_v13 = vpop.f32.mrf.mxu1 }
 0x90d   : > { %v5388_v7 = vadd.f32 %v5387_v51, %v5294_v20  ;;  %v5429_v9 = vadd.f32 %v5428_v13, %v5335_v23 }
 0x90e   : > { %v5389_v15 = vpop.f32.mrf.mxu0  ;;  %v13180_v42 = vpop.f32.mrf.mxu1 }
 0x90f   : > { %v5390_v58 = vadd.f32 %v5389_v15, %v5296_v22 }
 0x910   : > { %v5391_v41 = vpop.f32.mrf.mxu0  ;;  %v5431_v49 = vpop.f32.mrf.mxu1 }
 0x912   : > { %v5392_v50 = vpop.f32.mrf.mxu0  ;;  %v13181_v33 = vpop.f32.mrf.mxu1 }
 0x914   : > { %v5494_v19 = vpop.f32.mrf.mxu0  ;;  %v5535_v6 = vpop.f32.mrf.mxu1 }
 0x915   : > { %v5541_v42 = vadd.f32 %v5494_v19, %v5388_v7  ;;  %v5543_v41 = vadd.f32 %v5535_v6, %v5429_v9 }
 0x916   : > { %v5496_v16 = vpop.f32.mrf.mxu0  ;;  %v13186_v34 = vpop.f32.mrf.mxu1 }
 0x917   : > { %v5542_v33 = vadd.f32 %v5496_v16, %v5390_v58 }
 0x918   : > { %v5498_v35 = vpop.f32.mrf.mxu0  ;;  %v5538_v21 = vpop.f32.mrf.mxu1 }
 0x91a   : > { %v5499_v25 = vpop.f32.mrf.mxu0  ;;  %v13187_v26 = vpop.f32.mrf.mxu1 }
 0x91c   : > { %v5604_v36 = vpop.f32.mrf.mxu0  ;;  %v5645_v40 = vpop.f32.mrf.mxu1 }
 0x91d   : > { %v5651_v34 = vadd.f32 %v5604_v36, %v5541_v42  ;;  %v5653_v35 = vadd.f32 %v5645_v40, %v5543_v41  ;;  %v12496_v41 = vld [vmem:[%s16586_s3 + $0x30] sm:$0xff] }
 0x91e   : > { %v5606_v27 = vpop.f32.mrf.mxu0  ;;  %v13192_v57 = vpop.f32.mrf.mxu1 }
 0x91f   : > { %v5652_v26 = vadd.f32 %v5606_v27, %v5542_v33  ;;  %v6200_v27 = vpop.permute.xlu0 %6199 }
 0x920   : > { %v5608_v62 = vpop.f32.mrf.mxu0  ;;  %v5648_v2 = vpop.f32.mrf.mxu1 }
 0x922   : > { %v5609_v5 = vpop.f32.mrf.mxu0  ;;  %v13193_v12 = vpop.f32.mrf.mxu1 }
 0x924   : > { %v5705_v59 = vpop.f32.mrf.mxu0  ;;  %v5746_v46 = vpop.f32.mrf.mxu1 }
 0x925   : > { %v5752_v57 = vadd.f32 %v5705_v59, %v5651_v34  ;;  %v5754_v62 = vadd.f32 %v5746_v46, %v5653_v35 }
 0x926   : > { %v5707_v4 = vpop.f32.mrf.mxu0  ;;  %v13198_v3 = vpop.f32.mrf.mxu1 }
 0x927   : > { %v5753_v12 = vadd.f32 %v5707_v4, %v5652_v26 }
 0x928   : > { %v5709_v56 = vpop.f32.mrf.mxu0  ;;  %v5749_v61 = vpop.f32.mrf.mxu1 }
 0x92a   : > { %v5710_v52 = vpop.f32.mrf.mxu0  ;;  %v13199_v39 = vpop.f32.mrf.mxu1 }
 0x92c   : > { %v5815_v60 = vpop.f32.mrf.mxu0  ;;  %v5856_v55 = vpop.f32.mrf.mxu1 }
 0x92d   : > { %v5862_v20 = vadd.f32 %v5815_v60, %v5752_v57  ;;  %v5864_v23 = vadd.f32 %v5856_v55, %v5754_v62 }
 0x92e   : > { %v5817_v53 = vpop.f32.mrf.mxu0  ;;  %v13204_v54 = vpop.f32.mrf.mxu1 }
 0x92f   : > { %v5863_v22 = vadd.f32 %v5817_v53, %v5753_v12 }
 0x930   : > { %v5819_v47 = vpop.f32.mrf.mxu0  ;;  %v5859_v44 = vpop.f32.mrf.mxu1 }
 0x932   : > { %v5820_v63 = vpop.f32.mrf.mxu0  ;;  %v13205_v11 = vpop.f32.mrf.mxu1 }
 0x934   : > { %v5925_v10 = vpop.f32.mrf.mxu0  ;;  %v5966_v14 = vpop.f32.mrf.mxu1 }
 0x935   : > { %v5972_v15 = vadd.f32 %v5925_v10, %v5862_v20  ;;  %v5974_v19 = vadd.f32 %v5966_v14, %v5864_v23 }
 0x936   : > { %v5927_v17 = vpop.f32.mrf.mxu0  ;;  %v13210_v48 = vpop.f32.mrf.mxu1 }
 0x937   : > { %v5973_v16 = vadd.f32 %v5927_v17, %v5863_v22 }
 0x938   : > { %v5929_v24 = vpop.f32.mrf.mxu0  ;;  %v5969_v18 = vpop.f32.mrf.mxu1 }
 0x93a   : > { %v5930_v49 = vpop.f32.mrf.mxu0  ;;  %v13211_v50 = vpop.f32.mrf.mxu1 }
 0x93c   : > { %v6035_v21 = vpop.f32.mrf.mxu0  ;;  %v6076_v25 = vpop.f32.mrf.mxu1 }
 0x93d   : > { %v6082_v36 = vadd.f32 %v6035_v21, %v5972_v15  ;;  %v6084_v40 = vadd.f32 %v6076_v25, %v5974_v19 }
 0x93e   : > { %v6037_v2 = vpop.f32.mrf.mxu0  ;;  %v13216_v5 = vpop.f32.mrf.mxu1 }
 0x93f   : > { %v6083_v59 = vadd.f32 %v6037_v2, %v5973_v16 }
 0x940   : > { %v6039_v51 = vpop.f32.mrf.mxu0  ;;  %v6079_v13 = vpop.f32.mrf.mxu1 }
 0x941   : > { %v12461_v13 = vld [vmem:[%s16585_s2 + $0xdc] sm:$0xf] }
 0x942   : > { %v6040_v6 = vpop.f32.mrf.mxu0  ;;  %v13217_v3 = vpop.f32.mrf.mxu1 }
 0x944   : > { %v6145_v56 = vpop.f32.mrf.mxu0  ;;  %v6186_v61 = vpop.f32.mrf.mxu1 }
 0x945   : > { %v6192_v46 = vadd.f32 %v6145_v56, %v6082_v36  ;;  %v6194_v52 = vadd.f32 %v6186_v61, %v6084_v40 }
 0x946   : > { %v6147_v39 = vpop.f32.mrf.mxu0  ;;  %v13222_v4 = vpop.f32.mrf.mxu1 }
 0x947   : > { %v6202_v60 = vadd.f32 %v6200_v27, %v6192_v46  ;;  %v6204_v55 = vadd.f32 %v6200_v27, %v6194_v52  ;;  %v6193_v54 = vadd.f32 %v6147_v39, %v6083_v59 }
 0x948   : > { %v6149_v47 = vpop.f32.mrf.mxu0  ;;  %v6189_v53 = vpop.f32.mrf.mxu1 }
 0x949   : > { %v6205_v44 = vmul.f32 %v6202_v60, %v14334_v31  ;;  %v6207_v63 = vmul.f32 %v6204_v55, %v14339_v43  ;;  %v6203_v11 = vadd.f32 %v6200_v27, %v6193_v54 }
 0x94a   : > { %v6150_v10 = vpop.f32.mrf.mxu0  ;;  %v13223_v14 = vpop.f32.mrf.mxu1 }
 0x94b   : > { %vm6210_vm11 = vcmp.ge.f32.partialorder %v6207_v63, 0.0  ;;  %v6213_v17 = vmul.f32 0.2, %v6207_v63  ;;  %v6211_v48 = vmul.f32 0.2, %v6205_v44  ;;  %v6206_v7 = vmul.f32 %v6203_v11, %v14336_v38 }
 0x94c   : > { %vm6208_vm12 = vcmp.ge.f32.partialorder %v6205_v44, 0.0 }
 0x94d   : > { %v15373_v9 = vsel %vm6210_vm11, %v6207_v63, %v6213_v17  ;;  %vm6209_vm13 = vcmp.ge.f32.partialorder %v6206_v7, 0.0  ;;  %v6212_v24 = vmul.f32 0.2, %v6206_v7  ;;  %v15377_v18 = vsel %vm6208_vm12, %v6205_v44, %v6211_v48  ;;  %v12460_v63 = vld [vmem:[%s16585_s2 + $0xd8] sm:$0xf] }
 0x94e   : > { %6235 = vrot.lane.b32.xlu0 %v15373_v9, %s14067_s21 }
 0x94f   : > { %v15379_v58 = vsel %vm6209_vm13, %v6206_v7, %v6212_v24 }
 0x950   : > { %v13810_v42 = vpack.i.bf16 %v15379_v58, %v15377_v18 }
 0x952   : > { %6221 = vrot.lane.b32.xlu0 %v15373_v9, %s14068_s22  ;;  %13811 = vrot.lane.b32.xlu1 %v13810_v42, %s14067_s21 }
 0x956   : > { %6435 = vrot.lane.b32.xlu0 %v15373_v9, %s14069_s23  ;;  %13816 = vrot.lane.b32.xlu1 %v13810_v42, %s14068_s22 }
 0x95a   : > { %6545 = vrot.lane.b32.xlu0 %v15373_v9, %s14070_s24  ;;  %13821 = vrot.lane.b32.xlu1 %v13810_v42, %s14069_s23 }
 0x95e   : > { %6756 = vrot.lane.b32.xlu0 %v15373_v9, %s14071_s25  ;;  %13826 = vrot.lane.b32.xlu1 %v13810_v42, %s14070_s24 }
 0x962   : > { %6866 = vrot.lane.b32.xlu0 %v15373_v9, %s14072_s26  ;;  %13831 = vrot.lane.b32.xlu1 %v13810_v42, %s14071_s25 }
 0x966   : > { %6976 = vrot.lane.b32.xlu0 %v15373_v9, %s14073_s27  ;;  %13836 = vrot.lane.b32.xlu1 %v13810_v42, %s14072_s26 }
 0x96a   : > { %7086 = vrot.lane.b32.xlu0 %v15373_v9, %s14074_s28  ;;  %13841 = vrot.lane.b32.xlu1 %v13810_v42, %s14073_s27 }
 0x96e   : > { %13846 = vrot.lane.b32.xlu1 %v13810_v42, %s14074_s28 }
 0x972   : > { %7196 = vperm.xlu1 %13689, %v12496_v41   ;;  %v12468_v41 = vld [vmem:[%s16585_s2 + $0xe0] sm:$0xf] }
 0x9c0   : > { %v6236_v49 = vpop.permute.xlu0 %6235 }
 0x9c4   : > { %v13812_v50 = vpop.permute.xlu1 %13811  ;;  %v6222_v26 = vpop.permute.xlu0 %6221 }
 0x9c5   : > { %v13814_v33 = vunpack.i.h.bf16 %v13812_v50  ;;  %v13813_v34 = vunpack.i.l.bf16 %v13812_v50 }
 0x9c7   : > { %v6238_v35 = vsel %vm241_vm1, %v13813_v34, %v13814_v33  ;;  %v6239_v21 = vsel %vm241_vm1, %v6236_v49, %v13813_v34  ;;  %v6237_v25 = vsel %vm241_vm1, %v13814_v33, %v6236_v49  ;;  %v6654_v34 = vpack.c.bf16 %v15379_v58, %v15379_v58 }
 0x9c8   : > { %v13817_v57 = vpop.permute.xlu1 %13816  ;;  %v6243_v62 = vpack.c.bf16 %v6238_v35, %v6238_v35  ;;  %v6242_v2 = vpack.c.bf16 %v6239_v21, %v6239_v21  ;;  %v6244_v5 = vpack.c.bf16 %v6237_v25, %v6237_v25  ;;  %v6436_v61 = vpop.permute.xlu0 %6435  ;;  %v6653_v25 = vpack.c.bf16 %v15377_v18, %v15377_v18 }
 0x9c9   : > { %v13819_v12 = vunpack.i.h.bf16 %v13817_v57  ;;  %v13818_v20 = vunpack.i.l.bf16 %v13817_v57 }
 0x9ca   : > { %12462 = vmatprep.subr.msk.bf16.mxu0 %vm254_vm3, %v6243_v62  ;;  %v6249_v23 = vsel %vm254_vm3, %v6242_v2, 0  ;;  %v6255_v51 = vsel %vm254_vm3, %v6244_v5, 0  ;;  %v12472_v62 = vld [vmem:[%s16585_s2 + $0xe4] sm:$0xf] }
 0x9cb   : > { %6272 = vmatpush1.bf16.msra.mxu0 %v6249_v23  ;;  %13225 = vmatpush3.bf16.msra.mxu1 %v6255_v51  ;;  %v6224_v22 = vsel %vm227_vm2, %v13818_v20, %v13819_v12  ;;  %v6225_v15 = vsel %vm227_vm2, %v6222_v26, %v13818_v20  ;;  %v6223_v19 = vsel %vm227_vm2, %v13819_v12, %v6222_v26  ;;  %v6660_v12 = vsel %vm254_vm3, %v6653_v25, 0 }
 0x9cc   : > { %v13822_v6 = vpop.permute.xlu1 %13821  ;;  %v6229_v3 = vpack.c.bf16 %v6224_v22, %v6224_v22  ;;  %13230 = vmatprep.subr.bf16.mxu1 %v14064_v0  ;;  %v6228_v16 = vpack.c.bf16 %v6225_v15, %v6225_v15  ;;  %v6230_v36 = vpack.c.bf16 %v6223_v19, %v6223_v19  ;;  %v6546_v10 = vpop.permute.xlu0 %6545  ;;  %v6655_v26 = vpack.c.bf16 %v15373_v9, %v15373_v9 }
 0x9cd   : > { %v13824_v40 = vunpack.i.h.bf16 %v13822_v6  ;;  %v13823_v56 = vunpack.i.l.bf16 %v13822_v6  ;;  %v12476_v6 = vld [vmem:[%s16585_s2 + $0xe8] sm:$0xf] }
 0x9ce   : > { %12463 = vmatmul.mubr.msk.bf16.vlgmr.msra.gmra.mxu0 %vm250_vm5, %v12461_v13  ;;  %13227 = vmatmul.mubr.msk.bf16.vlgmr.msra.gmra.mxu1 %vm250_vm5, %v12461_v13  ;;  %v6342_v27 = vsel %vm254_vm3, %v6228_v16, 0  ;;  %v6348_v59 = vsel %vm254_vm3, %v6230_v36, 0  ;;  %v6666_v18 = vsel %vm254_vm3, %v6655_v26, 0 }
 0x9cf   : > { %v6438_v46 = vsel %vm444_vm4, %v13823_v56, %v13824_v40  ;;  %12465 = vmatprep.subr.msk.bf16.mxu0 %vm254_vm3, %v6229_v3  ;;  %13231 = vmatpush3.bf16.msra.mxu1 %v6348_v59  ;;  %v6439_v52 = vsel %vm444_vm4, %v6436_v61, %v13823_v56  ;;  %v6437_v39 = vsel %vm444_vm4, %v13824_v40, %v6436_v61 }
 0x9d0   : > { %v6443_v4 = vpack.c.bf16 %v6438_v46, %v6438_v46  ;;  %6365 = vmatpush1.bf16.msra.mxu0 %v6342_v27  ;;  %v13827_v60 = vpop.permute.xlu1 %13826  ;;  %6382 = vmatprep.mubr.bf16.mxu0 %v14065_v1  ;;  %v6442_v47 = vpack.c.bf16 %v6439_v52, %v6439_v52  ;;  %v6444_v53 = vpack.c.bf16 %v6437_v39, %v6437_v39  ;;  %v6757_v21 = vpop.permute.xlu0 %6756 }
 0x9d1   : > { %v13829_v55 = vunpack.i.h.bf16 %v13827_v60  ;;  %v13828_v54 = vunpack.i.l.bf16 %v13827_v60  ;;  %13232 = vmatprep.mubr.msk.bf16.mxu1 %vm14066_vm0, %v14064_v0  ;;  %13236 = vmatprep.subr.bf16.mxu1 %v14064_v0  ;;  %v12480_v60 = vld [vmem:[%s16585_s2 + $0xec] sm:$0xf] }
 0x9d2   : > { %12469 = vmatprep.subr.msk.bf16.mxu0 %vm254_vm3, %v6443_v4  ;;  %v6449_v14 = vsel %vm254_vm3, %v6442_v47, 0  ;;  %v6455_v17 = vsel %vm254_vm3, %v6444_v53, 0 }
 0x9d3   : > { %v6548_v44 = vsel %vm555_vm6, %v13828_v54, %v13829_v55  ;;  %v6549_v48 = vsel %vm555_vm6, %v6546_v10, %v13828_v54  ;;  %v6547_v7 = vsel %vm555_vm6, %v13829_v55, %v6546_v10 }
 0x9d4   : > { %v6553_v11 = vpack.c.bf16 %v6548_v44, %v6548_v44  ;;  %v6552_v24 = vpack.c.bf16 %v6549_v48, %v6549_v48  ;;  %v6554_v42 = vpack.c.bf16 %v6547_v7, %v6547_v7  ;;  %v13832_v49 = vpop.permute.xlu1 %13831  ;;  %v6867_v51 = vpop.permute.xlu0 %6866 }
 0x9d5   : > { %v13834_v35 = vunpack.i.h.bf16 %v13832_v49  ;;  %v13833_v57 = vunpack.i.l.bf16 %v13832_v49 }
 0x9d6   : > { %12466 = vmatmul.mubr.msk.bf16.vlgmr.msra.gmra.mxu0 %vm250_vm5, %v12460_v63  ;;  %13233 = vmatmul.mubr.msk.bf16.vlgmr.msra.gmra.mxu1 %vm250_vm5, %v12460_v63  ;;  %v6559_v50 = vsel %vm254_vm3, %v6552_v24, 0  ;;  %v6565_v33 = vsel %vm254_vm3, %v6554_v42, 0  ;;  %v12484_v24 = vld [vmem:[%s16585_s2 + $0xf0] sm:$0xf] }
 0x9d7   : > { %6472 = vmatpush1.bf16.msra.mxu0 %v6449_v14  ;;  %13237 = vmatpush3.bf16.msra.mxu1 %v6455_v17  ;;  %v6758_v58 = vsel %vm767_vm7, %v13834_v35, %v6757_v21  ;;  %v6759_v9 = vsel %vm767_vm7, %v13833_v57, %v13834_v35  ;;  %v6760_v23 = vsel %vm767_vm7, %v6757_v21, %v13833_v57  ;;  %v12488_v21 = vld [vmem:[%s16585_s2 + $0xf4] sm:$0xf] }
 0x9d8   : > { %12473 = vmatprep.subr.msk.bf16.mxu0 %vm254_vm3, %v6553_v11  ;;  %6489 = vmatprep.mubr.bf16.mxu0 %v14065_v1  ;;  %v13837_v2 = vpop.permute.xlu1 %13836  ;;  %v6764_v5 = vpack.c.bf16 %v6758_v58, %v6758_v58  ;;  %v6763_v13 = vpack.c.bf16 %v6759_v9, %v6759_v9  ;;  %v6765_v22 = vpack.c.bf16 %v6760_v23, %v6760_v23  ;;  %v6977_v59 = vpop.permute.xlu0 %6976  ;;  %v12492_v58 = vld [vmem:[%s16585_s2 + $0xf8] sm:$0xf] }
 0x9d9   : > { %13238 = vmatprep.mubr.msk.bf16.mxu1 %vm14066_vm0, %v14064_v0  ;;  %13242 = vmatprep.subr.bf16.mxu1 %v14064_v0  ;;  %v13839_v20 = vunpack.i.h.bf16 %v13837_v2  ;;  %v13838_v19 = vunpack.i.l.bf16 %v13837_v2 }
 0x9da   : > { %v6770_v36 = vsel %vm254_vm3, %v6763_v13, 0  ;;  %v6776_v40 = vsel %vm254_vm3, %v6765_v22, 0 }
 0x9db   : > { %v6868_v15 = vsel %vm878_vm8, %v13839_v20, %v6867_v51  ;;  %v6869_v61 = vsel %vm878_vm8, %v13838_v19, %v13839_v20  ;;  %v6870_v27 = vsel %vm878_vm8, %v6867_v51, %v13838_v19 }
 0x9dc   : > { %v13842_v3 = vpop.permute.xlu1 %13841  ;;  %v6874_v16 = vpack.c.bf16 %v6868_v15, %v6868_v15  ;;  %v6873_v46 = vpack.c.bf16 %v6869_v61, %v6869_v61  ;;  %v6875_v52 = vpack.c.bf16 %v6870_v27, %v6870_v27  ;;  %v7087_v10 = vpop.permute.xlu0 %7086 }
 0x9dd   : > { %v13844_v56 = vunpack.i.h.bf16 %v13842_v3  ;;  %v13843_v4 = vunpack.i.l.bf16 %v13842_v3 }
 0x9de   : > { %12470 = vmatmul.mubr.msk.bf16.vlgmr.msra.gmra.mxu0 %vm250_vm5, %v12468_v41  ;;  %13239 = vmatmul.mubr.msk.bf16.vlgmr.msra.gmra.mxu1 %vm250_vm5, %v12468_v41  ;;  %v6880_v47 = vsel %vm254_vm3, %v6873_v46, 0  ;;  %v6886_v53 = vsel %vm254_vm3, %v6875_v52, 0 }
 0x9df   : > { %6582 = vmatpush1.bf16.msra.mxu0 %v6559_v50  ;;  %13243 = vmatpush3.bf16.msra.mxu1 %v6565_v33  ;;  %v6978_v39 = vsel %vm989_vm9, %v13844_v56, %v6977_v59  ;;  %v6979_v63 = vsel %vm989_vm9, %v13843_v4, %v13844_v56  ;;  %v6980_v11 = vsel %vm989_vm9, %v6977_v59, %v13843_v4 }
 0x9e0   : > { %12477 = vmatprep.subr.msk.bf16.mxu0 %vm254_vm3, %v6654_v34  ;;  %6599 = vmatprep.mubr.bf16.mxu0 %v14065_v1  ;;  %v13847_v55 = vpop.permute.xlu1 %13846  ;;  %v6984_v54 = vpack.c.bf16 %v6978_v39, %v6978_v39  ;;  %v6983_v14 = vpack.c.bf16 %v6979_v63, %v6979_v63  ;;  %v6985_v17 = vpack.c.bf16 %v6980_v11, %v6980_v11 }
 0x9e1   : > { %13244 = vmatprep.mubr.msk.bf16.mxu1 %vm14066_vm0, %v14064_v0  ;;  %13248 = vmatprep.subr.bf16.mxu1 %v14064_v0  ;;  %v13849_v44 = vunpack.i.h.bf16 %v13847_v55  ;;  %v13848_v7 = vunpack.i.l.bf16 %v13847_v55 }
 0x9e2   : > { %v6990_v41 = vsel %vm254_vm3, %v6983_v14, 0  ;;  %v6996_v49 = vsel %vm254_vm3, %v6985_v17, 0 }
 0x9e3   : > { %v7088_v48 = vsel %vm1100_vm10, %v13849_v44, %v7087_v10  ;;  %v7089_v50 = vsel %vm1100_vm10, %v13848_v7, %v13849_v44  ;;  %v7090_v33 = vsel %vm1100_vm10, %v7087_v10, %v13848_v7 }
 0x9e4   : > { %v7094_v42 = vpack.c.bf16 %v7088_v48, %v7088_v48  ;;  %v7093_v34 = vpack.c.bf16 %v7089_v50, %v7089_v50  ;;  %v7095_v35 = vpack.c.bf16 %v7090_v33, %v7090_v33 }
 0x9e6   : > { %12474 = vmatmul.mubr.msk.bf16.vlgmr.msra.gmra.mxu0 %vm250_vm5, %v12472_v62  ;;  %13245 = vmatmul.mubr.msk.bf16.vlgmr.msra.gmra.mxu1 %vm250_vm5, %v12472_v62  ;;  %v7100_v25 = vsel %vm254_vm3, %v7093_v34, 0  ;;  %v7106_v26 = vsel %vm254_vm3, %v7095_v35, 0 }
 0x9e7   : > { %6683 = vmatpush1.bf16.msra.mxu0 %v6660_v12  ;;  %13249 = vmatpush3.bf16.msra.mxu1 %v6666_v18 }
 0x9e8   : > { %12481 = vmatprep.subr.msk.bf16.mxu0 %vm254_vm3, %v6764_v5  ;;  %6700 = vmatprep.mubr.bf16.mxu0 %v14065_v1 }
 0x9e9   : > { %13250 = vmatprep.mubr.msk.bf16.mxu1 %vm14066_vm0, %v14064_v0  ;;  %13254 = vmatprep.subr.bf16.mxu1 %v14064_v0 }
 0x9ee   : > { %12478 = vmatmul.mubr.msk.bf16.vlgmr.msra.gmra.mxu0 %vm250_vm5, %v12476_v6  ;;  %13251 = vmatmul.mubr.msk.bf16.vlgmr.msra.gmra.mxu1 %vm250_vm5, %v12476_v6 }
 0x9ef   : > { %6793 = vmatpush1.bf16.msra.mxu0 %v6770_v36  ;;  %13255 = vmatpush3.bf16.msra.mxu1 %v6776_v40 }
 0x9f0   : > { %12485 = vmatprep.subr.msk.bf16.mxu0 %vm254_vm3, %v6874_v16  ;;  %6810 = vmatprep.mubr.bf16.mxu0 %v14065_v1 }
 0x9f1   : > { %13256 = vmatprep.mubr.msk.bf16.mxu1 %vm14066_vm0, %v14064_v0  ;;  %13260 = vmatprep.subr.bf16.mxu1 %v14064_v0 }
 0x9f6   : > { %12482 = vmatmul.mubr.msk.bf16.vlgmr.msra.gmra.mxu0 %vm250_vm5, %v12480_v60  ;;  %13257 = vmatmul.mubr.msk.bf16.vlgmr.msra.gmra.mxu1 %vm250_vm5, %v12480_v60 }
 0x9f7   : > { %6903 = vmatpush1.bf16.msra.mxu0 %v6880_v47  ;;  %13261 = vmatpush3.bf16.msra.mxu1 %v6886_v53 }
 0x9f8   : > { %12489 = vmatprep.subr.msk.bf16.mxu0 %vm254_vm3, %v6984_v54  ;;  %6920 = vmatprep.mubr.bf16.mxu0 %v14065_v1 }
 0x9f9   : > { %13262 = vmatprep.mubr.msk.bf16.mxu1 %vm14066_vm0, %v14064_v0  ;;  %13266 = vmatprep.subr.bf16.mxu1 %v14064_v0 }
 0x9fe   : > { %12486 = vmatmul.mubr.msk.bf16.vlgmr.msra.gmra.mxu0 %vm250_vm5, %v12484_v24  ;;  %13263 = vmatmul.mubr.msk.bf16.vlgmr.msra.gmra.mxu1 %vm250_vm5, %v12484_v24 }
 0x9ff   : > { %7013 = vmatpush1.bf16.msra.mxu0 %v6990_v41  ;;  %13267 = vmatpush3.bf16.msra.mxu1 %v6996_v49 }
 0xa00   : > { %12493 = vmatprep.subr.msk.bf16.mxu0 %vm254_vm3, %v7094_v42  ;;  %7030 = vmatprep.mubr.bf16.mxu0 %v14065_v1 }
 0xa01   : > { %13268 = vmatprep.mubr.msk.bf16.mxu1 %vm14066_vm0, %v14064_v0  ;;  %13272 = vmatprep.subr.bf16.mxu1 %v14064_v0 }
 0xa06   : > { %12490 = vmatmul.mubr.msk.bf16.vlgmr.msra.gmra.mxu0 %vm250_vm5, %v12488_v21  ;;  %13269 = vmatmul.mubr.msk.bf16.vlgmr.msra.gmra.mxu1 %vm250_vm5, %v12488_v21 }
 0xa07   : > { %7123 = vmatpush1.bf16.msra.mxu0 %v7100_v25  ;;  %13273 = vmatpush3.bf16.msra.mxu1 %v7106_v26 }
 0xa08   : > { %7140 = vmatprep.mubr.bf16.mxu0 %v14065_v1  ;;  %13274 = vmatprep.mubr.msk.bf16.mxu1 %vm14066_vm0, %v14064_v0 }
 0xa09   : > { %13278 = vmatprep.subr.bf16.mxu1 %v14064_v0 }
 0xa0e   : > { %12494 = vmatmul.mubr.msk.bf16.vlgmr.msra.gmra.mxu0 %vm250_vm5, %v12492_v58  ;;  %13275 = vmatmul.mubr.msk.bf16.vlgmr.msra.gmra.mxu1 %vm250_vm5, %v12492_v58 }
 0xa0f   : > { %7280 = vmatprep.mubr.bf16.mxu0 %v14065_v1  ;;  %13280 = vmatprep.mubr.msk.bf16.mxu1 %vm14066_vm0, %v14064_v0 }
 0xa8e   : > { %v6291_v57 = vpop.f32.mrf.mxu0  ;;  %v6332_v62 = vpop.f32.mrf.mxu1 }
 0xa90   : > { %v6293_v2 = vpop.f32.mrf.mxu0  ;;  %v13228_v5 = vpop.f32.mrf.mxu1 }
 0xa92   : > { %v6295_v12 = vpop.f32.mrf.mxu0  ;;  %v6335_v18 = vpop.f32.mrf.mxu1 }
 0xa94   : > { %v6296_v20 = vpop.f32.mrf.mxu0  ;;  %v13229_v9 = vpop.f32.mrf.mxu1 }
 0xa96   : > { %v6384_v23 = vpop.f32.mrf.mxu0  ;;  %v6425_v51 = vpop.f32.mrf.mxu1 }
 0xa97   : > { %v6385_v5 = vadd.f32 %v6384_v23, %v6291_v57  ;;  %v6426_v12 = vadd.f32 %v6425_v51, %v6332_v62 }
 0xa98   : > { %v6386_v13 = vpop.f32.mrf.mxu0  ;;  %v13234_v22 = vpop.f32.mrf.mxu1 }
 0xa99   : > { %v6387_v9 = vadd.f32 %v6386_v13, %v6293_v2 }
 0xa9a   : > { %v6388_v15 = vpop.f32.mrf.mxu0  ;;  %v6428_v19 = vpop.f32.mrf.mxu1 }
 0xa9c   : > { %v6389_v6 = vpop.f32.mrf.mxu0  ;;  %v13235_v3 = vpop.f32.mrf.mxu1 }
 0xa9e   : > { %v6491_v16 = vpop.f32.mrf.mxu0  ;;  %v6532_v36 = vpop.f32.mrf.mxu1 }
 0xa9f   : > { %v6538_v22 = vadd.f32 %v6491_v16, %v6385_v5  ;;  %v6540_v15 = vadd.f32 %v6532_v36, %v6426_v12 }
 0xaa0   : > { %v6493_v40 = vpop.f32.mrf.mxu0  ;;  %v13240_v56 = vpop.f32.mrf.mxu1 }
 0xaa1   : > { %v6539_v3 = vadd.f32 %v6493_v40, %v6387_v9 }
 0xaa2   : > { %v6495_v61 = vpop.f32.mrf.mxu0  ;;  %v6535_v27 = vpop.f32.mrf.mxu1 }
 0xaa4   : > { %v6496_v59 = vpop.f32.mrf.mxu0  ;;  %v13241_v46 = vpop.f32.mrf.mxu1 }
 0xaa6   : > { %v6601_v52 = vpop.f32.mrf.mxu0  ;;  %v6642_v39 = vpop.f32.mrf.mxu1 }
 0xaa7   : > { %v6648_v56 = vadd.f32 %v6601_v52, %v6538_v22  ;;  %v6650_v61 = vadd.f32 %v6642_v39, %v6540_v15 }
 0xaa8   : > { %v6603_v4 = vpop.f32.mrf.mxu0  ;;  %v13246_v60 = vpop.f32.mrf.mxu1 }
 0xaa9   : > { %v6649_v46 = vadd.f32 %v6603_v4, %v6539_v3  ;;  %v7197_v4 = vpop.permute.xlu1 %7196 }
 0xaaa   : > { %v6605_v55 = vpop.f32.mrf.mxu0  ;;  %v6645_v54 = vpop.f32.mrf.mxu1 }
 0xaac   : > { %v6606_v47 = vpop.f32.mrf.mxu0  ;;  %v13247_v53 = vpop.f32.mrf.mxu1 }
 0xaae   : > { %v6702_v44 = vpop.f32.mrf.mxu0  ;;  %v6743_v63 = vpop.f32.mrf.mxu1 }
 0xaaf   : > { %v6749_v60 = vadd.f32 %v6702_v44, %v6648_v56  ;;  %v6751_v55 = vadd.f32 %v6743_v63, %v6650_v61 }
 0xab0   : > { %v6704_v11 = vpop.f32.mrf.mxu0  ;;  %v13252_v10 = vpop.f32.mrf.mxu1 }
 0xab1   : > { %v6750_v53 = vadd.f32 %v6704_v11, %v6649_v46 }
 0xab2   : > { %v6706_v14 = vpop.f32.mrf.mxu0  ;;  %v6746_v17 = vpop.f32.mrf.mxu1 }
 0xab4   : > { %v6707_v48 = vpop.f32.mrf.mxu0  ;;  %v13253_v7 = vpop.f32.mrf.mxu1 }
 0xab6   : > { %v6812_v24 = vpop.f32.mrf.mxu0  ;;  %v6853_v42 = vpop.f32.mrf.mxu1 }
 0xab7   : > { %v6859_v57 = vadd.f32 %v6812_v24, %v6749_v60  ;;  %v6861_v62 = vadd.f32 %v6853_v42, %v6751_v55 }
 0xab8   : > { %v6814_v41 = vpop.f32.mrf.mxu0  ;;  %v13258_v49 = vpop.f32.mrf.mxu1 }
 0xab9   : > { %v6860_v2 = vadd.f32 %v6814_v41, %v6750_v53 }
 0xaba   : > { %v6816_v50 = vpop.f32.mrf.mxu0  ;;  %v6856_v33 = vpop.f32.mrf.mxu1 }
 0xabc   : > { %v6817_v34 = vpop.f32.mrf.mxu0  ;;  %v13259_v35 = vpop.f32.mrf.mxu1 }
 0xabe   : > { %v6922_v21 = vpop.f32.mrf.mxu0  ;;  %v6963_v25 = vpop.f32.mrf.mxu1 }
 0xabf   : > { %v6969_v13 = vadd.f32 %v6922_v21, %v6859_v57  ;;  %v6971_v16 = vadd.f32 %v6963_v25, %v6861_v62  ;;  %v12498_v62 = vld [vmem:[%s16585_s2 + $0x100] sm:$0xf] }
 0xac0   : > { %v6924_v26 = vpop.f32.mrf.mxu0  ;;  %v13264_v58 = vpop.f32.mrf.mxu1 }
 0xac1   : > { %v6970_v40 = vadd.f32 %v6924_v26, %v6860_v2 }
 0xac2   : > { %v6926_v18 = vpop.f32.mrf.mxu0  ;;  %v6966_v20 = vpop.f32.mrf.mxu1 }
 0xac3   : > { %v12533_v20 = vld [vmem:[%s16586_s3 + $0x38] sm:$0xff] }
 0xac4   : > { %v6927_v19 = vpop.f32.mrf.mxu0  ;;  %v13265_v6 = vpop.f32.mrf.mxu1 }
 0xac6   : > { %v7032_v27 = vpop.f32.mrf.mxu0  ;;  %v7073_v59 = vpop.f32.mrf.mxu1 }
 0xac7   : > { %v7079_v52 = vadd.f32 %v7032_v27, %v6969_v13  ;;  %v7081_v39 = vadd.f32 %v7073_v59, %v6971_v16 }
 0xac8   : > { %v7034_v54 = vpop.f32.mrf.mxu0  ;;  %v13270_v47 = vpop.f32.mrf.mxu1 }
 0xac9   : > { %v7080_v44 = vadd.f32 %v7034_v54, %v6970_v40 }
 0xaca   : > { %v7036_v23 = vpop.f32.mrf.mxu0  ;;  %v7076_v51 = vpop.f32.mrf.mxu1 }
 0xacc   : > { %v7037_v36 = vpop.f32.mrf.mxu0  ;;  %v13271_v10 = vpop.f32.mrf.mxu1 }
 0xace   : > { %v7142_v14 = vpop.f32.mrf.mxu0  ;;  %v7183_v17 = vpop.f32.mrf.mxu1 }
 0xacf   : > { %v7189_v63 = vadd.f32 %v7142_v14, %v7079_v52  ;;  %v7191_v48 = vadd.f32 %v7183_v17, %v7081_v39 }
 0xad0   : > { %v7144_v7 = vpop.f32.mrf.mxu0  ;;  %v13276_v11 = vpop.f32.mrf.mxu1 }
 0xad1   : > { %v7199_v24 = vadd.f32 %v7197_v4, %v7189_v63  ;;  %v7201_v42 = vadd.f32 %v7197_v4, %v7191_v48  ;;  %v7190_v49 = vadd.f32 %v7144_v7, %v7080_v44 }
 0xad2   : > { %v7146_v50 = vpop.f32.mrf.mxu0  ;;  %v7186_v41 = vpop.f32.mrf.mxu1 }
 0xad3   : > { %v7202_v33 = vmul.f32 %v7199_v24, %v14334_v31  ;;  %v7204_v34 = vmul.f32 %v7201_v42, %v14339_v43  ;;  %v7200_v35 = vadd.f32 %v7197_v4, %v7190_v49  ;;  %v12497_v50 = vld [vmem:[%s16585_s2 + $0xfc] sm:$0xf] }
 0xad4   : > { %v7147_v21 = vpop.f32.mrf.mxu0  ;;  %v13277_v25 = vpop.f32.mrf.mxu1 }
 0xad5   : > { %v15572_v26 = vmax.f32 %v7204_v34, 0.0  ;;  %v7203_v58 = vmul.f32 %v7200_v35, %v14336_v38  ;;  %v15575_v5 = vmax.f32 %v7202_v33, 0.0 }
 0xad7   : > { %v15577_v12 = vmax.f32 %v7203_v58, 0.0  ;;  %7226 = vrot.lane.b32.xlu1 %v15572_v26, %s14067_s21 }
 0xad9   : > { %v13850_v18 = vpack.i.bf16 %v15577_v12, %v15575_v5 }
 0xadb   : > { %7212 = vrot.lane.b32.xlu1 %v15572_v26, %s14068_s22  ;;  %13851 = vrot.lane.b32.xlu0 %v13850_v18, %s14067_s21 }
 0xadf   : > { %7426 = vrot.lane.b32.xlu1 %v15572_v26, %s14069_s23  ;;  %13856 = vrot.lane.b32.xlu0 %v13850_v18, %s14068_s22 }
 0xae3   : > { %7536 = vrot.lane.b32.xlu1 %v15572_v26, %s14070_s24  ;;  %13861 = vrot.lane.b32.xlu0 %v13850_v18, %s14069_s23 }
 0xae7   : > { %7747 = vrot.lane.b32.xlu1 %v15572_v26, %s14071_s25  ;;  %13866 = vrot.lane.b32.xlu0 %v13850_v18, %s14070_s24 }
 0xaeb   : > { %7857 = vrot.lane.b32.xlu1 %v15572_v26, %s14072_s26  ;;  %13871 = vrot.lane.b32.xlu0 %v13850_v18, %s14071_s25 }
 0xaef   : > { %7967 = vrot.lane.b32.xlu1 %v15572_v26, %s14073_s27  ;;  %13876 = vrot.lane.b32.xlu0 %v13850_v18, %s14072_s26 }
 0xaf3   : > { %8077 = vrot.lane.b32.xlu1 %v15572_v26, %s14074_s28  ;;  %13881 = vrot.lane.b32.xlu0 %v13850_v18, %s14073_s27 }
 0xaf7   : > { %13886 = vrot.lane.b32.xlu0 %v13850_v18, %s14074_s28 }
 0xafb   : > { %8187 = vperm.xlu0 %13608, %v12533_v20   ;;  %v12505_v20 = vld [vmem:[%s16585_s2 + $0x104] sm:$0xf] }
 0xb49   : > { %v7227_v9 = vpop.permute.xlu1 %7226 }
 0xb4d   : > { %v13852_v22 = vpop.permute.xlu0 %13851  ;;  %v7213_v61 = vpop.permute.xlu1 %7212 }
 0xb4e   : > { %v13854_v15 = vunpack.i.h.bf16 %v13852_v22  ;;  %v13853_v19 = vunpack.i.l.bf16 %v13852_v22 }
 0xb50   : > { %v7229_v6 = vsel %vm241_vm1, %v13853_v19, %v13854_v15  ;;  %v7230_v3 = vsel %vm241_vm1, %v7227_v9, %v13853_v19  ;;  %v7228_v56 = vsel %vm241_vm1, %v13854_v15, %v7227_v9  ;;  %v7645_v19 = vpack.c.bf16 %v15577_v12, %v15577_v12 }
 0xb51   : > { %v7234_v27 = vpack.c.bf16 %v7229_v6, %v7229_v6  ;;  %v13857_v59 = vpop.permute.xlu0 %13856  ;;  %v7233_v46 = vpack.c.bf16 %v7230_v3, %v7230_v3  ;;  %v7235_v60 = vpack.c.bf16 %v7228_v56, %v7228_v56  ;;  %v7427_v52 = vpop.permute.xlu1 %7426  ;;  %v7644_v56 = vpack.c.bf16 %v15575_v5, %v15575_v5 }
 0xb52   : > { %v13859_v55 = vunpack.i.h.bf16 %v13857_v59  ;;  %v13858_v54 = vunpack.i.l.bf16 %v13857_v59  ;;  %v12509_v59 = vld [vmem:[%s16585_s2 + $0x108] sm:$0xf] }
 0xb53   : > { %12499 = vmatprep.subr.msk.bf16.mxu0 %vm254_vm3, %v7234_v27  ;;  %v7240_v47 = vsel %vm254_vm3, %v7233_v46, 0  ;;  %v7246_v53 = vsel %vm254_vm3, %v7235_v60, 0 }
 0xb54   : > { %v7215_v57 = vsel %vm227_vm2, %v13858_v54, %v13859_v55  ;;  %7263 = vmatpush1.bf16.msra.mxu0 %v7240_v47  ;;  %13279 = vmatpush3.bf16.msra.mxu1 %v7246_v53  ;;  %v7216_v23 = vsel %vm227_vm2, %v7213_v61, %v13858_v54  ;;  %v7214_v51 = vsel %vm227_vm2, %v13859_v55, %v7213_v61  ;;  %v7651_v55 = vsel %vm254_vm3, %v7644_v56, 0 }
 0xb55   : > { %v7220_v2 = vpack.c.bf16 %v7215_v57, %v7215_v57  ;;  %v13862_v13 = vpop.permute.xlu0 %13861  ;;  %13284 = vmatprep.subr.bf16.mxu1 %v14064_v0  ;;  %v7219_v16 = vpack.c.bf16 %v7216_v23, %v7216_v23  ;;  %v7221_v36 = vpack.c.bf16 %v7214_v51, %v7214_v51  ;;  %v7537_v33 = vpop.permute.xlu1 %7536  ;;  %v7646_v61 = vpack.c.bf16 %v15572_v26, %v15572_v26 }
 0xb56   : > { %v13864_v10 = vunpack.i.h.bf16 %v13862_v13  ;;  %v13863_v40 = vunpack.i.l.bf16 %v13862_v13 }
 0xb57   : > { %12500 = vmatmul.mubr.msk.bf16.vlgmr.msra.gmra.mxu0 %vm250_vm5, %v12498_v62  ;;  %13281 = vmatmul.mubr.msk.bf16.vlgmr.msra.gmra.mxu1 %vm250_vm5, %v12498_v62  ;;  %v7333_v39 = vsel %vm254_vm3, %v7219_v16, 0  ;;  %v7339_v14 = vsel %vm254_vm3, %v7221_v36, 0  ;;  %v7657_v5 = vsel %vm254_vm3, %v7646_v61, 0 }
 0xb58   : > { %v7429_v17 = vsel %vm444_vm4, %v13863_v40, %v13864_v10  ;;  %12502 = vmatprep.subr.msk.bf16.mxu0 %vm254_vm3, %v7220_v2  ;;  %13285 = vmatpush3.bf16.msra.mxu1 %v7339_v14  ;;  %v7430_v4 = vsel %vm444_vm4, %v7427_v52, %v13863_v40  ;;  %v7428_v44 = vsel %vm444_vm4, %v13864_v10, %v7427_v52  ;;  %v12513_v2 = vld [vmem:[%s16585_s2 + $0x10c] sm:$0xf] }
 0xb59   : > { %v7434_v63 = vpack.c.bf16 %v7429_v17, %v7429_v17  ;;  %7356 = vmatpush1.bf16.msra.mxu0 %v7333_v39  ;;  %v13867_v48 = vpop.permute.xlu0 %13866  ;;  %7373 = vmatprep.mubr.bf16.mxu0 %v14065_v1  ;;  %v7433_v24 = vpack.c.bf16 %v7430_v4, %v7430_v4  ;;  %v7435_v42 = vpack.c.bf16 %v7428_v44, %v7428_v44  ;;  %v7748_v3 = vpop.permute.xlu1 %7747 }
 0xb5a   : > { %v13869_v7 = vunpack.i.h.bf16 %v13867_v48  ;;  %v13868_v11 = vunpack.i.l.bf16 %v13867_v48  ;;  %13286 = vmatprep.mubr.msk.bf16.mxu1 %vm14066_vm0, %v14064_v0  ;;  %13290 = vmatprep.subr.bf16.mxu1 %v14064_v0  ;;  %v12517_v48 = vld [vmem:[%s16585_s2 + $0x110] sm:$0xf] }
 0xb5b   : > { %12506 = vmatprep.subr.msk.bf16.mxu0 %vm254_vm3, %v7434_v63  ;;  %v7440_v34 = vsel %vm254_vm3, %v7433_v24, 0  ;;  %v7446_v35 = vsel %vm254_vm3, %v7435_v42, 0 }
 0xb5c   : > { %v7539_v49 = vsel %vm555_vm6, %v13868_v11, %v13869_v7  ;;  %v7540_v21 = vsel %vm555_vm6, %v7537_v33, %v13868_v11  ;;  %v7538_v25 = vsel %vm555_vm6, %v13869_v7, %v7537_v33 }
 0xb5d   : > { %v7544_v41 = vpack.c.bf16 %v7539_v49, %v7539_v49  ;;  %v7543_v58 = vpack.c.bf16 %v7540_v21, %v7540_v21  ;;  %v7545_v18 = vpack.c.bf16 %v7538_v25, %v7538_v25  ;;  %v13872_v9 = vpop.permute.xlu0 %13871  ;;  %v7858_v53 = vpop.permute.xlu1 %7857 }
 0xb5e   : > { %v13874_v6 = vunpack.i.h.bf16 %v13872_v9  ;;  %v13873_v27 = vunpack.i.l.bf16 %v13872_v9 }
 0xb5f   : > { %12503 = vmatmul.mubr.msk.bf16.vlgmr.msra.gmra.mxu0 %vm250_vm5, %v12497_v50  ;;  %13287 = vmatmul.mubr.msk.bf16.vlgmr.msra.gmra.mxu1 %vm250_vm5, %v12497_v50  ;;  %v7550_v22 = vsel %vm254_vm3, %v7543_v58, 0  ;;  %v7556_v15 = vsel %vm254_vm3, %v7545_v18, 0  ;;  %v12521_v58 = vld [vmem:[%s16585_s2 + $0x114] sm:$0xf] }
 0xb60   : > { %7463 = vmatpush1.bf16.msra.mxu0 %v7440_v34  ;;  %13291 = vmatpush3.bf16.msra.mxu1 %v7446_v35  ;;  %v7749_v12 = vsel %vm767_vm7, %v13874_v6, %v7748_v3  ;;  %v7750_v26 = vsel %vm767_vm7, %v13873_v27, %v13874_v6  ;;  %v7751_v47 = vsel %vm767_vm7, %v7748_v3, %v13873_v27  ;;  %v12525_v3 = vld [vmem:[%s16585_s2 + $0x118] sm:$0xf] }
 0xb61   : > { %12510 = vmatprep.subr.msk.bf16.mxu0 %vm254_vm3, %v7544_v41  ;;  %7480 = vmatprep.mubr.bf16.mxu0 %v14065_v1  ;;  %v13877_v46 = vpop.permute.xlu0 %13876  ;;  %v7755_v60 = vpack.c.bf16 %v7749_v12, %v7749_v12  ;;  %v7754_v57 = vpack.c.bf16 %v7750_v26, %v7750_v26  ;;  %v7756_v62 = vpack.c.bf16 %v7751_v47, %v7751_v47  ;;  %v7968_v14 = vpop.permute.xlu1 %7967  ;;  %v12529_v12 = vld [vmem:[%s16585_s2 + $0x11c] sm:$0xf] }
 0xb62   : > { %13292 = vmatprep.mubr.msk.bf16.mxu1 %vm14066_vm0, %v14064_v0  ;;  %13296 = vmatprep.subr.bf16.mxu1 %v14064_v0  ;;  %v13879_v54 = vunpack.i.h.bf16 %v13877_v46  ;;  %v13878_v51 = vunpack.i.l.bf16 %v13877_v46 }
 0xb63   : > { %v7761_v36 = vsel %vm254_vm3, %v7754_v57, 0  ;;  %v7767_v10 = vsel %vm254_vm3, %v7756_v62, 0 }
 0xb64   : > { %v7859_v23 = vsel %vm878_vm8, %v13879_v54, %v7858_v53  ;;  %v7860_v52 = vsel %vm878_vm8, %v13878_v51, %v13879_v54  ;;  %v7861_v39 = vsel %vm878_vm8, %v7858_v53, %v13878_v51 }
 0xb65   : > { %v13882_v13 = vpop.permute.xlu0 %13881  ;;  %v7865_v16 = vpack.c.bf16 %v7859_v23, %v7859_v23  ;;  %v7864_v17 = vpack.c.bf16 %v7860_v52, %v7860_v52  ;;  %v7866_v4 = vpack.c.bf16 %v7861_v39, %v7861_v39  ;;  %v8078_v33 = vpop.permute.xlu1 %8077 }
 0xb66   : > { %v13884_v40 = vunpack.i.h.bf16 %v13882_v13  ;;  %v13883_v63 = vunpack.i.l.bf16 %v13882_v13 }
 0xb67   : > { %12507 = vmatmul.mubr.msk.bf16.vlgmr.msra.gmra.mxu0 %vm250_vm5, %v12505_v20  ;;  %13293 = vmatmul.mubr.msk.bf16.vlgmr.msra.gmra.mxu1 %vm250_vm5, %v12505_v20  ;;  %v7871_v24 = vsel %vm254_vm3, %v7864_v17, 0  ;;  %v7877_v42 = vsel %vm254_vm3, %v7866_v4, 0 }
 0xb68   : > { %7573 = vmatpush1.bf16.msra.mxu0 %v7550_v22  ;;  %13297 = vmatpush3.bf16.msra.mxu1 %v7556_v15  ;;  %v7969_v44 = vsel %vm989_vm9, %v13884_v40, %v7968_v14  ;;  %v7970_v50 = vsel %vm989_vm9, %v13883_v63, %v13884_v40  ;;  %v7971_v41 = vsel %vm989_vm9, %v7968_v14, %v13883_v63 }
 0xb69   : > { %12514 = vmatprep.subr.msk.bf16.mxu0 %vm254_vm3, %v7645_v19  ;;  %7590 = vmatprep.mubr.bf16.mxu0 %v14065_v1  ;;  %v13887_v7 = vpop.permute.xlu0 %13886  ;;  %v7975_v11 = vpack.c.bf16 %v7969_v44, %v7969_v44  ;;  %v7974_v34 = vpack.c.bf16 %v7970_v50, %v7970_v50  ;;  %v7976_v35 = vpack.c.bf16 %v7971_v41, %v7971_v41 }
 0xb6a   : > { %13298 = vmatprep.mubr.msk.bf16.mxu1 %vm14066_vm0, %v14064_v0  ;;  %13302 = vmatprep.subr.bf16.mxu1 %v14064_v0  ;;  %v13889_v49 = vunpack.i.h.bf16 %v13887_v7  ;;  %v13888_v25 = vunpack.i.l.bf16 %v13887_v7 }
 0xb6b   : > { %v7981_v20 = vsel %vm254_vm3, %v7974_v34, 0  ;;  %v7987_v9 = vsel %vm254_vm3, %v7976_v35, 0 }
 0xb6c   : > { %v8079_v21 = vsel %vm1100_vm10, %v13889_v49, %v8078_v33  ;;  %v8080_v22 = vsel %vm1100_vm10, %v13888_v25, %v13889_v49  ;;  %v8081_v15 = vsel %vm1100_vm10, %v8078_v33, %v13888_v25 }
 0xb6d   : > { %v8085_v18 = vpack.c.bf16 %v8079_v21, %v8079_v21  ;;  %v8084_v19 = vpack.c.bf16 %v8080_v22, %v8080_v22  ;;  %v8086_v6 = vpack.c.bf16 %v8081_v15, %v8081_v15 }
 0xb6f   : > { %12511 = vmatmul.mubr.msk.bf16.vlgmr.msra.gmra.mxu0 %vm250_vm5, %v12509_v59  ;;  %13299 = vmatmul.mubr.msk.bf16.vlgmr.msra.gmra.mxu1 %vm250_vm5, %v12509_v59  ;;  %v8091_v56 = vsel %vm254_vm3, %v8084_v19, 0  ;;  %v8097_v61 = vsel %vm254_vm3, %v8086_v6, 0 }
 0xb70   : > { %7674 = vmatpush1.bf16.msra.mxu0 %v7651_v55  ;;  %13303 = vmatpush3.bf16.msra.mxu1 %v7657_v5 }
 0xb71   : > { %12518 = vmatprep.subr.msk.bf16.mxu0 %vm254_vm3, %v7755_v60  ;;  %7691 = vmatprep.mubr.bf16.mxu0 %v14065_v1 }
 0xb72   : > { %13304 = vmatprep.mubr.msk.bf16.mxu1 %vm14066_vm0, %v14064_v0  ;;  %13308 = vmatprep.subr.bf16.mxu1 %v14064_v0 }
 0xb77   : > { %12515 = vmatmul.mubr.msk.bf16.vlgmr.msra.gmra.mxu0 %vm250_vm5, %v12513_v2  ;;  %13305 = vmatmul.mubr.msk.bf16.vlgmr.msra.gmra.mxu1 %vm250_vm5, %v12513_v2 }
 0xb78   : > { %7784 = vmatpush1.bf16.msra.mxu0 %v7761_v36  ;;  %13309 = vmatpush3.bf16.msra.mxu1 %v7767_v10 }
 0xb79   : > { %12522 = vmatprep.subr.msk.bf16.mxu0 %vm254_vm3, %v7865_v16  ;;  %7801 = vmatprep.mubr.bf16.mxu0 %v14065_v1 }
 0xb7a   : > { %13310 = vmatprep.mubr.msk.bf16.mxu1 %vm14066_vm0, %v14064_v0  ;;  %13314 = vmatprep.subr.bf16.mxu1 %v14064_v0 }
 0xb7f   : > { %12519 = vmatmul.mubr.msk.bf16.vlgmr.msra.gmra.mxu0 %vm250_vm5, %v12517_v48  ;;  %13311 = vmatmul.mubr.msk.bf16.vlgmr.msra.gmra.mxu1 %vm250_vm5, %v12517_v48 }
 0xb80   : > { %7894 = vmatpush1.bf16.msra.mxu0 %v7871_v24  ;;  %13315 = vmatpush3.bf16.msra.mxu1 %v7877_v42 }
 0xb81   : > { %12526 = vmatprep.subr.msk.bf16.mxu0 %vm254_vm3, %v7975_v11  ;;  %7911 = vmatprep.mubr.bf16.mxu0 %v14065_v1 }
 0xb82   : > { %13316 = vmatprep.mubr.msk.bf16.mxu1 %vm14066_vm0, %v14064_v0  ;;  %13320 = vmatprep.subr.bf16.mxu1 %v14064_v0 }
 0xb87   : > { %12523 = vmatmul.mubr.msk.bf16.vlgmr.msra.gmra.mxu0 %vm250_vm5, %v12521_v58  ;;  %13317 = vmatmul.mubr.msk.bf16.vlgmr.msra.gmra.mxu1 %vm250_vm5, %v12521_v58 }
 0xb88   : > { %8004 = vmatpush1.bf16.msra.mxu0 %v7981_v20  ;;  %13321 = vmatpush3.bf16.msra.mxu1 %v7987_v9 }
 0xb89   : > { %12530 = vmatprep.subr.msk.bf16.mxu0 %vm254_vm3, %v8085_v18  ;;  %8021 = vmatprep.mubr.bf16.mxu0 %v14065_v1 }
 0xb8a   : > { %13322 = vmatprep.mubr.msk.bf16.mxu1 %vm14066_vm0, %v14064_v0  ;;  %13326 = vmatprep.subr.bf16.mxu1 %v14064_v0 }
 0xb8f   : > { %12527 = vmatmul.mubr.msk.bf16.vlgmr.msra.gmra.mxu0 %vm250_vm5, %v12525_v3  ;;  %13323 = vmatmul.mubr.msk.bf16.vlgmr.msra.gmra.mxu1 %vm250_vm5, %v12525_v3 }
 0xb90   : > { %8114 = vmatpush1.bf16.msra.mxu0 %v8091_v56  ;;  %13327 = vmatpush3.bf16.msra.mxu1 %v8097_v61 }
 0xb91   : > { %8131 = vmatprep.mubr.bf16.mxu0 %v14065_v1  ;;  %13328 = vmatprep.mubr.msk.bf16.mxu1 %vm14066_vm0, %v14064_v0 }
 0xb92   : > { %13332 = vmatprep.subr.bf16.mxu1 %v14064_v0 }
 0xb97   : > { %12531 = vmatmul.mubr.msk.bf16.vlgmr.msra.gmra.mxu0 %vm250_vm5, %v12529_v12  ;;  %13329 = vmatmul.mubr.msk.bf16.vlgmr.msra.gmra.mxu1 %vm250_vm5, %v12529_v12 }
 0xb98   : > { %8277 = vmatprep.mubr.bf16.mxu0 %v14065_v1  ;;  %13334 = vmatprep.mubr.msk.bf16.mxu1 %vm14066_vm0, %v14064_v0 }
 0xc17   : > { %v7282_v27 = vpop.f32.mrf.mxu0  ;;  %v7323_v59 = vpop.f32.mrf.mxu1 }
 0xc19   : > { %v7284_v46 = vpop.f32.mrf.mxu0  ;;  %v13282_v60 = vpop.f32.mrf.mxu1 }
 0xc1b   : > { %v7286_v55 = vpop.f32.mrf.mxu0  ;;  %v7326_v5 = vpop.f32.mrf.mxu1 }
 0xc1d   : > { %v7287_v54 = vpop.f32.mrf.mxu0  ;;  %v13283_v26 = vpop.f32.mrf.mxu1 }
 0xc1f   : > { %v7375_v47 = vpop.f32.mrf.mxu0  ;;  %v7416_v53 = vpop.f32.mrf.mxu1 }
 0xc20   : > { %v7376_v60 = vadd.f32 %v7375_v47, %v7282_v27  ;;  %v7417_v55 = vadd.f32 %v7416_v53, %v7323_v59 }
 0xc21   : > { %v7377_v57 = vpop.f32.mrf.mxu0  ;;  %v13288_v62 = vpop.f32.mrf.mxu1 }
 0xc22   : > { %v7378_v26 = vadd.f32 %v7377_v57, %v7284_v46 }
 0xc23   : > { %v7379_v23 = vpop.f32.mrf.mxu0  ;;  %v7419_v51 = vpop.f32.mrf.mxu1 }
 0xc25   : > { %v7380_v2 = vpop.f32.mrf.mxu0  ;;  %v13289_v13 = vpop.f32.mrf.mxu1 }
 0xc27   : > { %v7482_v16 = vpop.f32.mrf.mxu0  ;;  %v7523_v36 = vpop.f32.mrf.mxu1 }
 0xc28   : > { %v7529_v62 = vadd.f32 %v7482_v16, %v7376_v60  ;;  %v7531_v23 = vadd.f32 %v7523_v36, %v7417_v55 }
 0xc29   : > { %v7484_v10 = vpop.f32.mrf.mxu0  ;;  %v13294_v40 = vpop.f32.mrf.mxu1 }
 0xc2a   : > { %v7530_v13 = vadd.f32 %v7484_v10, %v7378_v26 }
 0xc2b   : > { %v7486_v52 = vpop.f32.mrf.mxu0  ;;  %v7526_v39 = vpop.f32.mrf.mxu1 }
 0xc2d   : > { %v7487_v14 = vpop.f32.mrf.mxu0  ;;  %v13295_v17 = vpop.f32.mrf.mxu1 }
 0xc2f   : > { %v7592_v4 = vpop.f32.mrf.mxu0  ;;  %v7633_v44 = vpop.f32.mrf.mxu1 }
 0xc30   : > { %v7639_v40 = vadd.f32 %v7592_v4, %v7529_v62  ;;  %v7641_v52 = vadd.f32 %v7633_v44, %v7531_v23 }
 0xc31   : > { %v7594_v63 = vpop.f32.mrf.mxu0  ;;  %v13300_v48 = vpop.f32.mrf.mxu1 }
 0xc32   : > { %v7640_v17 = vadd.f32 %v7594_v63, %v7530_v13  ;;  %v8188_v63 = vpop.permute.xlu0 %8187 }
 0xc33   : > { %v7596_v7 = vpop.f32.mrf.mxu0  ;;  %v7636_v11 = vpop.f32.mrf.mxu1 }
 0xc35   : > { %v7597_v24 = vpop.f32.mrf.mxu0  ;;  %v13301_v42 = vpop.f32.mrf.mxu1 }
 0xc37   : > { %v7693_v49 = vpop.f32.mrf.mxu0  ;;  %v7734_v50 = vpop.f32.mrf.mxu1 }
 0xc38   : > { %v7740_v48 = vadd.f32 %v7693_v49, %v7639_v40  ;;  %v7742_v7 = vadd.f32 %v7734_v50, %v7641_v52 }
 0xc39   : > { %v7695_v41 = vpop.f32.mrf.mxu0  ;;  %v13306_v33 = vpop.f32.mrf.mxu1 }
 0xc3a   : > { %v7741_v42 = vadd.f32 %v7695_v41, %v7640_v17 }
 0xc3b   : > { %v7697_v34 = vpop.f32.mrf.mxu0  ;;  %v7737_v35 = vpop.f32.mrf.mxu1 }
 0xc3d   : > { %v7698_v21 = vpop.f32.mrf.mxu0  ;;  %v13307_v25 = vpop.f32.mrf.mxu1 }
 0xc3f   : > { %v7803_v58 = vpop.f32.mrf.mxu0  ;;  %v7844_v18 = vpop.f32.mrf.mxu1 }
 0xc40   : > { %v7850_v27 = vadd.f32 %v7803_v58, %v7740_v48  ;;  %v7852_v59 = vadd.f32 %v7844_v18, %v7742_v7 }
 0xc41   : > { %v7805_v20 = vpop.f32.mrf.mxu0  ;;  %v13312_v9 = vpop.f32.mrf.mxu1 }
 0xc42   : > { %v7851_v46 = vadd.f32 %v7805_v20, %v7741_v42 }
 0xc43   : > { %v7807_v22 = vpop.f32.mrf.mxu0  ;;  %v7847_v15 = vpop.f32.mrf.mxu1 }
 0xc45   : > { %v7808_v19 = vpop.f32.mrf.mxu0  ;;  %v13313_v6 = vpop.f32.mrf.mxu1 }
 0xc47   : > { %v7913_v3 = vpop.f32.mrf.mxu0  ;;  %v7954_v56 = vpop.f32.mrf.mxu1 }
 0xc48   : > { %v7960_v57 = vadd.f32 %v7913_v3, %v7850_v27  ;;  %v7962_v16 = vadd.f32 %v7954_v56, %v7852_v59  ;;  %v12535_v59 = vld [vmem:[%s16585_s2 + $0x124] sm:$0xf] }
 0xc49   : > { %v7915_v61 = vpop.f32.mrf.mxu0  ;;  %v13318_v12 = vpop.f32.mrf.mxu1 }
 0xc4a   : > { %v7961_v10 = vadd.f32 %v7915_v61, %v7851_v46 }
 0xc4b   : > { %v7917_v5 = vpop.f32.mrf.mxu0  ;;  %v7957_v54 = vpop.f32.mrf.mxu1 }
 0xc4d   : > { %v7918_v51 = vpop.f32.mrf.mxu0  ;;  %v13319_v2 = vpop.f32.mrf.mxu1 }
 0xc4f   : > { %v8023_v39 = vpop.f32.mrf.mxu0  ;;  %v8064_v14 = vpop.f32.mrf.mxu1 }
 0xc50   : > { %v8070_v4 = vadd.f32 %v8023_v39, %v7960_v57  ;;  %v8072_v44 = vadd.f32 %v8064_v14, %v7962_v16 }
 0xc51   : > { %v8025_v11 = vpop.f32.mrf.mxu0  ;;  %v13324_v24 = vpop.f32.mrf.mxu1 }
 0xc52   : > { %v8071_v49 = vadd.f32 %v8025_v11, %v7961_v10 }
 0xc53   : > { %v8027_v47 = vpop.f32.mrf.mxu0  ;;  %v8067_v53 = vpop.f32.mrf.mxu1 }
 0xc55   : > { %v8028_v36 = vpop.f32.mrf.mxu0  ;;  %v13325_v33 = vpop.f32.mrf.mxu1 }
 0xc57   : > { %v8133_v34 = vpop.f32.mrf.mxu0  ;;  %v8174_v35 = vpop.f32.mrf.mxu1 }
 0xc58   : > { %v8180_v50 = vadd.f32 %v8133_v34, %v8070_v4  ;;  %v8182_v21 = vadd.f32 %v8174_v35, %v8072_v44 }
 0xc59   : > { %v8135_v25 = vpop.f32.mrf.mxu0  ;;  %v13330_v41 = vpop.f32.mrf.mxu1 }
 0xc5a   : > { %v8190_v58 = vadd.f32 %v8188_v63, %v8180_v50  ;;  %v8192_v18 = vadd.f32 %v8188_v63, %v8182_v21  ;;  %v8181_v9 = vadd.f32 %v8135_v25, %v8071_v49 }
 0xc5b   : > { %v8137_v22 = vpop.f32.mrf.mxu0  ;;  %v8177_v20 = vpop.f32.mrf.mxu1 }
 0xc5c   : > { %v8193_v15 = vmul.f32 %v8190_v58, %v14334_v31  ;;  %v8195_v19 = vmul.f32 %v8192_v18, %v14339_v43  ;;  %v8191_v6 = vadd.f32 %v8188_v63, %v8181_v9  ;;  %v12534_v22 = vld [vmem:[%s16585_s2 + $0x120] sm:$0xf] }
 0xc5d   : > { %v8138_v3 = vpop.f32.mrf.mxu0  ;;  %v13331_v56 = vpop.f32.mrf.mxu1 }
 0xc5e   : > { %v8199_v61 = vadd.f32 %v8193_v15, %v14956_v28  ;;  %v8201_v12 = vadd.f32 %v8195_v19, %v14959_v32  ;;  %v8194_v60 = vmul.f32 %v8191_v6, %v14336_v38  ;;  %v12570_v28 = vld [vmem:[%s16586_s3 + $0x40] sm:$0xff] }
 0xc60   : > { %v15775_v55 = vmax.f32 %v8201_v12, 0.0  ;;  %v8200_v5 = vadd.f32 %v8194_v60, %v14965_v45  ;;  %v15778_v54 = vmax.f32 %v8199_v61, 0.0  ;;  %v12542_v60 = vld [vmem:[%s16585_s2 + $0x128] sm:$0xf] }
 0xc62   : > { %v15780_v26 = vmax.f32 %v8200_v5, 0.0  ;;  %8223 = vrot.lane.b32.xlu0 %v15775_v55, %s14067_s21 }
 0xc64   : > { %v13890_v62 = vpack.i.bf16 %v15780_v26, %v15778_v54 }
 0xc66   : > { %8209 = vrot.lane.b32.xlu0 %v15775_v55, %s14068_s22  ;;  %13891 = vrot.lane.b32.xlu1 %v13890_v62, %s14067_s21 }
 0xc6a   : > { %8423 = vrot.lane.b32.xlu0 %v15775_v55, %s14069_s23  ;;  %13896 = vrot.lane.b32.xlu1 %v13890_v62, %s14068_s22 }
 0xc6e   : > { %8533 = vrot.lane.b32.xlu0 %v15775_v55, %s14070_s24  ;;  %13901 = vrot.lane.b32.xlu1 %v13890_v62, %s14069_s23 }
 0xc72   : > { %8744 = vrot.lane.b32.xlu0 %v15775_v55, %s14071_s25  ;;  %13906 = vrot.lane.b32.xlu1 %v13890_v62, %s14070_s24 }
 0xc76   : > { %8854 = vrot.lane.b32.xlu0 %v15775_v55, %s14072_s26  ;;  %13911 = vrot.lane.b32.xlu1 %v13890_v62, %s14071_s25 }
 0xc7a   : > { %8964 = vrot.lane.b32.xlu0 %v15775_v55, %s14073_s27  ;;  %13916 = vrot.lane.b32.xlu1 %v13890_v62, %s14072_s26 }
 0xc7e   : > { %9074 = vrot.lane.b32.xlu0 %v15775_v55, %s14074_s28  ;;  %13921 = vrot.lane.b32.xlu1 %v13890_v62, %s14073_s27 }
 0xc82   : > { %13926 = vrot.lane.b32.xlu1 %v13890_v62, %s14074_s28 }
 0xc86   : > { %9184 = vperm.xlu1 %13689, %v12570_v28  }
 0xcd4   : > { %v8224_v32 = vpop.permute.xlu0 %8223 }
 0xcd8   : > { %v13892_v45 = vpop.permute.xlu1 %13891  ;;  %v8210_v52 = vpop.permute.xlu0 %8209 }
 0xcd9   : > { %v13894_v23 = vunpack.i.h.bf16 %v13892_v45  ;;  %v13893_v51 = vunpack.i.l.bf16 %v13892_v45 }
 0xcdb   : > { %v8226_v2 = vsel %vm241_vm1, %v13893_v51, %v13894_v23  ;;  %v8227_v13 = vsel %vm241_vm1, %v8224_v32, %v13893_v51  ;;  %v8225_v40 = vsel %vm241_vm1, %v13894_v23, %v8224_v32  ;;  %v8642_v32 = vpack.c.bf16 %v15780_v26, %v15780_v26 }
 0xcdc   : > { %v8231_v39 = vpack.c.bf16 %v8226_v2, %v8226_v2  ;;  %v13897_v14 = vpop.permute.xlu1 %13896  ;;  %v8230_v17 = vpack.c.bf16 %v8227_v13, %v8227_v13  ;;  %v8232_v48 = vpack.c.bf16 %v8225_v40, %v8225_v40  ;;  %v8424_v4 = vpop.permute.xlu0 %8423  ;;  %v8641_v51 = vpack.c.bf16 %v15778_v54, %v15778_v54  ;;  %v12546_v40 = vld [vmem:[%s16585_s2 + $0x12c] sm:$0xf] }
 0xcdd   : > { %v13899_v7 = vunpack.i.h.bf16 %v13897_v14  ;;  %v13898_v11 = vunpack.i.l.bf16 %v13897_v14  ;;  %v8643_v2 = vpack.c.bf16 %v15775_v55, %v15775_v55 }
 0xcde   : > { %12536 = vmatprep.subr.msk.bf16.mxu0 %vm254_vm3, %v8231_v39  ;;  %v8237_v24 = vsel %vm254_vm3, %v8230_v17, 0  ;;  %v8243_v42 = vsel %vm254_vm3, %v8232_v48, 0  ;;  %v8648_v14 = vsel %vm254_vm3, %v8641_v51, 0 }
 0xcdf   : > { %v8212_v27 = vsel %vm227_vm2, %v13898_v11, %v13899_v7  ;;  %8260 = vmatpush1.bf16.msra.mxu0 %v8237_v24  ;;  %13333 = vmatpush3.bf16.msra.mxu1 %v8243_v42  ;;  %v8213_v47 = vsel %vm227_vm2, %v8210_v52, %v13898_v11  ;;  %v8211_v53 = vsel %vm227_vm2, %v13899_v7, %v8210_v52  ;;  %v8654_v54 = vsel %vm254_vm3, %v8643_v2, 0 }
 0xce0   : > { %v8217_v46 = vpack.c.bf16 %v8212_v27, %v8212_v27  ;;  %v13902_v57 = vpop.permute.xlu1 %13901  ;;  %13338 = vmatprep.subr.bf16.mxu1 %v14064_v0  ;;  %v8216_v16 = vpack.c.bf16 %v8213_v47, %v8213_v47  ;;  %v8218_v36 = vpack.c.bf16 %v8211_v53, %v8211_v53  ;;  %v8534_v15 = vpop.permute.xlu0 %8533 }
 0xce1   : > { %v13904_v33 = vunpack.i.h.bf16 %v13902_v57  ;;  %v13903_v10 = vunpack.i.l.bf16 %v13902_v57 }
 0xce2   : > { %12537 = vmatmul.mubr.msk.bf16.vlgmr.msra.gmra.mxu0 %vm250_vm5, %v12535_v59  ;;  %13335 = vmatmul.mubr.msk.bf16.vlgmr.msra.gmra.mxu1 %vm250_vm5, %v12535_v59  ;;  %v8330_v44 = vsel %vm254_vm3, %v8216_v16, 0  ;;  %v8336_v34 = vsel %vm254_vm3, %v8218_v36, 0  ;;  %v12550_v59 = vld [vmem:[%s16585_s2 + $0x130] sm:$0xf] }
 0xce3   : > { %v8426_v35 = vsel %vm444_vm4, %v13903_v10, %v13904_v33  ;;  %12539 = vmatprep.subr.msk.bf16.mxu0 %vm254_vm3, %v8217_v46  ;;  %13339 = vmatpush3.bf16.msra.mxu1 %v8336_v34  ;;  %v8427_v63 = vsel %vm444_vm4, %v8424_v4, %v13903_v10  ;;  %v8425_v49 = vsel %vm444_vm4, %v13904_v33, %v8424_v4 }
 0xce4   : > { %v8431_v50 = vpack.c.bf16 %v8426_v35, %v8426_v35  ;;  %8353 = vmatpush1.bf16.msra.mxu0 %v8330_v44  ;;  %v13907_v21 = vpop.permute.xlu1 %13906  ;;  %8370 = vmatprep.mubr.bf16.mxu0 %v14065_v1  ;;  %v8430_v58 = vpack.c.bf16 %v8427_v63, %v8427_v63  ;;  %v8432_v18 = vpack.c.bf16 %v8425_v49, %v8425_v49  ;;  %v8745_v23 = vpop.permute.xlu0 %8744  ;;  %v12554_v63 = vld [vmem:[%s16585_s2 + $0x134] sm:$0xf] }
 0xce5   : > { %v13909_v25 = vunpack.i.h.bf16 %v13907_v21  ;;  %v13908_v41 = vunpack.i.l.bf16 %v13907_v21  ;;  %13340 = vmatprep.mubr.msk.bf16.mxu1 %vm14066_vm0, %v14064_v0  ;;  %13344 = vmatprep.subr.bf16.mxu1 %v14064_v0 }
 0xce6   : > { %12543 = vmatprep.subr.msk.bf16.mxu0 %vm254_vm3, %v8431_v50  ;;  %v8437_v19 = vsel %vm254_vm3, %v8430_v58, 0  ;;  %v8443_v6 = vsel %vm254_vm3, %v8432_v18, 0 }
 0xce7   : > { %v8536_v9 = vsel %vm555_vm6, %v13908_v41, %v13909_v25  ;;  %v8537_v3 = vsel %vm555_vm6, %v8534_v15, %v13908_v41  ;;  %v8535_v56 = vsel %vm555_vm6, %v13909_v25, %v8534_v15 }
 0xce8   : > { %v8541_v20 = vpack.c.bf16 %v8536_v9, %v8536_v9  ;;  %v8540_v61 = vpack.c.bf16 %v8537_v3, %v8537_v3  ;;  %v8542_v12 = vpack.c.bf16 %v8535_v56, %v8535_v56  ;;  %v13912_v5 = vpop.permute.xlu1 %13911  ;;  %v8855_v7 = vpop.permute.xlu0 %8854 }
 0xce9   : > { %v13914_v45 = vunpack.i.h.bf16 %v13912_v5  ;;  %v13913_v13 = vunpack.i.l.bf16 %v13912_v5 }
 0xcea   : > { %12540 = vmatmul.mubr.msk.bf16.vlgmr.msra.gmra.mxu0 %vm250_vm5, %v12534_v22  ;;  %13341 = vmatmul.mubr.msk.bf16.vlgmr.msra.gmra.mxu1 %vm250_vm5, %v12534_v22  ;;  %v8547_v62 = vsel %vm254_vm3, %v8540_v61, 0  ;;  %v8553_v28 = vsel %vm254_vm3, %v8542_v12, 0 }
 0xceb   : > { %8460 = vmatpush1.bf16.msra.mxu0 %v8437_v19  ;;  %13345 = vmatpush3.bf16.msra.mxu1 %v8443_v6  ;;  %v8746_v26 = vsel %vm767_vm7, %v13914_v45, %v8745_v23  ;;  %v8747_v55 = vsel %vm767_vm7, %v13913_v13, %v13914_v45  ;;  %v8748_v48 = vsel %vm767_vm7, %v8745_v23, %v13913_v13  ;;  %v12558_v6 = vld [vmem:[%s16585_s2 + $0x138] sm:$0xf]  ;;  %v12566_v23 = vld [vmem:[%s16585_s2 + $0x140] sm:$0xf] }
 0xcec   : > { %12547 = vmatprep.subr.msk.bf16.mxu0 %vm254_vm3, %v8541_v20  ;;  %8477 = vmatprep.mubr.bf16.mxu0 %v14065_v1  ;;  %v13917_v52 = vpop.permute.xlu1 %13916  ;;  %v8752_v39 = vpack.c.bf16 %v8746_v26, %v8746_v26  ;;  %v8751_v11 = vpack.c.bf16 %v8747_v55, %v8747_v55  ;;  %v8753_v24 = vpack.c.bf16 %v8748_v48, %v8748_v48  ;;  %v8965_v10 = vpop.permute.xlu0 %8964 }
 0xced   : > { %13346 = vmatprep.mubr.msk.bf16.mxu1 %vm14066_vm0, %v14064_v0  ;;  %13350 = vmatprep.subr.bf16.mxu1 %v14064_v0  ;;  %v13919_v17 = vunpack.i.h.bf16 %v13917_v52  ;;  %v13918_v27 = vunpack.i.l.bf16 %v13917_v52 }
 0xcee   : > { %v8758_v46 = vsel %vm254_vm3, %v8751_v11, 0  ;;  %v8764_v57 = vsel %vm254_vm3, %v8753_v24, 0 }
 0xcef   : > { %v8856_v42 = vsel %vm878_vm8, %v13919_v17, %v8855_v7  ;;  %v8857_v36 = vsel %vm878_vm8, %v13918_v27, %v13919_v17  ;;  %v8858_v33 = vsel %vm878_vm8, %v8855_v7, %v13918_v27 }
 0xcf0   : > { %v13922_v47 = vpop.permute.xlu1 %13921  ;;  %v8862_v53 = vpack.c.bf16 %v8856_v42, %v8856_v42  ;;  %v8861_v4 = vpack.c.bf16 %v8857_v36, %v8857_v36  ;;  %v8863_v44 = vpack.c.bf16 %v8858_v33, %v8858_v33  ;;  %v9075_v9 = vpop.permute.xlu0 %9074 }
 0xcf1   : > { %v13924_v16 = vunpack.i.h.bf16 %v13922_v47  ;;  %v13923_v35 = vunpack.i.l.bf16 %v13922_v47 }
 0xcf2   : > { %12544 = vmatmul.mubr.msk.bf16.vlgmr.msra.gmra.mxu0 %vm250_vm5, %v12542_v60  ;;  %13347 = vmatmul.mubr.msk.bf16.vlgmr.msra.gmra.mxu1 %vm250_vm5, %v12542_v60  ;;  %v8868_v21 = vsel %vm254_vm3, %v8861_v4, 0  ;;  %v8874_v25 = vsel %vm254_vm3, %v8863_v44, 0 }
 0xcf3   : > { %8570 = vmatpush1.bf16.msra.mxu0 %v8547_v62  ;;  %13351 = vmatpush3.bf16.msra.mxu1 %v8553_v28  ;;  %v8966_v34 = vsel %vm989_vm9, %v13924_v16, %v8965_v10  ;;  %v8967_v58 = vsel %vm989_vm9, %v13923_v35, %v13924_v16  ;;  %v8968_v18 = vsel %vm989_vm9, %v8965_v10, %v13923_v35  ;;  %v12562_v28 = vld [vmem:[%s16585_s2 + $0x13c] sm:$0xf] }
 0xcf4   : > { %12551 = vmatprep.subr.msk.bf16.mxu0 %vm254_vm3, %v8642_v32  ;;  %8587 = vmatprep.mubr.bf16.mxu0 %v14065_v1  ;;  %v13927_v49 = vpop.permute.xlu1 %13926  ;;  %v8972_v50 = vpack.c.bf16 %v8966_v34, %v8966_v34  ;;  %v8971_v22 = vpack.c.bf16 %v8967_v58, %v8967_v58  ;;  %v8973_v20 = vpack.c.bf16 %v8968_v18, %v8968_v18 }
 0xcf5   : > { %13352 = vmatprep.mubr.msk.bf16.mxu1 %vm14066_vm0, %v14064_v0  ;;  %13356 = vmatprep.subr.bf16.mxu1 %v14064_v0  ;;  %v13929_v41 = vunpack.i.h.bf16 %v13927_v49  ;;  %v13928_v19 = vunpack.i.l.bf16 %v13927_v49 }
 0xcf6   : > { %v8978_v56 = vsel %vm254_vm3, %v8971_v22, 0  ;;  %v8984_v61 = vsel %vm254_vm3, %v8973_v20, 0 }
 0xcf7   : > { %v9076_v15 = vsel %vm1100_vm10, %v13929_v41, %v9075_v9  ;;  %v9077_v12 = vsel %vm1100_vm10, %v13928_v19, %v13929_v41  ;;  %v9078_v60 = vsel %vm1100_vm10, %v9075_v9, %v13928_v19 }
 0xcf8   : > { %v9082_v3 = vpack.c.bf16 %v9076_v15, %v9076_v15  ;;  %v9081_v5 = vpack.c.bf16 %v9077_v12, %v9077_v12  ;;  %v9083_v62 = vpack.c.bf16 %v9078_v60, %v9078_v60 }
 0xcfa   : > { %12548 = vmatmul.mubr.msk.bf16.vlgmr.msra.gmra.mxu0 %vm250_vm5, %v12546_v40  ;;  %13353 = vmatmul.mubr.msk.bf16.vlgmr.msra.gmra.mxu1 %vm250_vm5, %v12546_v40  ;;  %v9088_v32 = vsel %vm254_vm3, %v9081_v5, 0  ;;  %v9094_v45 = vsel %vm254_vm3, %v9083_v62, 0 }
 0xcfb   : > { %8671 = vmatpush1.bf16.msra.mxu0 %v8648_v14  ;;  %13357 = vmatpush3.bf16.msra.mxu1 %v8654_v54 }
 0xcfc   : > { %12555 = vmatprep.subr.msk.bf16.mxu0 %vm254_vm3, %v8752_v39  ;;  %8688 = vmatprep.mubr.bf16.mxu0 %v14065_v1 }
 0xcfd   : > { %13358 = vmatprep.mubr.msk.bf16.mxu1 %vm14066_vm0, %v14064_v0  ;;  %13362 = vmatprep.subr.bf16.mxu1 %v14064_v0 }
 0xd02   : > { %12552 = vmatmul.mubr.msk.bf16.vlgmr.msra.gmra.mxu0 %vm250_vm5, %v12550_v59  ;;  %13359 = vmatmul.mubr.msk.bf16.vlgmr.msra.gmra.mxu1 %vm250_vm5, %v12550_v59 }
 0xd03   : > { %8781 = vmatpush1.bf16.msra.mxu0 %v8758_v46  ;;  %13363 = vmatpush3.bf16.msra.mxu1 %v8764_v57 }
 0xd04   : > { %12559 = vmatprep.subr.msk.bf16.mxu0 %vm254_vm3, %v8862_v53  ;;  %8798 = vmatprep.mubr.bf16.mxu0 %v14065_v1 }
 0xd05   : > { %13364 = vmatprep.mubr.msk.bf16.mxu1 %vm14066_vm0, %v14064_v0  ;;  %13368 = vmatprep.subr.bf16.mxu1 %v14064_v0 }
 0xd0a   : > { %12556 = vmatmul.mubr.msk.bf16.vlgmr.msra.gmra.mxu0 %vm250_vm5, %v12554_v63  ;;  %13365 = vmatmul.mubr.msk.bf16.vlgmr.msra.gmra.mxu1 %vm250_vm5, %v12554_v63 }
 0xd0b   : > { %8891 = vmatpush1.bf16.msra.mxu0 %v8868_v21  ;;  %13369 = vmatpush3.bf16.msra.mxu1 %v8874_v25 }
 0xd0c   : > { %12563 = vmatprep.subr.msk.bf16.mxu0 %vm254_vm3, %v8972_v50  ;;  %8908 = vmatprep.mubr.bf16.mxu0 %v14065_v1 }
 0xd0d   : > { %13370 = vmatprep.mubr.msk.bf16.mxu1 %vm14066_vm0, %v14064_v0  ;;  %13374 = vmatprep.subr.bf16.mxu1 %v14064_v0 }
 0xd12   : > { %12560 = vmatmul.mubr.msk.bf16.vlgmr.msra.gmra.mxu0 %vm250_vm5, %v12558_v6  ;;  %13371 = vmatmul.mubr.msk.bf16.vlgmr.msra.gmra.mxu1 %vm250_vm5, %v12558_v6 }
 0xd13   : > { %9001 = vmatpush1.bf16.msra.mxu0 %v8978_v56  ;;  %13375 = vmatpush3.bf16.msra.mxu1 %v8984_v61 }
 0xd14   : > { %12567 = vmatprep.subr.msk.bf16.mxu0 %vm254_vm3, %v9082_v3  ;;  %9018 = vmatprep.mubr.bf16.mxu0 %v14065_v1 }
 0xd15   : > { %13376 = vmatprep.mubr.msk.bf16.mxu1 %vm14066_vm0, %v14064_v0  ;;  %13380 = vmatprep.subr.bf16.mxu1 %v14064_v0 }
 0xd1a   : > { %12564 = vmatmul.mubr.msk.bf16.vlgmr.msra.gmra.mxu0 %vm250_vm5, %v12562_v28  ;;  %13377 = vmatmul.mubr.msk.bf16.vlgmr.msra.gmra.mxu1 %vm250_vm5, %v12562_v28 }
 0xd1b   : > { %9111 = vmatpush1.bf16.msra.mxu0 %v9088_v32  ;;  %13381 = vmatpush3.bf16.msra.mxu1 %v9094_v45 }
 0xd1c   : > { %9128 = vmatprep.mubr.bf16.mxu0 %v14065_v1  ;;  %13382 = vmatprep.mubr.msk.bf16.mxu1 %vm14066_vm0, %v14064_v0 }
 0xd1d   : > { %13386 = vmatprep.subr.bf16.mxu1 %v14064_v0 }
 0xd22   : > { %12568 = vmatmul.mubr.msk.bf16.vlgmr.msra.gmra.mxu0 %vm250_vm5, %v12566_v23  ;;  %13383 = vmatmul.mubr.msk.bf16.vlgmr.msra.gmra.mxu1 %vm250_vm5, %v12566_v23 }
 0xd23   : > { %9268 = vmatprep.mubr.bf16.mxu0 %v14065_v1  ;;  %13388 = vmatprep.mubr.msk.bf16.mxu1 %vm14066_vm0, %v14064_v0 }
 0xda2   : > { %v8279_v51 = vpop.f32.mrf.mxu0  ;;  %v8320_v2 = vpop.f32.mrf.mxu1 }
 0xda4   : > { %v8281_v26 = vpop.f32.mrf.mxu0  ;;  %v13336_v13 = vpop.f32.mrf.mxu1 }
 0xda6   : > { %v8283_v40 = vpop.f32.mrf.mxu0  ;;  %v8323_v52 = vpop.f32.mrf.mxu1 }
 0xda8   : > { %v8284_v39 = vpop.f32.mrf.mxu0  ;;  %v13337_v14 = vpop.f32.mrf.mxu1 }
 0xdaa   : > { %v8372_v54 = vpop.f32.mrf.mxu0  ;;  %v8413_v17 = vpop.f32.mrf.mxu1 }
 0xdab   : > { %v8373_v32 = vadd.f32 %v8372_v54, %v8279_v51  ;;  %v8414_v45 = vadd.f32 %v8413_v17, %v8320_v2 }
 0xdac   : > { %v8374_v55 = vpop.f32.mrf.mxu0  ;;  %v13342_v48 = vpop.f32.mrf.mxu1 }
 0xdad   : > { %v8375_v40 = vadd.f32 %v8374_v55, %v8281_v26 }
 0xdae   : > { %v8376_v7 = vpop.f32.mrf.mxu0  ;;  %v8416_v11 = vpop.f32.mrf.mxu1 }
 0xdb0   : > { %v8377_v24 = vpop.f32.mrf.mxu0  ;;  %v13343_v42 = vpop.f32.mrf.mxu1 }
 0xdb2   : > { %v8479_v27 = vpop.f32.mrf.mxu0  ;;  %v8520_v59 = vpop.f32.mrf.mxu1 }
 0xdb3   : > { %v8526_v52 = vadd.f32 %v8479_v27, %v8373_v32  ;;  %v8528_v39 = vadd.f32 %v8520_v59, %v8414_v45  ;;  %v12607_v32 = vld [vmem:[%s16586_s3 + $0x48] sm:$0xff] }
 0xdb4   : > { %v8481_v47 = vpop.f32.mrf.mxu0  ;;  %v13348_v53 = vpop.f32.mrf.mxu1 }
 0xdb5   : > { %v8527_v7 = vadd.f32 %v8481_v47, %v8375_v40 }
 0xdb6   : > { %v8483_v46 = vpop.f32.mrf.mxu0  ;;  %v8523_v57 = vpop.f32.mrf.mxu1 }
 0xdb8   : > { %v8484_v16 = vpop.f32.mrf.mxu0  ;;  %v13349_v36 = vpop.f32.mrf.mxu1 }
 0xdba   : > { %v8589_v33 = vpop.f32.mrf.mxu0  ;;  %v8630_v10 = vpop.f32.mrf.mxu1 }
 0xdbb   : > { %v8636_v11 = vadd.f32 %v8589_v33, %v8526_v52  ;;  %v8638_v24 = vadd.f32 %v8630_v10, %v8528_v39 }
 0xdbc   : > { %v8591_v4 = vpop.f32.mrf.mxu0  ;;  %v13354_v44 = vpop.f32.mrf.mxu1 }
 0xdbd   : > { %v8637_v46 = vadd.f32 %v8591_v4, %v8527_v7  ;;  %v9185_v4 = vpop.permute.xlu1 %9184 }
 0xdbe   : > { %v8593_v34 = vpop.f32.mrf.mxu0  ;;  %v8633_v35 = vpop.f32.mrf.mxu1 }
 0xdc0   : > { %v8594_v63 = vpop.f32.mrf.mxu0  ;;  %v13355_v49 = vpop.f32.mrf.mxu1 }
 0xdc2   : > { %v8690_v50 = vpop.f32.mrf.mxu0  ;;  %v8731_v21 = vpop.f32.mrf.mxu1 }
 0xdc3   : > { %v8737_v57 = vadd.f32 %v8690_v50, %v8636_v11  ;;  %v8739_v16 = vadd.f32 %v8731_v21, %v8638_v24 }
 0xdc4   : > { %v8692_v25 = vpop.f32.mrf.mxu0  ;;  %v13360_v41 = vpop.f32.mrf.mxu1 }
 0xdc5   : > { %v8738_v34 = vadd.f32 %v8692_v25, %v8637_v46 }
 0xdc6   : > { %v8694_v58 = vpop.f32.mrf.mxu0  ;;  %v8734_v18 = vpop.f32.mrf.mxu1 }
 0xdc8   : > { %v8695_v9 = vpop.f32.mrf.mxu0  ;;  %v13361_v22 = vpop.f32.mrf.mxu1 }
 0xdca   : > { %v8800_v20 = vpop.f32.mrf.mxu0  ;;  %v8841_v15 = vpop.f32.mrf.mxu1 }
 0xdcb   : > { %v8847_v51 = vadd.f32 %v8800_v20, %v8737_v57  ;;  %v8849_v2 = vadd.f32 %v8841_v15, %v8739_v16 }
 0xdcc   : > { %v8802_v19 = vpop.f32.mrf.mxu0  ;;  %v13366_v6 = vpop.f32.mrf.mxu1 }
 0xdcd   : > { %v8848_v26 = vadd.f32 %v8802_v19, %v8738_v34 }
 0xdce   : > { %v8804_v3 = vpop.f32.mrf.mxu0  ;;  %v8844_v56 = vpop.f32.mrf.mxu1 }
 0xdd0   : > { %v8805_v61 = vpop.f32.mrf.mxu0  ;;  %v13367_v12 = vpop.f32.mrf.mxu1 }
 0xdd2   : > { %v8910_v60 = vpop.f32.mrf.mxu0  ;;  %v8951_v5 = vpop.f32.mrf.mxu1 }
 0xdd3   : > { %v8957_v55 = vadd.f32 %v8910_v60, %v8847_v51  ;;  %v8959_v27 = vadd.f32 %v8951_v5, %v8849_v2 }
 0xdd4   : > { %v8912_v62 = vpop.f32.mrf.mxu0  ;;  %v13372_v28 = vpop.f32.mrf.mxu1 }
 0xdd5   : > { %v8958_v47 = vadd.f32 %v8912_v62, %v8848_v26 }
 0xdd6   : > { %v8914_v23 = vpop.f32.mrf.mxu0  ;;  %v8954_v13 = vpop.f32.mrf.mxu1 }
 0xdd8   : > { %v8915_v14 = vpop.f32.mrf.mxu0  ;;  %v13373_v48 = vpop.f32.mrf.mxu1 }
 0xdda   : > { %v9020_v42 = vpop.f32.mrf.mxu0  ;;  %v9061_v53 = vpop.f32.mrf.mxu1 }
 0xddb   : > { %v9067_v33 = vadd.f32 %v9020_v42, %v8957_v55  ;;  %v9069_v10 = vadd.f32 %v9061_v53, %v8959_v27 }
 0xddc   : > { %v9022_v36 = vpop.f32.mrf.mxu0  ;;  %v13378_v44 = vpop.f32.mrf.mxu1 }
 0xddd   : > { %v9068_v50 = vadd.f32 %v9022_v36, %v8958_v47  ;;  %v12572_v44 = vld [vmem:[%s16585_s2 + $0x148] sm:$0xf] }
 0xdde   : > { %v9024_v54 = vpop.f32.mrf.mxu0  ;;  %v9064_v17 = vpop.f32.mrf.mxu1 }
 0xde0   : > { %v9025_v59 = vpop.f32.mrf.mxu0  ;;  %v13379_v35 = vpop.f32.mrf.mxu1 }
 0xde2   : > { %v9130_v63 = vpop.f32.mrf.mxu0  ;;  %v9171_v49 = vpop.f32.mrf.mxu1 }
 0xde3   : > { %v9177_v21 = vadd.f32 %v9130_v63, %v9067_v33  ;;  %v9179_v41 = vadd.f32 %v9171_v49, %v9069_v10 }
 0xde4   : > { %v9132_v58 = vpop.f32.mrf.mxu0  ;;  %v13384_v25 = vpop.f32.mrf.mxu1 }
 0xde5   : > { %v9187_v18 = vadd.f32 %v9185_v4, %v9177_v21  ;;  %v9189_v9 = vadd.f32 %v9185_v4, %v9179_v41  ;;  %v9178_v22 = vadd.f32 %v9132_v58, %v9068_v50 }
 0xde6   : > { %v9134_v20 = vpop.f32.mrf.mxu0  ;;  %v9174_v15 = vpop.f32.mrf.mxu1 }
 0xde7   : > { %v9190_v19 = vmul.f32 %v9187_v18, %v14334_v31  ;;  %v9192_v6 = vmul.f32 %v9189_v9, %v14339_v43  ;;  %v9188_v3 = vadd.f32 %v9185_v4, %v9178_v22  ;;  %v12571_v18 = vld [vmem:[%s16585_s2 + $0x144] sm:$0xf] }
 0xde8   : > { %v9135_v56 = vpop.f32.mrf.mxu0  ;;  %v13385_v61 = vpop.f32.mrf.mxu1 }
 0xde9   : > { %v15975_v12 = vmax.f32 %v9192_v6, 0.0  ;;  %v9191_v60 = vmul.f32 %v9188_v3, %v14336_v38  ;;  %v15978_v5 = vmax.f32 %v9190_v19, 0.0  ;;  %v12579_v61 = vld [vmem:[%s16585_s2 + $0x14c] sm:$0xf] }
 0xdeb   : > { %v15980_v62 = vmax.f32 %v9191_v60, 0.0  ;;  %9214 = vrot.lane.b32.xlu1 %v15975_v12, %s14067_s21 }
 0xded   : > { %v13930_v28 = vpack.i.bf16 %v15980_v62, %v15978_v5 }
 0xdef   : > { %9200 = vrot.lane.b32.xlu1 %v15975_v12, %s14068_s22  ;;  %13931 = vrot.lane.b32.xlu0 %v13930_v28, %s14067_s21 }
 0xdf3   : > { %9414 = vrot.lane.b32.xlu1 %v15975_v12, %s14069_s23  ;;  %13936 = vrot.lane.b32.xlu0 %v13930_v28, %s14068_s22 }
 0xdf7   : > { %9524 = vrot.lane.b32.xlu1 %v15975_v12, %s14070_s24  ;;  %13941 = vrot.lane.b32.xlu0 %v13930_v28, %s14069_s23 }
 0xdfb   : > { %9735 = vrot.lane.b32.xlu1 %v15975_v12, %s14071_s25  ;;  %13946 = vrot.lane.b32.xlu0 %v13930_v28, %s14070_s24 }
 0xdff   : > { %9845 = vrot.lane.b32.xlu1 %v15975_v12, %s14072_s26  ;;  %13951 = vrot.lane.b32.xlu0 %v13930_v28, %s14071_s25 }
 0xe03   : > { %9955 = vrot.lane.b32.xlu1 %v15975_v12, %s14073_s27  ;;  %13956 = vrot.lane.b32.xlu0 %v13930_v28, %s14072_s26 }
 0xe07   : > { %10065 = vrot.lane.b32.xlu1 %v15975_v12, %s14074_s28  ;;  %13961 = vrot.lane.b32.xlu0 %v13930_v28, %s14073_s27 }
 0xe0b   : > { %13966 = vrot.lane.b32.xlu0 %v13930_v28, %s14074_s28 }
 0xe0f   : > { %10175 = vperm.xlu0 %13608, %v12607_v32  }
 0xe5d   : > { %v9215_v45 = vpop.permute.xlu1 %9214 }
 0xe61   : > { %v13932_v23 = vpop.permute.xlu0 %13931  ;;  %v9201_v48 = vpop.permute.xlu1 %9200 }
 0xe62   : > { %v13934_v13 = vunpack.i.h.bf16 %v13932_v23  ;;  %v13933_v40 = vunpack.i.l.bf16 %v13932_v23 }
 0xe64   : > { %v9217_v52 = vsel %vm241_vm1, %v13933_v40, %v13934_v13  ;;  %v9218_v39 = vsel %vm241_vm1, %v9215_v45, %v13933_v40  ;;  %v9216_v14 = vsel %vm241_vm1, %v13934_v13, %v9215_v45  ;;  %v9633_v45 = vpack.c.bf16 %v15980_v62, %v15980_v62 }
 0xe65   : > { %v9222_v7 = vpack.c.bf16 %v9217_v52, %v9217_v52  ;;  %v13937_v11 = vpop.permute.xlu0 %13936  ;;  %v9221_v24 = vpack.c.bf16 %v9218_v39, %v9218_v39  ;;  %v9223_v42 = vpack.c.bf16 %v9216_v14, %v9216_v14  ;;  %v9415_v59 = vpop.permute.xlu1 %9414  ;;  %v9632_v40 = vpack.c.bf16 %v15978_v5, %v15978_v5  ;;  %v12583_v14 = vld [vmem:[%s16585_s2 + $0x150] sm:$0xf] }
 0xe66   : > { %v13939_v53 = vunpack.i.h.bf16 %v13937_v11  ;;  %v13938_v46 = vunpack.i.l.bf16 %v13937_v11  ;;  %v9634_v52 = vpack.c.bf16 %v15975_v12, %v15975_v12 }
 0xe67   : > { %12573 = vmatprep.subr.msk.bf16.mxu0 %vm254_vm3, %v9222_v7  ;;  %v9228_v57 = vsel %vm254_vm3, %v9221_v24, 0  ;;  %v9234_v16 = vsel %vm254_vm3, %v9223_v42, 0  ;;  %v9639_v11 = vsel %vm254_vm3, %v9632_v40, 0 }
 0xe68   : > { %v9203_v36 = vsel %vm227_vm2, %v13938_v46, %v13939_v53  ;;  %9251 = vmatpush1.bf16.msra.mxu0 %v9228_v57  ;;  %13387 = vmatpush3.bf16.msra.mxu1 %v9234_v16  ;;  %v9204_v34 = vsel %vm227_vm2, %v9201_v48, %v13938_v46  ;;  %v9202_v51 = vsel %vm227_vm2, %v13939_v53, %v9201_v48  ;;  %v9645_v5 = vsel %vm254_vm3, %v9634_v52, 0 }
 0xe69   : > { %v9208_v2 = vpack.c.bf16 %v9203_v36, %v9203_v36  ;;  %v13942_v54 = vpop.permute.xlu0 %13941  ;;  %13392 = vmatprep.subr.bf16.mxu1 %v14064_v0  ;;  %v9207_v17 = vpack.c.bf16 %v9204_v34, %v9204_v34  ;;  %v9209_v26 = vpack.c.bf16 %v9202_v51, %v9202_v51  ;;  %v9525_v22 = vpop.permute.xlu1 %9524 }
 0xe6a   : > { %v13944_v55 = vunpack.i.h.bf16 %v13942_v54  ;;  %v13943_v27 = vunpack.i.l.bf16 %v13942_v54 }
 0xe6b   : > { %12574 = vmatmul.mubr.msk.bf16.vlgmr.msra.gmra.mxu0 %vm250_vm5, %v12572_v44  ;;  %13389 = vmatmul.mubr.msk.bf16.vlgmr.msra.gmra.mxu1 %vm250_vm5, %v12572_v44  ;;  %v9321_v35 = vsel %vm254_vm3, %v9207_v17, 0  ;;  %v9327_v47 = vsel %vm254_vm3, %v9209_v26, 0  ;;  %v12587_v44 = vld [vmem:[%s16585_s2 + $0x154] sm:$0xf] }
 0xe6c   : > { %v9417_v33 = vsel %vm444_vm4, %v13943_v27, %v13944_v55  ;;  %12576 = vmatprep.subr.msk.bf16.mxu0 %vm254_vm3, %v9208_v2  ;;  %13393 = vmatpush3.bf16.msra.mxu1 %v9327_v47  ;;  %v9418_v10 = vsel %vm444_vm4, %v9415_v59, %v13943_v27  ;;  %v9416_v63 = vsel %vm444_vm4, %v13944_v55, %v9415_v59 }
 0xe6d   : > { %v9422_v49 = vpack.c.bf16 %v9417_v33, %v9417_v33  ;;  %9344 = vmatpush1.bf16.msra.mxu0 %v9321_v35  ;;  %v13947_v4 = vpop.permute.xlu0 %13946  ;;  %9361 = vmatprep.mubr.bf16.mxu0 %v14065_v1  ;;  %v9421_v41 = vpack.c.bf16 %v9418_v10, %v9418_v10  ;;  %v9423_v58 = vpack.c.bf16 %v9416_v63, %v9416_v63  ;;  %v9736_v13 = vpop.permute.xlu1 %9735  ;;  %v12591_v10 = vld [vmem:[%s16585_s2 + $0x158] sm:$0xf] }
 0xe6e   : > { %v13949_v50 = vunpack.i.h.bf16 %v13947_v4  ;;  %v13948_v21 = vunpack.i.l.bf16 %v13947_v4  ;;  %13394 = vmatprep.mubr.msk.bf16.mxu1 %vm14066_vm0, %v14064_v0  ;;  %13398 = vmatprep.subr.bf16.mxu1 %v14064_v0 }
 0xe6f   : > { %12580 = vmatprep.subr.msk.bf16.mxu0 %vm254_vm3, %v9422_v49  ;;  %v9428_v20 = vsel %vm254_vm3, %v9421_v41, 0  ;;  %v9434_v15 = vsel %vm254_vm3, %v9423_v58, 0 }
 0xe70   : > { %v9527_v25 = vsel %vm555_vm6, %v13948_v21, %v13949_v50  ;;  %v9528_v19 = vsel %vm555_vm6, %v9525_v22, %v13948_v21  ;;  %v9526_v6 = vsel %vm555_vm6, %v13949_v50, %v9525_v22 }
 0xe71   : > { %v9532_v9 = vpack.c.bf16 %v9527_v25, %v9527_v25  ;;  %v9531_v3 = vpack.c.bf16 %v9528_v19, %v9528_v19  ;;  %v9533_v56 = vpack.c.bf16 %v9526_v6, %v9526_v6  ;;  %v13952_v60 = vpop.permute.xlu0 %13951  ;;  %v9846_v53 = vpop.permute.xlu1 %9845 }
 0xe72   : > { %v13954_v23 = vunpack.i.h.bf16 %v13952_v60  ;;  %v13953_v39 = vunpack.i.l.bf16 %v13952_v60 }
 0xe73   : > { %12577 = vmatmul.mubr.msk.bf16.vlgmr.msra.gmra.mxu0 %vm250_vm5, %v12571_v18  ;;  %13395 = vmatmul.mubr.msk.bf16.vlgmr.msra.gmra.mxu1 %vm250_vm5, %v12571_v18  ;;  %v9538_v28 = vsel %vm254_vm3, %v9531_v3, 0  ;;  %v9544_v32 = vsel %vm254_vm3, %v9533_v56, 0 }
 0xe74   : > { %9451 = vmatpush1.bf16.msra.mxu0 %v9428_v20  ;;  %13399 = vmatpush3.bf16.msra.mxu1 %v9434_v15  ;;  %v9737_v62 = vsel %vm767_vm7, %v13954_v23, %v9736_v13  ;;  %v9738_v12 = vsel %vm767_vm7, %v13953_v39, %v13954_v23  ;;  %v9739_v42 = vsel %vm767_vm7, %v9736_v13, %v13953_v39  ;;  %v12595_v15 = vld [vmem:[%s16585_s2 + $0x15c] sm:$0xf]  ;;  %v12603_v13 = vld [vmem:[%s16585_s2 + $0x164] sm:$0xf] }
 0xe75   : > { %12584 = vmatprep.subr.msk.bf16.mxu0 %vm254_vm3, %v9532_v9  ;;  %9468 = vmatprep.mubr.bf16.mxu0 %v14065_v1  ;;  %v13957_v48 = vpop.permute.xlu0 %13956  ;;  %v9743_v7 = vpack.c.bf16 %v9737_v62, %v9737_v62  ;;  %v9742_v46 = vpack.c.bf16 %v9738_v12, %v9738_v12  ;;  %v9744_v57 = vpack.c.bf16 %v9739_v42, %v9739_v42  ;;  %v9956_v27 = vpop.permute.xlu1 %9955 }
 0xe76   : > { %13400 = vmatprep.mubr.msk.bf16.mxu1 %vm14066_vm0, %v14064_v0  ;;  %13404 = vmatprep.subr.bf16.mxu1 %v14064_v0  ;;  %v13959_v24 = vunpack.i.h.bf16 %v13957_v48  ;;  %v13958_v36 = vunpack.i.l.bf16 %v13957_v48 }
 0xe77   : > { %v9749_v2 = vsel %vm254_vm3, %v9742_v46, 0  ;;  %v9755_v54 = vsel %vm254_vm3, %v9744_v57, 0 }
 0xe78   : > { %v9847_v16 = vsel %vm878_vm8, %v13959_v24, %v9846_v53  ;;  %v9848_v26 = vsel %vm878_vm8, %v13958_v36, %v13959_v24  ;;  %v9849_v55 = vsel %vm878_vm8, %v9846_v53, %v13958_v36 }
 0xe79   : > { %v13962_v34 = vpop.permute.xlu0 %13961  ;;  %v9853_v51 = vpack.c.bf16 %v9847_v16, %v9847_v16  ;;  %v9852_v59 = vpack.c.bf16 %v9848_v26, %v9848_v26  ;;  %v9854_v35 = vpack.c.bf16 %v9849_v55, %v9849_v55  ;;  %v10066_v25 = vpop.permute.xlu1 %10065 }
 0xe7a   : > { %v13964_v17 = vunpack.i.h.bf16 %v13962_v34  ;;  %v13963_v33 = vunpack.i.l.bf16 %v13962_v34 }
 0xe7b   : > { %12581 = vmatmul.mubr.msk.bf16.vlgmr.msra.gmra.mxu0 %vm250_vm5, %v12579_v61  ;;  %13401 = vmatmul.mubr.msk.bf16.vlgmr.msra.gmra.mxu1 %vm250_vm5, %v12579_v61  ;;  %v9859_v4 = vsel %vm254_vm3, %v9852_v59, 0  ;;  %v9865_v50 = vsel %vm254_vm3, %v9854_v35, 0 }
 0xe7c   : > { %9561 = vmatpush1.bf16.msra.mxu0 %v9538_v28  ;;  %13405 = vmatpush3.bf16.msra.mxu1 %v9544_v32  ;;  %v9957_v47 = vsel %vm989_vm9, %v13964_v17, %v9956_v27  ;;  %v9958_v41 = vsel %vm989_vm9, %v13963_v33, %v13964_v17  ;;  %v9959_v58 = vsel %vm989_vm9, %v9956_v27, %v13963_v33  ;;  %v12599_v32 = vld [vmem:[%s16585_s2 + $0x160] sm:$0xf] }
 0xe7d   : > { %12588 = vmatprep.subr.msk.bf16.mxu0 %vm254_vm3, %v9633_v45  ;;  %9578 = vmatprep.mubr.bf16.mxu0 %v14065_v1  ;;  %v13967_v63 = vpop.permute.xlu0 %13966  ;;  %v9963_v49 = vpack.c.bf16 %v9957_v47, %v9957_v47  ;;  %v9962_v18 = vpack.c.bf16 %v9958_v41, %v9958_v41  ;;  %v9964_v9 = vpack.c.bf16 %v9959_v58, %v9959_v58 }
 0xe7e   : > { %13406 = vmatprep.mubr.msk.bf16.mxu1 %vm14066_vm0, %v14064_v0  ;;  %13410 = vmatprep.subr.bf16.mxu1 %v14064_v0  ;;  %v13969_v21 = vunpack.i.h.bf16 %v13967_v63  ;;  %v13968_v20 = vunpack.i.l.bf16 %v13967_v63 }
 0xe7f   : > { %v9969_v6 = vsel %vm254_vm3, %v9962_v18, 0  ;;  %v9975_v3 = vsel %vm254_vm3, %v9964_v9, 0 }
 0xe80   : > { %v10067_v22 = vsel %vm1100_vm10, %v13969_v21, %v10066_v25  ;;  %v10068_v56 = vsel %vm1100_vm10, %v13968_v20, %v13969_v21  ;;  %v10069_v61 = vsel %vm1100_vm10, %v10066_v25, %v13968_v20 }
 0xe81   : > { %v10073_v19 = vpack.c.bf16 %v10067_v22, %v10067_v22  ;;  %v10072_v60 = vpack.c.bf16 %v10068_v56, %v10068_v56  ;;  %v10074_v28 = vpack.c.bf16 %v10069_v61, %v10069_v61 }
 0xe83   : > { %12585 = vmatmul.mubr.msk.bf16.vlgmr.msra.gmra.mxu0 %vm250_vm5, %v12583_v14  ;;  %13407 = vmatmul.mubr.msk.bf16.vlgmr.msra.gmra.mxu1 %vm250_vm5, %v12583_v14  ;;  %v10079_v45 = vsel %vm254_vm3, %v10072_v60, 0  ;;  %v10085_v23 = vsel %vm254_vm3, %v10074_v28, 0 }
 0xe84   : > { %9662 = vmatpush1.bf16.msra.mxu0 %v9639_v11  ;;  %13411 = vmatpush3.bf16.msra.mxu1 %v9645_v5 }
 0xe85   : > { %12592 = vmatprep.subr.msk.bf16.mxu0 %vm254_vm3, %v9743_v7  ;;  %9679 = vmatprep.mubr.bf16.mxu0 %v14065_v1 }
 0xe86   : > { %13412 = vmatprep.mubr.msk.bf16.mxu1 %vm14066_vm0, %v14064_v0  ;;  %13416 = vmatprep.subr.bf16.mxu1 %v14064_v0 }
 0xe8b   : > { %12589 = vmatmul.mubr.msk.bf16.vlgmr.msra.gmra.mxu0 %vm250_vm5, %v12587_v44  ;;  %13413 = vmatmul.mubr.msk.bf16.vlgmr.msra.gmra.mxu1 %vm250_vm5, %v12587_v44 }
 0xe8c   : > { %9772 = vmatpush1.bf16.msra.mxu0 %v9749_v2  ;;  %13417 = vmatpush3.bf16.msra.mxu1 %v9755_v54 }
 0xe8d   : > { %12596 = vmatprep.subr.msk.bf16.mxu0 %vm254_vm3, %v9853_v51  ;;  %9789 = vmatprep.mubr.bf16.mxu0 %v14065_v1 }
 0xe8e   : > { %13418 = vmatprep.mubr.msk.bf16.mxu1 %vm14066_vm0, %v14064_v0  ;;  %13422 = vmatprep.subr.bf16.mxu1 %v14064_v0 }
 0xe93   : > { %12593 = vmatmul.mubr.msk.bf16.vlgmr.msra.gmra.mxu0 %vm250_vm5, %v12591_v10  ;;  %13419 = vmatmul.mubr.msk.bf16.vlgmr.msra.gmra.mxu1 %vm250_vm5, %v12591_v10 }
 0xe94   : > { %9882 = vmatpush1.bf16.msra.mxu0 %v9859_v4  ;;  %13423 = vmatpush3.bf16.msra.mxu1 %v9865_v50 }
 0xe95   : > { %12600 = vmatprep.subr.msk.bf16.mxu0 %vm254_vm3, %v9963_v49  ;;  %9899 = vmatprep.mubr.bf16.mxu0 %v14065_v1 }
 0xe96   : > { %13424 = vmatprep.mubr.msk.bf16.mxu1 %vm14066_vm0, %v14064_v0  ;;  %13428 = vmatprep.subr.bf16.mxu1 %v14064_v0 }
 0xe9b   : > { %12597 = vmatmul.mubr.msk.bf16.vlgmr.msra.gmra.mxu0 %vm250_vm5, %v12595_v15  ;;  %13425 = vmatmul.mubr.msk.bf16.vlgmr.msra.gmra.mxu1 %vm250_vm5, %v12595_v15 }
 0xe9c   : > { %9992 = vmatpush1.bf16.msra.mxu0 %v9969_v6  ;;  %13429 = vmatpush3.bf16.msra.mxu1 %v9975_v3 }
 0xe9d   : > { %12604 = vmatprep.subr.msk.bf16.mxu0 %vm254_vm3, %v10073_v19  ;;  %10009 = vmatprep.mubr.bf16.mxu0 %v14065_v1 }
 0xe9e   : > { %13430 = vmatprep.mubr.msk.bf16.mxu1 %vm14066_vm0, %v14064_v0  ;;  %13434 = vmatprep.subr.bf16.mxu1 %v14064_v0 }
 0xea3   : > { %12601 = vmatmul.mubr.msk.bf16.vlgmr.msra.gmra.mxu0 %vm250_vm5, %v12599_v32  ;;  %13431 = vmatmul.mubr.msk.bf16.vlgmr.msra.gmra.mxu1 %vm250_vm5, %v12599_v32 }
 0xea4   : > { %10102 = vmatpush1.bf16.msra.mxu0 %v10079_v45  ;;  %13435 = vmatpush3.bf16.msra.mxu1 %v10085_v23 }
 0xea5   : > { %10119 = vmatprep.mubr.bf16.mxu0 %v14065_v1  ;;  %13436 = vmatprep.mubr.msk.bf16.mxu1 %vm14066_vm0, %v14064_v0 }
 0xea6   : > { %13440 = vmatprep.subr.bf16.mxu1 %v14064_v0 }
 0xeab   : > { %12605 = vmatmul.mubr.msk.bf16.vlgmr.msra.gmra.mxu0 %vm250_vm5, %v12603_v13  ;;  %13437 = vmatmul.mubr.msk.bf16.vlgmr.msra.gmra.mxu1 %vm250_vm5, %v12603_v13 }
 0xeac   : > { %10265 = vmatprep.mubr.bf16.mxu0 %v14065_v1  ;;  %13442 = vmatprep.mubr.msk.bf16.mxu1 %vm14066_vm0, %v14064_v0 }
 0xf2b   : > { %v9270_v40 = vpop.f32.mrf.mxu0  ;;  %v9311_v52 = vpop.f32.mrf.mxu1 }
 0xf2d   : > { %v9272_v62 = vpop.f32.mrf.mxu0  ;;  %v13390_v39 = vpop.f32.mrf.mxu1 }
 0xf2f   : > { %v9274_v14 = vpop.f32.mrf.mxu0  ;;  %v9314_v48 = vpop.f32.mrf.mxu1 }
 0xf31   : > { %v9275_v7 = vpop.f32.mrf.mxu0  ;;  %v13391_v11 = vpop.f32.mrf.mxu1 }
 0xf33   : > { %v9363_v5 = vpop.f32.mrf.mxu0  ;;  %v9404_v24 = vpop.f32.mrf.mxu1 }
 0xf34   : > { %v9364_v45 = vadd.f32 %v9363_v5, %v9270_v40  ;;  %v9405_v23 = vadd.f32 %v9404_v24, %v9311_v52 }
 0xf35   : > { %v9365_v12 = vpop.f32.mrf.mxu0  ;;  %v13396_v42 = vpop.f32.mrf.mxu1 }
 0xf36   : > { %v9366_v14 = vadd.f32 %v9365_v12, %v9272_v62 }
 0xf37   : > { %v9367_v53 = vpop.f32.mrf.mxu0  ;;  %v9407_v46 = vpop.f32.mrf.mxu1 }
 0xf39   : > { %v9368_v57 = vpop.f32.mrf.mxu0  ;;  %v13397_v16 = vpop.f32.mrf.mxu1 }
 0xf3b   : > { %v9470_v36 = vpop.f32.mrf.mxu0  ;;  %v9511_v44 = vpop.f32.mrf.mxu1 }
 0xf3c   : > { %v9517_v48 = vadd.f32 %v9470_v36, %v9364_v45  ;;  %v9519_v7 = vadd.f32 %v9511_v44, %v9405_v23 }
 0xf3d   : > { %v9472_v34 = vpop.f32.mrf.mxu0  ;;  %v13402_v51 = vpop.f32.mrf.mxu1 }
 0xf3e   : > { %v9518_v53 = vadd.f32 %v9472_v34, %v9366_v14 }
 0xf3f   : > { %v9474_v2 = vpop.f32.mrf.mxu0  ;;  %v9514_v54 = vpop.f32.mrf.mxu1 }
 0xf41   : > { %v9475_v17 = vpop.f32.mrf.mxu0  ;;  %v13403_v26 = vpop.f32.mrf.mxu1 }
 0xf43   : > { %v9580_v55 = vpop.f32.mrf.mxu0  ;;  %v9621_v27 = vpop.f32.mrf.mxu1 }
 0xf44   : > { %v9627_v46 = vadd.f32 %v9580_v55, %v9517_v48  ;;  %v9629_v57 = vadd.f32 %v9621_v27, %v9519_v7 }
 0xf45   : > { %v9582_v59 = vpop.f32.mrf.mxu0  ;;  %v13408_v35 = vpop.f32.mrf.mxu1 }
 0xf46   : > { %v9628_v2 = vadd.f32 %v9582_v59, %v9518_v53  ;;  %v10176_v59 = vpop.permute.xlu0 %10175 }
 0xf47   : > { %v9584_v47 = vpop.f32.mrf.mxu0  ;;  %v9624_v33 = vpop.f32.mrf.mxu1 }
 0xf49   : > { %v9585_v10 = vpop.f32.mrf.mxu0  ;;  %v13409_v63 = vpop.f32.mrf.mxu1 }
 0xf4b   : > { %v9681_v49 = vpop.f32.mrf.mxu0  ;;  %v9722_v4 = vpop.f32.mrf.mxu1 }
 0xf4c   : > { %v9728_v54 = vadd.f32 %v9681_v49, %v9627_v46  ;;  %v9730_v17 = vadd.f32 %v9722_v4, %v9629_v57 }
 0xf4d   : > { %v9683_v50 = vpop.f32.mrf.mxu0  ;;  %v13414_v21 = vpop.f32.mrf.mxu1 }
 0xf4e   : > { %v9729_v47 = vadd.f32 %v9683_v50, %v9628_v2 }
 0xf4f   : > { %v9685_v41 = vpop.f32.mrf.mxu0  ;;  %v9725_v58 = vpop.f32.mrf.mxu1 }
 0xf51   : > { %v9686_v25 = vpop.f32.mrf.mxu0  ;;  %v13415_v18 = vpop.f32.mrf.mxu1 }
 0xf53   : > { %v9791_v9 = vpop.f32.mrf.mxu0  ;;  %v9832_v22 = vpop.f32.mrf.mxu1 }
 0xf54   : > { %v9838_v40 = vadd.f32 %v9791_v9, %v9728_v54  ;;  %v9840_v52 = vadd.f32 %v9832_v22, %v9730_v17 }
 0xf55   : > { %v9793_v20 = vpop.f32.mrf.mxu0  ;;  %v13420_v15 = vpop.f32.mrf.mxu1 }
 0xf56   : > { %v9839_v62 = vadd.f32 %v9793_v20, %v9729_v47 }
 0xf57   : > { %v9795_v19 = vpop.f32.mrf.mxu0  ;;  %v9835_v6 = vpop.f32.mrf.mxu1 }
 0xf59   : > { %v9796_v3 = vpop.f32.mrf.mxu0  ;;  %v13421_v56 = vpop.f32.mrf.mxu1 }
 0xf5b   : > { %v9901_v61 = vpop.f32.mrf.mxu0  ;;  %v9942_v60 = vpop.f32.mrf.mxu1 }
 0xf5c   : > { %v9948_v12 = vadd.f32 %v9901_v61, %v9838_v40  ;;  %v9950_v36 = vadd.f32 %v9942_v60, %v9840_v52 }
 0xf5d   : > { %v9903_v28 = vpop.f32.mrf.mxu0  ;;  %v13426_v32 = vpop.f32.mrf.mxu1 }
 0xf5e   : > { %v9949_v34 = vadd.f32 %v9903_v28, %v9839_v62 }
 0xf5f   : > { %v9905_v13 = vpop.f32.mrf.mxu0  ;;  %v9945_v39 = vpop.f32.mrf.mxu1 }
 0xf61   : > { %v9906_v11 = vpop.f32.mrf.mxu0  ;;  %v13427_v42 = vpop.f32.mrf.mxu1 }
 0xf63   : > { %v10011_v16 = vpop.f32.mrf.mxu0  ;;  %v10052_v51 = vpop.f32.mrf.mxu1 }
 0xf64   : > { %v10058_v55 = vadd.f32 %v10011_v16, %v9948_v12  ;;  %v10060_v27 = vadd.f32 %v10052_v51, %v9950_v36 }
 0xf65   : > { %v10013_v26 = vpop.f32.mrf.mxu0  ;;  %v13432_v35 = vpop.f32.mrf.mxu1 }
 0xf66   : > { %v10059_v49 = vadd.f32 %v10013_v26, %v9949_v34  ;;  %v12609_v35 = vld [vmem:[%s16585_s2 + $0x16c] sm:$0xf] }
 0xf67   : > { %v10015_v5 = vpop.f32.mrf.mxu0  ;;  %v10055_v24 = vpop.f32.mrf.mxu1 }
 0xf69   : > { %v10016_v44 = vpop.f32.mrf.mxu0  ;;  %v13433_v33 = vpop.f32.mrf.mxu1 }
 0xf6b   : > { %v10121_v10 = vpop.f32.mrf.mxu0  ;;  %v10162_v63 = vpop.f32.mrf.mxu1 }
 0xf6c   : > { %v10168_v4 = vadd.f32 %v10121_v10, %v10058_v55  ;;  %v10170_v21 = vadd.f32 %v10162_v63, %v10060_v27 }
 0xf6d   : > { %v10123_v41 = vpop.f32.mrf.mxu0  ;;  %v13438_v50 = vpop.f32.mrf.mxu1 }
 0xf6e   : > { %v10178_v58 = vadd.f32 %v10176_v59, %v10168_v4  ;;  %v10180_v25 = vadd.f32 %v10176_v59, %v10170_v21  ;;  %v10169_v18 = vadd.f32 %v10123_v41, %v10059_v49 }
 0xf6f   : > { %v10125_v9 = vpop.f32.mrf.mxu0  ;;  %v10165_v22 = vpop.f32.mrf.mxu1 }
 0xf70   : > { %v10181_v20 = vmul.f32 %v10178_v58, %v14334_v31  ;;  %v10183_v15 = vmul.f32 %v10180_v25, %v14339_v43  ;;  %v10179_v19 = vadd.f32 %v10176_v59, %v10169_v18  ;;  %v12608_v58 = vld [vmem:[%s16585_s2 + $0x168] sm:$0xf] }
 0xf71   : > { %v10126_v6 = vpop.f32.mrf.mxu0  ;;  %v13439_v3 = vpop.f32.mrf.mxu1 }
 0xf72   : > { %v10187_v56 = vadd.f32 %v10181_v20, %v14541_v29  ;;  %v10189_v61 = vadd.f32 %v10183_v15, %v14544_v30  ;;  %v10182_v60 = vmul.f32 %v10179_v19, %v14336_v38  ;;  %v12644_v29 = vld [vmem:[%s16586_s3 + $0x50] sm:$0xff] }
 0xf73   : > { %v12616_v3 = vld [vmem:[%s16585_s2 + $0x170] sm:$0xf] }
 0xf74   : > { %v16178_v28 = vmax.f32 %v10189_v61, 0.0  ;;  %v10188_v32 = vadd.f32 %v10182_v60, %v14550_v37  ;;  %v16181_v45 = vmax.f32 %v10187_v56, 0.0 }
 0xf76   : > { %v16183_v23 = vmax.f32 %v10188_v32, 0.0  ;;  %10211 = vrot.lane.b32.xlu0 %v16178_v28, %s14067_s21 }
 0xf78   : > { %v13970_v13 = vpack.i.bf16 %v16183_v23, %v16181_v45  ;;  %v10630_v32 = vpack.c.bf16 %v16183_v23, %v16183_v23 }
 0xf7a   : > { %10197 = vrot.lane.b32.xlu0 %v16178_v28, %s14068_s22  ;;  %13971 = vrot.lane.b32.xlu1 %v13970_v13, %s14067_s21 }
 0xf7e   : > { %10411 = vrot.lane.b32.xlu0 %v16178_v28, %s14069_s23  ;;  %13976 = vrot.lane.b32.xlu1 %v13970_v13, %s14068_s22 }
 0xf82   : > { %10521 = vrot.lane.b32.xlu0 %v16178_v28, %s14070_s24  ;;  %13981 = vrot.lane.b32.xlu1 %v13970_v13, %s14069_s23 }
 0xf86   : > { %10732 = vrot.lane.b32.xlu0 %v16178_v28, %s14071_s25  ;;  %13986 = vrot.lane.b32.xlu1 %v13970_v13, %s14070_s24 }
 0xf8a   : > { %10842 = vrot.lane.b32.xlu0 %v16178_v28, %s14072_s26  ;;  %13991 = vrot.lane.b32.xlu1 %v13970_v13, %s14071_s25 }
 0xf8e   : > { %10952 = vrot.lane.b32.xlu0 %v16178_v28, %s14073_s27  ;;  %13996 = vrot.lane.b32.xlu1 %v13970_v13, %s14072_s26 }
 0xf92   : > { %11062 = vrot.lane.b32.xlu0 %v16178_v28, %s14074_s28  ;;  %14001 = vrot.lane.b32.xlu1 %v13970_v13, %s14073_s27 }
 0xf96   : > { %14006 = vrot.lane.b32.xlu1 %v13970_v13, %s14074_s28 }
 0xf9a   : > { %11172 = vperm.xlu1 %13689, %v12644_v29  }
 0xfe8   : > { %v10212_v30 = vpop.permute.xlu0 %10211 }
 0xfec   : > { %v13972_v37 = vpop.permute.xlu1 %13971  ;;  %v10198_v42 = vpop.permute.xlu0 %10197 }
 0xfed   : > { %v13974_v39 = vunpack.i.h.bf16 %v13972_v37  ;;  %v13973_v14 = vunpack.i.l.bf16 %v13972_v37  ;;  %v10631_v37 = vpack.c.bf16 %v16178_v28, %v16178_v28 }
 0xfef   : > { %v10214_v48 = vsel %vm241_vm1, %v13973_v14, %v13974_v39  ;;  %v10215_v7 = vsel %vm241_vm1, %v10212_v30, %v13973_v14  ;;  %v10213_v11 = vsel %vm241_vm1, %v13974_v39, %v10212_v30  ;;  %v10629_v30 = vpack.c.bf16 %v16181_v45, %v16181_v45  ;;  %v12620_v14 = vld [vmem:[%s16585_s2 + $0x174] sm:$0xf] }
 0xff0   : > { %v10219_v53 = vpack.c.bf16 %v10214_v48, %v10214_v48  ;;  %v13977_v46 = vpop.permute.xlu1 %13976  ;;  %v10218_v57 = vpack.c.bf16 %v10215_v7, %v10215_v7  ;;  %v10220_v16 = vpack.c.bf16 %v10213_v11, %v10213_v11  ;;  %v10412_v44 = vpop.permute.xlu0 %10411  ;;  %v10642_v45 = vsel %vm254_vm3, %v10631_v37, 0 }
 0xff1   : > { %v13979_v51 = vunpack.i.h.bf16 %v13977_v46  ;;  %v13978_v2 = vunpack.i.l.bf16 %v13977_v46  ;;  %v10636_v11 = vsel %vm254_vm3, %v10629_v30, 0 }
 0xff2   : > { %12610 = vmatprep.subr.msk.bf16.mxu0 %vm254_vm3, %v10219_v53  ;;  %v10225_v54 = vsel %vm254_vm3, %v10218_v57, 0  ;;  %v10231_v17 = vsel %vm254_vm3, %v10220_v16, 0 }
 0xff3   : > { %v10200_v26 = vsel %vm227_vm2, %v13978_v2, %v13979_v51  ;;  %10248 = vmatpush1.bf16.msra.mxu0 %v10225_v54  ;;  %13441 = vmatpush3.bf16.msra.mxu1 %v10231_v17  ;;  %v10201_v47 = vsel %vm227_vm2, %v10198_v42, %v13978_v2  ;;  %v10199_v40 = vsel %vm227_vm2, %v13979_v51, %v10198_v42  ;;  %v12624_v54 = vld [vmem:[%s16585_s2 + $0x178] sm:$0xf] }
 0xff4   : > { %v10205_v52 = vpack.c.bf16 %v10200_v26, %v10200_v26  ;;  %v13982_v5 = vpop.permute.xlu1 %13981  ;;  %13446 = vmatprep.subr.bf16.mxu1 %v14064_v0  ;;  %v10204_v24 = vpack.c.bf16 %v10201_v47, %v10201_v47  ;;  %v10206_v62 = vpack.c.bf16 %v10199_v40, %v10199_v40  ;;  %v10522_v18 = vpop.permute.xlu0 %10521 }
 0xff5   : > { %v13984_v12 = vunpack.i.h.bf16 %v13982_v5  ;;  %v13983_v36 = vunpack.i.l.bf16 %v13982_v5 }
 0xff6   : > { %12611 = vmatmul.mubr.msk.bf16.vlgmr.msra.gmra.mxu0 %vm250_vm5, %v12609_v35  ;;  %13443 = vmatmul.mubr.msk.bf16.vlgmr.msra.gmra.mxu1 %vm250_vm5, %v12609_v35  ;;  %v10318_v33 = vsel %vm254_vm3, %v10204_v24, 0  ;;  %v10324_v34 = vsel %vm254_vm3, %v10206_v62, 0 }
 0xff7   : > { %v10414_v55 = vsel %vm444_vm4, %v13983_v36, %v13984_v12  ;;  %12613 = vmatprep.subr.msk.bf16.mxu0 %vm254_vm3, %v10205_v52  ;;  %13447 = vmatpush3.bf16.msra.mxu1 %v10324_v34  ;;  %v10415_v27 = vsel %vm444_vm4, %v10412_v44, %v13983_v36  ;;  %v10413_v10 = vsel %vm444_vm4, %v13984_v12, %v10412_v44 }
 0xff8   : > { %v10419_v63 = vpack.c.bf16 %v10414_v55, %v10414_v55  ;;  %10341 = vmatpush1.bf16.msra.mxu0 %v10318_v33  ;;  %v13987_v59 = vpop.permute.xlu1 %13986  ;;  %10358 = vmatprep.mubr.bf16.mxu0 %v14065_v1  ;;  %v10418_v21 = vpack.c.bf16 %v10415_v27, %v10415_v27  ;;  %v10420_v41 = vpack.c.bf16 %v10413_v10, %v10413_v10  ;;  %v10733_v29 = vpop.permute.xlu0 %10732  ;;  %v12628_v33 = vld [vmem:[%s16585_s2 + $0x17c] sm:$0xf] }
 0xff9   : > { %v13989_v49 = vunpack.i.h.bf16 %v13987_v59  ;;  %v13988_v4 = vunpack.i.l.bf16 %v13987_v59  ;;  %13448 = vmatprep.mubr.msk.bf16.mxu1 %vm14066_vm0, %v14064_v0  ;;  %13452 = vmatprep.subr.bf16.mxu1 %v14064_v0 }
 0xffa   : > { %12617 = vmatprep.subr.msk.bf16.mxu0 %vm254_vm3, %v10419_v63  ;;  %v10425_v9 = vsel %vm254_vm3, %v10418_v21, 0  ;;  %v10431_v22 = vsel %vm254_vm3, %v10420_v41, 0 }
 0xffb   : > { %v10524_v50 = vsel %vm555_vm6, %v13988_v4, %v13989_v49  ;;  %v10525_v20 = vsel %vm555_vm6, %v10522_v18, %v13988_v4  ;;  %v10523_v15 = vsel %vm555_vm6, %v13989_v49, %v10522_v18 }
 0xffc   : > { %v10529_v25 = vpack.c.bf16 %v10524_v50, %v10524_v50  ;;  %v10528_v19 = vpack.c.bf16 %v10525_v20, %v10525_v20  ;;  %v10530_v6 = vpack.c.bf16 %v10523_v15, %v10523_v15  ;;  %v13992_v56 = vpop.permute.xlu1 %13991  ;;  %v10843_v46 = vpop.permute.xlu0 %10842 }
 0xffd   : > { %v13994_v13 = vunpack.i.h.bf16 %v13992_v56  ;;  %v13993_v39 = vunpack.i.l.bf16 %v13992_v56 }
 0xffe   : > { %12614 = vmatmul.mubr.msk.bf16.vlgmr.msra.gmra.mxu0 %vm250_vm5, %v12608_v58  ;;  %13449 = vmatmul.mubr.msk.bf16.vlgmr.msra.gmra.mxu1 %vm250_vm5, %v12608_v58  ;;  %v10535_v61 = vsel %vm254_vm3, %v10528_v19, 0  ;;  %v10541_v60 = vsel %vm254_vm3, %v10530_v6, 0 }
 0xfff   : > { %10448 = vmatpush1.bf16.msra.mxu0 %v10425_v9  ;;  %13453 = vmatpush3.bf16.msra.mxu1 %v10431_v22  ;;  %v10734_v23 = vsel %vm767_vm7, %v13994_v13, %v10733_v29  ;;  %v10735_v28 = vsel %vm767_vm7, %v13993_v39, %v13994_v13  ;;  %v10736_v53 = vsel %vm767_vm7, %v10733_v29, %v13993_v39 }
0x1000   : > { %12621 = vmatprep.subr.msk.bf16.mxu0 %vm254_vm3, %v10529_v25  ;;  %10465 = vmatprep.mubr.bf16.mxu0 %v14065_v1  ;;  %v13997_v48 = vpop.permute.xlu1 %13996  ;;  %v10740_v7 = vpack.c.bf16 %v10734_v23, %v10734_v23  ;;  %v10739_v57 = vpack.c.bf16 %v10735_v28, %v10735_v28  ;;  %v10741_v16 = vpack.c.bf16 %v10736_v53, %v10736_v53  ;;  %v10953_v24 = vpop.permute.xlu0 %10952  ;;  %v12632_v25 = vld [vmem:[%s16585_s2 + $0x180] sm:$0xf] }
0x1001   : > { %13454 = vmatprep.mubr.msk.bf16.mxu1 %vm14066_vm0, %v14064_v0  ;;  %13458 = vmatprep.subr.bf16.mxu1 %v14064_v0  ;;  %v13999_v42 = vunpack.i.h.bf16 %v13997_v48  ;;  %v13998_v2 = vunpack.i.l.bf16 %v13997_v48 }
0x1002   : > { %v10746_v35 = vsel %vm254_vm3, %v10739_v57, 0  ;;  %v10752_v47 = vsel %vm254_vm3, %v10741_v16, 0 }
0x1003   : > { %v10844_v51 = vsel %vm878_vm8, %v13999_v42, %v10843_v46  ;;  %v10845_v52 = vsel %vm878_vm8, %v13998_v2, %v13999_v42  ;;  %v10846_v5 = vsel %vm878_vm8, %v10843_v46, %v13998_v2 }
0x1004   : > { %v14002_v17 = vpop.permute.xlu1 %14001  ;;  %v10850_v26 = vpack.c.bf16 %v10844_v51, %v10844_v51  ;;  %v10849_v62 = vpack.c.bf16 %v10845_v52, %v10845_v52  ;;  %v10851_v12 = vpack.c.bf16 %v10846_v5, %v10846_v5  ;;  %v11063_v4 = vpop.permute.xlu0 %11062 }
0x1005   : > { %v14004_v40 = vunpack.i.h.bf16 %v14002_v17  ;;  %v14003_v44 = vunpack.i.l.bf16 %v14002_v17 }
0x1006   : > { %12618 = vmatmul.mubr.msk.bf16.vlgmr.msra.gmra.mxu0 %vm250_vm5, %v12616_v3  ;;  %13455 = vmatmul.mubr.msk.bf16.vlgmr.msra.gmra.mxu1 %vm250_vm5, %v12616_v3  ;;  %v10856_v27 = vsel %vm254_vm3, %v10849_v62, 0  ;;  %v10862_v10 = vsel %vm254_vm3, %v10851_v12, 0  ;;  %v12636_v3 = vld [vmem:[%s16585_s2 + $0x184] sm:$0xf] }
0x1007   : > { %10558 = vmatpush1.bf16.msra.mxu0 %v10535_v61  ;;  %13459 = vmatpush3.bf16.msra.mxu1 %v10541_v60  ;;  %v10954_v36 = vsel %vm989_vm9, %v14004_v40, %v10953_v24  ;;  %v10955_v59 = vsel %vm989_vm9, %v14003_v44, %v14004_v40  ;;  %v10956_v49 = vsel %vm989_vm9, %v10953_v24, %v14003_v44  ;;  %v12640_v60 = vld [vmem:[%s16585_s2 + $0x188] sm:$0xf] }
0x1008   : > { %12625 = vmatprep.subr.msk.bf16.mxu0 %vm254_vm3, %v10630_v32  ;;  %10575 = vmatprep.mubr.bf16.mxu0 %v14065_v1  ;;  %v14007_v34 = vpop.permute.xlu1 %14006  ;;  %v10960_v55 = vpack.c.bf16 %v10954_v36, %v10954_v36  ;;  %v10959_v21 = vpack.c.bf16 %v10955_v59, %v10955_v59  ;;  %v10961_v41 = vpack.c.bf16 %v10956_v49, %v10956_v49 }
0x1009   : > { %13460 = vmatprep.mubr.msk.bf16.mxu1 %vm14066_vm0, %v14064_v0  ;;  %13464 = vmatprep.subr.bf16.mxu1 %v14064_v0  ;;  %v14009_v63 = vunpack.i.h.bf16 %v14007_v34  ;;  %v14008_v58 = vunpack.i.l.bf16 %v14007_v34 }
0x100a   : > { %v10966_v9 = vsel %vm254_vm3, %v10959_v21, 0  ;;  %v10972_v22 = vsel %vm254_vm3, %v10961_v41, 0 }
0x100b   : > { %v11064_v50 = vsel %vm1100_vm10, %v14009_v63, %v11063_v4  ;;  %v11065_v20 = vsel %vm1100_vm10, %v14008_v58, %v14009_v63  ;;  %v11066_v15 = vsel %vm1100_vm10, %v11063_v4, %v14008_v58 }
0x100c   : > { %v11070_v18 = vpack.c.bf16 %v11064_v50, %v11064_v50  ;;  %v11069_v19 = vpack.c.bf16 %v11065_v20, %v11065_v20  ;;  %v11071_v6 = vpack.c.bf16 %v11066_v15, %v11066_v15 }
0x100e   : > { %12622 = vmatmul.mubr.msk.bf16.vlgmr.msra.gmra.mxu0 %vm250_vm5, %v12620_v14  ;;  %13461 = vmatmul.mubr.msk.bf16.vlgmr.msra.gmra.mxu1 %vm250_vm5, %v12620_v14  ;;  %v11076_v56 = vsel %vm254_vm3, %v11069_v19, 0  ;;  %v11082_v61 = vsel %vm254_vm3, %v11071_v6, 0 }
0x100f   : > { %10659 = vmatpush1.bf16.msra.mxu0 %v10636_v11  ;;  %13465 = vmatpush3.bf16.msra.mxu1 %v10642_v45 }
0x1010   : > { %12629 = vmatprep.subr.msk.bf16.mxu0 %vm254_vm3, %v10740_v7  ;;  %10676 = vmatprep.mubr.bf16.mxu0 %v14065_v1 }
0x1011   : > { %13466 = vmatprep.mubr.msk.bf16.mxu1 %vm14066_vm0, %v14064_v0  ;;  %13470 = vmatprep.subr.bf16.mxu1 %v14064_v0 }
0x1016   : > { %12626 = vmatmul.mubr.msk.bf16.vlgmr.msra.gmra.mxu0 %vm250_vm5, %v12624_v54  ;;  %13467 = vmatmul.mubr.msk.bf16.vlgmr.msra.gmra.mxu1 %vm250_vm5, %v12624_v54 }
0x1017   : > { %10769 = vmatpush1.bf16.msra.mxu0 %v10746_v35  ;;  %13471 = vmatpush3.bf16.msra.mxu1 %v10752_v47 }
0x1018   : > { %12633 = vmatprep.subr.msk.bf16.mxu0 %vm254_vm3, %v10850_v26  ;;  %10786 = vmatprep.mubr.bf16.mxu0 %v14065_v1 }
0x1019   : > { %13472 = vmatprep.mubr.msk.bf16.mxu1 %vm14066_vm0, %v14064_v0  ;;  %13476 = vmatprep.subr.bf16.mxu1 %v14064_v0 }
0x101e   : > { %12630 = vmatmul.mubr.msk.bf16.vlgmr.msra.gmra.mxu0 %vm250_vm5, %v12628_v33  ;;  %13473 = vmatmul.mubr.msk.bf16.vlgmr.msra.gmra.mxu1 %vm250_vm5, %v12628_v33 }
0x101f   : > { %10879 = vmatpush1.bf16.msra.mxu0 %v10856_v27  ;;  %13477 = vmatpush3.bf16.msra.mxu1 %v10862_v10 }
0x1020   : > { %12637 = vmatprep.subr.msk.bf16.mxu0 %vm254_vm3, %v10960_v55  ;;  %10896 = vmatprep.mubr.bf16.mxu0 %v14065_v1 }
0x1021   : > { %13478 = vmatprep.mubr.msk.bf16.mxu1 %vm14066_vm0, %v14064_v0  ;;  %13482 = vmatprep.subr.bf16.mxu1 %v14064_v0 }
0x1026   : > { %12634 = vmatmul.mubr.msk.bf16.vlgmr.msra.gmra.mxu0 %vm250_vm5, %v12632_v25  ;;  %13479 = vmatmul.mubr.msk.bf16.vlgmr.msra.gmra.mxu1 %vm250_vm5, %v12632_v25 }
0x1027   : > { %10989 = vmatpush1.bf16.msra.mxu0 %v10966_v9  ;;  %13483 = vmatpush3.bf16.msra.mxu1 %v10972_v22 }
0x1028   : > { %12641 = vmatprep.subr.msk.bf16.mxu0 %vm254_vm3, %v11070_v18  ;;  %11006 = vmatprep.mubr.bf16.mxu0 %v14065_v1 }
0x1029   : > { %13484 = vmatprep.mubr.msk.bf16.mxu1 %vm14066_vm0, %v14064_v0  ;;  %13488 = vmatprep.subr.bf16.mxu1 %v14064_v0 }
0x102e   : > { %12638 = vmatmul.mubr.msk.bf16.vlgmr.msra.gmra.mxu0 %vm250_vm5, %v12636_v3  ;;  %13485 = vmatmul.mubr.msk.bf16.vlgmr.msra.gmra.mxu1 %vm250_vm5, %v12636_v3 }
0x102f   : > { %11099 = vmatpush1.bf16.msra.mxu0 %v11076_v56  ;;  %13489 = vmatpush3.bf16.msra.mxu1 %v11082_v61 }
0x1030   : > { %11116 = vmatprep.mubr.bf16.mxu0 %v14065_v1  ;;  %13490 = vmatprep.mubr.msk.bf16.mxu1 %vm14066_vm0, %v14064_v0 }
0x1031   : > { %13494 = vmatprep.subr.bf16.mxu1 %v14064_v0 }
0x1036   : > { %12642 = vmatmul.mubr.msk.bf16.vlgmr.msra.gmra.mxu0 %vm250_vm5, %v12640_v60  ;;  %13491 = vmatmul.mubr.msk.bf16.vlgmr.msra.gmra.mxu1 %vm250_vm5, %v12640_v60 }
0x1037   : > { %11256 = vmatprep.mubr.bf16.mxu0 %v14065_v1  ;;  %13496 = vmatprep.mubr.msk.bf16.mxu1 %vm14066_vm0, %v14064_v0 }
0x10b6   : > { %v10267_v32 = vpop.f32.mrf.mxu0  ;;  %v10308_v13 = vpop.f32.mrf.mxu1 }
0x10b8   : > { %v10269_v29 = vpop.f32.mrf.mxu0  ;;  %v13444_v30 = vpop.f32.mrf.mxu1 }
0x10ba   : > { %v10271_v37 = vpop.f32.mrf.mxu0  ;;  %v10311_v23 = vpop.f32.mrf.mxu1 }
0x10bc   : > { %v10272_v39 = vpop.f32.mrf.mxu0  ;;  %v13445_v14 = vpop.f32.mrf.mxu1 }
0x10be   : > { %v10360_v48 = vpop.f32.mrf.mxu0  ;;  %v10401_v7 = vpop.f32.mrf.mxu1 }
0x10bf   : > { %v10361_v19 = vadd.f32 %v10360_v48, %v10267_v32  ;;  %v10402_v6 = vadd.f32 %v10401_v7, %v10308_v13 }
0x10c0   : > { %v10362_v11 = vpop.f32.mrf.mxu0  ;;  %v13450_v45 = vpop.f32.mrf.mxu1 }
0x10c1   : > { %v10363_v61 = vadd.f32 %v10362_v11, %v10269_v29 }
0x10c2   : > { %v10364_v42 = vpop.f32.mrf.mxu0  ;;  %v10404_v28 = vpop.f32.mrf.mxu1 }
0x10c4   : > { %v10365_v53 = vpop.f32.mrf.mxu0  ;;  %v13451_v46 = vpop.f32.mrf.mxu1 }
0x10c6   : > { %v10467_v57 = vpop.f32.mrf.mxu0  ;;  %v10508_v16 = vpop.f32.mrf.mxu1 }
0x10c7   : > { %v10514_v60 = vadd.f32 %v10467_v57, %v10361_v19  ;;  %v10516_v30 = vadd.f32 %v10508_v16, %v10402_v6 }
0x10c8   : > { %v10469_v51 = vpop.f32.mrf.mxu0  ;;  %v13456_v2 = vpop.f32.mrf.mxu1 }
0x10c9   : > { %v10515_v39 = vadd.f32 %v10469_v51, %v10363_v61 }
0x10ca   : > { %v10471_v54 = vpop.f32.mrf.mxu0  ;;  %v10511_v17 = vpop.f32.mrf.mxu1 }
0x10cc   : > { %v10472_v26 = vpop.f32.mrf.mxu0  ;;  %v13457_v35 = vpop.f32.mrf.mxu1 }
0x10ce   : > { %v10577_v47 = vpop.f32.mrf.mxu0  ;;  %v10618_v40 = vpop.f32.mrf.mxu1 }
0x10cf   : > { %v10624_v14 = vadd.f32 %v10577_v47, %v10514_v60  ;;  %v10626_v45 = vadd.f32 %v10618_v40, %v10516_v30 }
0x10d0   : > { %v10579_v52 = vpop.f32.mrf.mxu0  ;;  %v13462_v5 = vpop.f32.mrf.mxu1 }
0x10d1   : > { %v10625_v53 = vadd.f32 %v10579_v52, %v10515_v39  ;;  %v11173_v52 = vpop.permute.xlu1 %11172 }
0x10d2   : > { %v10581_v24 = vpop.f32.mrf.mxu0  ;;  %v10621_v62 = vpop.f32.mrf.mxu1 }
0x10d4   : > { %v10582_v12 = vpop.f32.mrf.mxu0  ;;  %v13463_v36 = vpop.f32.mrf.mxu1 }
0x10d6   : > { %v10678_v44 = vpop.f32.mrf.mxu0  ;;  %v10719_v33 = vpop.f32.mrf.mxu1 }
0x10d7   : > { %v10725_v46 = vadd.f32 %v10678_v44, %v10624_v14  ;;  %v10727_v2 = vadd.f32 %v10719_v33, %v10626_v45 }
0x10d8   : > { %v10680_v34 = vpop.f32.mrf.mxu0  ;;  %v13468_v55 = vpop.f32.mrf.mxu1 }
0x10d9   : > { %v10726_v26 = vadd.f32 %v10680_v34, %v10625_v53 }
0x10da   : > { %v10682_v27 = vpop.f32.mrf.mxu0  ;;  %v10722_v10 = vpop.f32.mrf.mxu1 }
0x10dc   : > { %v10683_v63 = vpop.f32.mrf.mxu0  ;;  %v13469_v59 = vpop.f32.mrf.mxu1 }
0x10de   : > { %v10788_v49 = vpop.f32.mrf.mxu0  ;;  %v10829_v4 = vpop.f32.mrf.mxu1 }
0x10df   : > { %v10835_v32 = vadd.f32 %v10788_v49, %v10725_v46  ;;  %v10837_v13 = vadd.f32 %v10829_v4, %v10727_v2  ;;  %v12646_v46 = vld [vmem:[%s16585_s2 + $0x190] sm:$0xf] }
0x10e0   : > { %v10790_v21 = vpop.f32.mrf.mxu0  ;;  %v13474_v41 = vpop.f32.mrf.mxu1 }
0x10e1   : > { %v10836_v29 = vadd.f32 %v10790_v21, %v10726_v26 }
0x10e2   : > { %v10792_v50 = vpop.f32.mrf.mxu0  ;;  %v10832_v58 = vpop.f32.mrf.mxu1 }
0x10e4   : > { %v10793_v25 = vpop.f32.mrf.mxu0  ;;  %v13475_v18 = vpop.f32.mrf.mxu1 }
0x10e6   : > { %v10898_v9 = vpop.f32.mrf.mxu0  ;;  %v10939_v22 = vpop.f32.mrf.mxu1 }
0x10e7   : > { %v10945_v11 = vadd.f32 %v10898_v9, %v10835_v32  ;;  %v10947_v57 = vadd.f32 %v10939_v22, %v10837_v13  ;;  %v12681_v22 = vld [vmem:[%s16586_s3 + $0x58] sm:$0xff] }
0x10e8   : > { %v10900_v20 = vpop.f32.mrf.mxu0  ;;  %v13480_v15 = vpop.f32.mrf.mxu1 }
0x10e9   : > { %v10946_v51 = vadd.f32 %v10900_v20, %v10836_v29 }
0x10ea   : > { %v10902_v3 = vpop.f32.mrf.mxu0  ;;  %v10942_v56 = vpop.f32.mrf.mxu1 }
0x10ec   : > { %v10903_v37 = vpop.f32.mrf.mxu0  ;;  %v13481_v23 = vpop.f32.mrf.mxu1 }
0x10ee   : > { %v11008_v42 = vpop.f32.mrf.mxu0  ;;  %v11049_v28 = vpop.f32.mrf.mxu1 }
0x10ef   : > { %v11055_v47 = vadd.f32 %v11008_v42, %v10945_v11  ;;  %v11057_v40 = vadd.f32 %v11049_v28, %v10947_v57 }
0x10f0   : > { %v11010_v54 = vpop.f32.mrf.mxu0  ;;  %v13486_v17 = vpop.f32.mrf.mxu1 }
0x10f1   : > { %v11056_v62 = vadd.f32 %v11010_v54, %v10946_v51 }
0x10f2   : > { %v11012_v48 = vpop.f32.mrf.mxu0  ;;  %v11052_v7 = vpop.f32.mrf.mxu1 }
0x10f4   : > { %v11013_v16 = vpop.f32.mrf.mxu0  ;;  %v13487_v35 = vpop.f32.mrf.mxu1 }
0x10f6   : > { %v11118_v5 = vpop.f32.mrf.mxu0  ;;  %v11159_v24 = vpop.f32.mrf.mxu1 }
0x10f7   : > { %v11165_v12 = vadd.f32 %v11118_v5, %v11055_v47  ;;  %v11167_v36 = vadd.f32 %v11159_v24, %v11057_v40 }
0x10f8   : > { %v11120_v44 = vpop.f32.mrf.mxu0  ;;  %v13492_v33 = vpop.f32.mrf.mxu1 }
0x10f9   : > { %v11175_v34 = vadd.f32 %v11173_v52, %v11165_v12  ;;  %v11177_v55 = vadd.f32 %v11173_v52, %v11167_v36  ;;  %v11166_v27 = vadd.f32 %v11120_v44, %v11056_v62  ;;  %v12645_v36 = vld [vmem:[%s16585_s2 + $0x18c] sm:$0xf] }
0x10fa   : > { %v11122_v10 = vpop.f32.mrf.mxu0  ;;  %v11162_v63 = vpop.f32.mrf.mxu1 }
0x10fb   : > { %v11178_v59 = vmul.f32 %v11175_v34, %v14334_v31  ;;  %v11180_v49 = vmul.f32 %v11177_v55, %v14339_v43  ;;  %v11176_v4 = vadd.f32 %v11173_v52, %v11166_v27 }
0x10fc   : > { %v11123_v21 = vpop.f32.mrf.mxu0  ;;  %v13493_v41 = vpop.f32.mrf.mxu1 }
0x10fd   : > { %v16378_v50 = vmax.f32 %v11180_v49, 0.0  ;;  %v11179_v58 = vmul.f32 %v11176_v4, %v14336_v38  ;;  %v16381_v25 = vmax.f32 %v11178_v59, 0.0  ;;  %v12653_v49 = vld [vmem:[%s16585_s2 + $0x194] sm:$0xf] }
0x10ff   : > { %v16383_v18 = vmax.f32 %v11179_v58, 0.0  ;;  %11202 = vrot.lane.b32.xlu1 %v16378_v50, %s14067_s21 }
0x1101   : > { %v14010_v9 = vpack.i.bf16 %v16383_v18, %v16381_v25  ;;  %v11621_v58 = vpack.c.bf16 %v16383_v18, %v16383_v18 }
0x1103   : > { %11188 = vrot.lane.b32.xlu1 %v16378_v50, %s14068_s22  ;;  %14011 = vrot.lane.b32.xlu0 %v14010_v9, %s14067_s21 }
0x1107   : > { %11402 = vrot.lane.b32.xlu1 %v16378_v50, %s14069_s23  ;;  %14016 = vrot.lane.b32.xlu0 %v14010_v9, %s14068_s22 }
0x110b   : > { %11512 = vrot.lane.b32.xlu1 %v16378_v50, %s14070_s24  ;;  %14021 = vrot.lane.b32.xlu0 %v14010_v9, %s14069_s23 }
0x110f   : > { %11723 = vrot.lane.b32.xlu1 %v16378_v50, %s14071_s25  ;;  %14026 = vrot.lane.b32.xlu0 %v14010_v9, %s14070_s24 }
0x1113   : > { %11833 = vrot.lane.b32.xlu1 %v16378_v50, %s14072_s26  ;;  %14031 = vrot.lane.b32.xlu0 %v14010_v9, %s14071_s25 }
0x1117   : > { %11943 = vrot.lane.b32.xlu1 %v16378_v50, %s14073_s27  ;;  %14036 = vrot.lane.b32.xlu0 %v14010_v9, %s14072_s26 }
0x111b   : > { %12053 = vrot.lane.b32.xlu1 %v16378_v50, %s14074_s28  ;;  %14041 = vrot.lane.b32.xlu0 %v14010_v9, %s14073_s27 }
0x111f   : > { %14046 = vrot.lane.b32.xlu0 %v14010_v9, %s14074_s28 }
0x1123   : > { %12163 = vperm.xlu0 %13608, %v12681_v22  }
0x1171   : > { %v11203_v20 = vpop.permute.xlu1 %11202 }
0x1175   : > { %v14012_v15 = vpop.permute.xlu0 %14011  ;;  %v11189_v60 = vpop.permute.xlu1 %11188 }
0x1176   : > { %v14014_v19 = vunpack.i.h.bf16 %v14012_v15  ;;  %v14013_v6 = vunpack.i.l.bf16 %v14012_v15  ;;  %v11622_v15 = vpack.c.bf16 %v16378_v50, %v16378_v50 }
0x1178   : > { %v11205_v3 = vsel %vm241_vm1, %v14013_v6, %v14014_v19  ;;  %v11206_v56 = vsel %vm241_vm1, %v11203_v20, %v14013_v6  ;;  %v11204_v61 = vsel %vm241_vm1, %v14014_v19, %v11203_v20  ;;  %v11620_v20 = vpack.c.bf16 %v16381_v25, %v16381_v25  ;;  %v12657_v6 = vld [vmem:[%s16585_s2 + $0x198] sm:$0xf] }
0x1179   : > { %v11210_v30 = vpack.c.bf16 %v11205_v3, %v11205_v3  ;;  %v14017_v37 = vpop.permute.xlu0 %14016  ;;  %v11209_v23 = vpack.c.bf16 %v11206_v56, %v11206_v56  ;;  %v11211_v39 = vpack.c.bf16 %v11204_v61, %v11204_v61  ;;  %v11403_v29 = vpop.permute.xlu1 %11402  ;;  %v11633_v25 = vsel %vm254_vm3, %v11622_v15, 0 }
0x117a   : > { %v14019_v14 = vunpack.i.h.bf16 %v14017_v37  ;;  %v14018_v45 = vunpack.i.l.bf16 %v14017_v37  ;;  %v11627_v61 = vsel %vm254_vm3, %v11620_v20, 0 }
0x117b   : > { %12647 = vmatprep.subr.msk.bf16.mxu0 %vm254_vm3, %v11210_v30  ;;  %v11216_v42 = vsel %vm254_vm3, %v11209_v23, 0  ;;  %v11222_v28 = vsel %vm254_vm3, %v11211_v39, 0 }
0x117c   : > { %v11191_v53 = vsel %vm227_vm2, %v14018_v45, %v14019_v14  ;;  %11239 = vmatpush1.bf16.msra.mxu0 %v11216_v42  ;;  %13495 = vmatpush3.bf16.msra.mxu1 %v11222_v28  ;;  %v11192_v2 = vsel %vm227_vm2, %v11189_v60, %v14018_v45  ;;  %v11190_v54 = vsel %vm227_vm2, %v14019_v14, %v11189_v60  ;;  %v12661_v42 = vld [vmem:[%s16585_s2 + $0x19c] sm:$0xf] }
0x117d   : > { %v11196_v17 = vpack.c.bf16 %v11191_v53, %v11191_v53  ;;  %v14022_v26 = vpop.permute.xlu0 %14021  ;;  %13500 = vmatprep.subr.bf16.mxu1 %v14064_v0  ;;  %v11195_v32 = vpack.c.bf16 %v11192_v2, %v11192_v2  ;;  %v11197_v13 = vpack.c.bf16 %v11190_v54, %v11190_v54  ;;  %v11513_v33 = vpop.permute.xlu1 %11512 }
0x117e   : > { %v14024_v48 = vunpack.i.h.bf16 %v14022_v26  ;;  %v14023_v7 = vunpack.i.l.bf16 %v14022_v26 }
0x117f   : > { %12648 = vmatmul.mubr.msk.bf16.vlgmr.msra.gmra.mxu0 %vm250_vm5, %v12646_v46  ;;  %13497 = vmatmul.mubr.msk.bf16.vlgmr.msra.gmra.mxu1 %vm250_vm5, %v12646_v46  ;;  %v11309_v11 = vsel %vm254_vm3, %v11195_v32, 0  ;;  %v11315_v57 = vsel %vm254_vm3, %v11197_v13, 0 }
0x1180   : > { %v11405_v16 = vsel %vm444_vm4, %v14023_v7, %v14024_v48  ;;  %12650 = vmatprep.subr.msk.bf16.mxu0 %vm254_vm3, %v11196_v17  ;;  %13501 = vmatpush3.bf16.msra.mxu1 %v11315_v57  ;;  %v11406_v35 = vsel %vm444_vm4, %v11403_v29, %v14023_v7  ;;  %v11404_v51 = vsel %vm444_vm4, %v14024_v48, %v11403_v29 }
0x1181   : > { %v11410_v47 = vpack.c.bf16 %v11405_v16, %v11405_v16  ;;  %11332 = vmatpush1.bf16.msra.mxu0 %v11309_v11  ;;  %v14027_v40 = vpop.permute.xlu0 %14026  ;;  %11349 = vmatprep.mubr.bf16.mxu0 %v14065_v1  ;;  %v11409_v52 = vpack.c.bf16 %v11406_v35, %v11406_v35  ;;  %v11411_v62 = vpack.c.bf16 %v11404_v51, %v11404_v51  ;;  %v11724_v22 = vpop.permute.xlu1 %11723  ;;  %v12665_v11 = vld [vmem:[%s16585_s2 + $0x1a0] sm:$0xf] }
0x1182   : > { %v14029_v5 = vunpack.i.h.bf16 %v14027_v40  ;;  %v14028_v24 = vunpack.i.l.bf16 %v14027_v40  ;;  %13502 = vmatprep.mubr.msk.bf16.mxu1 %vm14066_vm0, %v14064_v0  ;;  %13506 = vmatprep.subr.bf16.mxu1 %v14064_v0 }
0x1183   : > { %12654 = vmatprep.subr.msk.bf16.mxu0 %vm254_vm3, %v11410_v47  ;;  %v11416_v34 = vsel %vm254_vm3, %v11409_v52, 0  ;;  %v11422_v55 = vsel %vm254_vm3, %v11411_v62, 0 }
0x1184   : > { %v11515_v12 = vsel %vm555_vm6, %v14028_v24, %v14029_v5  ;;  %v11516_v27 = vsel %vm555_vm6, %v11513_v33, %v14028_v24  ;;  %v11514_v10 = vsel %vm555_vm6, %v14029_v5, %v11513_v33 }
0x1185   : > { %v11520_v44 = vpack.c.bf16 %v11515_v12, %v11515_v12  ;;  %v11519_v63 = vpack.c.bf16 %v11516_v27, %v11516_v27  ;;  %v11521_v59 = vpack.c.bf16 %v11514_v10, %v11514_v10  ;;  %v14032_v4 = vpop.permute.xlu0 %14031  ;;  %v11834_v37 = vpop.permute.xlu1 %11833 }
0x1186   : > { %v14034_v9 = vunpack.i.h.bf16 %v14032_v4  ;;  %v14033_v19 = vunpack.i.l.bf16 %v14032_v4 }
0x1187   : > { %12651 = vmatmul.mubr.msk.bf16.vlgmr.msra.gmra.mxu0 %vm250_vm5, %v12645_v36  ;;  %13503 = vmatmul.mubr.msk.bf16.vlgmr.msra.gmra.mxu1 %vm250_vm5, %v12645_v36  ;;  %v11526_v21 = vsel %vm254_vm3, %v11519_v63, 0  ;;  %v11532_v41 = vsel %vm254_vm3, %v11521_v59, 0 }
0x1188   : > { %11439 = vmatpush1.bf16.msra.mxu0 %v11416_v34  ;;  %13507 = vmatpush3.bf16.msra.mxu1 %v11422_v55  ;;  %v11725_v18 = vsel %vm767_vm7, %v14034_v9, %v11724_v22  ;;  %v11726_v50 = vsel %vm767_vm7, %v14033_v19, %v14034_v9  ;;  %v11727_v30 = vsel %vm767_vm7, %v11724_v22, %v14033_v19 }
0x1189   : > { %12658 = vmatprep.subr.msk.bf16.mxu0 %vm254_vm3, %v11520_v44  ;;  %11456 = vmatprep.mubr.bf16.mxu0 %v14065_v1  ;;  %v14037_v3 = vpop.permute.xlu0 %14036  ;;  %v11731_v56 = vpack.c.bf16 %v11725_v18, %v11725_v18  ;;  %v11730_v23 = vpack.c.bf16 %v11726_v50, %v11726_v50  ;;  %v11732_v39 = vpack.c.bf16 %v11727_v30, %v11727_v30  ;;  %v11944_v32 = vpop.permute.xlu1 %11943  ;;  %v12669_v44 = vld [vmem:[%s16585_s2 + $0x1a4] sm:$0xf] }
0x118a   : > { %13508 = vmatprep.mubr.msk.bf16.mxu1 %vm14066_vm0, %v14064_v0  ;;  %13512 = vmatprep.subr.bf16.mxu1 %v14064_v0  ;;  %v14039_v60 = vunpack.i.h.bf16 %v14037_v3  ;;  %v14038_v45 = vunpack.i.l.bf16 %v14037_v3 }
0x118b   : > { %v11737_v46 = vsel %vm254_vm3, %v11730_v23, 0  ;;  %v11743_v2 = vsel %vm254_vm3, %v11732_v39, 0 }
0x118c   : > { %v11835_v14 = vsel %vm878_vm8, %v14039_v60, %v11834_v37  ;;  %v11836_v17 = vsel %vm878_vm8, %v14038_v45, %v14039_v60  ;;  %v11837_v26 = vsel %vm878_vm8, %v11834_v37, %v14038_v45 }
0x118d   : > { %v14042_v28 = vpop.permute.xlu0 %14041  ;;  %v11841_v53 = vpack.c.bf16 %v11835_v14, %v11835_v14  ;;  %v11840_v13 = vpack.c.bf16 %v11836_v17, %v11836_v17  ;;  %v11842_v48 = vpack.c.bf16 %v11837_v26, %v11837_v26  ;;  %v12054_v24 = vpop.permute.xlu1 %12053 }
0x118e   : > { %v14044_v54 = vunpack.i.h.bf16 %v14042_v28  ;;  %v14043_v29 = vunpack.i.l.bf16 %v14042_v28 }
0x118f   : > { %12655 = vmatmul.mubr.msk.bf16.vlgmr.msra.gmra.mxu0 %vm250_vm5, %v12653_v49  ;;  %13509 = vmatmul.mubr.msk.bf16.vlgmr.msra.gmra.mxu1 %vm250_vm5, %v12653_v49  ;;  %v11847_v35 = vsel %vm254_vm3, %v11840_v13, 0  ;;  %v11853_v51 = vsel %vm254_vm3, %v11842_v48, 0  ;;  %v12673_v49 = vld [vmem:[%s16585_s2 + $0x1a8] sm:$0xf] }
0x1190   : > { %11549 = vmatpush1.bf16.msra.mxu0 %v11526_v21  ;;  %13513 = vmatpush3.bf16.msra.mxu1 %v11532_v41  ;;  %v11945_v7 = vsel %vm989_vm9, %v14044_v54, %v11944_v32  ;;  %v11946_v40 = vsel %vm989_vm9, %v14043_v29, %v14044_v54  ;;  %v11947_v5 = vsel %vm989_vm9, %v11944_v32, %v14043_v29  ;;  %v12677_v21 = vld [vmem:[%s16585_s2 + $0x1ac] sm:$0xf] }
0x1191   : > { %12662 = vmatprep.subr.msk.bf16.mxu0 %vm254_vm3, %v11621_v58  ;;  %11566 = vmatprep.mubr.bf16.mxu0 %v14065_v1  ;;  %v14047_v57 = vpop.permute.xlu0 %14046  ;;  %v11951_v16 = vpack.c.bf16 %v11945_v7, %v11945_v7  ;;  %v11950_v52 = vpack.c.bf16 %v11946_v40, %v11946_v40  ;;  %v11952_v62 = vpack.c.bf16 %v11947_v5, %v11947_v5 }
0x1192   : > { %13514 = vmatprep.mubr.msk.bf16.mxu1 %vm14066_vm0, %v14064_v0  ;;  %13518 = vmatprep.subr.bf16.mxu1 %v14064_v0  ;;  %v14049_v47 = vunpack.i.h.bf16 %v14047_v57  ;;  %v14048_v36 = vunpack.i.l.bf16 %v14047_v57 }
0x1193   : > { %v11957_v34 = vsel %vm254_vm3, %v11950_v52, 0  ;;  %v11963_v55 = vsel %vm254_vm3, %v11952_v62, 0 }
0x1194   : > { %v12055_v12 = vsel %vm1100_vm10, %v14049_v47, %v12054_v24  ;;  %v12056_v27 = vsel %vm1100_vm10, %v14048_v36, %v14049_v47  ;;  %v12057_v10 = vsel %vm1100_vm10, %v12054_v24, %v14048_v36 }
0x1195   : > { %v12061_v33 = vpack.c.bf16 %v12055_v12, %v12055_v12  ;;  %v12060_v63 = vpack.c.bf16 %v12056_v27, %v12056_v27  ;;  %v12062_v59 = vpack.c.bf16 %v12057_v10, %v12057_v10 }
0x1197   : > { %12659 = vmatmul.mubr.msk.bf16.vlgmr.msra.gmra.mxu0 %vm250_vm5, %v12657_v6  ;;  %13515 = vmatmul.mubr.msk.bf16.vlgmr.msra.gmra.mxu1 %vm250_vm5, %v12657_v6  ;;  %v12067_v8 = vsel %vm254_vm3, %v12060_v63, 0  ;;  %v12073_v4 = vsel %vm254_vm3, %v12062_v59, 0 }
0x1198   : > { %11650 = vmatpush1.bf16.msra.mxu0 %v11627_v61  ;;  %13519 = vmatpush3.bf16.msra.mxu1 %v11633_v25 }
0x1199   : > { %12666 = vmatprep.subr.msk.bf16.mxu0 %vm254_vm3, %v11731_v56  ;;  %11667 = vmatprep.mubr.bf16.mxu0 %v14065_v1 }
0x119a   : > { %13520 = vmatprep.mubr.msk.bf16.mxu1 %vm14066_vm0, %v14064_v0  ;;  %13524 = vmatprep.subr.bf16.mxu1 %v14064_v0 }
0x119f   : > { %12663 = vmatmul.mubr.msk.bf16.vlgmr.msra.gmra.mxu0 %vm250_vm5, %v12661_v42  ;;  %13521 = vmatmul.mubr.msk.bf16.vlgmr.msra.gmra.mxu1 %vm250_vm5, %v12661_v42 }
0x11a0   : > { %11760 = vmatpush1.bf16.msra.mxu0 %v11737_v46  ;;  %13525 = vmatpush3.bf16.msra.mxu1 %v11743_v2 }
0x11a1   : > { %12670 = vmatprep.subr.msk.bf16.mxu0 %vm254_vm3, %v11841_v53  ;;  %11777 = vmatprep.mubr.bf16.mxu0 %v14065_v1 }
0x11a2   : > { %13526 = vmatprep.mubr.msk.bf16.mxu1 %vm14066_vm0, %v14064_v0  ;;  %13530 = vmatprep.subr.bf16.mxu1 %v14064_v0 }
0x11a7   : > { %12667 = vmatmul.mubr.msk.bf16.vlgmr.msra.gmra.mxu0 %vm250_vm5, %v12665_v11  ;;  %13527 = vmatmul.mubr.msk.bf16.vlgmr.msra.gmra.mxu1 %vm250_vm5, %v12665_v11 }
0x11a8   : > { %11870 = vmatpush1.bf16.msra.mxu0 %v11847_v35  ;;  %13531 = vmatpush3.bf16.msra.mxu1 %v11853_v51 }
0x11a9   : > { %12674 = vmatprep.subr.msk.bf16.mxu0 %vm254_vm3, %v11951_v16  ;;  %11887 = vmatprep.mubr.bf16.mxu0 %v14065_v1 }
0x11aa   : > { %13532 = vmatprep.mubr.msk.bf16.mxu1 %vm14066_vm0, %v14064_v0  ;;  %13536 = vmatprep.subr.bf16.mxu1 %v14064_v0 }
0x11af   : > { %12671 = vmatmul.mubr.msk.bf16.vlgmr.msra.gmra.mxu0 %vm250_vm5, %v12669_v44  ;;  %13533 = vmatmul.mubr.msk.bf16.vlgmr.msra.gmra.mxu1 %vm250_vm5, %v12669_v44 }
0x11b0   : > { %11980 = vmatpush1.bf16.msra.mxu0 %v11957_v34  ;;  %13537 = vmatpush3.bf16.msra.mxu1 %v11963_v55 }
0x11b1   : > { %12678 = vmatprep.subr.msk.bf16.mxu0 %vm254_vm3, %v12061_v33  ;;  %11997 = vmatprep.mubr.bf16.mxu0 %v14065_v1 }
0x11b2   : > { %13538 = vmatprep.mubr.msk.bf16.mxu1 %vm14066_vm0, %v14064_v0  ;;  %13542 = vmatprep.subr.bf16.mxu1 %v14064_v0 }
0x11b7   : > { %12675 = vmatmul.mubr.msk.bf16.vlgmr.msra.gmra.mxu0 %vm250_vm5, %v12673_v49  ;;  %13539 = vmatmul.mubr.msk.bf16.vlgmr.msra.gmra.mxu1 %vm250_vm5, %v12673_v49 }
0x11b8   : > { %12090 = vmatpush1.bf16.msra.mxu0 %v12067_v8  ;;  %13543 = vmatpush3.bf16.msra.mxu1 %v12073_v4 }
0x11b9   : > { %12107 = vmatprep.mubr.bf16.mxu0 %v14065_v1  ;;  %13544 = vmatprep.mubr.msk.bf16.mxu1 %vm14066_vm0, %v14064_v0 }
0x11bf   : > { %12679 = vmatmul.mubr.msk.bf16.vlgmr.msra.gmra.mxu0 %vm250_vm5, %v12677_v21  ;;  %13545 = vmatmul.mubr.msk.bf16.vlgmr.msra.gmra.mxu1 %vm250_vm5, %v12677_v21 }
0x123f   : > { %v11258_v41 = vpop.f32.mrf.mxu0  ;;  %v11299_v58 = vpop.f32.mrf.mxu1 }
0x1241   : > { %v11260_v9 = vpop.f32.mrf.mxu0  ;;  %v13498_v22 = vpop.f32.mrf.mxu1 }
0x1243   : > { %v11262_v20 = vpop.f32.mrf.mxu0  ;;  %v11302_v15 = vpop.f32.mrf.mxu1 }
0x1245   : > { %v11263_v18 = vpop.f32.mrf.mxu0  ;;  %v13499_v19 = vpop.f32.mrf.mxu1 }
0x1247   : > { %v11351_v1 = vpop.f32.mrf.mxu0  ;;  %v11392_v6 = vpop.f32.mrf.mxu1 }
0x1248   : > { %v11352_v55 = vadd.f32 %v11351_v1, %v11258_v41  ;;  %v11393_v27 = vadd.f32 %v11392_v6, %v11299_v58 }
0x1249   : > { %v11353_v3 = vpop.f32.mrf.mxu0  ;;  %v13504_v0 = vpop.f32.mrf.mxu1 }
0x124a   : > { %v11354_v59 = vadd.f32 %v11353_v3, %v11260_v9 }
0x124b   : > { %v11355_v56 = vpop.f32.mrf.mxu0  ;;  %v11395_v61 = vpop.f32.mrf.mxu1 }
0x124d   : > { %v11356_v25 = vpop.f32.mrf.mxu0  ;;  %v13505_v60 = vpop.f32.mrf.mxu1 }
0x124f   : > { %v11458_v50 = vpop.f32.mrf.mxu0  ;;  %v11499_v30 = vpop.f32.mrf.mxu1 }
0x1250   : > { %v11505_v49 = vadd.f32 %v11458_v50, %v11352_v55  ;;  %v11507_v8 = vadd.f32 %v11499_v30, %v11393_v27 }
0x1251   : > { %v11460_v37 = vpop.f32.mrf.mxu0  ;;  %v13510_v23 = vpop.f32.mrf.mxu1 }
0x1252   : > { %v11506_v22 = vadd.f32 %v11460_v37, %v11354_v59 }
0x1253   : > { %v11462_v39 = vpop.f32.mrf.mxu0  ;;  %v11502_v14 = vpop.f32.mrf.mxu1 }
0x1255   : > { %v11463_v45 = vpop.f32.mrf.mxu0  ;;  %v13511_v42 = vpop.f32.mrf.mxu1 }
0x1257   : > { %v11568_v28 = vpop.f32.mrf.mxu0  ;;  %v11609_v53 = vpop.f32.mrf.mxu1 }
0x1258   : > { %v11615_v20 = vadd.f32 %v11568_v28, %v11505_v49  ;;  %v11617_v15 = vadd.f32 %v11609_v53, %v11507_v8  ;;  %v12164_v53 = vpop.permute.xlu0 %12163 }
0x1259   : > { %v11570_v46 = vpop.f32.mrf.mxu0  ;;  %v13516_v2 = vpop.f32.mrf.mxu1 }
0x125a   : > { %v11616_v0 = vadd.f32 %v11570_v46, %v11506_v22 }
0x125b   : > { %v11572_v54 = vpop.f32.mrf.mxu0  ;;  %v11612_v17 = vpop.f32.mrf.mxu1 }
0x125d   : > { %v11573_v26 = vpop.f32.mrf.mxu0  ;;  %v13517_v32 = vpop.f32.mrf.mxu1 }
0x125f   : > { %v11669_v13 = vpop.f32.mrf.mxu0  ;;  %v11710_v48 = vpop.f32.mrf.mxu1 }
0x1260   : > { %v11716_v56 = vadd.f32 %v11669_v13, %v11615_v20  ;;  %v11718_v61 = vadd.f32 %v11710_v48, %v11617_v15 }
0x1261   : > { %v11671_v7 = vpop.f32.mrf.mxu0  ;;  %v13522_v29 = vpop.f32.mrf.mxu1 }
0x1262   : > { %v11717_v23 = vadd.f32 %v11671_v7, %v11616_v0 }
0x1263   : > { %v11673_v11 = vpop.f32.mrf.mxu0  ;;  %v11713_v57 = vpop.f32.mrf.mxu1 }
0x1265   : > { %v11674_v16 = vpop.f32.mrf.mxu0  ;;  %v13523_v35 = vpop.f32.mrf.mxu1 }
0x1267   : > { %v11779_v51 = vpop.f32.mrf.mxu0  ;;  %v11820_v47 = vpop.f32.mrf.mxu1 }
0x1268   : > { %v11826_v41 = vadd.f32 %v11779_v51, %v11716_v56  ;;  %v11828_v58 = vadd.f32 %v11820_v47, %v11718_v61 }
0x1269   : > { %v11781_v40 = vpop.f32.mrf.mxu0  ;;  %v13528_v5 = vpop.f32.mrf.mxu1 }
0x126a   : > { %v11827_v9 = vadd.f32 %v11781_v40, %v11717_v23 }
0x126b   : > { %v11783_v24 = vpop.f32.mrf.mxu0  ;;  %v11823_v52 = vpop.f32.mrf.mxu1 }
0x126d   : > { %v11784_v62 = vpop.f32.mrf.mxu0  ;;  %v13529_v12 = vpop.f32.mrf.mxu1 }
0x126f   : > { %v11889_v36 = vpop.f32.mrf.mxu0  ;;  %v11930_v44 = vpop.f32.mrf.mxu1 }
0x1270   : > { %v11936_v3 = vadd.f32 %v11889_v36, %v11826_v41  ;;  %v11938_v50 = vadd.f32 %v11930_v44, %v11828_v58 }
0x1271   : > { %v11891_v33 = vpop.f32.mrf.mxu0  ;;  %v13534_v34 = vpop.f32.mrf.mxu1 }
0x1272   : > { %v11937_v37 = vadd.f32 %v11891_v33, %v11827_v9 }
0x1273   : > { %v11893_v10 = vpop.f32.mrf.mxu0  ;;  %v11933_v63 = vpop.f32.mrf.mxu1 }
0x1275   : > { %v11894_v4 = vpop.f32.mrf.mxu0  ;;  %v13535_v21 = vpop.f32.mrf.mxu1 }
0x1277   : > { %v11999_v18 = vpop.f32.mrf.mxu0  ;;  %v12040_v19 = vpop.f32.mrf.mxu1 }
0x1278   : > { %v12046_v14 = vadd.f32 %v11999_v18, %v11936_v3  ;;  %v12048_v45 = vadd.f32 %v12040_v19, %v11938_v50 }
0x1279   : > { %v12001_v25 = vpop.f32.mrf.mxu0  ;;  %v13540_v60 = vpop.f32.mrf.mxu1 }
0x127a   : > { %v12047_v46 = vadd.f32 %v12001_v25, %v11937_v37 }
0x127b   : > { %v12003_v1 = vpop.f32.mrf.mxu0  ;;  %v12043_v6 = vpop.f32.mrf.mxu1 }
0x127d   : > { %v12004_v30 = vpop.f32.mrf.mxu0  ;;  %v13541_v39 = vpop.f32.mrf.mxu1 }
0x127f   : > { %v12109_v42 = vpop.f32.mrf.mxu0  ;;  %v12150_v28 = vpop.f32.mrf.mxu1 }
0x1280   : > { %v12156_v2 = vadd.f32 %v12109_v42, %v12046_v14  ;;  %v12158_v54 = vadd.f32 %v12150_v28, %v12048_v45 }
0x1281   : > { %v12111_v17 = vpop.f32.mrf.mxu0  ;;  %v13546_v26 = vpop.f32.mrf.mxu1 }
0x1282   : > { %v12166_v32 = vadd.f32 %v12164_v53, %v12156_v2  ;;  %v12168_v13 = vadd.f32 %v12164_v53, %v12158_v54  ;;  %v12157_v48 = vadd.f32 %v12111_v17, %v12047_v46 }
0x1283   : > { %v12113_v7 = vpop.f32.mrf.mxu0  ;;  %v12153_v29 = vpop.f32.mrf.mxu1 }
0x1284   : > { %v12169_v11 = vmul.f32 %v12166_v32, %v14334_v31  ;;  %v12171_v57 = vmul.f32 %v12168_v13, %v14339_v43  ;;  %v12167_v16 = vadd.f32 %v12164_v53, %v12157_v48 }
0x1285   : > { %v12114_v35 = vpop.f32.mrf.mxu0  ;;  %v13547_v51 = vpop.f32.mrf.mxu1 }
0x1286   : > { %14050 = vtanh.f32 %v12169_v11  ;;  %v12170_v47 = vmul.f32 %v12167_v16, %v14336_v38 }
0x1287   : > { %14052 = vtanh.f32 %v12171_v57 }
0x1288   : > { %14054 = vtanh.f32 %v12170_v47 }
0x1293   : > { %v14051_v40 = vpop.eup %14050 }
0x1294   : > { %v14053_v5 = vpop.eup %14052  ;;  %12175 = vst [vmem:[%s197_s14] sm:$0xff] %v14051_v40 }
0x1295   : > { %v14055_v24 = vpop.eup %14054  ;;  %12177 = vst [vmem:[%s197_s14 + $0x10] sm:$0xff] %v14053_v5 }
0x1296   : > { %12176 = vst [vmem:[%s197_s14 + $0x8] sm:$0xff] %v14055_v24 }
0x1297 PF: > { %s14_s15 = sadd.s32 1, %s14062_s15  }
0x1298   : > { %p11_p4 = scmp.ge.s32.totalorder %s14_s15, 4  }
0x129a   :  { %13 = sbr.rel (!%p11_p4) target bundleno = 1 (0x1), region = 184 }

</bundles_post_ra>
